<compile_context>
chip_gen: v6e
topology: v6e:2x2x1
jax: 0.10.0
libtpu: 0.0.40
codegen_flags: <defaults>
</compile_context>

<pallas_src>
import functools

import jax
import jax.numpy as jnp
from jax.experimental import pallas as pl
from jax.experimental.pallas import tpu as pltpu

LN_EPS = 1e-5  # PyTorch nn.LayerNorm default


def _round_up(n, m):
    return ((n + m - 1) // m) * m


def _gelu_exact(x):
    # PyTorch nn.GELU() default = exact erf formulation (tanh-approx would move
    # work to the EUP but changes numerics vs the PyTorch module).
    return 0.5 * x * (1.0 + jax.lax.erf(x * (1.0 / jnp.sqrt(2.0))))


def _layernorm(x, gamma, beta, d_true, lane_mask):
    """LayerNorm over the last dim; correct when x is zero-padded past d_true."""
    inv_d = 1.0 / d_true
    mean = jnp.sum(x, axis=-1, keepdims=True) * inv_d   # padded lanes are zero
    centered = x - mean
    if lane_mask is not None:
        centered = jnp.where(lane_mask, centered, 0.0)
    var = jnp.sum(centered * centered, axis=-1, keepdims=True) * inv_d
    return centered * jax.lax.rsqrt(var + LN_EPS) * gamma + beta


def grb_kernel(x_ref,
               g1_ref, be1_ref,            # norm1 gamma/beta       (1, Dp)
               w1_ref, b1_ref,             # ff linear1             (Dp, 2Dp), (1, 2Dp)
               w2_ref, b2_ref,             # ff linear2             (2Dp, Dp), (1, Dp)
               g2_ref, be2_ref,            # norm2 gamma/beta       (1, Dp)
               wgx_ref, wgr_ref, bg_ref,   # gate split weights     (Dp, Dp) x2, (1, Dp)
               o_ref,
               *, d_true):
    x = x_ref[...].astype(jnp.float32)
    residual = x
    rows, d_pad = x.shape

    lane_mask = None
    if d_pad != d_true:
        lane = jax.lax.broadcasted_iota(jnp.int32, (rows, d_pad), 1)
        lane_mask = lane < d_true

    w_dtype = w1_ref.dtype  # matmul operand dtype (bf16 in the perf config)

    # norm1
    h = _layernorm(x, g1_ref[...].astype(jnp.float32),
                   be1_ref[...].astype(jnp.float32), d_true, lane_mask)

    # ff: Linear(D -> 2D) -> GELU -> (Dropout = identity, eval) -> Linear(2D -> D)
    h = jnp.dot(h.astype(w_dtype), w1_ref[...],
                preferred_element_type=jnp.float32) + b1_ref[...].astype(jnp.float32)
    h = _gelu_exact(h)
    h = jnp.dot(h.astype(w_dtype), w2_ref[...],
                preferred_element_type=jnp.float32) + b2_ref[...].astype(jnp.float32)

    # norm2
    xn = _layernorm(h, g2_ref[...].astype(jnp.float32),
                    be2_ref[...].astype(jnp.float32), d_true, lane_mask)

    # gate = sigmoid(Linear(2D -> D)(concat([xn, residual], -1)))
    # concat-then-matmul rewritten as two matmuls with the split weight.
    g = (jnp.dot(xn.astype(w_dtype), wgx_ref[...], preferred_element_type=jnp.float32)
         + jnp.dot(residual.astype(w_dtype), wgr_ref[...], preferred_element_type=jnp.float32)
         + bg_ref[...].astype(jnp.float32))
    g = jax.nn.sigmoid(g)

    o_ref[...] = (g * xn + (1.0 - g) * residual).astype(o_ref.dtype)


@functools.partial(
    jax.jit,
    static_argnames=("tile_rows", "single_buffer_weights", "vmem_limit_bytes"))
def gated_residual_block(x, params, *, tile_rows=256, single_buffer_weights=True,
                         vmem_limit_bytes=None):
    """x: (B, S, D).  params: dict of weights (see init_params).

    tile_rows: row block fed to the MXU.  Default 256 (multiple of the 256-wide
    v6e/v7x MXU; also a multiple of v5e's 128).  Keep the resulting grid >= 2
    blocks so both v7x TensorCores get work.  For very large D (>= 2048) on
    v7x (64 MiB VMEM/TC), raise vmem_limit_bytes or add a K-tiling grid axis
    for w1/w2 instead of whole-weight residency.
    """
    B, S, D = x.shape
    rows = B * S
    dp = _round_up(D, 128)       # lane-dense feature dim
    hp = 2 * dp                  # lane-dense ff hidden dim
    rows_pad = _round_up(rows, tile_rows)
    grid = (pl.cdiv(rows_pad, tile_rows),)

    def pad2(a, r, c):
        return jnp.pad(a, ((0, r - a.shape[0]), (0, c - a.shape[1])))

    x2 = pad2(x.reshape(rows, D), rows_pad, dp)
    p = params
    g1, be1 = pad2(p["g1"], 1, dp), pad2(p["be1"], 1, dp)
    g2, be2 = pad2(p["g2"], 1, dp), pad2(p["be2"], 1, dp)
    w1, b1 = pad2(p["w1"], dp, hp), pad2(p["b1"], 1, hp)
    w2, b2 = pad2(p["w2"], hp, dp), pad2(p["b2"], 1, dp)
    wgx, wgr = pad2(p["wgx"], dp, dp), pad2(p["wgr"], dp, dp)
    bg = pad2(p["bg"], 1, dp)

    # Weights/biases have a constant index_map (never change across grid steps);
    # single-buffer them so they are not held twice in VMEM.
    const_kw = {"pipeline_mode": pl.Buffered(1)} if single_buffer_weights else {}

    def const_spec(shape):
        return pl.BlockSpec(shape, lambda i: (0, 0), **const_kw)

    cp_kwargs = dict(dimension_semantics=("parallel",))
    if vmem_limit_bytes is not None:
        cp_kwargs["vmem_limit_bytes"] = vmem_limit_bytes

    out = pl.pallas_call(
        functools.partial(grb_kernel, d_true=D),
        out_shape=jax.ShapeDtypeStruct((rows_pad, dp), x.dtype),
        grid_spec=pltpu.PrefetchScalarGridSpec(
            num_scalar_prefetch=0,
            grid=grid,
            in_specs=[
                pl.BlockSpec((tile_rows, dp), lambda i: (i, 0)),   # x rows
                const_spec((1, dp)), const_spec((1, dp)),          # norm1
                const_spec((dp, hp)), const_spec((1, hp)),         # ff linear1
                const_spec((hp, dp)), const_spec((1, dp)),         # ff linear2
                const_spec((1, dp)), const_spec((1, dp)),          # norm2
                const_spec((dp, dp)), const_spec((dp, dp)),        # gate (xn / residual)
                const_spec((1, dp)),                               # gate bias
            ],
            out_specs=pl.BlockSpec((tile_rows, dp), lambda i: (i, 0)),
        ),
        compiler_params=pltpu.CompilerParams(**cp_kwargs),
    )(x2, g1, be1, w1, b1, w2, b2, g2, be2, wgx, wgr, bg)

    return out[:rows, :D].reshape(B, S, D)


def init_params(key, dim):
    """Deterministic synthetic parameters.  Linear weights stored as (in, out)."""
    ks = jax.random.split(key, 6)
    scale = 0.05
    wg_full = scale * jax.random.normal(ks[2], (2 * dim, dim), jnp.float32)
    return dict(
        g1=jnp.ones((1, dim), jnp.float32),
        be1=jnp.zeros((1, dim), jnp.float32),
        w1=scale * jax.random.normal(ks[0], (dim, 2 * dim), jnp.float32),
        b1=scale * jax.random.normal(ks[3], (1, 2 * dim), jnp.float32),
        w2=scale * jax.random.normal(ks[1], (2 * dim, dim), jnp.float32),
        b2=scale * jax.random.normal(ks[4], (1, dim), jnp.float32),
        g2=jnp.ones((1, dim), jnp.float32),
        be2=jnp.zeros((1, dim), jnp.float32),
        wgx=wg_full[:dim],          # acts on the normed ff output
        wgr=wg_full[dim:],          # acts on the residual
        bg=scale * jax.random.normal(ks[5], (1, dim), jnp.float32),
    )


def reference(x, p):
    """Pure-JAX reference mirroring the PyTorch forward (eval mode)."""
    def ln(v, g, b):
        mean = jnp.mean(v, axis=-1, keepdims=True)
        var = jnp.mean((v - mean) ** 2, axis=-1, keepdims=True)
        return (v - mean) * jax.lax.rsqrt(var + LN_EPS) * g + b

    residual = x
    h = ln(x, p["g1"], p["be1"])
    h = _gelu_exact(h @ p["w1"] + p["b1"])
    h = h @ p["w2"] + p["b2"]
    xn = ln(h, p["g2"], p["be2"])
    g = jax.nn.sigmoid(xn @ p["wgx"] + residual @ p["wgr"] + p["bg"])
    return g * xn + (1.0 - g) * residual


if __name__ == "__main__":
    # Small but representative shapes; D=96 is deliberately NOT a multiple of
    # 128 so the lane-padding + masked-LayerNorm path is exercised, and
    # rows=384 with tile_rows=256 exercises the cdiv/row-padding path (grid=2).
    B, S, D = 4, 96, 96
    key = jax.random.PRNGKey(0)
    kx, kp = jax.random.split(key)
    x = jax.random.normal(kx, (B, S, D), jnp.float32)
    params = init_params(kp, D)
    ref = reference(x, params)

    def run_and_check(p, tol, **kw):
        out = jax.block_until_ready(gated_residual_block(x, p, **kw))
        assert out.shape == (B, S, D)
        if not jnp.allclose(out, ref, atol=tol, rtol=tol):
            raise AssertionError("mismatch vs reference")
        return out

    # 1) f32 weights: tight-tolerance check.  Try single-buffered constant
    #    weight blocks first; fall back to default double-buffering if this
    #    jax/libtpu rejects pl.Buffered(1).
    try:
        run_and_check(params, 2e-4, single_buffer_weights=True)
        sbw = True
    except Exception:
        run_and_check(params, 2e-4, single_buffer_weights=False)
        sbw = False

    # 2) bf16 matmul weights (production perf config), f32 MXU accumulation.
    params_bf16 = dict(params)
    for k in ("w1", "w2", "wgx", "wgr"):
        params_bf16[k] = params[k].astype(jnp.bfloat16)
    run_and_check(params_bf16, 2e-2, single_buffer_weights=sbw)

    print("KERNEL_OK")
</pallas_src>

<mosaic_0001>
module attributes {stable_mosaic.version = 11 : i64} {
  func.func @grb_kernel(%arg0: i32, %arg1: memref<256x128xf32, #tpu.memory_space<vmem>>, %arg2: memref<1x128xf32, #tpu.memory_space<vmem>>, %arg3: memref<1x128xf32, #tpu.memory_space<vmem>>, %arg4: memref<128x256xf32, #tpu.memory_space<vmem>>, %arg5: memref<1x256xf32, #tpu.memory_space<vmem>>, %arg6: memref<256x128xf32, #tpu.memory_space<vmem>>, %arg7: memref<1x128xf32, #tpu.memory_space<vmem>>, %arg8: memref<1x128xf32, #tpu.memory_space<vmem>>, %arg9: memref<1x128xf32, #tpu.memory_space<vmem>>, %arg10: memref<128x128xf32, #tpu.memory_space<vmem>>, %arg11: memref<128x128xf32, #tpu.memory_space<vmem>>, %arg12: memref<1x128xf32, #tpu.memory_space<vmem>>, %arg13: memref<256x128xf32, #tpu.memory_space<vmem>>) attributes {dimension_semantics = [#tpu.dimension_semantics<parallel>], iteration_bounds = array<i64: 2>, scalar_prefetch = 0 : i64, scratch_operands = 0 : i64, tpu.core_type = #tpu.core_type<tc>, window_params = [{transform_indices = @transform_0, window_bounds = array<i64: 256, 128>}, {pipeline_mode = #tpu.pipeline_mode<synchronous>, transform_indices = @transform_1, window_bounds = array<i64: 1, 128>}, {pipeline_mode = #tpu.pipeline_mode<synchronous>, transform_indices = @transform_2, window_bounds = array<i64: 1, 128>}, {pipeline_mode = #tpu.pipeline_mode<synchronous>, transform_indices = @transform_3, window_bounds = array<i64: 128, 256>}, {pipeline_mode = #tpu.pipeline_mode<synchronous>, transform_indices = @transform_4, window_bounds = array<i64: 1, 256>}, {pipeline_mode = #tpu.pipeline_mode<synchronous>, transform_indices = @transform_5, window_bounds = array<i64: 256, 128>}, {pipeline_mode = #tpu.pipeline_mode<synchronous>, transform_indices = @transform_6, window_bounds = array<i64: 1, 128>}, {pipeline_mode = #tpu.pipeline_mode<synchronous>, transform_indices = @transform_7, window_bounds = array<i64: 1, 128>}, {pipeline_mode = #tpu.pipeline_mode<synchronous>, transform_indices = @transform_8, window_bounds = array<i64: 1, 128>}, {pipeline_mode = #tpu.pipeline_mode<synchronous>, transform_indices = @transform_9, window_bounds = array<i64: 128, 128>}, {pipeline_mode = #tpu.pipeline_mode<synchronous>, transform_indices = @transform_10, window_bounds = array<i64: 128, 128>}, {pipeline_mode = #tpu.pipeline_mode<synchronous>, transform_indices = @transform_11, window_bounds = array<i64: 1, 128>}, {transform_indices = @transform_12, window_bounds = array<i64: 256, 128>}]} {
    %c0 = arith.constant 0 : index
    %c0_0 = arith.constant 0 : index
    %0 = vector.load %arg1[%c0, %c0_0] : memref<256x128xf32, #tpu.memory_space<vmem>>, vector<256x128xf32>
    %1 = tpu.iota {dimensions = array<i32: 1>} : vector<256x128xi32>
    %c96_i32 = arith.constant 96 : i32
    %2 = vector.broadcast %c96_i32 : i32 to vector<256x128xi32>
    %3 = arith.cmpi slt, %1, %2 : vector<256x128xi32>
    %c0_1 = arith.constant 0 : index
    %c0_2 = arith.constant 0 : index
    %4 = vector.load %arg2[%c0_1, %c0_2] : memref<1x128xf32, #tpu.memory_space<vmem>>, vector<1x128xf32>
    %c0_3 = arith.constant 0 : index
    %c0_4 = arith.constant 0 : index
    %5 = vector.load %arg3[%c0_3, %c0_4] : memref<1x128xf32, #tpu.memory_space<vmem>>, vector<1x128xf32>
    %cst = arith.constant dense<0.000000e+00> : vector<256xf32>
    %6 = vector.multi_reduction <add>, %0, %cst [1] : vector<256x128xf32> to vector<256xf32>
    %7 = vector.shape_cast %6 : vector<256xf32> to vector<256x1xf32>
    %cst_5 = arith.constant 0.010416667 : f32
    %8 = vector.broadcast %cst_5 : f32 to vector<256x1xf32>
    %9 = arith.mulf %7, %8 : vector<256x1xf32>
    %10 = vector.broadcast %9 : vector<256x1xf32> to vector<256x128xf32>
    %11 = arith.subf %0, %10 : vector<256x128xf32>
    %cst_6 = arith.constant 0.000000e+00 : f32
    %12 = vector.broadcast %cst_6 : f32 to vector<256x128xf32>
    %13 = arith.select %3, %11, %12 : vector<256x128xi1>, vector<256x128xf32>
    %14 = arith.mulf %13, %13 : vector<256x128xf32>
    %cst_7 = arith.constant dense<0.000000e+00> : vector<256xf32>
    %15 = vector.multi_reduction <add>, %14, %cst_7 [1] : vector<256x128xf32> to vector<256xf32>
    %16 = vector.shape_cast %15 : vector<256xf32> to vector<256x1xf32>
    %cst_8 = arith.constant 0.010416667 : f32
    %17 = vector.broadcast %cst_8 : f32 to vector<256x1xf32>
    %18 = arith.mulf %16, %17 : vector<256x1xf32>
    %cst_9 = arith.constant 9.99999974E-6 : f32
    %19 = vector.broadcast %cst_9 : f32 to vector<256x1xf32>
    %20 = arith.addf %18, %19 : vector<256x1xf32>
    %21 = math.rsqrt %20 : vector<256x1xf32>
    %22 = vector.broadcast %21 : vector<256x1xf32> to vector<256x128xf32>
    %23 = arith.mulf %13, %22 : vector<256x128xf32>
    %24 = vector.broadcast %4 : vector<1x128xf32> to vector<256x128xf32>
    %25 = arith.mulf %23, %24 : vector<256x128xf32>
    %26 = vector.broadcast %5 : vector<1x128xf32> to vector<256x128xf32>
    %27 = arith.addf %25, %26 : vector<256x128xf32>
    %c0_10 = arith.constant 0 : index
    %c0_11 = arith.constant 0 : index
    %28 = vector.load %arg4[%c0_10, %c0_11] : memref<128x256xf32, #tpu.memory_space<vmem>>, vector<128x256xf32>
    %cst_12 = arith.constant dense<0.000000e+00> : vector<256x256xf32>
    %29 = tpu.matmul %27, %28, %cst_12 {dimension_numbers = #tpu.dot_dimension_numbers<[1], [0], [0], [1], [0, 0, 1, 1], [], []>} : vector<256x128xf32>, vector<128x256xf32>, vector<256x256xf32> -> vector<256x256xf32>
    %c0_13 = arith.constant 0 : index
    %c0_14 = arith.constant 0 : index
    %30 = vector.load %arg5[%c0_13, %c0_14] : memref<1x256xf32, #tpu.memory_space<vmem>>, vector<1x256xf32>
    %31 = vector.broadcast %30 : vector<1x256xf32> to vector<256x256xf32>
    %32 = arith.addf %29, %31 : vector<256x256xf32>
    %cst_15 = arith.constant 5.000000e-01 : f32
    %33 = vector.broadcast %cst_15 : f32 to vector<256x256xf32>
    %34 = arith.mulf %33, %32 : vector<256x256xf32>
    %cst_16 = arith.constant 2.000000e+00 : f32
    %35 = math.sqrt %cst_16 : f32
    %cst_17 = arith.constant 1.000000e+00 : f32
    %36 = arith.divf %cst_17, %35 : f32
    %37 = vector.broadcast %36 : f32 to vector<256x256xf32>
    %38 = arith.mulf %32, %37 : vector<256x256xf32>
    %39 = math.erf %38 : vector<256x256xf32>
    %cst_18 = arith.constant 1.000000e+00 : f32
    %40 = vector.broadcast %cst_18 : f32 to vector<256x256xf32>
    %41 = arith.addf %40, %39 : vector<256x256xf32>
    %42 = arith.mulf %34, %41 : vector<256x256xf32>
    %c0_19 = arith.constant 0 : index
    %c0_20 = arith.constant 0 : index
    %43 = vector.load %arg6[%c0_19, %c0_20] : memref<256x128xf32, #tpu.memory_space<vmem>>, vector<256x128xf32>
    %cst_21 = arith.constant dense<0.000000e+00> : vector<256x128xf32>
    %44 = tpu.matmul %42, %43, %cst_21 {dimension_numbers = #tpu.dot_dimension_numbers<[1], [0], [0], [1], [0, 0, 1, 1], [], []>} : vector<256x256xf32>, vector<256x128xf32>, vector<256x128xf32> -> vector<256x128xf32>
    %c0_22 = arith.constant 0 : index
    %c0_23 = arith.constant 0 : index
    %45 = vector.load %arg7[%c0_22, %c0_23] : memref<1x128xf32, #tpu.memory_space<vmem>>, vector<1x128xf32>
    %46 = vector.broadcast %45 : vector<1x128xf32> to vector<256x128xf32>
    %47 = arith.addf %44, %46 : vector<256x128xf32>
    %c0_24 = arith.constant 0 : index
    %c0_25 = arith.constant 0 : index
    %48 = vector.load %arg8[%c0_24, %c0_25] : memref<1x128xf32, #tpu.memory_space<vmem>>, vector<1x128xf32>
    %c0_26 = arith.constant 0 : index
    %c0_27 = arith.constant 0 : index
    %49 = vector.load %arg9[%c0_26, %c0_27] : memref<1x128xf32, #tpu.memory_space<vmem>>, vector<1x128xf32>
    %cst_28 = arith.constant dense<0.000000e+00> : vector<256xf32>
    %50 = vector.multi_reduction <add>, %47, %cst_28 [1] : vector<256x128xf32> to vector<256xf32>
    %51 = vector.shape_cast %50 : vector<256xf32> to vector<256x1xf32>
    %cst_29 = arith.constant 0.010416667 : f32
    %52 = vector.broadcast %cst_29 : f32 to vector<256x1xf32>
    %53 = arith.mulf %51, %52 : vector<256x1xf32>
    %54 = vector.broadcast %53 : vector<256x1xf32> to vector<256x128xf32>
    %55 = arith.subf %47, %54 : vector<256x128xf32>
    %cst_30 = arith.constant 0.000000e+00 : f32
    %56 = vector.broadcast %cst_30 : f32 to vector<256x128xf32>
    %57 = arith.select %3, %55, %56 : vector<256x128xi1>, vector<256x128xf32>
    %58 = arith.mulf %57, %57 : vector<256x128xf32>
    %cst_31 = arith.constant dense<0.000000e+00> : vector<256xf32>
    %59 = vector.multi_reduction <add>, %58, %cst_31 [1] : vector<256x128xf32> to vector<256xf32>
    %60 = vector.shape_cast %59 : vector<256xf32> to vector<256x1xf32>
    %cst_32 = arith.constant 0.010416667 : f32
    %61 = vector.broadcast %cst_32 : f32 to vector<256x1xf32>
    %62 = arith.mulf %60, %61 : vector<256x1xf32>
    %cst_33 = arith.constant 9.99999974E-6 : f32
    %63 = vector.broadcast %cst_33 : f32 to vector<256x1xf32>
    %64 = arith.addf %62, %63 : vector<256x1xf32>
    %65 = math.rsqrt %64 : vector<256x1xf32>
    %66 = vector.broadcast %65 : vector<256x1xf32> to vector<256x128xf32>
    %67 = arith.mulf %57, %66 : vector<256x128xf32>
    %68 = vector.broadcast %48 : vector<1x128xf32> to vector<256x128xf32>
    %69 = arith.mulf %67, %68 : vector<256x128xf32>
    %70 = vector.broadcast %49 : vector<1x128xf32> to vector<256x128xf32>
    %71 = arith.addf %69, %70 : vector<256x128xf32>
    %c0_34 = arith.constant 0 : index
    %c0_35 = arith.constant 0 : index
    %72 = vector.load %arg10[%c0_34, %c0_35] : memref<128x128xf32, #tpu.memory_space<vmem>>, vector<128x128xf32>
    %cst_36 = arith.constant dense<0.000000e+00> : vector<256x128xf32>
    %73 = tpu.matmul %71, %72, %cst_36 {dimension_numbers = #tpu.dot_dimension_numbers<[1], [0], [0], [1], [0, 0, 1, 1], [], []>} : vector<256x128xf32>, vector<128x128xf32>, vector<256x128xf32> -> vector<256x128xf32>
    %c0_37 = arith.constant 0 : index
    %c0_38 = arith.constant 0 : index
    %74 = vector.load %arg11[%c0_37, %c0_38] : memref<128x128xf32, #tpu.memory_space<vmem>>, vector<128x128xf32>
    %cst_39 = arith.constant dense<0.000000e+00> : vector<256x128xf32>
    %75 = tpu.matmul %0, %74, %cst_39 {dimension_numbers = #tpu.dot_dimension_numbers<[1], [0], [0], [1], [0, 0, 1, 1], [], []>} : vector<256x128xf32>, vector<128x128xf32>, vector<256x128xf32> -> vector<256x128xf32>
    %76 = arith.addf %73, %75 : vector<256x128xf32>
    %c0_40 = arith.constant 0 : index
    %c0_41 = arith.constant 0 : index
    %77 = vector.load %arg12[%c0_40, %c0_41] : memref<1x128xf32, #tpu.memory_space<vmem>>, vector<1x128xf32>
    %78 = vector.broadcast %77 : vector<1x128xf32> to vector<256x128xf32>
    %79 = arith.addf %76, %78 : vector<256x128xf32>
    %80 = arith.negf %79 : vector<256x128xf32>
    %81 = math.exp %80 : vector<256x128xf32>
    %cst_42 = arith.constant 1.000000e+00 : f32
    %82 = vector.broadcast %cst_42 : f32 to vector<256x128xf32>
    %83 = arith.addf %82, %81 : vector<256x128xf32>
    %84 = arith.divf %82, %83 : vector<256x128xf32>
    %85 = arith.mulf %84, %71 : vector<256x128xf32>
    %cst_43 = arith.constant 1.000000e+00 : f32
    %86 = vector.broadcast %cst_43 : f32 to vector<256x128xf32>
    %87 = arith.subf %86, %84 : vector<256x128xf32>
    %88 = arith.mulf %87, %0 : vector<256x128xf32>
    %89 = arith.addf %85, %88 : vector<256x128xf32>
    %c0_44 = arith.constant 0 : index
    %c0_45 = arith.constant 0 : index
    %90 = vector.load %arg13[%c0_44, %c0_45] : memref<256x128xf32, #tpu.memory_space<vmem>>, vector<256x128xf32>
    tpu.vector_store %arg13[%c0_44, %c0_45], %89 {strides = array<i32>} : memref<256x128xf32, #tpu.memory_space<vmem>>, vector<256x128xf32>,
    return
  }
  func.func @transform_0(%arg0: i32) -> (i32, i32) {
    %c0_i32 = arith.constant 0 : i32
    %c0_i32_0 = arith.constant 0 : i32
    return %arg0, %c0_i32 : i32, i32
  }
  func.func @transform_1(%arg0: i32) -> (i32, i32) {
    %c0_i32 = arith.constant 0 : i32
    %c0_i32_0 = arith.constant 0 : i32
    %c0_i32_1 = arith.constant 0 : i32
    return %c0_i32, %c0_i32_0 : i32, i32
  }
  func.func @transform_2(%arg0: i32) -> (i32, i32) {
    %c0_i32 = arith.constant 0 : i32
    %c0_i32_0 = arith.constant 0 : i32
    %c0_i32_1 = arith.constant 0 : i32
    return %c0_i32, %c0_i32_0 : i32, i32
  }
  func.func @transform_3(%arg0: i32) -> (i32, i32) {
    %c0_i32 = arith.constant 0 : i32
    %c0_i32_0 = arith.constant 0 : i32
    %c0_i32_1 = arith.constant 0 : i32
    return %c0_i32, %c0_i32_0 : i32, i32
  }
  func.func @transform_4(%arg0: i32) -> (i32, i32) {
    %c0_i32 = arith.constant 0 : i32
    %c0_i32_0 = arith.constant 0 : i32
    %c0_i32_1 = arith.constant 0 : i32
    return %c0_i32, %c0_i32_0 : i32, i32
  }
  func.func @transform_5(%arg0: i32) -> (i32, i32) {
    %c0_i32 = arith.constant 0 : i32
    %c0_i32_0 = arith.constant 0 : i32
    %c0_i32_1 = arith.constant 0 : i32
    return %c0_i32, %c0_i32_0 : i32, i32
  }
  func.func @transform_6(%arg0: i32) -> (i32, i32) {
    %c0_i32 = arith.constant 0 : i32
    %c0_i32_0 = arith.constant 0 : i32
    %c0_i32_1 = arith.constant 0 : i32
    return %c0_i32, %c0_i32_0 : i32, i32
  }
  func.func @transform_7(%arg0: i32) -> (i32, i32) {
    %c0_i32 = arith.constant 0 : i32
    %c0_i32_0 = arith.constant 0 : i32
    %c0_i32_1 = arith.constant 0 : i32
    return %c0_i32, %c0_i32_0 : i32, i32
  }
  func.func @transform_8(%arg0: i32) -> (i32, i32) {
    %c0_i32 = arith.constant 0 : i32
    %c0_i32_0 = arith.constant 0 : i32
    %c0_i32_1 = arith.constant 0 : i32
    return %c0_i32, %c0_i32_0 : i32, i32
  }
  func.func @transform_9(%arg0: i32) -> (i32, i32) {
    %c0_i32 = arith.constant 0 : i32
    %c0_i32_0 = arith.constant 0 : i32
    %c0_i32_1 = arith.constant 0 : i32
    return %c0_i32, %c0_i32_0 : i32, i32
  }
  func.func @transform_10(%arg0: i32) -> (i32, i32) {
    %c0_i32 = arith.constant 0 : i32
    %c0_i32_0 = arith.constant 0 : i32
    %c0_i32_1 = arith.constant 0 : i32
    return %c0_i32, %c0_i32_0 : i32, i32
  }
  func.func @transform_11(%arg0: i32) -> (i32, i32) {
    %c0_i32 = arith.constant 0 : i32
    %c0_i32_0 = arith.constant 0 : i32
    %c0_i32_1 = arith.constant 0 : i32
    return %c0_i32, %c0_i32_0 : i32, i32
  }
  func.func @transform_12(%arg0: i32) -> (i32, i32) {
    %c0_i32 = arith.constant 0 : i32
    %c0_i32_0 = arith.constant 0 : i32
    return %arg0, %c0_i32 : i32, i32
  }
}

module attributes {stable_mosaic.version = 11 : i64} {
  func.func @grb_kernel(%arg0: i32, %arg1: memref<256x128xf32, #tpu.memory_space<vmem>>, %arg2: memref<1x128xf32, #tpu.memory_space<vmem>>, %arg3: memref<1x128xf32, #tpu.memory_space<vmem>>, %arg4: memref<128x256xf32, #tpu.memory_space<vmem>>, %arg5: memref<1x256xf32, #tpu.memory_space<vmem>>, %arg6: memref<256x128xf32, #tpu.memory_space<vmem>>, %arg7: memref<1x128xf32, #tpu.memory_space<vmem>>, %arg8: memref<1x128xf32, #tpu.memory_space<vmem>>, %arg9: memref<1x128xf32, #tpu.memory_space<vmem>>, %arg10: memref<128x128xf32, #tpu.memory_space<vmem>>, %arg11: memref<128x128xf32, #tpu.memory_space<vmem>>, %arg12: memref<1x128xf32, #tpu.memory_space<vmem>>, %arg13: memref<256x128xf32, #tpu.memory_space<vmem>>) attributes {dimension_semantics = [#tpu.dimension_semantics<parallel>], iteration_bounds = array<i64: 2>, scalar_prefetch = 0 : i64, scratch_operands = 0 : i64, tpu.core_type = #tpu.core_type<tc>, window_params = [{transform_indices = @transform_0, window_bounds = array<i64: 256, 128>}, {pipeline_mode = #tpu.pipeline_mode<synchronous>, transform_indices = @transform_1, window_bounds = array<i64: 1, 128>}, {pipeline_mode = #tpu.pipeline_mode<synchronous>, transform_indices = @transform_2, window_bounds = array<i64: 1, 128>}, {pipeline_mode = #tpu.pipeline_mode<synchronous>, transform_indices = @transform_3, window_bounds = array<i64: 128, 256>}, {pipeline_mode = #tpu.pipeline_mode<synchronous>, transform_indices = @transform_4, window_bounds = array<i64: 1, 256>}, {pipeline_mode = #tpu.pipeline_mode<synchronous>, transform_indices = @transform_5, window_bounds = array<i64: 256, 128>}, {pipeline_mode = #tpu.pipeline_mode<synchronous>, transform_indices = @transform_6, window_bounds = array<i64: 1, 128>}, {pipeline_mode = #tpu.pipeline_mode<synchronous>, transform_indices = @transform_7, window_bounds = array<i64: 1, 128>}, {pipeline_mode = #tpu.pipeline_mode<synchronous>, transform_indices = @transform_8, window_bounds = array<i64: 1, 128>}, {pipeline_mode = #tpu.pipeline_mode<synchronous>, transform_indices = @transform_9, window_bounds = array<i64: 128, 128>}, {pipeline_mode = #tpu.pipeline_mode<synchronous>, transform_indices = @transform_10, window_bounds = array<i64: 128, 128>}, {pipeline_mode = #tpu.pipeline_mode<synchronous>, transform_indices = @transform_11, window_bounds = array<i64: 1, 128>}, {transform_indices = @transform_12, window_bounds = array<i64: 256, 128>}]} {
    %c0 = arith.constant 0 : index
    %c0_0 = arith.constant 0 : index
    %0 = vector.load %arg1[%c0, %c0_0] : memref<256x128xf32, #tpu.memory_space<vmem>>, vector<256x128xf32>
    %1 = tpu.iota {dimensions = array<i32: 1>} : vector<256x128xi32>
    %c96_i32 = arith.constant 96 : i32
    %2 = vector.broadcast %c96_i32 : i32 to vector<256x128xi32>
    %3 = arith.cmpi slt, %1, %2 : vector<256x128xi32>
    %c0_1 = arith.constant 0 : index
    %c0_2 = arith.constant 0 : index
    %4 = vector.load %arg2[%c0_1, %c0_2] : memref<1x128xf32, #tpu.memory_space<vmem>>, vector<1x128xf32>
    %c0_3 = arith.constant 0 : index
    %c0_4 = arith.constant 0 : index
    %5 = vector.load %arg3[%c0_3, %c0_4] : memref<1x128xf32, #tpu.memory_space<vmem>>, vector<1x128xf32>
    %cst = arith.constant dense<0.000000e+00> : vector<256xf32>
    %6 = vector.multi_reduction <add>, %0, %cst [1] : vector<256x128xf32> to vector<256xf32>
    %7 = vector.shape_cast %6 : vector<256xf32> to vector<256x1xf32>
    %cst_5 = arith.constant 0.010416667 : f32
    %8 = vector.broadcast %cst_5 : f32 to vector<256x1xf32>
    %9 = arith.mulf %7, %8 : vector<256x1xf32>
    %10 = vector.broadcast %9 : vector<256x1xf32> to vector<256x128xf32>
    %11 = arith.subf %0, %10 : vector<256x128xf32>
    %cst_6 = arith.constant 0.000000e+00 : f32
    %12 = vector.broadcast %cst_6 : f32 to vector<256x128xf32>
    %13 = arith.select %3, %11, %12 : vector<256x128xi1>, vector<256x128xf32>
    %14 = arith.mulf %13, %13 : vector<256x128xf32>
    %cst_7 = arith.constant dense<0.000000e+00> : vector<256xf32>
    %15 = vector.multi_reduction <add>, %14, %cst_7 [1] : vector<256x128xf32> to vector<256xf32>
    %16 = vector.shape_cast %15 : vector<256xf32> to vector<256x1xf32>
    %cst_8 = arith.constant 0.010416667 : f32
    %17 = vector.broadcast %cst_8 : f32 to vector<256x1xf32>
    %18 = arith.mulf %16, %17 : vector<256x1xf32>
    %cst_9 = arith.constant 9.99999974E-6 : f32
    %19 = vector.broadcast %cst_9 : f32 to vector<256x1xf32>
    %20 = arith.addf %18, %19 : vector<256x1xf32>
    %21 = math.rsqrt %20 : vector<256x1xf32>
    %22 = vector.broadcast %21 : vector<256x1xf32> to vector<256x128xf32>
    %23 = arith.mulf %13, %22 : vector<256x128xf32>
    %24 = vector.broadcast %4 : vector<1x128xf32> to vector<256x128xf32>
    %25 = arith.mulf %23, %24 : vector<256x128xf32>
    %26 = vector.broadcast %5 : vector<1x128xf32> to vector<256x128xf32>
    %27 = arith.addf %25, %26 : vector<256x128xf32>
    %c0_10 = arith.constant 0 : index
    %c0_11 = arith.constant 0 : index
    %28 = vector.load %arg4[%c0_10, %c0_11] : memref<128x256xf32, #tpu.memory_space<vmem>>, vector<128x256xf32>
    %cst_12 = arith.constant dense<0.000000e+00> : vector<256x256xf32>
    %29 = tpu.matmul %27, %28, %cst_12 {dimension_numbers = #tpu.dot_dimension_numbers<[1], [0], [0], [1], [0, 0, 1, 1], [], []>} : vector<256x128xf32>, vector<128x256xf32>, vector<256x256xf32> -> vector<256x256xf32>
    %c0_13 = arith.constant 0 : index
    %c0_14 = arith.constant 0 : index
    %30 = vector.load %arg5[%c0_13, %c0_14] : memref<1x256xf32, #tpu.memory_space<vmem>>, vector<1x256xf32>
    %31 = vector.broadcast %30 : vector<1x256xf32> to vector<256x256xf32>
    %32 = arith.addf %29, %31 : vector<256x256xf32>
    %cst_15 = arith.constant 5.000000e-01 : f32
    %33 = vector.broadcast %cst_15 : f32 to vector<256x256xf32>
    %34 = arith.mulf %33, %32 : vector<256x256xf32>
    %cst_16 = arith.constant 2.000000e+00 : f32
    %35 = math.sqrt %cst_16 : f32
    %cst_17 = arith.constant 1.000000e+00 : f32
    %36 = arith.divf %cst_17, %35 : f32
    %37 = vector.broadcast %36 : f32 to vector<256x256xf32>
    %38 = arith.mulf %32, %37 : vector<256x256xf32>
    %39 = math.erf %38 : vector<256x256xf32>
    %cst_18 = arith.constant 1.000000e+00 : f32
    %40 = vector.broadcast %cst_18 : f32 to vector<256x256xf32>
    %41 = arith.addf %40, %39 : vector<256x256xf32>
    %42 = arith.mulf %34, %41 : vector<256x256xf32>
    %c0_19 = arith.constant 0 : index
    %c0_20 = arith.constant 0 : index
    %43 = vector.load %arg6[%c0_19, %c0_20] : memref<256x128xf32, #tpu.memory_space<vmem>>, vector<256x128xf32>
    %cst_21 = arith.constant dense<0.000000e+00> : vector<256x128xf32>
    %44 = tpu.matmul %42, %43, %cst_21 {dimension_numbers = #tpu.dot_dimension_numbers<[1], [0], [0], [1], [0, 0, 1, 1], [], []>} : vector<256x256xf32>, vector<256x128xf32>, vector<256x128xf32> -> vector<256x128xf32>
    %c0_22 = arith.constant 0 : index
    %c0_23 = arith.constant 0 : index
    %45 = vector.load %arg7[%c0_22, %c0_23] : memref<1x128xf32, #tpu.memory_space<vmem>>, vector<1x128xf32>
    %46 = vector.broadcast %45 : vector<1x128xf32> to vector<256x128xf32>
    %47 = arith.addf %44, %46 : vector<256x128xf32>
    %c0_24 = arith.constant 0 : index
    %c0_25 = arith.constant 0 : index
    %48 = vector.load %arg8[%c0_24, %c0_25] : memref<1x128xf32, #tpu.memory_space<vmem>>, vector<1x128xf32>
    %c0_26 = arith.constant 0 : index
    %c0_27 = arith.constant 0 : index
    %49 = vector.load %arg9[%c0_26, %c0_27] : memref<1x128xf32, #tpu.memory_space<vmem>>, vector<1x128xf32>
    %cst_28 = arith.constant dense<0.000000e+00> : vector<256xf32>
    %50 = vector.multi_reduction <add>, %47, %cst_28 [1] : vector<256x128xf32> to vector<256xf32>
    %51 = vector.shape_cast %50 : vector<256xf32> to vector<256x1xf32>
    %cst_29 = arith.constant 0.010416667 : f32
    %52 = vector.broadcast %cst_29 : f32 to vector<256x1xf32>
    %53 = arith.mulf %51, %52 : vector<256x1xf32>
    %54 = vector.broadcast %53 : vector<256x1xf32> to vector<256x128xf32>
    %55 = arith.subf %47, %54 : vector<256x128xf32>
    %cst_30 = arith.constant 0.000000e+00 : f32
    %56 = vector.broadcast %cst_30 : f32 to vector<256x128xf32>
    %57 = arith.select %3, %55, %56 : vector<256x128xi1>, vector<256x128xf32>
    %58 = arith.mulf %57, %57 : vector<256x128xf32>
    %cst_31 = arith.constant dense<0.000000e+00> : vector<256xf32>
    %59 = vector.multi_reduction <add>, %58, %cst_31 [1] : vector<256x128xf32> to vector<256xf32>
    %60 = vector.shape_cast %59 : vector<256xf32> to vector<256x1xf32>
    %cst_32 = arith.constant 0.010416667 : f32
    %61 = vector.broadcast %cst_32 : f32 to vector<256x1xf32>
    %62 = arith.mulf %60, %61 : vector<256x1xf32>
    %cst_33 = arith.constant 9.99999974E-6 : f32
    %63 = vector.broadcast %cst_33 : f32 to vector<256x1xf32>
    %64 = arith.addf %62, %63 : vector<256x1xf32>
    %65 = math.rsqrt %64 : vector<256x1xf32>
    %66 = vector.broadcast %65 : vector<256x1xf32> to vector<256x128xf32>
    %67 = arith.mulf %57, %66 : vector<256x128xf32>
    %68 = vector.broadcast %48 : vector<1x128xf32> to vector<256x128xf32>
    %69 = arith.mulf %67, %68 : vector<256x128xf32>
    %70 = vector.broadcast %49 : vector<1x128xf32> to vector<256x128xf32>
    %71 = arith.addf %69, %70 : vector<256x128xf32>
    %c0_34 = arith.constant 0 : index
    %c0_35 = arith.constant 0 : index
    %72 = vector.load %arg10[%c0_34, %c0_35] : memref<128x128xf32, #tpu.memory_space<vmem>>, vector<128x128xf32>
    %cst_36 = arith.constant dense<0.000000e+00> : vector<256x128xf32>
    %73 = tpu.matmul %71, %72, %cst_36 {dimension_numbers = #tpu.dot_dimension_numbers<[1], [0], [0], [1], [0, 0, 1, 1], [], []>} : vector<256x128xf32>, vector<128x128xf32>, vector<256x128xf32> -> vector<256x128xf32>
    %c0_37 = arith.constant 0 : index
    %c0_38 = arith.constant 0 : index
    %74 = vector.load %arg11[%c0_37, %c0_38] : memref<128x128xf32, #tpu.memory_space<vmem>>, vector<128x128xf32>
    %cst_39 = arith.constant dense<0.000000e+00> : vector<256x128xf32>
    %75 = tpu.matmul %0, %74, %cst_39 {dimension_numbers = #tpu.dot_dimension_numbers<[1], [0], [0], [1], [0, 0, 1, 1], [], []>} : vector<256x128xf32>, vector<128x128xf32>, vector<256x128xf32> -> vector<256x128xf32>
    %76 = arith.addf %73, %75 : vector<256x128xf32>
    %c0_40 = arith.constant 0 : index
    %c0_41 = arith.constant 0 : index
    %77 = vector.load %arg12[%c0_40, %c0_41] : memref<1x128xf32, #tpu.memory_space<vmem>>, vector<1x128xf32>
    %78 = vector.broadcast %77 : vector<1x128xf32> to vector<256x128xf32>
    %79 = arith.addf %76, %78 : vector<256x128xf32>
    %80 = arith.negf %79 : vector<256x128xf32>
    %81 = math.exp %80 : vector<256x128xf32>
    %cst_42 = arith.constant 1.000000e+00 : f32
    %82 = vector.broadcast %cst_42 : f32 to vector<256x128xf32>
    %83 = arith.addf %82, %81 : vector<256x128xf32>
    %84 = arith.divf %82, %83 : vector<256x128xf32>
    %85 = arith.mulf %84, %71 : vector<256x128xf32>
    %cst_43 = arith.constant 1.000000e+00 : f32
    %86 = vector.broadcast %cst_43 : f32 to vector<256x128xf32>
    %87 = arith.subf %86, %84 : vector<256x128xf32>
    %88 = arith.mulf %87, %0 : vector<256x128xf32>
    %89 = arith.addf %85, %88 : vector<256x128xf32>
    %c0_44 = arith.constant 0 : index
    %c0_45 = arith.constant 0 : index
    %90 = vector.load %arg13[%c0_44, %c0_45] : memref<256x128xf32, #tpu.memory_space<vmem>>, vector<256x128xf32>
    tpu.vector_store %arg13[%c0_44, %c0_45], %89 {strides = array<i32>} : memref<256x128xf32, #tpu.memory_space<vmem>>, vector<256x128xf32>,
    return
  }
  func.func @transform_0(%arg0: i32) -> (i32, i32) {
    %c0_i32 = arith.constant 0 : i32
    %c0_i32_0 = arith.constant 0 : i32
    return %arg0, %c0_i32 : i32, i32
  }
  func.func @transform_1(%arg0: i32) -> (i32, i32) {
    %c0_i32 = arith.constant 0 : i32
    %c0_i32_0 = arith.constant 0 : i32
    %c0_i32_1 = arith.constant 0 : i32
    return %c0_i32, %c0_i32_0 : i32, i32
  }
  func.func @transform_2(%arg0: i32) -> (i32, i32) {
    %c0_i32 = arith.constant 0 : i32
    %c0_i32_0 = arith.constant 0 : i32
    %c0_i32_1 = arith.constant 0 : i32
    return %c0_i32, %c0_i32_0 : i32, i32
  }
  func.func @transform_3(%arg0: i32) -> (i32, i32) {
    %c0_i32 = arith.constant 0 : i32
    %c0_i32_0 = arith.constant 0 : i32
    %c0_i32_1 = arith.constant 0 : i32
    return %c0_i32, %c0_i32_0 : i32, i32
  }
  func.func @transform_4(%arg0: i32) -> (i32, i32) {
    %c0_i32 = arith.constant 0 : i32
    %c0_i32_0 = arith.constant 0 : i32
    %c0_i32_1 = arith.constant 0 : i32
    return %c0_i32, %c0_i32_0 : i32, i32
  }
  func.func @transform_5(%arg0: i32) -> (i32, i32) {
    %c0_i32 = arith.constant 0 : i32
    %c0_i32_0 = arith.constant 0 : i32
    %c0_i32_1 = arith.constant 0 : i32
    return %c0_i32, %c0_i32_0 : i32, i32
  }
  func.func @transform_6(%arg0: i32) -> (i32, i32) {
    %c0_i32 = arith.constant 0 : i32
    %c0_i32_0 = arith.constant 0 : i32
    %c0_i32_1 = arith.constant 0 : i32
    return %c0_i32, %c0_i32_0 : i32, i32
  }
  func.func @transform_7(%arg0: i32) -> (i32, i32) {
    %c0_i32 = arith.constant 0 : i32
    %c0_i32_0 = arith.constant 0 : i32
    %c0_i32_1 = arith.constant 0 : i32
    return %c0_i32, %c0_i32_0 : i32, i32
  }
  func.func @transform_8(%arg0: i32) -> (i32, i32) {
    %c0_i32 = arith.constant 0 : i32
    %c0_i32_0 = arith.constant 0 : i32
    %c0_i32_1 = arith.constant 0 : i32
    return %c0_i32, %c0_i32_0 : i32, i32
  }
  func.func @transform_9(%arg0: i32) -> (i32, i32) {
    %c0_i32 = arith.constant 0 : i32
    %c0_i32_0 = arith.constant 0 : i32
    %c0_i32_1 = arith.constant 0 : i32
    return %c0_i32, %c0_i32_0 : i32, i32
  }
  func.func @transform_10(%arg0: i32) -> (i32, i32) {
    %c0_i32 = arith.constant 0 : i32
    %c0_i32_0 = arith.constant 0 : i32
    %c0_i32_1 = arith.constant 0 : i32
    return %c0_i32, %c0_i32_0 : i32, i32
  }
  func.func @transform_11(%arg0: i32) -> (i32, i32) {
    %c0_i32 = arith.constant 0 : i32
    %c0_i32_0 = arith.constant 0 : i32
    %c0_i32_1 = arith.constant 0 : i32
    return %c0_i32, %c0_i32_0 : i32, i32
  }
  func.func @transform_12(%arg0: i32) -> (i32, i32) {
    %c0_i32 = arith.constant 0 : i32
    %c0_i32_0 = arith.constant 0 : i32
    return %arg0, %c0_i32 : i32, i32
  }
}

</mosaic_0001>

<bundles_post_ra>
// kernel: gated_residual_block.1
= control target key start
LH: loop header
LB: loop body
LE: loop exit
PB: predicated region body
PF: predicated region fallthrough
CT: control target
= control target key end

     0   :  { %s4058_s21 = smov 0   ;;  %s6032_s0 = inlined_call_operand.vmem [shape: f32[512,128], index: 0, kind: input, shape index: {}]   ;;  %s6033_s1 = inlined_call_operand.vmem [shape: f32[1,128], index: 1, kind: input, shape index: {}]   ;;  %s6034_s2 = inlined_call_operand.vmem [shape: f32[1,128], index: 2, kind: input, shape index: {}]   ;;  %s6035_s3 = inlined_call_operand.vmem [shape: f32[128,256], index: 3, kind: input, shape index: {}]   ;;  %s6036_s4 = inlined_call_operand.vmem [shape: f32[1,256], index: 4, kind: input, shape index: {}]   ;;  %s6037_s5 = inlined_call_operand.vmem [shape: f32[256,128], index: 5, kind: input, shape index: {}]   ;;  %s6038_s6 = inlined_call_operand.vmem [shape: f32[1,128], index: 6, kind: input, shape index: {}]   ;;  %s6039_s7 = inlined_call_operand.vmem [shape: f32[1,128], index: 7, kind: input, shape index: {}]   ;;  %s6040_s8 = inlined_call_operand.vmem [shape: f32[1,128], index: 8, kind: input, shape index: {}]   ;;  %s6041_s9 = inlined_call_operand.vmem [shape: f32[128,128], index: 9, kind: input, shape index: {}]   ;;  %s6042_s10 = inlined_call_operand.vmem [shape: f32[128,128], index: 10, kind: input, shape index: {}]   ;;  %s6043_s11 = inlined_call_operand.vmem [shape: f32[1,128], index: 11, kind: input, shape index: {}]   ;;  %s6044_s12 = inlined_call_operand.vmem [shape: f32[512,128], index: 12, kind: output, shape index: {}]  }
   0x1 LB: > { %s3190_s22 = sadd.s32 4294967295, %s3990_s21   ;;  %p3194_p0 = scmp.ge.s32.totalorder %s3990_s21, 1  ;;  %s3990_s21 = sphi %s4058_s21, %s22_s21  }
   0x2   : > { %p363_p1 = scmp.lt.s32.totalorder %s3990_s21, 3 }
   0x4   : > { %p364_p2 = pnand %p3194_p0, %p363_p1 }
   0x6   : > { %367 = sbr.rel (%p364_p2) target bundleno = 1407 (0x57f), region = 68 }
   0xb   : > { %s3195_s23 = sshll.u32 %s3190_s22, 5  ;;  %v945_v32 = vld [vmem:[%s6035_s3 + $0xf8] sm:$0xff]  ;;  %v944_v33 = vld [vmem:[%s6035_s3 + $0xf0] sm:$0xff]  ;;  %v943_v34 = vld [vmem:[%s6035_s3 + $0xe8] sm:$0xff]  ;;  %v449_v40 = vlaneseq }
   0xc   : > { %p406_p3 = scmp.lt.s32.totalorder %s3195_s23, 63  ;;  %958 = vmatprep.subr.mxu0 %v945_v32  ;;  %v942_v35 = vld [vmem:[%s6035_s3 + $0xe0] sm:$0xff]  ;;  %v941_v36 = vld [vmem:[%s6035_s3 + $0xd8] sm:$0xff]  ;;  %v940_v37 = vld [vmem:[%s6035_s3 + $0xd0] sm:$0xff] }
   0xd   : > { %959 = vmatpush1.msra.mxu0 %v944_v33  ;;  %v939_v38 = vld [vmem:[%s6035_s3 + $0xc8] sm:$0xff]  ;;  %v938_v39 = vld [vmem:[%s6035_s3 + $0xc0] sm:$0xff]  ;;  %v4229_v41 = vand.u32 127, %v449_v40 }
   0xe   : > { %s6088_s23 = smov (!%p406_p3, %s3195_s23), 63  ;;  %960 = vmatprep.subr.mxu0 %v943_v34 }
   0xf   : > { %s3196_s24 = sshll.u32 %s6088_s23, 3  ;;  %961 = vmatpush1.msra.mxu0 %v942_v35  ;;  %vm451_vm0 = vcmp.lt.s32.totalorder %v4229_v41, 96  ;;  %v5594_v41 = vld [vmem:[%s6039_s7] ss:$0 sm:$0xff] }
  0x10   : > { %s4074_s27 = scalar_lea.vmem %s6032_s0, %s3196_s24  ;;  %962 = vmatprep.subr.mxu0 %v941_v36  ;;  %s5877_s25 = scalar_lea.vmem %s6044_s12, %s3196_s24 }
  0x11   : > { %v4077_v0 = vld [vmem:[%s4074_s27 + $0x10] sm:$0xff]  ;;  %v4080_v1 = vld [vmem:[%s4074_s27] sm:$0xff]  ;;  %v4085_v2 = vld [vmem:[%s4074_s27 + $0x18] sm:$0xff]  ;;  %963 = vmatpush1.msra.mxu0 %v940_v37 }
  0x12   : > { %458 = vadd.xlane.f32.xlu1 %v4077_v0  ;;  %454 = vadd.xlane.f32.xlu0 %v4080_v1  ;;  %v4088_v3 = vld [vmem:[%s4074_s27 + $0x8] sm:$0xff]  ;;  %v4096_v5 = vld [vmem:[%s4074_s27 + $0x20] sm:$0xff]  ;;  %v4101_v6 = vld [vmem:[%s4074_s27 + $0x38] sm:$0xff] }
  0x13   : > { %v4093_v4 = vld [vmem:[%s4074_s27 + $0x28] sm:$0xff]  ;;  %v4104_v7 = vld [vmem:[%s4074_s27 + $0x30] sm:$0xff]  ;;  %v4112_v9 = vld [vmem:[%s4074_s27 + $0x40] sm:$0xff]  ;;  %964 = vmatprep.subr.mxu0 %v939_v38 }
  0x14   : > { %v4109_v8 = vld [vmem:[%s4074_s27 + $0x48] sm:$0xff]  ;;  %v4117_v10 = vld [vmem:[%s4074_s27 + $0x58] sm:$0xff]  ;;  %v4120_v11 = vld [vmem:[%s4074_s27 + $0x50] sm:$0xff]  ;;  %965 = vmatpush1.msra.mxu0 %v938_v39 }
  0x15   : > { %v4125_v12 = vld [vmem:[%s4074_s27 + $0x68] sm:$0xff]  ;;  %v4128_v13 = vld [vmem:[%s4074_s27 + $0x60] sm:$0xff]  ;;  %v4133_v14 = vld [vmem:[%s4074_s27 + $0x78] sm:$0xff] }
  0x16   : > { %460 = vadd.xlane.f32.xlu1 %v4085_v2  ;;  %456 = vadd.xlane.f32.xlu0 %v4088_v3  ;;  %v4136_v15 = vld [vmem:[%s4074_s27 + $0x70] sm:$0xff]  ;;  %v4141_v16 = vld [vmem:[%s4074_s27 + $0x88] sm:$0xff]  ;;  %v4144_v17 = vld [vmem:[%s4074_s27 + $0x80] sm:$0xff] }
  0x17   : > { %v4149_v18 = vld [vmem:[%s4074_s27 + $0x98] sm:$0xff]  ;;  %v4152_v19 = vld [vmem:[%s4074_s27 + $0x90] sm:$0xff]  ;;  %v4157_v20 = vld [vmem:[%s4074_s27 + $0xa0] sm:$0xff] }
  0x18   : > { %v4161_v21 = vld [vmem:[%s4074_s27 + $0xa8] sm:$0xff]  ;;  %v4165_v22 = vld [vmem:[%s4074_s27 + $0xb0] sm:$0xff]  ;;  %v4169_v23 = vld [vmem:[%s4074_s27 + $0xb8] sm:$0xff] }
  0x19   : > { %v4173_v24 = vld [vmem:[%s4074_s27 + $0xc0] sm:$0xff]  ;;  %v4177_v25 = vld [vmem:[%s4074_s27 + $0xc8] sm:$0xff]  ;;  %v4181_v26 = vld [vmem:[%s4074_s27 + $0xd0] sm:$0xff] }
  0x1a   : > { %464 = vadd.xlane.f32.xlu1 %v4093_v4  ;;  %462 = vadd.xlane.f32.xlu0 %v4096_v5  ;;  %v4185_v27 = vld [vmem:[%s4074_s27 + $0xd8] sm:$0xff]  ;;  %v4189_v28 = vld [vmem:[%s4074_s27 + $0xe0] sm:$0xff]  ;;  %v4193_v29 = vld [vmem:[%s4074_s27 + $0xe8] sm:$0xff] }
  0x1b   : > { %v4197_v30 = vld [vmem:[%s4074_s27 + $0xf0] sm:$0xff]  ;;  %v4201_v31 = vld [vmem:[%s4074_s27 + $0xf8] sm:$0xff]  ;;  %v935_v38 = vld [vmem:[%s6035_s3 + $0xa8] sm:$0xff] }
  0x1c   : > { %v936_v37 = vld [vmem:[%s6035_s3 + $0xb0] sm:$0xff] }
  0x1e   : > { %468 = vadd.xlane.f32.xlu1 %v4101_v6  ;;  %466 = vadd.xlane.f32.xlu0 %v4104_v7 }
  0x22   : > { %472 = vadd.xlane.f32.xlu1 %v4109_v8  ;;  %470 = vadd.xlane.f32.xlu0 %v4112_v9 }
  0x26   : > { %476 = vadd.xlane.f32.xlu1 %v4117_v10  ;;  %474 = vadd.xlane.f32.xlu0 %v4120_v11 }
  0x2a   : > { %480 = vadd.xlane.f32.xlu1 %v4125_v12  ;;  %478 = vadd.xlane.f32.xlu0 %v4128_v13 }
  0x2e   : > { %484 = vadd.xlane.f32.xlu1 %v4133_v14  ;;  %482 = vadd.xlane.f32.xlu0 %v4136_v15 }
  0x32   : > { %488 = vadd.xlane.f32.xlu1 %v4141_v16  ;;  %486 = vadd.xlane.f32.xlu0 %v4144_v17 }
  0x36   : > { %492 = vadd.xlane.f32.xlu1 %v4149_v18  ;;  %490 = vadd.xlane.f32.xlu0 %v4152_v19 }
  0x3a   : > { %494 = vadd.xlane.f32.xlu1 %v4157_v20 }
  0x3e   : > { %496 = vadd.xlane.f32.xlu1 %v4161_v21 }
  0x42   : > { %498 = vadd.xlane.f32.xlu1 %v4165_v22 }
  0x46   : > { %500 = vadd.xlane.f32.xlu1 %v4169_v23 }
  0x4a   : > { %502 = vadd.xlane.f32.xlu1 %v4173_v24 }
  0x4e   : > { %504 = vadd.xlane.f32.xlu1 %v4177_v25 }
  0x52   : > { %506 = vadd.xlane.f32.xlu1 %v4181_v26 }
  0x56   : > { %508 = vadd.xlane.f32.xlu1 %v4185_v27 }
  0x5a   : > { %510 = vadd.xlane.f32.xlu1 %v4189_v28 }
  0x5e   : > { %512 = vadd.xlane.f32.xlu1 %v4193_v29 }
  0x62   : > { %514 = vadd.xlane.f32.xlu1 %v4197_v30 }
  0x66   : > { %516 = vadd.xlane.f32.xlu1 %v4201_v31 }
  0x9b   : > { %v459_v42 = vpop.xlane.xlu1 %458  ;;  %v455_v43 = vpop.xlane.xlu0 %454 }
  0x9c   : > { %v520_v44 = vmul.f32 0.010416667, %v459_v42  ;;  %v518_v45 = vmul.f32 0.010416667, %v455_v43  ;;  %v934_v42 = vld [vmem:[%s6035_s3 + $0xa0] sm:$0xff] }
  0x9e   : > { %v550_v46 = vsub.f32 %v4080_v1, %v518_v45  ;;  %v552_v49 = vsub.f32 %v4077_v0, %v520_v44 }
  0x9f   : > { %v461_v47 = vpop.xlane.xlu1 %460  ;;  %v457_v48 = vpop.xlane.xlu0 %456 }
  0xa0   : > { %v521_v50 = vmul.f32 0.010416667, %v461_v47  ;;  %v519_v51 = vmul.f32 0.010416667, %v457_v48  ;;  %v4236_v52 = vsel %vm451_vm0, %v550_v46, 0.0  ;;  %v4248_v59 = vsel %vm451_vm0, %v552_v49, 0.0 }
  0xa1   : > { %v614_v53 = vmul.f32 %v4236_v52, %v4236_v52  ;;  %v616_v63 = vmul.f32 %v4248_v59, %v4248_v59  ;;  %v933_v47 = vld [vmem:[%s6035_s3 + $0x98] sm:$0xff]  ;;  %v932_v48 = vld [vmem:[%s6035_s3 + $0x90] sm:$0xff] }
  0xa2   : > { %v551_v54 = vsub.f32 %v4088_v3, %v519_v51  ;;  %v553_v57 = vsub.f32 %v4085_v2, %v521_v50  ;;  %v930_v51 = vld [vmem:[%s6035_s3 + $0x80] sm:$0xff] }
  0xa3   : > { %v465_v55 = vpop.xlane.xlu1 %464  ;;  %646 = vadd.xlane.f32.xlu0 %v614_v53  ;;  %v463_v56 = vpop.xlane.xlu0 %462 }
  0xa4   : > { %v4244_v58 = vsel %vm451_vm0, %v551_v54, 0.0  ;;  %v522_v60 = vmul.f32 0.010416667, %v463_v56  ;;  %v523_v0 = vmul.f32 0.010416667, %v465_v55  ;;  %v4257_v2 = vsel %vm451_vm0, %v553_v57, 0.0 }
  0xa5   : > { %v615_v61 = vmul.f32 %v4244_v58, %v4244_v58  ;;  %v617_v33 = vmul.f32 %v4257_v2, %v4257_v2  ;;  %v929_v57 = vld [vmem:[%s6035_s3 + $0x78] sm:$0xff] }
  0xa6   : > { %v554_v1 = vsub.f32 %v4096_v5, %v522_v60  ;;  %v555_v34 = vsub.f32 %v4093_v4, %v523_v0  ;;  %v937_v5 = vld [vmem:[%s6035_s3 + $0xb8] sm:$0xff]  ;;  %v928_v60 = vld [vmem:[%s6035_s3 + $0x70] sm:$0xff] }
  0xa7   : > { %v469_v62 = vpop.xlane.xlu1 %468  ;;  %648 = vadd.xlane.f32.xlu0 %v615_v61  ;;  %v467_v3 = vpop.xlane.xlu0 %466  ;;  %966 = vmatprep.subr.mxu0 %v937_v5  ;;  %v925_v5 = vld [vmem:[%s6035_s3 + $0x58] sm:$0xff] }
  0xa8   : > { %v4264_v35 = vsel %vm451_vm0, %v554_v1, 0.0  ;;  %v524_v36 = vmul.f32 0.010416667, %v467_v3  ;;  %967 = vmatpush1.msra.mxu0 %v936_v37  ;;  %v525_v43 = vmul.f32 0.010416667, %v469_v62  ;;  %v4285_v45 = vsel %vm451_vm0, %v555_v34, 0.0 }
  0xa9   : > { %v618_v4 = vmul.f32 %v4264_v35, %v4264_v35  ;;  %968 = vmatprep.subr.mxu0 %v935_v38  ;;  %v619_v50 = vmul.f32 %v4285_v45, %v4285_v45  ;;  %v926_v3 = vld [vmem:[%s6035_s3 + $0x60] sm:$0xff]  ;;  %v924_v37 = vld [vmem:[%s6035_s3 + $0x50] sm:$0xff] }
  0xaa   : > { %v556_v44 = vsub.f32 %v4104_v7, %v524_v36  ;;  %969 = vmatpush1.msra.mxu0 %v934_v42  ;;  %v931_v7 = vld [vmem:[%s6035_s3 + $0x88] sm:$0xff]  ;;  %v557_v53 = vsub.f32 %v4101_v6, %v525_v43 }
  0xab   : > { %v473_v32 = vpop.xlane.xlu1 %472  ;;  %650 = vadd.xlane.f32.xlu0 %v616_v63  ;;  %v471_v46 = vpop.xlane.xlu0 %470  ;;  %970 = vmatprep.subr.mxu0 %v933_v47  ;;  %v927_v6 = vld [vmem:[%s6035_s3 + $0x68] sm:$0xff] }
  0xac   : > { %971 = vmatpush1.msra.mxu0 %v932_v48  ;;  %v4304_v55 = vsel %vm451_vm0, %v556_v44, 0.0  ;;  %v526_v56 = vmul.f32 0.010416667, %v471_v46  ;;  %v527_v62 = vmul.f32 0.010416667, %v473_v32  ;;  %v4328_v32 = vsel %vm451_vm0, %v557_v53, 0.0 }
  0xad   : > { %972 = vmatprep.subr.mxu0 %v931_v7  ;;  %v620_v0 = vmul.f32 %v4304_v55, %v4304_v55  ;;  %v621_v43 = vmul.f32 %v4328_v32, %v4328_v32  ;;  %v922_v46 = vld [vmem:[%s6035_s3 + $0x40] sm:$0xff] }
  0xae   : > { %973 = vmatpush1.msra.mxu0 %v930_v51  ;;  %v558_v34 = vsub.f32 %v4112_v9, %v526_v56  ;;  %v923_v9 = vld [vmem:[%s6035_s3 + $0x48] sm:$0xff]  ;;  %v920_v51 = vld [vmem:[%s6035_s3 + $0x30] sm:$0xff] }
  0xaf   : > { %v4275_v39 = vpop.xlane.xlu1 %476  ;;  %652 = vadd.xlane.f32.xlu0 %v617_v33  ;;  %974 = vmatprep.subr.mxu0 %v929_v57  ;;  %v475_v1 = vpop.xlane.xlu0 %474  ;;  %v919_v57 = vld [vmem:[%s6035_s3 + $0x28] sm:$0xff] }
  0xb0   : > { %975 = vmatpush1.msra.mxu0 %v928_v60  ;;  %v4354_v48 = vsel %vm451_vm0, %v558_v34, 0.0  ;;  %v529_v53 = vmul.f32 0.010416667, %v4275_v39 }
  0xb1   : > { %976 = vmatprep.subr.mxu0 %v927_v6  ;;  %v622_v56 = vmul.f32 %v4354_v48, %v4354_v48 }
  0xb2   : > { %977 = vmatpush1.msra.mxu0 %v926_v3  ;;  %v561_v34 = vsub.f32 %v4117_v10, %v529_v53  ;;  %v915_v10 = vld [vmem:[%s6035_s3 + $0x8] sm:$0xff] }
  0xb3   : > { %v481_v49 = vpop.xlane.xlu1 %480  ;;  %654 = vadd.xlane.f32.xlu0 %v618_v4  ;;  %978 = vmatprep.subr.mxu0 %v925_v5  ;;  %v559_v4 = vsub.f32 %v4109_v8, %v527_v62  ;;  %v479_v44 = vpop.xlane.xlu0 %478  ;;  %v528_v8 = vmul.f32 0.010416667, %v475_v1 }
  0xb4   : > { %v531_v54 = vmul.f32 0.010416667, %v481_v49  ;;  %979 = vmatpush1.msra.mxu0 %v924_v37  ;;  %v921_v49 = vld [vmem:[%s6035_s3 + $0x38] sm:$0xff]  ;;  %v530_v5 = vmul.f32 0.010416667, %v479_v44  ;;  %v3992_v37 = vmov 0.0  }
  0xb5   : > { %980 = vmatprep.subr.mxu0 %v923_v9  ;;  %v4378_v39 = vsel %vm451_vm0, %v559_v4, 0.0  ;;  %1022 = vmatprep.mubr.f32.mxu0 %v3992_v37  ;;  %v914_v9 = vld [vmem:[%s6035_s3] sm:$0xff] }
  0xb6   : > { %v563_v61 = vsub.f32 %v4125_v12, %v531_v54  ;;  %981 = vmatpush1.msra.mxu0 %v922_v46  ;;  %v623_v3 = vmul.f32 %v4378_v39, %v4378_v39  ;;  %1574 = vmatprep.subr.mxu1 %v3992_v37  ;;  %v562_v46 = vsub.f32 %v4128_v13, %v530_v5 }
  0xb7   : > { %v485_v63 = vpop.xlane.xlu1 %484  ;;  %656 = vadd.xlane.f32.xlu0 %v619_v50  ;;  %982 = vmatprep.subr.mxu0 %v921_v49  ;;  %v483_v62 = vpop.xlane.xlu0 %482 }
  0xb8   : > { %v533_v33 = vmul.f32 0.010416667, %v485_v63  ;;  %v4323_v12 = vsel %vm451_vm0, %v563_v61, 0.0  ;;  %v560_v61 = vsub.f32 %v4120_v11, %v528_v8  ;;  %983 = vmatpush1.msra.mxu0 %v920_v51  ;;  %v918_v63 = vld [vmem:[%s6035_s3 + $0x20] sm:$0xff]  ;;  %v917_v11 = vld [vmem:[%s6035_s3 + $0x18] sm:$0xff]  ;;  %v4430_v53 = vsel %vm451_vm0, %v562_v46, 0.0 }
  0xb9   : > { %v627_v36 = vmul.f32 %v4323_v12, %v4323_v12  ;;  %984 = vmatprep.subr.mxu0 %v919_v57  ;;  %v532_v8 = vmul.f32 0.010416667, %v483_v62 }
  0xba   : > { %v565_v38 = vsub.f32 %v4133_v14, %v533_v33  ;;  %v916_v33 = vld [vmem:[%s6035_s3 + $0x10] sm:$0xff]  ;;  %985 = vmatpush1.msra.mxu0 %v918_v63 }
  0xbb   : > { %672 = vadd.xlane.f32.xlu1 %v627_v36  ;;  %v489_v42 = vpop.xlane.xlu1 %488  ;;  %658 = vadd.xlane.f32.xlu0 %v620_v0  ;;  %v4401_v36 = vsel %vm451_vm0, %v560_v61, 0.0  ;;  %v564_v13 = vsub.f32 %v4136_v15, %v532_v8 }
  0xbc   : > { %v535_v47 = vmul.f32 0.010416667, %v489_v42  ;;  %v4350_v14 = vsel %vm451_vm0, %v565_v38, 0.0  ;;  %986 = vmatprep.subr.mxu0 %v917_v11  ;;  %v624_v42 = vmul.f32 %v4401_v36, %v4401_v36 }
  0xbd   : > { %v629_v7 = vmul.f32 %v4350_v14, %v4350_v14  ;;  %987 = vmatpush1.msra.mxu0 %v916_v33  ;;  %v4439_v15 = vsel %vm451_vm0, %v564_v13, 0.0 }
  0xbe   : > { %v567_v50 = vsub.f32 %v4141_v16, %v535_v47  ;;  %v4418_v47 = vsel %vm451_vm0, %v561_v34, 0.0  ;;  %988 = vmatprep.subr.mxu0 %v915_v10  ;;  %v628_v11 = vmul.f32 %v4439_v15, %v4439_v15 }
  0xbf   : > { %676 = vadd.xlane.f32.xlu1 %v629_v7  ;;  %v493_v54 = vpop.xlane.xlu1 %492  ;;  %660 = vadd.xlane.f32.xlu0 %v621_v43  ;;  %v487_v43 = vpop.xlane.xlu0 %486 }
  0xc0   : > { %v537_v60 = vmul.f32 0.010416667, %v493_v54  ;;  %v4373_v16 = vsel %vm451_vm0, %v567_v50, 0.0  ;;  %989 = vmatpush1.msra.mxu0 %v914_v9  ;;  %v625_v50 = vmul.f32 %v4418_v47, %v4418_v47  ;;  %v534_v54 = vmul.f32 0.010416667, %v487_v43 }
  0xc1   : > { %v631_v6 = vmul.f32 %v4373_v16, %v4373_v16 }
  0xc2   : > { %v569_v0 = vsub.f32 %v4149_v18, %v537_v60  ;;  %v626_v60 = vmul.f32 %v4430_v53, %v4430_v53 }
  0xc3   : > { %680 = vadd.xlane.f32.xlu1 %v631_v6  ;;  %v495_v1 = vpop.xlane.xlu1 %494  ;;  %662 = vadd.xlane.f32.xlu0 %v622_v56  ;;  %v566_v6 = vsub.f32 %v4144_v17, %v534_v54 }
  0xc4   : > { %v4397_v18 = vsel %vm451_vm0, %v569_v0, 0.0 }
  0xc5   : > { %v633_v38 = vmul.f32 %v4397_v18, %v4397_v18  ;;  %v4451_v17 = vsel %vm451_vm0, %v566_v6, 0.0 }
  0xc7   : > { %684 = vadd.xlane.f32.xlu1 %v633_v38  ;;  %v497_v4 = vpop.xlane.xlu1 %496  ;;  %664 = vadd.xlane.f32.xlu0 %v623_v3  ;;  %v538_v3 = vmul.f32 0.010416667, %v495_v1  ;;  %v630_v38 = vmul.f32 %v4451_v17, %v4451_v17 }
  0xc8   : > { %v539_v44 = vmul.f32 0.010416667, %v497_v4 }
  0xc9   : > { %v570_v1 = vsub.f32 %v4157_v20, %v538_v3 }
  0xca   : > { %v571_v7 = vsub.f32 %v4161_v21, %v539_v44  ;;  %v491_v21 = vpop.xlane.xlu0 %490 }
  0xcb   : > { %v499_v49 = vpop.xlane.xlu1 %498  ;;  %666 = vadd.xlane.f32.xlu0 %v624_v42  ;;  %v536_v62 = vmul.f32 0.010416667, %v491_v21  ;;  %v4472_v20 = vsel %vm451_vm0, %v570_v1, 0.0 }
  0xcc   : > { %v4425_v51 = vsel %vm451_vm0, %v571_v7, 0.0  ;;  %v540_v10 = vmul.f32 0.010416667, %v499_v49  ;;  %v634_v49 = vmul.f32 %v4472_v20, %v4472_v20 }
  0xcd   : > { %v635_v56 = vmul.f32 %v4425_v51, %v4425_v51  ;;  %v568_v34 = vsub.f32 %v4152_v19, %v536_v62 }
  0xce   : > { %v572_v44 = vsub.f32 %v4165_v22, %v540_v10 }
  0xcf   : > { %688 = vadd.xlane.f32.xlu1 %v635_v56  ;;  %v501_v57 = vpop.xlane.xlu1 %500  ;;  %668 = vadd.xlane.f32.xlu0 %v625_v50  ;;  %v4460_v19 = vsel %vm451_vm0, %v568_v34, 0.0 }
  0xd0   : > { %v541_v61 = vmul.f32 0.010416667, %v501_v57  ;;  %v632_v43 = vmul.f32 %v4460_v19, %v4460_v19  ;;  %v4481_v54 = vsel %vm451_vm0, %v572_v44, 0.0 }
  0xd1   : > { %v636_v57 = vmul.f32 %v4481_v54, %v4481_v54 }
  0xd2   : > { %v573_v63 = vsub.f32 %v4169_v23, %v541_v61 }
  0xd3   : > { %v503_v0 = vpop.xlane.xlu1 %502  ;;  %670 = vadd.xlane.f32.xlu0 %v626_v60 }
  0xd4   : > { %v4446_v33 = vsel %vm451_vm0, %v573_v63, 0.0  ;;  %v542_v46 = vmul.f32 0.010416667, %v503_v0 }
  0xd5   : > { %v637_v5 = vmul.f32 %v4446_v33, %v4446_v33 }
  0xd6   : > { %v574_v22 = vsub.f32 %v4173_v24, %v542_v46 }
  0xd7   : > { %692 = vadd.xlane.f32.xlu1 %v637_v5  ;;  %v505_v23 = vpop.xlane.xlu1 %504  ;;  %674 = vadd.xlane.f32.xlu0 %v628_v11 }
  0xd8   : > { %v543_v9 = vmul.f32 0.010416667, %v505_v23  ;;  %v4493_v24 = vsel %vm451_vm0, %v574_v22, 0.0 }
  0xd9   : > { %v638_v63 = vmul.f32 %v4493_v24, %v4493_v24 }
  0xda   : > { %v575_v4 = vsub.f32 %v4177_v25, %v543_v9 }
  0xdb   : > { %v507_v42 = vpop.xlane.xlu1 %506  ;;  %678 = vadd.xlane.f32.xlu0 %v630_v38 }
  0xdc   : > { %v4468_v8 = vsel %vm451_vm0, %v575_v4, 0.0  ;;  %v544_v50 = vmul.f32 0.010416667, %v507_v42 }
  0xdd   : > { %v639_v7 = vmul.f32 %v4468_v8, %v4468_v8 }
  0xde   : > { %v576_v60 = vsub.f32 %v4181_v26, %v544_v50 }
  0xdf   : > { %696 = vadd.xlane.f32.xlu1 %v639_v7  ;;  %v509_v25 = vpop.xlane.xlu1 %508  ;;  %682 = vadd.xlane.f32.xlu0 %v632_v43 }
  0xe0   : > { %v545_v13 = vmul.f32 0.010416667, %v509_v25  ;;  %v4502_v11 = vsel %vm451_vm0, %v576_v60, 0.0 }
  0xe1   : > { %v640_v5 = vmul.f32 %v4502_v11, %v4502_v11 }
  0xe2   : > { %v577_v56 = vsub.f32 %v4185_v27, %v545_v13 }
  0xe3   : > { %v511_v21 = vpop.xlane.xlu1 %510  ;;  %686 = vadd.xlane.f32.xlu0 %v634_v49 }
  0xe4   : > { %v546_v61 = vmul.f32 0.010416667, %v511_v21  ;;  %v4489_v6 = vsel %vm451_vm0, %v577_v56, 0.0 }
  0xe5   : > { %v641_v62 = vmul.f32 %v4489_v6, %v4489_v6 }
  0xe6   : > { %v578_v26 = vsub.f32 %v4189_v28, %v546_v61 }
  0xe7   : > { %700 = vadd.xlane.f32.xlu1 %v641_v62  ;;  %v513_v27 = vpop.xlane.xlu1 %512  ;;  %690 = vadd.xlane.f32.xlu0 %v636_v57 }
  0xe8   : > { %v547_v0 = vmul.f32 0.010416667, %v513_v27  ;;  %v4513_v28 = vsel %vm451_vm0, %v578_v26, 0.0  ;;  %v4536_v26 = vld [vmem:[%s6033_s1] ss:$0 sm:$0xff] }
  0xe9   : > { %v642_v9 = vmul.f32 %v4513_v28, %v4513_v28 }
  0xea   : > { %v579_v3 = vsub.f32 %v4193_v29, %v547_v0 }
  0xeb   : > { %v515_v34 = vpop.xlane.xlu1 %514  ;;  %694 = vadd.xlane.f32.xlu0 %v638_v63 }
  0xec   : > { %v548_v23 = vmul.f32 0.010416667, %v515_v34  ;;  %v4509_v38 = vsel %vm451_vm0, %v579_v3, 0.0 }
  0xed   : > { %v643_v1 = vmul.f32 %v4509_v38, %v4509_v38 }
  0xee   : > { %v580_v10 = vsub.f32 %v4197_v30, %v548_v23 }
  0xef   : > { %704 = vadd.xlane.f32.xlu1 %v643_v1  ;;  %v517_v29 = vpop.xlane.xlu1 %516  ;;  %698 = vadd.xlane.f32.xlu0 %v640_v5  ;;  %v4542_v5 = vld [vmem:[%s6034_s2] ss:$0 sm:$0xff] }
  0xf0   : > { %v549_v4 = vmul.f32 0.010416667, %v517_v29  ;;  %v4522_v42 = vsel %vm451_vm0, %v580_v10, 0.0  ;;  %v1550_v29 = vld [vmem:[%s6037_s5 + $0x78] sm:$0xff] }
  0xf1   : > { %v644_v44 = vmul.f32 %v4522_v42, %v4522_v42  ;;  %1575 = vmatpush1.msra.mxu1 %v1550_v29 }
  0xf2   : > { %v581_v43 = vsub.f32 %v4201_v31, %v549_v4  ;;  %1576 = vmatprep.subr.mxu1 %v3992_v37 }
  0xf3   : > { %702 = vadd.xlane.f32.xlu0 %v642_v9  ;;  %v1549_v9 = vld [vmem:[%s6037_s5 + $0x70] sm:$0xff] }
  0xf4   : > { %v4529_v30 = vsel %vm451_vm0, %v581_v43, 0.0  ;;  %1577 = vmatpush1.msra.mxu1 %v1549_v9 }
  0xf5   : > { %v645_v46 = vmul.f32 %v4529_v30, %v4529_v30  ;;  %1578 = vmatprep.subr.mxu1 %v3992_v37 }
  0xf7   : > { %708 = vadd.xlane.f32.xlu1 %v645_v46  ;;  %706 = vadd.xlane.f32.xlu0 %v644_v44  ;;  %v1548_v46 = vld [vmem:[%s6037_s5 + $0x68] sm:$0xff] }
  0xf8   : > { %1579 = vmatpush1.msra.mxu1 %v1548_v46 }
  0xf9   : > { %1580 = vmatprep.subr.mxu1 %v3992_v37 }
 0x12c   : > { %v647_v7 = vpop.xlane.xlu0 %646 }
 0x12d   : > { %v710_v25 = vmul.f32 0.010416667, %v647_v7 }
 0x12f   : > { %v742_v49 = vadd.f32 1e-05, %v710_v25 }
 0x130   : > { %v649_v22 = vpop.xlane.xlu0 %648 }
 0x131   : > { %3536 = vrsqrt.f32 %v742_v49  ;;  %v711_v50 = vmul.f32 0.010416667, %v649_v22 }
 0x133   : > { %v743_v31 = vadd.f32 1e-05, %v711_v50 }
 0x134   : > { %v651_v13 = vpop.xlane.xlu0 %650 }
 0x135   : > { %3538 = vrsqrt.f32 %v743_v31  ;;  %v712_v56 = vmul.f32 0.010416667, %v651_v13 }
 0x137   : > { %v744_v21 = vadd.f32 1e-05, %v712_v56  ;;  %v1546_v56 = vld [vmem:[%s6037_s5 + $0x58] sm:$0xff] }
 0x138   : > { %v653_v57 = vpop.xlane.xlu0 %652 }
 0x139   : > { %3540 = vrsqrt.f32 %v744_v21  ;;  %v713_v60 = vmul.f32 0.010416667, %v653_v57 }
 0x13b   : > { %v745_v61 = vadd.f32 1e-05, %v713_v60 }
 0x13c   : > { %v655_v62 = vpop.xlane.xlu0 %654 }
 0x13d   : > { %3542 = vrsqrt.f32 %v745_v61  ;;  %v714_v27 = vmul.f32 0.010416667, %v655_v62 }
 0x13e   : > { %v3537_v63 = vpop.eup %3536 }
 0x13f   : > { %v746_v0 = vadd.f32 1e-05, %v714_v27  ;;  %v806_v3 = vmul.f32 %v3537_v63, %v4236_v52 }
 0x140   : > { %v657_v34 = vpop.xlane.xlu0 %656 }
 0x141   : > { %3544 = vrsqrt.f32 %v746_v0  ;;  %v715_v23 = vmul.f32 0.010416667, %v657_v34  ;;  %v844_v1 = vmul.f32 %v4536_v26, %v806_v3  ;;  %v1544_v0 = vld [vmem:[%s6037_s5 + $0x48] sm:$0xff] }
 0x142   : > { %v3539_v10 = vpop.eup %3538 }
 0x143   : > { %v747_v52 = vadd.f32 1e-05, %v715_v23  ;;  %v882_v4 = vadd.f32 %v4542_v5, %v844_v1  ;;  %v807_v43 = vmul.f32 %v3539_v10, %v4244_v58  ;;  %v1547_v58 = vld [vmem:[%s6037_s5 + $0x60] sm:$0xff] }
 0x144   : > { %v659_v44 = vpop.xlane.xlu0 %658  ;;  %1581 = vmatpush1.msra.mxu1 %v1547_v58  ;;  %v1540_v58 = vld [vmem:[%s6037_s5 + $0x28] sm:$0xff] }
 0x145   : > { %3546 = vrsqrt.f32 %v747_v52  ;;  %v716_v7 = vmul.f32 0.010416667, %v659_v44  ;;  %1023 = vmatmul.mubr.f32.vlgmr.msra.gmra.mxu0 %v882_v4  ;;  %v845_v25 = vmul.f32 %v4536_v26, %v807_v43  ;;  %1582 = vmatprep.subr.mxu1 %v3992_v37  ;;  %v1542_v52 = vld [vmem:[%s6037_s5 + $0x38] sm:$0xff] }
 0x146   : > { %v3541_v49 = vpop.eup %3540  ;;  %1028 = vmatprep.mubr.f32.mxu0 %v3992_v37  ;;  %1583 = vmatpush1.msra.mxu1 %v1546_v56 }
 0x147   : > { %v748_v22 = vadd.f32 1e-05, %v716_v7  ;;  %v883_v50 = vadd.f32 %v4542_v5, %v845_v25  ;;  %v808_v31 = vmul.f32 %v3541_v49, %v4248_v59  ;;  %v1545_v59 = vld [vmem:[%s6037_s5 + $0x50] sm:$0xff]  ;;  %1584 = vmatprep.subr.mxu1 %v3992_v37 }
 0x148   : > { %v661_v13 = vpop.xlane.xlu0 %660  ;;  %1585 = vmatpush1.msra.mxu1 %v1545_v59 }
 0x149   : > { %v717_v21 = vmul.f32 0.010416667, %v661_v13  ;;  %1029 = vmatmul.mubr.f32.gmra.mxu0 %v883_v50  ;;  %v846_v57 = vmul.f32 %v4536_v26, %v808_v31  ;;  %3548 = vrsqrt.f32 %v748_v22  ;;  %1586 = vmatprep.subr.mxu1 %v3992_v37  ;;  %v673_v22 = vpop.xlane.xlu1 %672 }
 0x14a   : > { %v3543_v60 = vpop.eup %3542  ;;  %1034 = vmatprep.mubr.f32.mxu0 %v3992_v37  ;;  %1587 = vmatpush1.msra.mxu1 %v1544_v0 }
 0x14b   : > { %v749_v61 = vadd.f32 1e-05, %v717_v21  ;;  %v884_v62 = vadd.f32 %v4542_v5, %v846_v57  ;;  %v809_v27 = vmul.f32 %v3543_v60, %v4257_v2  ;;  %v1543_v2 = vld [vmem:[%s6037_s5 + $0x40] sm:$0xff]  ;;  %1588 = vmatprep.subr.mxu1 %v3992_v37  ;;  %v723_v57 = vmul.f32 0.010416667, %v673_v22 }
 0x14c   : > { %v663_v63 = vpop.xlane.xlu0 %662  ;;  %1589 = vmatpush1.msra.mxu1 %v1543_v2 }
 0x14d   : > { %v718_v3 = vmul.f32 0.010416667, %v663_v63  ;;  %1035 = vmatmul.mubr.f32.gmra.mxu0 %v884_v62  ;;  %v847_v34 = vmul.f32 %v4536_v26, %v809_v27  ;;  %3550 = vrsqrt.f32 %v749_v61  ;;  %1590 = vmatprep.subr.mxu1 %v3992_v37  ;;  %v1538_v61 = vld [vmem:[%s6037_s5 + $0x18] sm:$0xff] }
 0x14e   : > { %v3545_v23 = vpop.eup %3544  ;;  %1040 = vmatprep.mubr.f32.mxu0 %v3992_v37  ;;  %1591 = vmatpush1.msra.mxu1 %v1542_v52  ;;  %v1535_v52 = vld [vmem:[%s6037_s5] sm:$0xff] }
 0x14f   : > { %v750_v1 = vadd.f32 1e-05, %v718_v3  ;;  %v885_v10 = vadd.f32 %v4542_v5, %v847_v34  ;;  %v810_v29 = vmul.f32 %v3545_v23, %v4264_v35  ;;  %v1541_v35 = vld [vmem:[%s6037_s5 + $0x30] sm:$0xff]  ;;  %1592 = vmatprep.subr.mxu1 %v3992_v37  ;;  %v755_v3 = vadd.f32 1e-05, %v723_v57  ;;  %v677_v34 = vpop.xlane.xlu1 %676 }
 0x150   : > { %v665_v9 = vpop.xlane.xlu0 %664  ;;  %1593 = vmatpush1.msra.mxu1 %v1541_v35 }
 0x151   : > { %v719_v4 = vmul.f32 0.010416667, %v665_v9  ;;  %1041 = vmatmul.mubr.f32.gmra.mxu0 %v885_v10  ;;  %v848_v43 = vmul.f32 %v4536_v26, %v810_v29  ;;  %3552 = vrsqrt.f32 %v750_v1  ;;  %1594 = vmatprep.subr.mxu1 %v3992_v37  ;;  %v1536_v10 = vld [vmem:[%s6037_s5 + $0x8] sm:$0xff] }
 0x152   : > { %v3547_v44 = vpop.eup %3546  ;;  %1046 = vmatprep.mubr.f32.mxu0 %v3992_v37  ;;  %1595 = vmatpush1.msra.mxu1 %v1540_v58  ;;  %v1565_v58 = vld [vmem:[%s6037_s5 + $0xf0] sm:$0xff] }
 0x153   : > { %v751_v46 = vadd.f32 1e-05, %v719_v4  ;;  %v886_v7 = vadd.f32 %v4542_v5, %v848_v43  ;;  %v811_v25 = vmul.f32 %v3547_v44, %v4285_v45  ;;  %v1539_v45 = vld [vmem:[%s6037_s5 + $0x20] sm:$0xff]  ;;  %1596 = vmatprep.subr.mxu1 %v3992_v37 }
 0x154   : > { %v667_v49 = vpop.xlane.xlu0 %666  ;;  %1597 = vmatpush1.msra.mxu1 %v1539_v45 }
 0x155   : > { %v720_v50 = vmul.f32 0.010416667, %v667_v49  ;;  %1047 = vmatmul.mubr.f32.gmra.mxu0 %v886_v7  ;;  %v849_v31 = vmul.f32 %v4536_v26, %v811_v25  ;;  %3554 = vrsqrt.f32 %v751_v46  ;;  %1598 = vmatprep.subr.mxu1 %v3992_v37  ;;  %v1566_v7 = vld [vmem:[%s6037_s5 + $0xf8] sm:$0xff] }
 0x156   : > { %1052 = vmatprep.mubr.f32.mxu0 %v3992_v37  ;;  %v3549_v13 = vpop.eup %3548  ;;  %1599 = vmatpush1.msra.mxu1 %v1538_v61 }
 0x157   : > { %v752_v56 = vadd.f32 1e-05, %v720_v50  ;;  %v887_v21 = vadd.f32 %v4542_v5, %v849_v31  ;;  %v812_v59 = vmul.f32 %v3549_v13, %v4304_v55  ;;  %v1537_v55 = vld [vmem:[%s6037_s5 + $0x10] sm:$0xff]  ;;  %1600 = vmatprep.subr.mxu1 %v3992_v37  ;;  %v681_v31 = vpop.xlane.xlu1 %680 }
 0x158   : > { %v669_v60 = vpop.xlane.xlu0 %668  ;;  %1601 = vmatpush1.msra.mxu1 %v1537_v55  ;;  %v727_v61 = vmul.f32 0.010416667, %v681_v31 }
 0x159   : > { %3556 = vrsqrt.f32 %v752_v56  ;;  %v721_v62 = vmul.f32 0.010416667, %v669_v60  ;;  %1053 = vmatmul.mubr.f32.gmra.mxu0 %v887_v21  ;;  %v850_v27 = vmul.f32 %v4536_v26, %v812_v59  ;;  %1602 = vmatprep.subr.mxu1 %v3992_v37  ;;  %v1564_v21 = vld [vmem:[%s6037_s5 + $0xe8] sm:$0xff] }
 0x15a   : > { %1058 = vmatprep.mubr.f32.mxu0 %v3992_v37  ;;  %v3551_v63 = vpop.eup %3550  ;;  %1603 = vmatpush1.msra.mxu1 %v1536_v10 }
 0x15b   : > { %v753_v0 = vadd.f32 1e-05, %v721_v62  ;;  %v888_v2 = vadd.f32 %v4542_v5, %v850_v27  ;;  %v813_v1 = vmul.f32 %v3551_v63, %v4328_v32  ;;  %v725_v32 = vmul.f32 0.010416667, %v677_v34  ;;  %1604 = vmatprep.subr.mxu1 %v3992_v37 }
 0x15c   : > { %v671_v23 = vpop.xlane.xlu0 %670  ;;  %1605 = vmatpush1.msra.mxu1 %v1535_v52 }
 0x15d   : > { %v722_v29 = vmul.f32 0.010416667, %v671_v23  ;;  %3558 = vrsqrt.f32 %v753_v0  ;;  %1059 = vmatmul.mubr.f32.gmra.mxu0 %v888_v2  ;;  %v851_v9 = vmul.f32 %v4536_v26, %v813_v1  ;;  %1606 = vmatprep.subr.mxu1 %v3992_v37  ;;  %v685_v23 = vpop.xlane.xlu1 %684 }
 0x15e   : > { %v3553_v4 = vpop.eup %3552  ;;  %1064 = vmatprep.mubr.f32.mxu0 %v3992_v37  ;;  %3560 = vrsqrt.f32 %v755_v3  ;;  %1607 = vmatpush2.msra.mxu1 %v1566_v7  ;;  %v759_v3 = vadd.f32 1e-05, %v727_v61 }
 0x15f   : > { %v754_v43 = vadd.f32 1e-05, %v722_v29  ;;  %v889_v35 = vadd.f32 %v4542_v5, %v851_v9  ;;  %v814_v46 = vmul.f32 %v3553_v4, %v4354_v48  ;;  %v757_v48 = vadd.f32 1e-05, %v725_v32  ;;  %1608 = vmatprep.subr.mxu1 %v3992_v37 }
 0x160   : > { %v675_v44 = vpop.xlane.xlu0 %674  ;;  %1609 = vmatpush2.msra.mxu1 %v1565_v58  ;;  %v729_v9 = vmul.f32 0.010416667, %v685_v23 }
 0x161   : > { %3562 = vrsqrt.f32 %v754_v43  ;;  %v724_v25 = vmul.f32 0.010416667, %v675_v44  ;;  %1065 = vmatmul.mubr.f32.gmra.mxu0 %v889_v35  ;;  %v852_v49 = vmul.f32 %v4536_v26, %v814_v46  ;;  %1610 = vmatprep.subr.mxu1 %v3992_v37 }
 0x162   : > { %v3555_v22 = vpop.eup %3554  ;;  %1070 = vmatprep.mubr.f32.mxu0 %v3992_v37  ;;  %1611 = vmatpush2.msra.mxu1 %v1564_v21  ;;  %v761_v46 = vadd.f32 1e-05, %v729_v9 }
 0x163   : > { %v756_v50 = vadd.f32 1e-05, %v724_v25  ;;  %v890_v13 = vadd.f32 %v4542_v5, %v852_v49  ;;  %v815_v56 = vmul.f32 %v3555_v22, %v4378_v39  ;;  %1612 = vmatprep.subr.mxu1 %v3992_v37  ;;  %v689_v49 = vpop.xlane.xlu1 %688 }
 0x164   : > { %v679_v45 = vpop.xlane.xlu0 %678 }
 0x165   : > { %v726_v57 = vmul.f32 0.010416667, %v679_v45  ;;  %3564 = vrsqrt.f32 %v756_v50  ;;  %1071 = vmatmul.mubr.f32.gmra.mxu0 %v890_v13  ;;  %v853_v59 = vmul.f32 %v4536_v26, %v815_v56 }
 0x166   : > { %v3557_v60 = vpop.eup %3556  ;;  %3566 = vrsqrt.f32 %v757_v48  ;;  %1076 = vmatprep.mubr.f32.mxu0 %v3992_v37 }
 0x167   : > { %v816_v39 = vmul.f32 %v3557_v60, %v4401_v36  ;;  %v758_v62 = vadd.f32 1e-05, %v726_v57  ;;  %v891_v27 = vadd.f32 %v4542_v5, %v853_v59  ;;  %v693_v60 = vpop.xlane.xlu1 %692 }
 0x168   : > { %v683_v55 = vpop.xlane.xlu0 %682 }
 0x169   : > { %v854_v63 = vmul.f32 %v4536_v26, %v816_v39  ;;  %1077 = vmatmul.mubr.f32.gmra.mxu0 %v891_v27  ;;  %3568 = vrsqrt.f32 %v758_v62  ;;  %v728_v2 = vmul.f32 0.010416667, %v683_v55  ;;  %v733_v39 = vmul.f32 0.010416667, %v693_v60 }
 0x16a   : > { %v3559_v0 = vpop.eup %3558  ;;  %1082 = vmatprep.mubr.f32.mxu0 %v3992_v37  ;;  %3570 = vrsqrt.f32 %v759_v3 }
 0x16b   : > { %v892_v34 = vadd.f32 %v4542_v5, %v854_v63  ;;  %v817_v36 = vmul.f32 %v3559_v0, %v4418_v47  ;;  %v3561_v1 = vpop.eup %3560  ;;  %v760_v4 = vadd.f32 1e-05, %v728_v2  ;;  %v697_v2 = vpop.xlane.xlu1 %696 }
 0x16c   : > { %v819_v43 = vmul.f32 %v3561_v1, %v4323_v12  ;;  %v687_v44 = vpop.xlane.xlu0 %686  ;;  %v731_v12 = vmul.f32 0.010416667, %v689_v49 }
 0x16d   : > { %1083 = vmatmul.mubr.f32.gmra.mxu0 %v892_v34  ;;  %v855_v29 = vmul.f32 %v4536_v26, %v817_v36  ;;  %3572 = vrsqrt.f32 %v760_v4  ;;  %v730_v58 = vmul.f32 0.010416667, %v687_v44  ;;  %v765_v34 = vadd.f32 1e-05, %v733_v39  ;;  %v1556_v39 = vld [vmem:[%s6037_s5 + $0xa8] sm:$0xff] }
 0x16e   : > { %v3563_v10 = vpop.eup %3562  ;;  %1088 = vmatprep.mubr.f32.mxu0 %v3992_v37  ;;  %3574 = vrsqrt.f32 %v761_v46  ;;  %v763_v21 = vadd.f32 1e-05, %v731_v12 }
 0x16f   : > { %v818_v52 = vmul.f32 %v3563_v10, %v4430_v53  ;;  %v893_v32 = vadd.f32 %v4542_v5, %v855_v29  ;;  %v857_v53 = vmul.f32 %v4536_v26, %v819_v43  ;;  %v762_v50 = vadd.f32 1e-05, %v730_v58  ;;  %v1563_v10 = vld [vmem:[%s6037_s5 + $0xe0] sm:$0xff] }
 0x170   : > { %v691_v56 = vpop.xlane.xlu0 %690  ;;  %v735_v29 = vmul.f32 0.010416667, %v697_v2  ;;  %1613 = vmatpush2.msra.mxu1 %v1563_v10 }
 0x171   : > { %v856_v35 = vmul.f32 %v4536_v26, %v818_v52  ;;  %1089 = vmatmul.mubr.f32.gmra.mxu0 %v893_v32  ;;  %v895_v31 = vadd.f32 %v4542_v5, %v857_v53  ;;  %3576 = vrsqrt.f32 %v762_v50  ;;  %v732_v59 = vmul.f32 0.010416667, %v691_v56  ;;  %1614 = vmatprep.subr.mxu1 %v3992_v37  ;;  %v1560_v53 = vld [vmem:[%s6037_s5 + $0xc8] sm:$0xff] }
 0x172   : > { %v3565_v47 = vpop.eup %3564  ;;  %1094 = vmatprep.mubr.f32.mxu0 %v3992_v37  ;;  %3578 = vrsqrt.f32 %v763_v21 }
 0x173   : > { %v894_v7 = vadd.f32 %v4542_v5, %v856_v35  ;;  %v3567_v25 = vpop.eup %3566  ;;  %v820_v22 = vmul.f32 %v3565_v47, %v4439_v15  ;;  %v764_v27 = vadd.f32 1e-05, %v732_v59  ;;  %v767_v35 = vadd.f32 1e-05, %v735_v29  ;;  %v1552_v29 = vld [vmem:[%s6037_s5 + $0x88] sm:$0xff] }
 0x174   : > { %v821_v48 = vmul.f32 %v3567_v25, %v4350_v14  ;;  %v695_v3 = vpop.xlane.xlu0 %694 }
 0x175   : > { %1095 = vmatmul.mubr.f32.gmra.mxu0 %v894_v7  ;;  %v858_v45 = vmul.f32 %v4536_v26, %v820_v22  ;;  %3580 = vrsqrt.f32 %v764_v27  ;;  %v734_v36 = vmul.f32 0.010416667, %v695_v3  ;;  %v701_v7 = vpop.xlane.xlu1 %700  ;;  %v1559_v22 = vld [vmem:[%s6037_s5 + $0xc0] sm:$0xff]  ;;  %v1554_v3 = vld [vmem:[%s6037_s5 + $0x98] sm:$0xff] }
 0x176   : > { %1100 = vmatprep.mubr.f32.mxu0 %v3992_v37  ;;  %v3569_v13 = vpop.eup %3568  ;;  %v859_v15 = vmul.f32 %v4536_v26, %v821_v48  ;;  %3582 = vrsqrt.f32 %v765_v34  ;;  %v737_v12 = vmul.f32 0.010416667, %v701_v7 }
 0x177   : > { %v3571_v57 = vpop.eup %3570  ;;  %v896_v61 = vadd.f32 %v4542_v5, %v858_v45  ;;  %v822_v14 = vmul.f32 %v3569_v13, %v4451_v17  ;;  %v766_v52 = vadd.f32 1e-05, %v734_v36  ;;  %v1558_v45 = vld [vmem:[%s6037_s5 + $0xb8] sm:$0xff] }
 0x178   : > { %v823_v62 = vmul.f32 %v3571_v57, %v4373_v16  ;;  %v897_v55 = vadd.f32 %v4542_v5, %v859_v15  ;;  %v699_v44 = vpop.xlane.xlu0 %698  ;;  %v769_v21 = vadd.f32 1e-05, %v737_v12 }
 0x179   : > { %1101 = vmatmul.mubr.f32.gmra.mxu0 %v895_v31  ;;  %v860_v63 = vmul.f32 %v4536_v26, %v822_v14  ;;  %3584 = vrsqrt.f32 %v766_v52  ;;  %v736_v25 = vmul.f32 0.010416667, %v699_v44  ;;  %v705_v60 = vpop.xlane.xlu1 %704  ;;  %v1551_v52 = vld [vmem:[%s6037_s5 + $0x80] sm:$0xff] }
 0x17a   : > { %1106 = vmatprep.mubr.f32.mxu0 %v3992_v37  ;;  %v3573_v0 = vpop.eup %3572  ;;  %v861_v17 = vmul.f32 %v4536_v26, %v823_v62  ;;  %3586 = vrsqrt.f32 %v767_v35  ;;  %v1555_v62 = vld [vmem:[%s6037_s5 + $0xa0] sm:$0xff]  ;;  %v739_v27 = vmul.f32 0.010416667, %v705_v60  ;;  %v949_v60 = vshrl.u32 %v449_v40, 7 }
 0x17b   : > { %v3575_v23 = vpop.eup %3574  ;;  %v898_v1 = vadd.f32 %v4542_v5, %v860_v63  ;;  %v824_v16 = vmul.f32 %v3573_v0, %v4460_v19  ;;  %v1562_v19 = vld [vmem:[%s6037_s5 + $0xd8] sm:$0xff]  ;;  %v768_v48 = vadd.f32 1e-05, %v736_v25 }
 0x17c   : > { %v825_v9 = vmul.f32 %v3575_v23, %v4397_v18  ;;  %v899_v4 = vadd.f32 %v4542_v5, %v861_v17  ;;  %1615 = vmatpush2.msra.mxu1 %v1562_v19  ;;  %v1561_v18 = vld [vmem:[%s6037_s5 + $0xd0] sm:$0xff]  ;;  %v703_v56 = vpop.xlane.xlu0 %702  ;;  %v771_v23 = vadd.f32 1e-05, %v739_v27 }
 0x17d   : > { %1107 = vmatmul.mubr.f32.gmra.mxu0 %v896_v61  ;;  %v862_v32 = vmul.f32 %v4536_v26, %v824_v16  ;;  %1616 = vmatprep.subr.mxu1 %v3992_v37  ;;  %3588 = vrsqrt.f32 %v768_v48  ;;  %v738_v59 = vmul.f32 0.010416667, %v703_v56 }
 0x17e   : > { %1112 = vmatprep.mubr.f32.mxu0 %v3992_v37  ;;  %v3577_v43 = vpop.eup %3576  ;;  %v863_v47 = vmul.f32 %v4536_v26, %v825_v9  ;;  %1617 = vmatpush2.msra.mxu1 %v1561_v18  ;;  %3590 = vrsqrt.f32 %v769_v21 }
 0x17f   : > { %v3579_v46 = vpop.eup %3578  ;;  %v900_v49 = vadd.f32 %v4542_v5, %v862_v32  ;;  %v826_v58 = vmul.f32 %v3577_v43, %v4472_v20  ;;  %1618 = vmatprep.subr.mxu1 %v3992_v37 }
 0x180   : > { %1619 = vmatpush2.msra.mxu1 %v1560_v53  ;;  %v827_v20 = vmul.f32 %v3579_v46, %v4425_v51  ;;  %v901_v50 = vadd.f32 %v4542_v5, %v863_v47  ;;  %v1557_v51 = vld [vmem:[%s6037_s5 + $0xb0] sm:$0xff]  ;;  %v707_v17 = vpop.xlane.xlu0 %706  ;;  %v709_v9 = vpop.xlane.xlu1 %708 }
 0x181   : > { %1113 = vmatmul.mubr.f32.gmra.mxu0 %v897_v55  ;;  %1620 = vmatprep.subr.mxu1 %v3992_v37  ;;  %v864_v31 = vmul.f32 %v4536_v26, %v826_v58  ;;  %v741_v32 = vmul.f32 0.010416667, %v709_v9 }
 0x182   : > { %1118 = vmatprep.mubr.f32.mxu0 %v3992_v37  ;;  %1621 = vmatpush2.msra.mxu1 %v1559_v22  ;;  %v3581_v13 = vpop.eup %3580  ;;  %v865_v15 = vmul.f32 %v4536_v26, %v827_v20 }
 0x183   : > { %1622 = vmatprep.subr.mxu1 %v3992_v37  ;;  %v3583_v57 = vpop.eup %3582  ;;  %v902_v61 = vadd.f32 %v4542_v5, %v864_v31  ;;  %v828_v14 = vmul.f32 %v3581_v13, %v4481_v54  ;;  %v770_v54 = vadd.f32 1e-05, %v738_v59  ;;  %v773_v35 = vadd.f32 1e-05, %v741_v32 }
 0x184   : > { %1623 = vmatpush2.msra.mxu1 %v1558_v45  ;;  %v829_v55 = vmul.f32 %v3583_v57, %v4446_v33  ;;  %v903_v63 = vadd.f32 %v4542_v5, %v865_v15  ;;  %v1553_v33 = vld [vmem:[%s6037_s5 + $0x90] sm:$0xff]  ;;  %v3920_v57 = vld [vmem:[%s4074_s27] sm:$0xff]  ;;  %v950_v59 = vsub.s32 0, %v949_v60 }
 0x185   : > { %1119 = vmatmul.mubr.f32.gmra.mxu0 %v898_v1  ;;  %1624 = vmatprep.subr.mxu1 %v3992_v37  ;;  %v866_v0 = vmul.f32 %v4536_v26, %v828_v14  ;;  %3592 = vrsqrt.f32 %v770_v54  ;;  %v740_v1 = vmul.f32 0.010416667, %v707_v17 }
 0x186   : > { %1124 = vmatprep.mubr.f32.mxu0 %v3992_v37  ;;  %1625 = vmatpush2.msra.mxu1 %v1557_v51  ;;  %v3585_v34 = vpop.eup %3584  ;;  %v867_v2 = vmul.f32 %v4536_v26, %v829_v55  ;;  %3594 = vrsqrt.f32 %v771_v23 }
 0x187   : > { %1626 = vmatprep.subr.mxu1 %v3992_v37  ;;  %v3587_v36 = vpop.eup %3586  ;;  %v904_v16 = vadd.f32 %v4542_v5, %v866_v0  ;;  %v830_v10 = vmul.f32 %v3585_v34, %v4493_v24  ;;  %v772_v19 = vadd.f32 1e-05, %v740_v1 }
 0x188   : > { %1627 = vmatpush2.msra.mxu1 %v1556_v39  ;;  %v831_v24 = vmul.f32 %v3587_v36, %v4468_v8 }
 0x189   : > { %1125 = vmatmul.mubr.f32.gmra.mxu0 %v899_v4  ;;  %1628 = vmatprep.subr.mxu1 %v3992_v37  ;;  %v905_v4 = vadd.f32 %v4542_v5, %v867_v2  ;;  %v868_v43 = vmul.f32 %v4536_v26, %v830_v10  ;;  %3596 = vrsqrt.f32 %v772_v19 }
 0x18a   : > { %1130 = vmatprep.mubr.f32.mxu0 %v3992_v37  ;;  %1629 = vmatpush2.msra.mxu1 %v1555_v62  ;;  %v3589_v44 = vpop.eup %3588  ;;  %v869_v18 = vmul.f32 %v4536_v26, %v831_v24  ;;  %3598 = vrsqrt.f32 %v773_v35 }
 0x18b   : > { %1630 = vmatprep.subr.mxu1 %v3992_v37  ;;  %v906_v47 = vadd.f32 %v4542_v5, %v868_v43  ;;  %v832_v46 = vmul.f32 %v3589_v44, %v4502_v11  ;;  %v3591_v7 = vpop.eup %3590 }
 0x18c   : > { %1631 = vmatpush2.msra.mxu1 %v1554_v3  ;;  %v907_v8 = vadd.f32 %v4542_v5, %v869_v18 }
 0x18d   : > { %1131 = vmatmul.mubr.f32.gmra.mxu0 %v900_v49  ;;  %1632 = vmatprep.subr.mxu1 %v3992_v37  ;;  %v870_v25 = vmul.f32 %v4536_v26, %v832_v46  ;;  %v833_v49 = vmul.f32 %v3591_v7, %v4489_v6 }
 0x18e   : > { %1136 = vmatprep.mubr.f32.mxu0 %v3992_v37  ;;  %1633 = vmatpush2.msra.mxu1 %v1553_v33 }
 0x18f   : > { %1634 = vmatprep.subr.mxu1 %v3992_v37  ;;  %v908_v53 = vadd.f32 %v4542_v5, %v870_v25  ;;  %v871_v22 = vmul.f32 %v4536_v26, %v833_v49 }
 0x190   : > { %1635 = vmatpush2.msra.mxu1 %v1552_v29 }
 0x191   : > { %1137 = vmatmul.mubr.f32.gmra.mxu0 %v901_v50  ;;  %1636 = vmatprep.subr.mxu1 %v3992_v37  ;;  %v909_v20 = vadd.f32 %v4542_v5, %v871_v22 }
 0x192   : > { %1142 = vmatprep.mubr.f32.mxu0 %v3992_v37  ;;  %1637 = vmatpush2.msra.mxu1 %v1551_v52  ;;  %v3593_v58 = vpop.eup %3592 }
 0x193   : > { %v834_v11 = vmul.f32 %v3593_v58, %v4513_v28  ;;  %v3595_v12 = vpop.eup %3594 }
 0x194   : > { %v835_v6 = vmul.f32 %v3595_v12, %v4509_v38 }
 0x195   : > { %1143 = vmatmul.mubr.f32.gmra.mxu0 %v902_v61  ;;  %v872_v48 = vmul.f32 %v4536_v26, %v834_v11  ;;  %v954_v61 = vsub.s32 1, %v949_v60 }
 0x196   : > { %1148 = vmatprep.mubr.f32.mxu0 %v3992_v37  ;;  %v3597_v50 = vpop.eup %3596  ;;  %v873_v45 = vmul.f32 %v4536_v26, %v835_v6 }
 0x197   : > { %v910_v31 = vadd.f32 %v4542_v5, %v872_v48  ;;  %v836_v28 = vmul.f32 %v3597_v50, %v4522_v42  ;;  %v3599_v13 = vpop.eup %3598 }
 0x198   : > { %v911_v56 = vadd.f32 %v4542_v5, %v873_v45  ;;  %v837_v38 = vmul.f32 %v3599_v13, %v4529_v30  ;;  %v946_v30 = vld [vmem:[%s6036_s4] sm:$0x3] }
 0x199   : > { %1149 = vmatmul.mubr.f32.gmra.mxu0 %v903_v63  ;;  %v874_v51 = vmul.f32 %v4536_v26, %v836_v28  ;;  %v4802_v14 = vrot.slane %v946_v30, %v950_v59  ;;  %v4804_v39 = vrot.slane %v946_v30, %v954_v61 }
 0x19a   : > { %1154 = vmatprep.mubr.f32.mxu0 %v3992_v37  ;;  %v875_v15 = vmul.f32 %v4536_v26, %v837_v38 }
 0x19b   : > { %v912_v21 = vadd.f32 %v4542_v5, %v874_v51 }
 0x19c   : > { %v913_v42 = vadd.f32 %v4542_v5, %v875_v15 }
 0x19d   : > { %1155 = vmatmul.mubr.f32.gmra.mxu0 %v904_v16 }
 0x19e   : > { %1160 = vmatprep.mubr.f32.mxu0 %v3992_v37 }
 0x1a1   : > { %1161 = vmatmul.mubr.f32.gmra.mxu0 %v905_v4 }
 0x1a2   : > { %1166 = vmatprep.mubr.f32.mxu0 %v3992_v37 }
 0x1a5   : > { %1167 = vmatmul.mubr.f32.gmra.mxu0 %v906_v47 }
 0x1a6   : > { %1172 = vmatprep.mubr.f32.mxu0 %v3992_v37 }
 0x1a9   : > { %1173 = vmatmul.mubr.f32.gmra.mxu0 %v907_v8 }
 0x1aa   : > { %1178 = vmatprep.mubr.f32.mxu0 %v3992_v37 }
 0x1ad   : > { %1179 = vmatmul.mubr.f32.gmra.mxu0 %v908_v53 }
 0x1ae   : > { %1184 = vmatprep.mubr.f32.mxu0 %v3992_v37 }
 0x1b1   : > { %1185 = vmatmul.mubr.f32.gmra.mxu0 %v909_v20 }
 0x1b2   : > { %1190 = vmatprep.mubr.f32.mxu0 %v3992_v37 }
 0x1b5   : > { %1191 = vmatmul.mubr.f32.gmra.mxu0 %v910_v31 }
 0x1b6   : > { %1196 = vmatprep.mubr.f32.mxu0 %v3992_v37 }
 0x1b9   : > { %1197 = vmatmul.mubr.f32.gmra.mxu0 %v911_v56 }
 0x1ba   : > { %1202 = vmatprep.mubr.f32.mxu0 %v3992_v37 }
 0x1bd   : > { %1203 = vmatmul.mubr.f32.gmra.mxu0 %v912_v21 }
 0x1be   : > { %1208 = vmatprep.mubr.f32.mxu0 %v3992_v37 }
 0x1c1   : > { %1209 = vmatmul.mubr.f32.gmra.mxu0 %v913_v42 }
 0x1c2   : > { %3367 = vmatprep.mubr.f32.mxu0 %v3920_v57 }
 0x205   : > { %v1024_v26 = vpop.f32.mrf.mxu0 }
 0x206   : > { %v1025_v37 = vadd.f32 %v1024_v26, %v4802_v14 }
 0x207   : > { %v1026_v62 = vpop.f32.mrf.mxu0 }
 0x208   : > { %v1279_v5 = vmul.f32 0.70710677, %v1025_v37  ;;  %v1027_v27 = vadd.f32 %v1026_v62, %v4804_v39  ;;  %v1215_v49 = vmul.f32 0.5, %v1025_v37 }
 0x209   : > { %v1030_v55 = vpop.f32.mrf.mxu0 }
 0x20a   : > { %3600 = verf.f32 %v1279_v5  ;;  %v1280_v40 = vmul.f32 0.70710677, %v1027_v27  ;;  %v1031_v54 = vadd.f32 %v1030_v55, %v4802_v14  ;;  %v1216_v53 = vmul.f32 0.5, %v1027_v27 }
 0x20b   : > { %v1032_v63 = vpop.f32.mrf.mxu0 }
 0x20c   : > { %3602 = verf.f32 %v1280_v40  ;;  %v1281_v0 = vmul.f32 0.70710677, %v1031_v54  ;;  %v1033_v3 = vadd.f32 %v1032_v63, %v4804_v39  ;;  %v1217_v38 = vmul.f32 0.5, %v1031_v54 }
 0x20d   : > { %v1036_v34 = vpop.f32.mrf.mxu0 }
 0x20e   : > { %3604 = verf.f32 %v1281_v0  ;;  %v1282_v17 = vmul.f32 0.70710677, %v1033_v3  ;;  %v4811_v33 = vadd.f32 %v1036_v34, %v4802_v14  ;;  %v1218_v48 = vmul.f32 0.5, %v1033_v3 }
 0x20f   : > { %v1038_v23 = vpop.f32.mrf.mxu0 }
 0x210   : > { %3606 = verf.f32 %v1282_v17  ;;  %v1283_v2 = vmul.f32 0.70710677, %v4811_v33  ;;  %v1039_v36 = vadd.f32 %v1038_v23, %v4804_v39  ;;  %v1219_v55 = vmul.f32 0.5, %v4811_v33 }
 0x211   : > { %v1042_v1 = vpop.f32.mrf.mxu0 }
 0x212   : > { %3608 = verf.f32 %v1283_v2  ;;  %v1284_v16 = vmul.f32 0.70710677, %v1039_v36  ;;  %v4816_v10 = vadd.f32 %v1042_v1, %v4802_v14  ;;  %v1220_v59 = vmul.f32 0.5, %v1039_v36 }
 0x213   : > { %v1044_v29 = vpop.f32.mrf.mxu0 }
 0x214   : > { %3610 = verf.f32 %v1284_v16  ;;  %v1285_v9 = vmul.f32 0.70710677, %v4816_v10  ;;  %v1045_v52 = vadd.f32 %v1044_v29, %v4804_v39  ;;  %v1221_v29 = vmul.f32 0.5, %v4816_v10 }
 0x215   : > { %v1048_v4 = vpop.f32.mrf.mxu0 }
 0x216   : > { %3612 = verf.f32 %v1285_v9  ;;  %v1286_v24 = vmul.f32 0.70710677, %v1045_v52  ;;  %v4821_v32 = vadd.f32 %v1048_v4, %v4802_v14  ;;  %v1222_v34 = vmul.f32 0.5, %v1045_v52 }
 0x217   : > { %v3601_v19 = vpop.eup %3600  ;;  %v1050_v43 = vpop.f32.mrf.mxu0 }
 0x218   : > { %3614 = verf.f32 %v1286_v24  ;;  %v1287_v44 = vmul.f32 0.70710677, %v4821_v32  ;;  %v4825_v18 = vadd.f32 %v1050_v43, %v4804_v39  ;;  %v1407_v46 = vadd.f32 1.0, %v3601_v19 }
 0x219   : > { %v3603_v35 = vpop.eup %3602  ;;  %v1054_v47 = vpop.f32.mrf.mxu0 }
 0x21a   : > { %3616 = verf.f32 %v1287_v44  ;;  %v1288_v7 = vmul.f32 0.70710677, %v4825_v18  ;;  %v4829_v8 = vadd.f32 %v1054_v47, %v4802_v14  ;;  %v1408_v22 = vadd.f32 1.0, %v3603_v35 }
 0x21b   : > { %v3605_v25 = vpop.eup %3604  ;;  %v1056_v58 = vpop.f32.mrf.mxu0  ;;  %v1471_v50 = vmul.f32 %v1407_v46, %v1215_v49  ;;  %v1224_v43 = vmul.f32 0.5, %v4825_v18  ;;  %v1223_v49 = vmul.f32 0.5, %v4821_v32 }
 0x21c   : > { %3618 = verf.f32 %v1288_v7  ;;  %v1289_v11 = vmul.f32 0.70710677, %v4829_v8  ;;  %v4833_v12 = vadd.f32 %v1056_v58, %v4804_v39  ;;  %v1472_v6 = vmul.f32 %v1408_v22, %v1216_v53 }
 0x21d   : > { %v3607_v20 = vpop.eup %3606  ;;  %v1060_v45 = vpop.f32.mrf.mxu0  ;;  %v1409_v13 = vadd.f32 1.0, %v3605_v25 }
 0x21e   : > { %3620 = verf.f32 %v1289_v11  ;;  %v1290_v31 = vmul.f32 0.70710677, %v4833_v12  ;;  %v1410_v28 = vadd.f32 1.0, %v3607_v20  ;;  %v4837_v51 = vadd.f32 %v1060_v45, %v4802_v14  ;;  %1638 = vmatprep.mubr.f32.mxu1 %v1472_v6 }
 0x21f   : > { %v3609_v56 = vpop.eup %3608  ;;  %v1062_v21 = vpop.f32.mrf.mxu0  ;;  %1639 = vmatmul.mubr.f32.vlgmr.msra.gmra.mxu1 %v1471_v50  ;;  %v1473_v61 = vmul.f32 %v1409_v13, %v1217_v38  ;;  %v1226_v20 = vmul.f32 0.5, %v4833_v12  ;;  %v1225_v13 = vmul.f32 0.5, %v4829_v8 }
 0x220   : > { %3622 = verf.f32 %v1290_v31  ;;  %v1474_v15 = vmul.f32 %v1410_v28, %v1218_v48  ;;  %v1291_v57 = vmul.f32 0.70710677, %v4837_v51  ;;  %v4841_v60 = vadd.f32 %v1062_v21, %v4804_v39 }
 0x221   : > { %v3611_v42 = vpop.eup %3610  ;;  %v1066_v30 = vpop.f32.mrf.mxu0  ;;  %v1411_v37 = vadd.f32 1.0, %v3609_v56 }
 0x222   : > { %1643 = vmatprep.mubr.f32.mxu1 %v1474_v15  ;;  %v1412_v26 = vadd.f32 1.0, %v3611_v42  ;;  %3624 = verf.f32 %v1291_v57  ;;  %v1292_v5 = vmul.f32 0.70710677, %v4841_v60  ;;  %v4845_v27 = vadd.f32 %v1066_v30, %v4802_v14 }
 0x223   : > { %v3613_v62 = vpop.eup %3612  ;;  %v1068_v40 = vpop.f32.mrf.mxu0  ;;  %1644 = vmatmul.mubr.f32.gmra.mxu1 %v1473_v61  ;;  %v1475_v23 = vmul.f32 %v1411_v37, %v1219_v55  ;;  %v1228_v37 = vmul.f32 0.5, %v4841_v60 }
 0x224   : > { %v1476_v54 = vmul.f32 %v1412_v26, %v1220_v59  ;;  %3626 = verf.f32 %v1292_v5  ;;  %v1293_v0 = vmul.f32 0.70710677, %v4845_v27  ;;  %v4850_v3 = vadd.f32 %v1068_v40, %v4804_v39 }
 0x225   : > { %v3615_v63 = vpop.eup %3614  ;;  %v1072_v17 = vpop.f32.mrf.mxu0  ;;  %v1413_v36 = vadd.f32 1.0, %v3613_v62  ;;  %v1227_v26 = vmul.f32 0.5, %v4837_v51 }
 0x226   : > { %1648 = vmatprep.mubr.f32.mxu1 %v1476_v54  ;;  %v1414_v2 = vadd.f32 1.0, %v3615_v63  ;;  %3628 = verf.f32 %v1293_v0  ;;  %v1294_v33 = vmul.f32 0.70710677, %v4850_v3  ;;  %v4854_v16 = vadd.f32 %v1072_v17, %v4802_v14 }
 0x227   : > { %v3617_v1 = vpop.eup %3616  ;;  %v1074_v9 = vpop.f32.mrf.mxu0  ;;  %1649 = vmatmul.mubr.f32.gmra.mxu1 %v1475_v23  ;;  %v1477_v35 = vmul.f32 %v1413_v36, %v1221_v29 }
 0x228   : > { %v1478_v4 = vmul.f32 %v1414_v2, %v1222_v34  ;;  %3630 = verf.f32 %v1294_v33  ;;  %v1295_v52 = vmul.f32 0.70710677, %v4854_v16  ;;  %v4859_v19 = vadd.f32 %v1074_v9, %v4804_v39 }
 0x229   : > { %v3619_v24 = vpop.eup %3618  ;;  %v1078_v44 = vpop.f32.mrf.mxu0  ;;  %v1415_v46 = vadd.f32 1.0, %v3617_v1  ;;  %v1230_v2 = vmul.f32 0.5, %v4850_v3  ;;  %v1229_v33 = vmul.f32 0.5, %v4845_v27  ;;  %v1231_v27 = vmul.f32 0.5, %v4854_v16 }
 0x22a   : > { %1653 = vmatprep.mubr.f32.mxu1 %v1478_v4  ;;  %v1416_v47 = vadd.f32 1.0, %v3619_v24  ;;  %3632 = verf.f32 %v1295_v52  ;;  %v1296_v10 = vmul.f32 0.70710677, %v4859_v19  ;;  %v4864_v25 = vadd.f32 %v1078_v44, %v4802_v14 }
 0x22b   : > { %v3621_v7 = vpop.eup %3620  ;;  %v1080_v58 = vpop.f32.mrf.mxu0  ;;  %1654 = vmatmul.mubr.f32.gmra.mxu1 %v1477_v35  ;;  %v1479_v6 = vmul.f32 %v1415_v46, %v1223_v49  ;;  %v1232_v46 = vmul.f32 0.5, %v4859_v19 }
 0x22c   : > { %v1480_v53 = vmul.f32 %v1416_v47, %v1224_v43  ;;  %3634 = verf.f32 %v1296_v10  ;;  %v1297_v18 = vmul.f32 0.70710677, %v4864_v25  ;;  %v4869_v11 = vadd.f32 %v1080_v58, %v4804_v39 }
 0x22d   : > { %v3623_v22 = vpop.eup %3622  ;;  %v1084_v48 = vpop.f32.mrf.mxu0  ;;  %v1417_v31 = vadd.f32 1.0, %v3621_v7 }
 0x22e   : > { %1658 = vmatprep.mubr.f32.mxu1 %v1480_v53  ;;  %v1418_v50 = vadd.f32 1.0, %v3623_v22  ;;  %3636 = verf.f32 %v1297_v18  ;;  %v1298_v32 = vmul.f32 0.70710677, %v4869_v11  ;;  %v4874_v45 = vadd.f32 %v1084_v48, %v4802_v14 }
 0x22f   : > { %v3625_v28 = vpop.eup %3624  ;;  %v1086_v56 = vpop.f32.mrf.mxu0  ;;  %1659 = vmatmul.mubr.f32.gmra.mxu1 %v1479_v6  ;;  %v1481_v57 = vmul.f32 %v1417_v31, %v1225_v13 }
 0x230   : > { %v1482_v38 = vmul.f32 %v1418_v50, %v1226_v20  ;;  %3638 = verf.f32 %v1298_v32  ;;  %v1299_v12 = vmul.f32 0.70710677, %v4874_v45  ;;  %v4879_v21 = vadd.f32 %v1086_v56, %v4804_v39 }
 0x231   : > { %v3627_v15 = vpop.eup %3626  ;;  %v1090_v42 = vpop.f32.mrf.mxu0  ;;  %v1419_v59 = vadd.f32 1.0, %v3625_v28  ;;  %v1234_v50 = vmul.f32 0.5, %v4869_v11  ;;  %v1233_v28 = vmul.f32 0.5, %v4864_v25  ;;  %v1235_v25 = vmul.f32 0.5, %v4874_v45 }
 0x232   : > { %1663 = vmatprep.mubr.f32.mxu1 %v1482_v38  ;;  %3640 = verf.f32 %v1299_v12  ;;  %v1300_v30 = vmul.f32 0.70710677, %v4879_v21  ;;  %v4883_v61 = vadd.f32 %v1090_v42, %v4802_v14  ;;  %v1420_v5 = vadd.f32 1.0, %v3627_v15 }
 0x233   : > { %v3629_v8 = vpop.eup %3628  ;;  %v1092_v62 = vpop.f32.mrf.mxu0  ;;  %1664 = vmatmul.mubr.f32.gmra.mxu1 %v1481_v57  ;;  %v1483_v34 = vmul.f32 %v1419_v59, %v1227_v26 }
 0x234   : > { %3642 = verf.f32 %v1300_v30  ;;  %v1301_v55 = vmul.f32 0.70710677, %v4883_v61  ;;  %v4889_v40 = vadd.f32 %v1092_v62, %v4804_v39  ;;  %v1484_v0 = vmul.f32 %v1420_v5, %v1228_v37 }
 0x235   : > { %v3631_v54 = vpop.eup %3630  ;;  %v1096_v63 = vpop.f32.mrf.mxu0  ;;  %v1421_v60 = vadd.f32 1.0, %v3629_v8  ;;  %v1236_v8 = vmul.f32 0.5, %v4879_v21 }
 0x236   : > { %3644 = verf.f32 %v1301_v55  ;;  %v1302_v17 = vmul.f32 0.70710677, %v4889_v40  ;;  %v4893_v51 = vadd.f32 %v1096_v63, %v4802_v14  ;;  %1668 = vmatprep.mubr.f32.mxu1 %v1484_v0  ;;  %v1422_v1 = vadd.f32 1.0, %v3631_v54 }
 0x237   : > { %v3633_v23 = vpop.eup %3632  ;;  %v1098_v36 = vpop.f32.mrf.mxu0  ;;  %1669 = vmatmul.mubr.f32.gmra.mxu1 %v1483_v34  ;;  %v1485_v35 = vmul.f32 %v1421_v60, %v1229_v33  ;;  %v1238_v60 = vmul.f32 0.5, %v4889_v40 }
 0x238   : > { %3646 = verf.f32 %v1302_v17  ;;  %v1303_v29 = vmul.f32 0.70710677, %v4893_v51  ;;  %v4899_v9 = vadd.f32 %v1098_v36, %v4804_v39  ;;  %v1486_v52 = vmul.f32 %v1422_v1, %v1230_v2 }
 0x239   : > { %v3635_v4 = vpop.eup %3634  ;;  %v1102_v24 = vpop.f32.mrf.mxu0  ;;  %v1423_v43 = vadd.f32 1.0, %v3633_v23  ;;  %v1237_v36 = vmul.f32 0.5, %v4883_v61  ;;  %v1239_v61 = vmul.f32 0.5, %v4893_v51 }
 0x23a   : > { %3648 = verf.f32 %v1303_v29  ;;  %v1304_v44 = vmul.f32 0.70710677, %v4899_v9  ;;  %v4903_v3 = vadd.f32 %v1102_v24, %v4802_v14  ;;  %1673 = vmatprep.mubr.f32.mxu1 %v1486_v52  ;;  %v1424_v10 = vadd.f32 1.0, %v3635_v4 }
 0x23b   : > { %v3637_v47 = vpop.eup %3636  ;;  %v1104_v7 = vpop.f32.mrf.mxu0  ;;  %1674 = vmatmul.mubr.f32.gmra.mxu1 %v1485_v35  ;;  %v1487_v20 = vmul.f32 %v1423_v43, %v1231_v27 }
 0x23c   : > { %3650 = verf.f32 %v1304_v44  ;;  %v1305_v49 = vmul.f32 0.70710677, %v4903_v3  ;;  %v4909_v58 = vadd.f32 %v1104_v7, %v4804_v39  ;;  %v1488_v18 = vmul.f32 %v1424_v10, %v1232_v46 }
 0x23d   : > { %v3639_v53 = vpop.eup %3638  ;;  %v1108_v22 = vpop.f32.mrf.mxu0  ;;  %v1425_v19 = vadd.f32 1.0, %v3637_v47  ;;  %v1240_v47 = vmul.f32 0.5, %v4899_v9 }
 0x23e   : > { %3652 = verf.f32 %v1305_v49  ;;  %v1306_v48 = vmul.f32 0.70710677, %v4909_v58  ;;  %v4913_v16 = vadd.f32 %v1108_v22, %v4802_v14  ;;  %1678 = vmatprep.mubr.f32.mxu1 %v1488_v18  ;;  %v1426_v32 = vadd.f32 1.0, %v3639_v53 }
 0x23f   : > { %v3641_v6 = vpop.eup %3640  ;;  %v1110_v31 = vpop.f32.mrf.mxu0  ;;  %1679 = vmatmul.mubr.f32.gmra.mxu1 %v1487_v20  ;;  %v1489_v59 = vmul.f32 %v1425_v19, %v1233_v28  ;;  %v1242_v19 = vmul.f32 0.5, %v4909_v58 }
 0x240   : > { %3654 = verf.f32 %v1306_v48  ;;  %v1307_v13 = vmul.f32 0.70710677, %v4913_v16  ;;  %v4919_v56 = vadd.f32 %v1110_v31, %v4804_v39  ;;  %v1490_v15 = vmul.f32 %v1426_v32, %v1234_v50 }
 0x241   : > { %v3643_v38 = vpop.eup %3642  ;;  %v1114_v12 = vpop.f32.mrf.mxu0  ;;  %v1427_v42 = vadd.f32 1.0, %v3641_v6  ;;  %v1241_v31 = vmul.f32 0.5, %v4903_v3  ;;  %v1243_v3 = vmul.f32 0.5, %v4913_v16 }
 0x242   : > { %3656 = verf.f32 %v1307_v13  ;;  %v1308_v57 = vmul.f32 0.70710677, %v4919_v56  ;;  %v4923_v11 = vadd.f32 %v1114_v12, %v4802_v14  ;;  %1683 = vmatprep.mubr.f32.mxu1 %v1490_v15  ;;  %v1428_v37 = vadd.f32 1.0, %v3643_v38 }
 0x243   : > { %v3645_v30 = vpop.eup %3644  ;;  %v1116_v26 = vpop.f32.mrf.mxu0  ;;  %1684 = vmatmul.mubr.f32.gmra.mxu1 %v1489_v59  ;;  %v1491_v0 = vmul.f32 %v1427_v42, %v1235_v25 }
 0x244   : > { %3658 = verf.f32 %v1308_v57  ;;  %v1309_v62 = vmul.f32 0.70710677, %v4923_v11  ;;  %v4929_v5 = vadd.f32 %v1116_v26, %v4804_v39  ;;  %v1492_v63 = vmul.f32 %v1428_v37, %v1236_v8 }
 0x245   : > { %v3647_v55 = vpop.eup %3646  ;;  %v1120_v54 = vpop.f32.mrf.mxu0  ;;  %v1429_v21 = vadd.f32 1.0, %v3645_v30  ;;  %v1244_v30 = vmul.f32 0.5, %v4919_v56 }
 0x246   : > { %3660 = verf.f32 %v1309_v62  ;;  %v1310_v34 = vmul.f32 0.70710677, %v4929_v5  ;;  %v4933_v45 = vadd.f32 %v1120_v54, %v4802_v14  ;;  %1688 = vmatprep.mubr.f32.mxu1 %v1492_v63  ;;  %v1430_v2 = vadd.f32 1.0, %v3647_v55 }
 0x247   : > { %v3649_v17 = vpop.eup %3648  ;;  %v1122_v23 = vpop.f32.mrf.mxu0  ;;  %1689 = vmatmul.mubr.f32.gmra.mxu1 %v1491_v0  ;;  %v1493_v44 = vmul.f32 %v1429_v21, %v1237_v36  ;;  %v1246_v21 = vmul.f32 0.5, %v4929_v5 }
 0x248   : > { %3662 = verf.f32 %v1310_v34  ;;  %v1311_v1 = vmul.f32 0.70710677, %v4933_v45  ;;  %v4939_v33 = vadd.f32 %v1122_v23, %v4804_v39  ;;  %v1494_v24 = vmul.f32 %v1430_v2, %v1238_v60 }
 0x249   : > { %v3651_v29 = vpop.eup %3650  ;;  %v1126_v4 = vpop.f32.mrf.mxu0  ;;  %v1431_v52 = vadd.f32 1.0, %v3649_v17  ;;  %v1245_v23 = vmul.f32 0.5, %v4923_v11  ;;  %v1247_v11 = vmul.f32 0.5, %v4933_v45 }
 0x24a   : > { %3664 = verf.f32 %v1311_v1  ;;  %v1312_v43 = vmul.f32 0.70710677, %v4939_v33  ;;  %v4943_v40 = vadd.f32 %v1126_v4, %v4802_v14  ;;  %1693 = vmatprep.mubr.f32.mxu1 %v1494_v24  ;;  %v1432_v46 = vadd.f32 1.0, %v3651_v29 }
 0x24b   : > { %v3653_v35 = vpop.eup %3652  ;;  %v1128_v27 = vpop.f32.mrf.mxu0  ;;  %1694 = vmatmul.mubr.f32.gmra.mxu1 %v1493_v44  ;;  %v1495_v18 = vmul.f32 %v1431_v52, %v1239_v61 }
 0x24c   : > { %3666 = verf.f32 %v1312_v43  ;;  %v1313_v7 = vmul.f32 0.70710677, %v4943_v40  ;;  %v4949_v10 = vadd.f32 %v1128_v27, %v4804_v39  ;;  %v1496_v22 = vmul.f32 %v1432_v46, %v1240_v47 }
 0x24d   : > { %v3655_v49 = vpop.eup %3654  ;;  %v1132_v53 = vpop.f32.mrf.mxu0  ;;  %v1433_v9 = vadd.f32 1.0, %v3653_v35  ;;  %v1248_v35 = vmul.f32 0.5, %v4939_v33 }
 0x24e   : > { %3668 = verf.f32 %v1313_v7  ;;  %v1314_v20 = vmul.f32 0.70710677, %v4949_v10  ;;  %v4953_v51 = vadd.f32 %v1132_v53, %v4802_v14  ;;  %1698 = vmatprep.mubr.f32.mxu1 %v1496_v22  ;;  %v1434_v50 = vadd.f32 1.0, %v3655_v49 }
 0x24f   : > { %v3657_v48 = vpop.eup %3656  ;;  %v1134_v6 = vpop.f32.mrf.mxu0  ;;  %1699 = vmatmul.mubr.f32.gmra.mxu1 %v1495_v18  ;;  %v1497_v57 = vmul.f32 %v1433_v9, %v1241_v31  ;;  %v1250_v9 = vmul.f32 0.5, %v4949_v10 }
 0x250   : > { %3670 = verf.f32 %v1314_v20  ;;  %v1315_v32 = vmul.f32 0.70710677, %v4953_v51  ;;  %v4959_v28 = vadd.f32 %v1134_v6, %v4804_v39  ;;  %v1498_v12 = vmul.f32 %v1434_v50, %v1242_v19 }
 0x251   : > { %v3659_v13 = vpop.eup %3658  ;;  %v1138_v38 = vpop.f32.mrf.mxu0  ;;  %v1435_v15 = vadd.f32 1.0, %v3657_v48  ;;  %v1249_v6 = vmul.f32 0.5, %v4943_v40  ;;  %v1251_v40 = vmul.f32 0.5, %v4953_v51 }
 0x252   : > { %3672 = verf.f32 %v1315_v32  ;;  %v1316_v42 = vmul.f32 0.70710677, %v4959_v28  ;;  %v4963_v58 = vadd.f32 %v1138_v38, %v4802_v14  ;;  %1703 = vmatprep.mubr.f32.mxu1 %v1498_v12  ;;  %v1436_v8 = vadd.f32 1.0, %v3659_v13 }
 0x253   : > { %v3661_v59 = vpop.eup %3660  ;;  %v1140_v25 = vpop.f32.mrf.mxu0  ;;  %1704 = vmatmul.mubr.f32.gmra.mxu1 %v1497_v57  ;;  %v1499_v63 = vmul.f32 %v1435_v15, %v1243_v3 }
 0x254   : > { %3674 = verf.f32 %v1316_v42  ;;  %v1317_v26 = vmul.f32 0.70710677, %v4963_v58  ;;  %v4969_v37 = vadd.f32 %v1140_v25, %v4804_v39  ;;  %v1500_v54 = vmul.f32 %v1436_v8, %v1244_v30 }
 0x255   : > { %v3663_v62 = vpop.eup %3662  ;;  %v1144_v55 = vpop.f32.mrf.mxu0  ;;  %v1437_v56 = vadd.f32 1.0, %v3661_v59  ;;  %v1252_v59 = vmul.f32 0.5, %v4959_v28 }
 0x256   : > { %3676 = verf.f32 %v1317_v26  ;;  %v1318_v0 = vmul.f32 0.70710677, %v4969_v37  ;;  %v4973_v16 = vadd.f32 %v1144_v55, %v4802_v14  ;;  %1708 = vmatprep.mubr.f32.mxu1 %v1500_v54  ;;  %v1438_v60 = vadd.f32 1.0, %v3663_v62 }
 0x257   : > { %v3665_v34 = vpop.eup %3664  ;;  %v1146_v17 = vpop.f32.mrf.mxu0  ;;  %1709 = vmatmul.mubr.f32.gmra.mxu1 %v1499_v63  ;;  %v1501_v43 = vmul.f32 %v1437_v56, %v1245_v23  ;;  %v1254_v56 = vmul.f32 0.5, %v4969_v37 }
 0x258   : > { %3678 = verf.f32 %v1318_v0  ;;  %v1319_v2 = vmul.f32 0.70710677, %v4973_v16  ;;  %v4979_v36 = vadd.f32 %v1146_v17, %v4804_v39  ;;  %v1502_v4 = vmul.f32 %v1438_v60, %v1246_v21 }
 0x259   : > { %v3667_v1 = vpop.eup %3666  ;;  %v1150_v29 = vpop.f32.mrf.mxu0  ;;  %v1439_v24 = vadd.f32 1.0, %v3665_v34  ;;  %v1253_v17 = vmul.f32 0.5, %v4963_v58  ;;  %v1255_v58 = vmul.f32 0.5, %v4973_v16 }
 0x25a   : > { %3680 = verf.f32 %v1319_v2  ;;  %v1320_v52 = vmul.f32 0.70710677, %v4979_v36  ;;  %v4983_v5 = vadd.f32 %v1150_v29, %v4802_v14  ;;  %1713 = vmatprep.mubr.f32.mxu1 %v1502_v4  ;;  %v1440_v47 = vadd.f32 1.0, %v3667_v1 }
 0x25b   : > { %v3669_v44 = vpop.eup %3668  ;;  %v1152_v61 = vpop.f32.mrf.mxu0  ;;  %1714 = vmatmul.mubr.f32.gmra.mxu1 %v1501_v43  ;;  %v1503_v22 = vmul.f32 %v1439_v24, %v1247_v11 }
 0x25c   : > { %3682 = verf.f32 %v1320_v52  ;;  %v1321_v27 = vmul.f32 0.70710677, %v4983_v5  ;;  %v4989_v46 = vadd.f32 %v1152_v61, %v4804_v39  ;;  %v1504_v53 = vmul.f32 %v1440_v47, %v1248_v35 }
 0x25d   : > { %v3671_v7 = vpop.eup %3670  ;;  %v1156_v49 = vpop.f32.mrf.mxu0  ;;  %v1441_v33 = vadd.f32 1.0, %v3669_v44  ;;  %v1256_v44 = vmul.f32 0.5, %v4979_v36 }
 0x25e   : > { %3684 = verf.f32 %v1321_v27  ;;  %v1322_v18 = vmul.f32 0.70710677, %v4989_v46  ;;  %v4993_v45 = vadd.f32 %v1156_v49, %v4802_v14  ;;  %1718 = vmatprep.mubr.f32.mxu1 %v1504_v53  ;;  %v1442_v19 = vadd.f32 1.0, %v3671_v7 }
 0x25f   : > { %v3673_v20 = vpop.eup %3672  ;;  %v1158_v48 = vpop.f32.mrf.mxu0  ;;  %1719 = vmatmul.mubr.f32.gmra.mxu1 %v1503_v22  ;;  %v1505_v42 = vmul.f32 %v1441_v33, %v1249_v6  ;;  %v1258_v33 = vmul.f32 0.5, %v4989_v46 }
 0x260   : > { %3686 = verf.f32 %v1322_v18  ;;  %v1323_v50 = vmul.f32 0.70710677, %v4993_v45  ;;  %v4999_v31 = vadd.f32 %v1158_v48, %v4804_v39  ;;  %v1506_v38 = vmul.f32 %v1442_v19, %v1250_v9 }
 0x261   : > { %v3675_v32 = vpop.eup %3674  ;;  %v1162_v13 = vpop.f32.mrf.mxu0  ;;  %v1443_v12 = vadd.f32 1.0, %v3673_v20  ;;  %v1257_v48 = vmul.f32 0.5, %v4983_v5  ;;  %v1259_v5 = vmul.f32 0.5, %v4993_v45 }
 0x262   : > { %3688 = verf.f32 %v1323_v50  ;;  %v1324_v15 = vmul.f32 0.70710677, %v4999_v31  ;;  %v5003_v10 = vadd.f32 %v1162_v13, %v4802_v14  ;;  %1723 = vmatprep.mubr.f32.mxu1 %v1506_v38  ;;  %v1444_v30 = vadd.f32 1.0, %v3675_v32 }
 0x263   : > { %v3677_v57 = vpop.eup %3676  ;;  %v1164_v3 = vpop.f32.mrf.mxu0  ;;  %1724 = vmatmul.mubr.f32.gmra.mxu1 %v1505_v42  ;;  %v1507_v54 = vmul.f32 %v1443_v12, %v1251_v40 }
 0x264   : > { %3690 = verf.f32 %v1324_v15  ;;  %v1325_v25 = vmul.f32 0.70710677, %v5003_v10  ;;  %v5009_v8 = vadd.f32 %v1164_v3, %v4804_v39  ;;  %v1508_v55 = vmul.f32 %v1444_v30, %v1252_v59 }
 0x265   : > { %v3679_v26 = vpop.eup %3678  ;;  %v1168_v62 = vpop.f32.mrf.mxu0  ;;  %v1445_v28 = vadd.f32 1.0, %v3677_v57  ;;  %v1260_v57 = vmul.f32 0.5, %v4999_v31 }
 0x266   : > { %3692 = verf.f32 %v1325_v25  ;;  %v1326_v63 = vmul.f32 0.70710677, %v5009_v8  ;;  %v5013_v51 = vadd.f32 %v1168_v62, %v4802_v14  ;;  %1728 = vmatprep.mubr.f32.mxu1 %v1508_v55  ;;  %v1446_v21 = vadd.f32 1.0, %v3679_v26 }
 0x267   : > { %v3681_v0 = vpop.eup %3680  ;;  %v1170_v34 = vpop.f32.mrf.mxu0  ;;  %1729 = vmatmul.mubr.f32.gmra.mxu1 %v1507_v54  ;;  %v1509_v52 = vmul.f32 %v1445_v28, %v1253_v17  ;;  %v1262_v28 = vmul.f32 0.5, %v5009_v8 }
 0x268   : > { %3694 = verf.f32 %v1326_v63  ;;  %v1327_v60 = vmul.f32 0.70710677, %v5013_v51  ;;  %v5019_v23 = vadd.f32 %v1170_v34, %v4804_v39  ;;  %v1510_v29 = vmul.f32 %v1446_v21, %v1254_v56 }
 0x269   : > { %v3683_v2 = vpop.eup %3682  ;;  %v1174_v1 = vpop.f32.mrf.mxu0  ;;  %v1447_v4 = vadd.f32 1.0, %v3681_v0  ;;  %v1261_v34 = vmul.f32 0.5, %v5003_v10  ;;  %v1263_v10 = vmul.f32 0.5, %v5013_v51 }
 0x26a   : > { %3696 = verf.f32 %v1327_v60  ;;  %v1328_v24 = vmul.f32 0.70710677, %v5019_v23  ;;  %v5023_v37 = vadd.f32 %v1174_v1, %v4802_v14  ;;  %1733 = vmatprep.mubr.f32.mxu1 %v1510_v29  ;;  %v1448_v35 = vadd.f32 1.0, %v3683_v2 }
 0x26b   : > { %v3685_v43 = vpop.eup %3684  ;;  %v1176_v11 = vpop.f32.mrf.mxu0  ;;  %1734 = vmatmul.mubr.f32.gmra.mxu1 %v1509_v52  ;;  %v1511_v53 = vmul.f32 %v1447_v4, %v1255_v58 }
 0x26c   : > { %3698 = verf.f32 %v1328_v24  ;;  %v1329_v61 = vmul.f32 0.70710677, %v5023_v37  ;;  %v5029_v47 = vadd.f32 %v1176_v11, %v4804_v39  ;;  %v1512_v49 = vmul.f32 %v1448_v35, %v1256_v44 }
 0x26d   : > { %v3687_v27 = vpop.eup %3686  ;;  %v1180_v7 = vpop.f32.mrf.mxu0  ;;  %v1449_v36 = vadd.f32 1.0, %v3685_v43  ;;  %v1264_v43 = vmul.f32 0.5, %v5019_v23 }
 0x26e   : > { %3700 = verf.f32 %v1329_v61  ;;  %v1330_v22 = vmul.f32 0.70710677, %v5029_v47  ;;  %v5033_v16 = vadd.f32 %v1180_v7, %v4802_v14  ;;  %1738 = vmatprep.mubr.f32.mxu1 %v1512_v49  ;;  %v1450_v9 = vadd.f32 1.0, %v3687_v27 }
 0x26f   : > { %v3689_v18 = vpop.eup %3688  ;;  %v1182_v20 = vpop.f32.mrf.mxu0  ;;  %1739 = vmatmul.mubr.f32.gmra.mxu1 %v1511_v53  ;;  %v1513_v15 = vmul.f32 %v1449_v36, %v1257_v48  ;;  %v1266_v36 = vmul.f32 0.5, %v5029_v47 }
 0x270   : > { %3702 = verf.f32 %v1330_v22  ;;  %v1331_v19 = vmul.f32 0.70710677, %v5033_v16  ;;  %v5039_v6 = vadd.f32 %v1182_v20, %v4804_v39  ;;  %v1514_v13 = vmul.f32 %v1450_v9, %v1258_v33 }
 0x271   : > { %v3691_v50 = vpop.eup %3690  ;;  %v1186_v32 = vpop.f32.mrf.mxu0  ;;  %v1451_v38 = vadd.f32 1.0, %v3689_v18  ;;  %v1265_v20 = vmul.f32 0.5, %v5023_v37 }
 0x272   : > { %3704 = verf.f32 %v1331_v19  ;;  %v1332_v12 = vmul.f32 0.70710677, %v5039_v6  ;;  %v5043_v46 = vadd.f32 %v1186_v32, %v4802_v14  ;;  %1743 = vmatprep.mubr.f32.mxu1 %v1514_v13  ;;  %v1452_v59 = vadd.f32 1.0, %v3691_v50 }
 0x273   : > { %v3693_v42 = vpop.eup %3692  ;;  %v1188_v40 = vpop.f32.mrf.mxu0  ;;  %1744 = vmatmul.mubr.f32.gmra.mxu1 %v1513_v15  ;;  %v1515_v55 = vmul.f32 %v1451_v38, %v1259_v5  ;;  %v1268_v37 = vmul.f32 0.5, %v5039_v6 }
 0x274   : > { %3706 = verf.f32 %v1332_v12  ;;  %v1333_v3 = vmul.f32 0.70710677, %v5043_v46  ;;  %v5049_v30 = vadd.f32 %v1188_v40, %v4804_v39  ;;  %v1516_v62 = vmul.f32 %v1452_v59, %v1260_v57 }
 0x275   : > { %v3695_v25 = vpop.eup %3694  ;;  %v1192_v26 = vpop.f32.mrf.mxu0  ;;  %v1453_v31 = vadd.f32 1.0, %v3693_v42  ;;  %v1267_v42 = vmul.f32 0.5, %v5033_v16  ;;  %v1269_v6 = vmul.f32 0.5, %v5043_v46 }
 0x276   : > { %3708 = verf.f32 %v1333_v3  ;;  %v1334_v54 = vmul.f32 0.70710677, %v5049_v30  ;;  %v5053_v45 = vadd.f32 %v1192_v26, %v4802_v14  ;;  %1748 = vmatprep.mubr.f32.mxu1 %v1516_v62  ;;  %v1454_v56 = vadd.f32 1.0, %v3695_v25 }
 0x277   : > { %v3697_v63 = vpop.eup %3696  ;;  %v1194_v0 = vpop.f32.mrf.mxu0  ;;  %1749 = vmatmul.mubr.f32.gmra.mxu1 %v1515_v55  ;;  %v1517_v24 = vmul.f32 %v1453_v31, %v1261_v34  ;;  %v1270_v25 = vmul.f32 0.5, %v5049_v30 }
 0x278   : > { %3710 = verf.f32 %v1334_v54  ;;  %v1335_v21 = vmul.f32 0.70710677, %v5053_v45  ;;  %v5059_v17 = vadd.f32 %v1194_v0, %v4804_v39  ;;  %v1518_v1 = vmul.f32 %v1454_v56, %v1262_v28 }
 0x279   : > { %v3699_v60 = vpop.eup %3698  ;;  %v1198_v2 = vpop.f32.mrf.mxu0  ;;  %v1455_v29 = vadd.f32 1.0, %v3697_v63  ;;  %v1271_v34 = vmul.f32 0.5, %v5053_v45 }
 0x27a   : > { %3712 = verf.f32 %v1335_v21  ;;  %v1336_v4 = vmul.f32 0.70710677, %v5059_v17  ;;  %v5063_v8 = vadd.f32 %v1198_v2, %v4802_v14  ;;  %1753 = vmatprep.mubr.f32.mxu1 %v1518_v1  ;;  %v1456_v44 = vadd.f32 1.0, %v3699_v60 }
 0x27b   : > { %v3701_v52 = vpop.eup %3700  ;;  %v1200_v58 = vpop.f32.mrf.mxu0  ;;  %1754 = vmatmul.mubr.f32.gmra.mxu1 %v1517_v24  ;;  %v1519_v49 = vmul.f32 %v1455_v29, %v1263_v10 }
 0x27c   : > { %3714 = verf.f32 %v1336_v4  ;;  %v1337_v11 = vmul.f32 0.70710677, %v5063_v8  ;;  %v1201_v35 = vadd.f32 %v1200_v58, %v4804_v39  ;;  %v1520_v7 = vmul.f32 %v1456_v44, %v1264_v43 }
 0x27d   : > { %v3703_v61 = vpop.eup %3702  ;;  %v1204_v27 = vpop.f32.mrf.mxu0  ;;  %v1457_v51 = vadd.f32 1.0, %v3701_v52  ;;  %v1273_v24 = vmul.f32 0.5, %v5063_v8 }
 0x27e   : > { %3716 = verf.f32 %v1337_v11  ;;  %v1338_v53 = vmul.f32 0.70710677, %v1201_v35  ;;  %v5070_v22 = vadd.f32 %v1204_v27, %v4802_v14  ;;  %1758 = vmatprep.mubr.f32.mxu1 %v1520_v7  ;;  %v1458_v33 = vadd.f32 1.0, %v3703_v61 }
 0x27f   : > { %v3705_v23 = vpop.eup %3704  ;;  %v1206_v18 = vpop.f32.mrf.mxu0  ;;  %1759 = vmatmul.mubr.f32.gmra.mxu1 %v1519_v49  ;;  %v1521_v47 = vmul.f32 %v1457_v51, %v1265_v20  ;;  %v1274_v2 = vmul.f32 0.5, %v1201_v35 }
 0x280   : > { %3718 = verf.f32 %v1338_v53  ;;  %v1339_v9 = vmul.f32 0.70710677, %v5070_v22  ;;  %v1207_v48 = vadd.f32 %v1206_v18, %v4804_v39  ;;  %v1522_v32 = vmul.f32 %v1458_v33, %v1266_v36  ;;  %v5089_v36 = vld [vmem:[%s6038_s6] ss:$0 sm:$0xff] }
 0x281   : > { %v3707_v19 = vpop.eup %3706  ;;  %v1210_v50 = vpop.f32.mrf.mxu0  ;;  %v1459_v13 = vadd.f32 1.0, %v3705_v23  ;;  %v1275_v11 = vmul.f32 0.5, %v5070_v22 }
 0x282   : > { %3720 = verf.f32 %v1339_v9  ;;  %v1340_v38 = vmul.f32 0.70710677, %v1207_v48  ;;  %v1211_v12 = vadd.f32 %v1210_v50, %v4802_v14  ;;  %1763 = vmatprep.mubr.f32.mxu1 %v1522_v32  ;;  %v1460_v57 = vadd.f32 1.0, %v3707_v19 }
 0x283   : > { %v3709_v15 = vpop.eup %3708  ;;  %v1212_v5 = vpop.f32.mrf.mxu0  ;;  %1764 = vmatmul.mubr.f32.gmra.mxu1 %v1521_v47  ;;  %v1523_v62 = vmul.f32 %v1459_v13, %v1267_v42  ;;  %v1276_v10 = vmul.f32 0.5, %v1207_v48 }
 0x284   : > { %3722 = verf.f32 %v1340_v38  ;;  %v1341_v40 = vmul.f32 0.70710677, %v1211_v12  ;;  %v1213_v59 = vadd.f32 %v1212_v5, %v4804_v39  ;;  %v1524_v26 = vmul.f32 %v1460_v57, %v1268_v37 }
 0x285   : > { %v3711_v3 = vpop.eup %3710  ;;  %v1461_v54 = vadd.f32 1.0, %v3709_v15  ;;  %v1272_v39 = vmul.f32 0.5, %v5059_v17  ;;  %v1277_v8 = vmul.f32 0.5, %v1211_v12 }
 0x286   : > { %3724 = verf.f32 %v1341_v40  ;;  %v1342_v14 = vmul.f32 0.70710677, %v1213_v59  ;;  %v1462_v55 = vadd.f32 1.0, %v3711_v3  ;;  %1768 = vmatprep.mubr.f32.mxu1 %v1524_v26  ;;  %v1278_v27 = vmul.f32 0.5, %v1213_v59 }
 0x287   : > { %v3713_v16 = vpop.eup %3712  ;;  %1769 = vmatmul.mubr.f32.gmra.mxu1 %v1523_v62  ;;  %v1525_v28 = vmul.f32 %v1461_v54, %v1269_v6 }
 0x288   : > { %3726 = verf.f32 %v1342_v14  ;;  %v1526_v31 = vmul.f32 %v1462_v55, %v1270_v25  ;;  %v1463_v30 = vadd.f32 1.0, %v3713_v16 }
 0x289   : > { %v3715_v63 = vpop.eup %3714 }
 0x28a   : > { %1773 = vmatprep.mubr.f32.mxu1 %v1526_v31  ;;  %v1464_v0 = vadd.f32 1.0, %v3715_v63  ;;  %v1527_v1 = vmul.f32 %v1463_v30, %v1271_v34 }
 0x28b   : > { %v3717_v56 = vpop.eup %3716  ;;  %1774 = vmatmul.mubr.f32.gmra.mxu1 %v1525_v28 }
 0x28c   : > { %v1528_v21 = vmul.f32 %v1464_v0, %v1272_v39  ;;  %v1465_v29 = vadd.f32 1.0, %v3717_v56 }
 0x28d   : > { %v3719_v60 = vpop.eup %3718 }
 0x28e   : > { %1778 = vmatprep.mubr.f32.mxu1 %v1528_v21  ;;  %v1466_v46 = vadd.f32 1.0, %v3719_v60  ;;  %v1529_v43 = vmul.f32 %v1465_v29, %v1273_v24 }
 0x28f   : > { %v3721_v4 = vpop.eup %3720  ;;  %1779 = vmatmul.mubr.f32.gmra.mxu1 %v1527_v1 }
 0x290   : > { %v1530_v17 = vmul.f32 %v1466_v46, %v1274_v2  ;;  %v1467_v44 = vadd.f32 1.0, %v3721_v4 }
 0x291   : > { %v3723_v52 = vpop.eup %3722 }
 0x292   : > { %1783 = vmatprep.mubr.f32.mxu1 %v1530_v17  ;;  %v1468_v58 = vadd.f32 1.0, %v3723_v52  ;;  %v1531_v7 = vmul.f32 %v1467_v44, %v1275_v11 }
 0x293   : > { %v3725_v45 = vpop.eup %3724  ;;  %1784 = vmatmul.mubr.f32.gmra.mxu1 %v1529_v43 }
 0x294   : > { %v1532_v35 = vmul.f32 %v1468_v58, %v1276_v10  ;;  %v1469_v53 = vadd.f32 1.0, %v3725_v45 }
 0x295   : > { %v3727_v61 = vpop.eup %3726 }
 0x296   : > { %1788 = vmatprep.mubr.f32.mxu1 %v1532_v35  ;;  %v1470_v49 = vadd.f32 1.0, %v3727_v61  ;;  %v1533_v23 = vmul.f32 %v1469_v53, %v1277_v8 }
 0x297   : > { %1789 = vmatmul.mubr.f32.gmra.mxu1 %v1531_v7 }
 0x298   : > { %v1534_v51 = vmul.f32 %v1470_v49, %v1278_v27 }
 0x29a   : > { %1793 = vmatprep.mubr.f32.mxu1 %v1534_v51 }
 0x29b   : > { %1794 = vmatmul.mubr.f32.gmra.mxu1 %v1533_v23 }
 0x2df   : > { %v1640_v22 = vpop.f32.mrf.mxu1 }
 0x2e0   : > { %v5092_v18 = vadd.f32 %v5089_v36, %v1640_v22  ;;  %v2292_v22 = vld [vmem:[%s6042_s10 + $0x78] sm:$0xff] }
 0x2e1   : > { %v1642_v33 = vpop.f32.mrf.mxu1  ;;  %3335 = vmatprep.subr.mxu0 %v2292_v22 }
 0x2e2   : > { %1801 = vadd.xlane.f32.xlu0 %v5092_v18  ;;  %3336 = vmatpush3.msra.mxu0 %v2292_v22  ;;  %v2277_v22 = vld [vmem:[%s6042_s10] sm:$0xff] }
 0x2e3   : > { %v1645_v20 = vpop.f32.mrf.mxu1 }
 0x2e4   : > { %v5096_v9 = vadd.f32 %v5089_v36, %v1645_v20 }
 0x2e5   : > { %v1647_v48 = vpop.f32.mrf.mxu1 }
 0x2e6   : > { %1803 = vadd.xlane.f32.xlu0 %v5096_v9  ;;  %v2291_v48 = vld [vmem:[%s6042_s10 + $0x70] sm:$0xff] }
 0x2e7   : > { %v1650_v19 = vpop.f32.mrf.mxu1  ;;  %3337 = vmatprep.subr.mxu0 %v2291_v48 }
 0x2e8   : > { %v5100_v50 = vadd.f32 %v5089_v36, %v1650_v19  ;;  %3338 = vmatpush3.msra.mxu0 %v2291_v48 }
 0x2e9   : > { %v1652_v32 = vpop.f32.mrf.mxu1 }
 0x2ea   : > { %1805 = vadd.xlane.f32.xlu0 %v5100_v50  ;;  %v2290_v32 = vld [vmem:[%s6042_s10 + $0x68] sm:$0xff] }
 0x2eb   : > { %v5103_v13 = vpop.f32.mrf.mxu1  ;;  %3339 = vmatprep.subr.mxu0 %v2290_v32 }
 0x2ec   : > { %3340 = vmatpush3.msra.mxu0 %v2290_v32 }
 0x2ed   : > { %v1657_v38 = vpop.f32.mrf.mxu1 }
 0x2ee   : > { %v5184_v38 = vadd.f32 %v5089_v36, %v5103_v13  ;;  %v2288_v13 = vld [vmem:[%s6042_s10 + $0x58] sm:$0xff] }
 0x2ef   : > { %v5105_v12 = vpop.f32.mrf.mxu1 }
 0x2f1   : > { %v1662_v47 = vpop.f32.mrf.mxu1 }
 0x2f3   : > { %v5107_v15 = vpop.f32.mrf.mxu1 }
 0x2f5   : > { %v1667_v42 = vpop.f32.mrf.mxu1 }
 0x2f7   : > { %v5109_v37 = vpop.f32.mrf.mxu1 }
 0x2f9   : > { %v1672_v5 = vpop.f32.mrf.mxu1 }
 0x2fa   : > { %v2289_v5 = vld [vmem:[%s6042_s10 + $0x60] sm:$0xff] }
 0x2fb   : > { %v5111_v57 = vpop.f32.mrf.mxu1  ;;  %3341 = vmatprep.subr.mxu0 %v2289_v5 }
 0x2fc   : > { %3342 = vmatpush3.msra.mxu0 %v2289_v5  ;;  %v3922_v5 = vld [vmem:[%s4074_s27 + $0x10] sm:$0xff] }
 0x2fd   : > { %v1677_v40 = vpop.f32.mrf.mxu1  ;;  %3343 = vmatprep.subr.mxu0 %v2288_v13 }
 0x2fe   : > { %3344 = vmatpush3.msra.mxu0 %v2288_v13  ;;  %v3924_v13 = vld [vmem:[%s4074_s27 + $0x20] sm:$0xff] }
 0x2ff   : > { %v1680_v59 = vpop.f32.mrf.mxu1 }
 0x300   : > { %v5114_v3 = vadd.f32 %v5089_v36, %v1680_v59  ;;  %v5199_v59 = vadd.f32 %v5089_v36, %v5105_v12  ;;  %v5211_v12 = vadd.f32 %v5089_v36, %v5107_v15 }
 0x301   : > { %v1682_v25 = vpop.f32.mrf.mxu1 }
 0x302   : > { %1817 = vadd.xlane.f32.xlu0 %v5114_v3 }
 0x303   : > { %v1685_v26 = vpop.f32.mrf.mxu1 }
 0x304   : > { %v5118_v62 = vadd.f32 %v5089_v36, %v1685_v26 }
 0x305   : > { %v1687_v14 = vpop.f32.mrf.mxu1 }
 0x306   : > { %1819 = vadd.xlane.f32.xlu1 %v5118_v62  ;;  %v2287_v14 = vld [vmem:[%s6042_s10 + $0x50] sm:$0xff] }
 0x307   : > { %v1690_v55 = vpop.f32.mrf.mxu1  ;;  %3345 = vmatprep.subr.mxu0 %v2287_v14 }
 0x308   : > { %v5122_v54 = vadd.f32 %v5089_v36, %v1690_v55  ;;  %3346 = vmatpush3.msra.mxu0 %v2287_v14  ;;  %v3926_v14 = vld [vmem:[%s4074_s27 + $0x30] sm:$0xff] }
 0x309   : > { %v1692_v16 = vpop.f32.mrf.mxu1 }
 0x30a   : > { %1821 = vadd.xlane.f32.xlu0 %v5122_v54 }
 0x30b   : > { %v1695_v6 = vpop.f32.mrf.mxu1 }
 0x30c   : > { %v5126_v31 = vadd.f32 %v5089_v36, %v1695_v6  ;;  %v2286_v6 = vld [vmem:[%s6042_s10 + $0x48] sm:$0xff] }
 0x30d   : > { %v1697_v63 = vpop.f32.mrf.mxu1  ;;  %3347 = vmatprep.subr.mxu0 %v2286_v6 }
 0x30e   : > { %1823 = vadd.xlane.f32.xlu1 %v5126_v31  ;;  %3348 = vmatpush3.msra.mxu0 %v2286_v6 }
 0x30f   : > { %v1700_v39 = vpop.f32.mrf.mxu1 }
 0x310   : > { %v5130_v28 = vadd.f32 %v5089_v36, %v1700_v39  ;;  %v2285_v39 = vld [vmem:[%s6042_s10 + $0x40] sm:$0xff] }
 0x311   : > { %v1702_v0 = vpop.f32.mrf.mxu1  ;;  %3349 = vmatprep.subr.mxu0 %v2285_v39 }
 0x312   : > { %1825 = vadd.xlane.f32.xlu0 %v5130_v28  ;;  %v5226_v0 = vadd.f32 %v5089_v36, %v5109_v37  ;;  %3350 = vmatpush3.msra.mxu0 %v2285_v39  ;;  %v5238_v37 = vadd.f32 %v5089_v36, %v5111_v57 }
 0x313   : > { %v1705_v30 = vpop.f32.mrf.mxu1 }
 0x314   : > { %v5134_v56 = vadd.f32 %v5089_v36, %v1705_v30 }
 0x315   : > { %v1707_v34 = vpop.f32.mrf.mxu1 }
 0x316   : > { %1827 = vadd.xlane.f32.xlu1 %v5134_v56 }
 0x317   : > { %v1710_v21 = vpop.f32.mrf.mxu1 }
 0x318   : > { %v5138_v60 = vadd.f32 %v5089_v36, %v1710_v21  ;;  %v2284_v21 = vld [vmem:[%s6042_s10 + $0x38] sm:$0xff] }
 0x319   : > { %v1712_v2 = vpop.f32.mrf.mxu1  ;;  %3351 = vmatprep.subr.mxu0 %v2284_v21 }
 0x31a   : > { %1829 = vadd.xlane.f32.xlu0 %v5138_v60  ;;  %3352 = vmatpush3.msra.mxu0 %v2284_v21  ;;  %v3929_v21 = vld [vmem:[%s4074_s27 + $0x48] sm:$0xff] }
 0x31b   : > { %v1715_v1 = vpop.f32.mrf.mxu1 }
 0x31c   : > { %v5142_v46 = vadd.f32 %v5089_v36, %v1715_v1 }
 0x31d   : > { %v1717_v29 = vpop.f32.mrf.mxu1 }
 0x31e   : > { %1831 = vadd.xlane.f32.xlu1 %v5142_v46  ;;  %v2283_v29 = vld [vmem:[%s6042_s10 + $0x30] sm:$0xff] }
 0x31f   : > { %v1720_v4 = vpop.f32.mrf.mxu1  ;;  %3353 = vmatprep.subr.mxu0 %v2283_v29 }
 0x320   : > { %v5146_v24 = vadd.f32 %v5089_v36, %v1720_v4  ;;  %3354 = vmatpush3.msra.mxu0 %v2283_v29  ;;  %v3930_v29 = vld [vmem:[%s4074_s27 + $0x50] sm:$0xff] }
 0x321   : > { %v1722_v17 = vpop.f32.mrf.mxu1 }
 0x322   : > { %1833 = vadd.xlane.f32.xlu0 %v5146_v24  ;;  %v2282_v17 = vld [vmem:[%s6042_s10 + $0x28] sm:$0xff] }
 0x323   : > { %v1725_v52 = vpop.f32.mrf.mxu1  ;;  %3355 = vmatprep.subr.mxu0 %v2282_v17 }
 0x324   : > { %v5150_v10 = vadd.f32 %v5089_v36, %v1725_v52  ;;  %3356 = vmatpush3.msra.mxu0 %v2282_v17 }
 0x325   : > { %v1727_v43 = vpop.f32.mrf.mxu1 }
 0x326   : > { %1835 = vadd.xlane.f32.xlu1 %v5150_v10  ;;  %v2281_v43 = vld [vmem:[%s6042_s10 + $0x20] sm:$0xff] }
 0x327   : > { %v1730_v58 = vpop.f32.mrf.mxu1  ;;  %3357 = vmatprep.subr.mxu0 %v2281_v43 }
 0x328   : > { %v5154_v44 = vadd.f32 %v5089_v36, %v1730_v58  ;;  %3358 = vmatpush3.msra.mxu0 %v2281_v43 }
 0x329   : > { %v1732_v45 = vpop.f32.mrf.mxu1 }
 0x32a   : > { %1837 = vadd.xlane.f32.xlu0 %v5154_v44  ;;  %v2280_v45 = vld [vmem:[%s6042_s10 + $0x18] sm:$0xff] }
 0x32b   : > { %v1735_v11 = vpop.f32.mrf.mxu1  ;;  %3359 = vmatprep.subr.mxu0 %v2280_v45 }
 0x32c   : > { %v5158_v35 = vadd.f32 %v5089_v36, %v1735_v11  ;;  %3360 = vmatpush3.msra.mxu0 %v2280_v45 }
 0x32d   : > { %v1737_v61 = vpop.f32.mrf.mxu1 }
 0x32e   : > { %1839 = vadd.xlane.f32.xlu1 %v5158_v35 }
 0x32f   : > { %v1740_v27 = vpop.f32.mrf.mxu1 }
 0x330   : > { %v5162_v7 = vadd.f32 %v5089_v36, %v1740_v27  ;;  %v2279_v27 = vld [vmem:[%s6042_s10 + $0x10] sm:$0xff] }
 0x331   : > { %v1742_v49 = vpop.f32.mrf.mxu1  ;;  %3361 = vmatprep.subr.mxu0 %v2279_v27 }
 0x332   : > { %1841 = vadd.xlane.f32.xlu0 %v5162_v7  ;;  %3362 = vmatpush3.msra.mxu0 %v2279_v27  ;;  %v2273_v27 = vld [vmem:[%s6041_s9 + $0x60] sm:$0xff] }
 0x333   : > { %v1745_v53 = vpop.f32.mrf.mxu1 }
 0x334   : > { %v5166_v8 = vadd.f32 %v5089_v36, %v1745_v53  ;;  %v2278_v53 = vld [vmem:[%s6042_s10 + $0x8] sm:$0xff] }
 0x335   : > { %v1747_v51 = vpop.f32.mrf.mxu1  ;;  %3363 = vmatprep.subr.mxu0 %v2278_v53 }
 0x336   : > { %1843 = vadd.xlane.f32.xlu1 %v5166_v8  ;;  %3364 = vmatpush3.msra.mxu0 %v2278_v53 }
 0x337   : > { %v1750_v23 = vpop.f32.mrf.mxu1  ;;  %3365 = vmatprep.subr.mxu0 %v2277_v22 }
 0x338   : > { %v5173_v33 = vadd.f32 %v5089_v36, %v1750_v23  ;;  %3366 = vmatpush3.msra.mxu0 %v2277_v22  ;;  %v3933_v22 = vld [vmem:[%s4074_s27 + $0x68] sm:$0xff] }
 0x339   : > { %v1752_v20 = vpop.f32.mrf.mxu1 }
 0x33a   : > { %1845 = vadd.xlane.f32.xlu0 %v5173_v33 }
 0x33b   : > { %v1755_v19 = vpop.f32.mrf.mxu1 }
 0x33c   : > { %v5187_v47 = vadd.f32 %v5089_v36, %v1755_v19 }
 0x33d   : > { %v1757_v42 = vpop.f32.mrf.mxu1 }
 0x33e   : > { %1847 = vadd.xlane.f32.xlu1 %v5187_v47  ;;  %1807 = vadd.xlane.f32.xlu0 %v5184_v38  ;;  %v3921_v42 = vld [vmem:[%s4074_s27 + $0x8] sm:$0xff] }
 0x33f   : > { %v1760_v40 = vpop.f32.mrf.mxu1  ;;  %3368 = vmatmul.mubr.f32.vlgmr.msra.gmra.mxu0 %v3921_v42  ;;  %v3935_v42 = vld [vmem:[%s4074_s27 + $0x78] sm:$0xff] }
 0x340   : > { %v5202_v25 = vadd.f32 %v5089_v36, %v1760_v40  ;;  %3370 = vmatprep.mubr.f32.mxu0 %v3922_v5  ;;  %v3923_v40 = vld [vmem:[%s4074_s27 + $0x18] sm:$0xff]  ;;  %v3937_v5 = vld [vmem:[%s4074_s27 + $0x88] sm:$0xff] }
 0x341   : > { %v1762_v26 = vpop.f32.mrf.mxu1 }
 0x342   : > { %1809 = vadd.xlane.f32.xlu0 %v5199_v59  ;;  %1849 = vadd.xlane.f32.xlu1 %v5202_v25  ;;  %v3925_v26 = vld [vmem:[%s4074_s27 + $0x28] sm:$0xff] }
 0x343   : > { %v1765_v55 = vpop.f32.mrf.mxu1  ;;  %3371 = vmatmul.mubr.f32.gmra.mxu0 %v3923_v40  ;;  %v3938_v40 = vld [vmem:[%s4074_s27 + $0x90] sm:$0xff] }
 0x344   : > { %v5214_v16 = vadd.f32 %v5089_v36, %v1765_v55  ;;  %3373 = vmatprep.mubr.f32.mxu0 %v3924_v13  ;;  %v3927_v55 = vld [vmem:[%s4074_s27 + $0x38] sm:$0xff] }
 0x345   : > { %v1767_v63 = vpop.f32.mrf.mxu1  ;;  %v2272_v13 = vld [vmem:[%s6041_s9 + $0x58] sm:$0xff] }
 0x346   : > { %1811 = vadd.xlane.f32.xlu0 %v5211_v12  ;;  %1851 = vadd.xlane.f32.xlu1 %v5214_v16  ;;  %v3928_v63 = vld [vmem:[%s4074_s27 + $0x40] sm:$0xff] }
 0x347   : > { %v1770_v15 = vpop.f32.mrf.mxu1  ;;  %3374 = vmatmul.mubr.f32.gmra.mxu0 %v3925_v26  ;;  %v3939_v26 = vld [vmem:[%s4074_s27 + $0x98] sm:$0xff] }
 0x348   : > { %v5229_v30 = vadd.f32 %v5089_v36, %v1770_v15  ;;  %3376 = vmatprep.mubr.f32.mxu0 %v3926_v14  ;;  %v2275_v15 = vld [vmem:[%s6041_s9 + $0x70] sm:$0xff]  ;;  %v3940_v14 = vld [vmem:[%s4074_s27 + $0xa0] sm:$0xff] }
 0x349   : > { %v1772_v34 = vpop.f32.mrf.mxu1 }
 0x34a   : > { %1813 = vadd.xlane.f32.xlu0 %v5226_v0  ;;  %1853 = vadd.xlane.f32.xlu1 %v5229_v30 }
 0x34b   : > { %v1775_v2 = vpop.f32.mrf.mxu1  ;;  %3377 = vmatmul.mubr.f32.gmra.mxu0 %v3927_v55  ;;  %v2270_v55 = vld [vmem:[%s6041_s9 + $0x48] sm:$0xff] }
 0x34c   : > { %v5241_v1 = vadd.f32 %v5089_v36, %v1775_v2  ;;  %3379 = vmatprep.mubr.f32.mxu0 %v3928_v63  ;;  %v3942_v63 = vld [vmem:[%s4074_s27 + $0xb0] sm:$0xff] }
 0x34d   : > { %v1777_v4 = vpop.f32.mrf.mxu1 }
 0x34e   : > { %1815 = vadd.xlane.f32.xlu0 %v5238_v37  ;;  %1855 = vadd.xlane.f32.xlu1 %v5241_v1 }
 0x34f   : > { %v1780_v57 = vpop.f32.mrf.mxu1  ;;  %3380 = vmatmul.mubr.f32.gmra.mxu0 %v3929_v21  ;;  %v3944_v21 = vld [vmem:[%s4074_s27 + $0xc0] sm:$0xff] }
 0x350   : > { %v5252_v52 = vadd.f32 %v5089_v36, %v1780_v57  ;;  %3382 = vmatprep.mubr.f32.mxu0 %v3930_v29  ;;  %v2274_v57 = vld [vmem:[%s6041_s9 + $0x68] sm:$0xff] }
 0x351   : > { %v1782_v58 = vpop.f32.mrf.mxu1 }
 0x352   : > { %1857 = vadd.xlane.f32.xlu1 %v5252_v52  ;;  %v3931_v58 = vld [vmem:[%s4074_s27 + $0x58] sm:$0xff] }
 0x353   : > { %v1785_v11 = vpop.f32.mrf.mxu1  ;;  %3383 = vmatmul.mubr.f32.gmra.mxu0 %v3931_v58  ;;  %v3946_v58 = vld [vmem:[%s4074_s27 + $0xd0] sm:$0xff] }
 0x354   : > { %v5262_v61 = vadd.f32 %v5089_v36, %v1785_v11  ;;  %v3932_v11 = vld [vmem:[%s4074_s27 + $0x60] sm:$0xff] }
 0x355   : > { %v1787_v49 = vpop.f32.mrf.mxu1  ;;  %3385 = vmatprep.mubr.f32.mxu0 %v3932_v11 }
 0x356   : > { %1859 = vadd.xlane.f32.xlu1 %v5262_v61 }
 0x357   : > { %v1790_v51 = vpop.f32.mrf.mxu1  ;;  %3386 = vmatmul.mubr.f32.gmra.mxu0 %v3933_v22 }
 0x358   : > { %v5272_v23 = vadd.f32 %v5089_v36, %v1790_v51 }
 0x359   : > { %v1792_v20 = vpop.f32.mrf.mxu1 }
 0x35a   : > { %1861 = vadd.xlane.f32.xlu1 %v5272_v23  ;;  %v3934_v20 = vld [vmem:[%s4074_s27 + $0x70] sm:$0xff] }
 0x35b   : > { %v1795_v48 = vpop.f32.mrf.mxu1  ;;  %3388 = vmatprep.mubr.f32.mxu0 %v3934_v20  ;;  %v3948_v20 = vld [vmem:[%s4074_s27 + $0xe0] sm:$0xff] }
 0x35c   : > { %v5279_v19 = vadd.f32 %v5089_v36, %v1795_v48  ;;  %v2276_v36 = vld [vmem:[%s6041_s9 + $0x78] sm:$0xff]  ;;  %3389 = vmatmul.mubr.f32.gmra.mxu0 %v3935_v42  ;;  %v2262_v42 = vld [vmem:[%s6041_s9 + $0x8] sm:$0xff] }
 0x35d   : > { %v1797_v32 = vpop.f32.mrf.mxu1  ;;  %3495 = vmatprep.subr.mxu1 %v2276_v36  ;;  %3415 = vmatprep.subr.mxu0 %v2276_v36 }
 0x35e   : > { %1863 = vadd.xlane.f32.xlu1 %v5279_v19  ;;  %3511 = vmatpush3.msra.mxu1 %v2276_v36 }
 0x35f   : > { %3416 = vmatpush3.msra.mxu0 %v2276_v36  ;;  %3496 = vmatprep.subr.mxu1 %v2275_v15  ;;  %v2271_v36 = vld [vmem:[%s6041_s9 + $0x50] sm:$0xff] }
 0x360   : > { %3512 = vmatpush3.msra.mxu1 %v2275_v15  ;;  %3417 = vmatprep.subr.mxu0 %v2275_v15 }
 0x361   : > { %3497 = vmatprep.subr.mxu1 %v2274_v57  ;;  %3418 = vmatpush3.msra.mxu0 %v2275_v15  ;;  %v5352_v15 = vld [vmem:[%s6041_s9 + $0x38] sm:$0xff] }
 0x362   : > { %3513 = vmatpush3.msra.mxu1 %v2274_v57  ;;  %3419 = vmatprep.subr.mxu0 %v2274_v57 }
 0x363   : > { %3498 = vmatprep.subr.mxu1 %v2273_v27  ;;  %3420 = vmatpush3.msra.mxu0 %v2274_v57  ;;  %v2266_v57 = vld [vmem:[%s6041_s9 + $0x28] sm:$0xff] }
 0x364   : > { %3514 = vmatpush3.msra.mxu1 %v2273_v27  ;;  %3421 = vmatprep.subr.mxu0 %v2273_v27 }
 0x365   : > { %3422 = vmatpush3.msra.mxu0 %v2273_v27  ;;  %3499 = vmatprep.subr.mxu1 %v2272_v13 }
 0x366   : > { %3423 = vmatprep.subr.mxu0 %v2272_v13  ;;  %3515 = vmatpush3.msra.mxu1 %v2272_v13 }
 0x367   : > { %3424 = vmatpush3.msra.mxu0 %v2272_v13  ;;  %3500 = vmatprep.subr.mxu1 %v2271_v36 }
 0x368   : > { %3425 = vmatprep.subr.mxu0 %v2271_v36  ;;  %3516 = vmatpush3.msra.mxu1 %v2271_v36 }
 0x369   : > { %3426 = vmatpush3.msra.mxu0 %v2271_v36  ;;  %3501 = vmatprep.subr.mxu1 %v2270_v55  ;;  %v3950_v36 = vld [vmem:[%s4074_s27 + $0xf0] sm:$0xff] }
 0x36a   : > { %3427 = vmatprep.subr.mxu0 %v2270_v55  ;;  %3517 = vmatpush3.msra.mxu1 %v2270_v55 }
 0x36b   : > { %v1802_v6 = vpop.xlane.xlu0 %1801  ;;  %3428 = vmatpush3.msra.mxu0 %v2270_v55 }
 0x36c   : > { %v1865_v39 = vmul.f32 0.010416667, %v1802_v6  ;;  %v3941_v6 = vld [vmem:[%s4074_s27 + $0xa8] sm:$0xff] }
 0x36e   : > { %v1897_v34 = vsub.f32 %v5092_v18, %v1865_v39  ;;  %v2269_v39 = vld [vmem:[%s6041_s9 + $0x40] sm:$0xff] }
 0x36f   : > { %v1804_v2 = vpop.xlane.xlu0 %1803  ;;  %3429 = vmatprep.subr.mxu0 %v2269_v39  ;;  %3502 = vmatprep.subr.mxu1 %v2269_v39 }
 0x370   : > { %v1866_v4 = vmul.f32 0.010416667, %v1804_v2  ;;  %v5301_v17 = vsel %vm451_vm0, %v1897_v34, 0.0  ;;  %3430 = vmatpush3.msra.mxu0 %v2269_v39  ;;  %v3943_v34 = vld [vmem:[%s4074_s27 + $0xb8] sm:$0xff]  ;;  %v2267_v2 = vld [vmem:[%s6041_s9 + $0x30] sm:$0xff]  ;;  %3518 = vmatpush3.msra.mxu1 %v2269_v39 }
 0x371   : > { %v1961_v18 = vmul.f32 %v5301_v17, %v5301_v17  ;;  %3431 = vmatprep.subr.mxu0 %v5352_v15  ;;  %3503 = vmatprep.subr.mxu1 %v5352_v15 }
 0x372   : > { %v1898_v43 = vsub.f32 %v5096_v9, %v1866_v4  ;;  %3432 = vmatpush3.msra.mxu0 %v5352_v15  ;;  %3519 = vmatpush3.msra.mxu1 %v5352_v15 }
 0x373   : > { %1993 = vadd.xlane.f32.xlu0 %v1961_v18  ;;  %v1806_v45 = vpop.xlane.xlu0 %1805  ;;  %3433 = vmatprep.subr.mxu0 %v2267_v2  ;;  %v3945_v18 = vld [vmem:[%s4074_s27 + $0xc8] sm:$0xff] }
 0x374   : > { %v5316_v49 = vsel %vm451_vm0, %v1898_v43, 0.0  ;;  %v1867_v53 = vmul.f32 0.010416667, %v1806_v45  ;;  %3434 = vmatpush3.msra.mxu0 %v2267_v2  ;;  %v2265_v45 = vld [vmem:[%s6041_s9 + $0x20] sm:$0xff]  ;;  %3504 = vmatprep.subr.mxu1 %v2267_v2 }
 0x375   : > { %v1962_v9 = vmul.f32 %v5316_v49, %v5316_v49  ;;  %3435 = vmatprep.subr.mxu0 %v2266_v57  ;;  %3520 = vmatpush3.msra.mxu1 %v2267_v2 }
 0x376   : > { %v1899_v51 = vsub.f32 %v5100_v50, %v1867_v53  ;;  %v3936_v50 = vld [vmem:[%s4074_s27 + $0x80] sm:$0xff]  ;;  %3436 = vmatpush3.msra.mxu0 %v2266_v57  ;;  %3505 = vmatprep.subr.mxu1 %v2266_v57 }
 0x377   : > { %1995 = vadd.xlane.f32.xlu0 %v1962_v9  ;;  %3391 = vmatprep.mubr.f32.mxu0 %v3936_v50 }
 0x378   : > { %v5325_v48 = vsel %vm451_vm0, %v1899_v51, 0.0  ;;  %3392 = vmatmul.mubr.f32.gmra.mxu0 %v3937_v5  ;;  %3437 = vmatprep.subr.mxu0 %v2265_v45  ;;  %v3947_v51 = vld [vmem:[%s4074_s27 + $0xd8] sm:$0xff] }
 0x379   : > { %v1963_v32 = vmul.f32 %v5325_v48, %v5325_v48  ;;  %3394 = vmatprep.mubr.f32.mxu0 %v3938_v40  ;;  %3438 = vmatpush3.msra.mxu0 %v2265_v45 }
 0x37a   : > { %3521 = vmatpush3.msra.mxu1 %v2266_v57 }
 0x37b   : > { %1997 = vadd.xlane.f32.xlu0 %v1963_v32  ;;  %v2263_v32 = vld [vmem:[%s6041_s9 + $0x10] sm:$0xff]  ;;  %3506 = vmatprep.subr.mxu1 %v2265_v45 }
 0x37c   : > { %3395 = vmatmul.mubr.f32.gmra.mxu0 %v3939_v26  ;;  %v3949_v26 = vld [vmem:[%s4074_s27 + $0xe8] sm:$0xff]  ;;  %3522 = vmatpush3.msra.mxu1 %v2265_v45 }
 0x37d   : > { %3397 = vmatprep.mubr.f32.mxu0 %v3940_v14 }
 0x380   : > { %3398 = vmatmul.mubr.f32.gmra.mxu0 %v3941_v6 }
 0x381   : > { %3400 = vmatprep.mubr.f32.mxu0 %v3942_v63 }
 0x384   : > { %3401 = vmatmul.mubr.f32.gmra.mxu0 %v3943_v34  ;;  %v3951_v34 = vld [vmem:[%s4074_s27 + $0xf8] sm:$0xff] }
 0x385   : > { %3403 = vmatprep.mubr.f32.mxu0 %v3944_v21 }
 0x388   : > { %3404 = vmatmul.mubr.f32.gmra.mxu0 %v3945_v18 }
 0x389   : > { %3406 = vmatprep.mubr.f32.mxu0 %v3946_v58 }
 0x38b   : > { %v1818_v29 = vpop.xlane.xlu0 %1817 }
 0x38c   : > { %v1873_v4 = vmul.f32 0.010416667, %v1818_v29  ;;  %3407 = vmatmul.mubr.f32.gmra.mxu0 %v3947_v51 }
 0x38d   : > { %3409 = vmatprep.mubr.f32.mxu0 %v3948_v20 }
 0x38e   : > { %v1905_v43 = vsub.f32 %v5114_v3, %v1873_v4  ;;  %v2264_v3 = vld [vmem:[%s6041_s9 + $0x18] sm:$0xff] }
 0x38f   : > { %v1820_v11 = vpop.xlane.xlu1 %1819  ;;  %3439 = vmatprep.subr.mxu0 %v2264_v3  ;;  %3507 = vmatprep.subr.mxu1 %v2264_v3 }
 0x390   : > { %v5372_v27 = vsel %vm451_vm0, %v1905_v43, 0.0  ;;  %v1874_v53 = vmul.f32 0.010416667, %v1820_v11  ;;  %3440 = vmatpush3.msra.mxu0 %v2264_v3  ;;  %3523 = vmatpush3.msra.mxu1 %v2264_v3 }
 0x391   : > { %v1969_v9 = vmul.f32 %v5372_v27, %v5372_v27  ;;  %3441 = vmatprep.subr.mxu0 %v2263_v32  ;;  %3410 = vmatmul.mubr.f32.gmra.mxu0 %v3949_v26 }
 0x392   : > { %v1906_v22 = vsub.f32 %v5118_v62, %v1874_v53  ;;  %3442 = vmatpush3.msra.mxu0 %v2263_v32  ;;  %v2261_v62 = vld [vmem:[%s6041_s9] sm:$0xff]  ;;  %3412 = vmatprep.mubr.f32.mxu0 %v3950_v36 }
 0x393   : > { %2009 = vadd.xlane.f32.xlu0 %v1969_v9  ;;  %v1822_v50 = vpop.xlane.xlu0 %1821  ;;  %3443 = vmatprep.subr.mxu0 %v2262_v42 }
 0x394   : > { %v1875_v5 = vmul.f32 0.010416667, %v1822_v50  ;;  %v5390_v40 = vsel %vm451_vm0, %v1906_v22, 0.0  ;;  %3444 = vmatpush3.msra.mxu0 %v2262_v42  ;;  %3508 = vmatprep.subr.mxu1 %v2263_v32 }
 0x395   : > { %v1970_v13 = vmul.f32 %v5390_v40, %v5390_v40  ;;  %3445 = vmatprep.subr.mxu0 %v2261_v62  ;;  %3413 = vmatmul.mubr.f32.gmra.mxu0 %v3951_v34 }
 0x396   : > { %v1907_v14 = vsub.f32 %v5122_v54, %v1875_v5  ;;  %3446 = vmatpush3.msra.mxu0 %v2261_v62  ;;  %3524 = vmatpush3.msra.mxu1 %v2263_v32 }
 0x397   : > { %v1824_v55 = vpop.xlane.xlu1 %1823  ;;  %2011 = vadd.xlane.f32.xlu1 %v1970_v13  ;;  %3509 = vmatprep.subr.mxu1 %v2262_v42 }
 0x398   : > { %v5403_v6 = vsel %vm451_vm0, %v1907_v14, 0.0  ;;  %v1876_v63 = vmul.f32 0.010416667, %v1824_v55  ;;  %3525 = vmatpush3.msra.mxu1 %v2262_v42 }
 0x399   : > { %v1971_v39 = vmul.f32 %v5403_v6, %v5403_v6  ;;  %3510 = vmatprep.subr.mxu1 %v2261_v62 }
 0x39a   : > { %v1908_v54 = vsub.f32 %v5126_v31, %v1876_v63  ;;  %3526 = vmatpush3.msra.mxu1 %v2261_v62 }
 0x39b   : > { %2013 = vadd.xlane.f32.xlu0 %v1971_v39  ;;  %v1826_v21 = vpop.xlane.xlu0 %1825 }
 0x39c   : > { %v5412_v29 = vsel %vm451_vm0, %v1908_v54, 0.0  ;;  %v1877_v4 = vmul.f32 0.010416667, %v1826_v21 }
 0x39d   : > { %v1972_v15 = vmul.f32 %v5412_v29, %v5412_v29 }
 0x39e   : > { %v1909_v18 = vsub.f32 %v5130_v28, %v1877_v4 }
 0x39f   : > { %v1828_v43 = vpop.xlane.xlu1 %1827  ;;  %2015 = vadd.xlane.f32.xlu1 %v1972_v15 }
 0x3a0   : > { %v5419_v31 = vsel %vm451_vm0, %v1909_v18, 0.0  ;;  %v1878_v2 = vmul.f32 0.010416667, %v1828_v43 }
 0x3a1   : > { %v1973_v58 = vmul.f32 %v5419_v31, %v5419_v31 }
 0x3a2   : > { %v1910_v57 = vsub.f32 %v5134_v56, %v1878_v2 }
 0x3a3   : > { %2017 = vadd.xlane.f32.xlu0 %v1973_v58  ;;  %v1830_v11 = vpop.xlane.xlu0 %1829 }
 0x3a4   : > { %v5426_v28 = vsel %vm451_vm0, %v1910_v57, 0.0  ;;  %v1879_v45 = vmul.f32 0.010416667, %v1830_v11 }
 0x3a5   : > { %v1974_v53 = vmul.f32 %v5426_v28, %v5426_v28 }
 0x3a6   : > { %v1911_v3 = vsub.f32 %v5138_v60, %v1879_v45 }
 0x3a7   : > { %v1832_v9 = vpop.xlane.xlu1 %1831  ;;  %2019 = vadd.xlane.f32.xlu1 %v1974_v53 }
 0x3a8   : > { %v5433_v56 = vsel %vm451_vm0, %v1911_v3, 0.0  ;;  %v1880_v51 = vmul.f32 0.010416667, %v1832_v9 }
 0x3a9   : > { %v1975_v22 = vmul.f32 %v5433_v56, %v5433_v56 }
 0x3aa   : > { %v1912_v20 = vsub.f32 %v5142_v46, %v1880_v51 }
 0x3ab   : > { %2021 = vadd.xlane.f32.xlu0 %v1975_v22  ;;  %v1834_v32 = vpop.xlane.xlu0 %1833 }
 0x3ac   : > { %v5440_v42 = vsel %vm451_vm0, %v1912_v20, 0.0  ;;  %v1881_v60 = vmul.f32 0.010416667, %v1834_v32 }
 0x3ad   : > { %v1976_v50 = vmul.f32 %v5440_v42, %v5440_v42 }
 0x3ae   : > { %v1913_v5 = vsub.f32 %v5146_v24, %v1881_v60 }
 0x3af   : > { %v1836_v62 = vpop.xlane.xlu1 %1835  ;;  %2023 = vadd.xlane.f32.xlu1 %v1976_v50 }
 0x3b0   : > { %v5447_v13 = vsel %vm451_vm0, %v1913_v5, 0.0  ;;  %v1882_v26 = vmul.f32 0.010416667, %v1836_v62 }
 0x3b1   : > { %v1977_v46 = vmul.f32 %v5447_v13, %v5447_v13 }
 0x3b2   : > { %v1914_v14 = vsub.f32 %v5150_v10, %v1882_v26 }
 0x3b3   : > { %2025 = vadd.xlane.f32.xlu0 %v1977_v46  ;;  %v1838_v36 = vpop.xlane.xlu0 %1837 }
 0x3b4   : > { %v5454_v55 = vsel %vm451_vm0, %v1914_v14, 0.0  ;;  %v1883_v63 = vmul.f32 0.010416667, %v1838_v36 }
 0x3b5   : > { %v1978_v24 = vmul.f32 %v5454_v55, %v5454_v55 }
 0x3b6   : > { %v1915_v39 = vsub.f32 %v5154_v44, %v1883_v63 }
 0x3b7   : > { %v1840_v34 = vpop.xlane.xlu1 %1839  ;;  %2027 = vadd.xlane.f32.xlu1 %v1978_v24 }
 0x3b8   : > { %v5461_v54 = vsel %vm451_vm0, %v1915_v39, 0.0  ;;  %v1884_v21 = vmul.f32 0.010416667, %v1840_v34 }
 0x3b9   : > { %v1979_v10 = vmul.f32 %v5461_v54, %v5461_v54 }
 0x3ba   : > { %v1916_v4 = vsub.f32 %v5158_v35, %v1884_v21 }
 0x3bb   : > { %2029 = vadd.xlane.f32.xlu0 %v1979_v10  ;;  %v1842_v15 = vpop.xlane.xlu0 %1841 }
 0x3bc   : > { %v5468_v18 = vsel %vm451_vm0, %v1916_v4, 0.0  ;;  %v1885_v43 = vmul.f32 0.010416667, %v1842_v15 }
 0x3bd   : > { %v1980_v44 = vmul.f32 %v5468_v18, %v5468_v18 }
 0x3be   : > { %v1917_v2 = vsub.f32 %v5162_v7, %v1885_v43 }
 0x3bf   : > { %v1844_v58 = vpop.xlane.xlu1 %1843  ;;  %2031 = vadd.xlane.f32.xlu1 %v1980_v44 }
 0x3c0   : > { %v5475_v57 = vsel %vm451_vm0, %v1917_v2, 0.0  ;;  %v1886_v11 = vmul.f32 0.010416667, %v1844_v58 }
 0x3c1   : > { %v1981_v35 = vmul.f32 %v5475_v57, %v5475_v57 }
 0x3c2   : > { %v1918_v45 = vsub.f32 %v5166_v8, %v1886_v11 }
 0x3c3   : > { %2033 = vadd.xlane.f32.xlu0 %v1981_v35  ;;  %v1846_v53 = vpop.xlane.xlu0 %1845 }
 0x3c4   : > { %v5482_v3 = vsel %vm451_vm0, %v1918_v45, 0.0  ;;  %v1887_v9 = vmul.f32 0.010416667, %v1846_v53 }
 0x3c5   : > { %v1982_v7 = vmul.f32 %v5482_v3, %v5482_v3 }
 0x3c6   : > { %v1919_v51 = vsub.f32 %v5173_v33, %v1887_v9 }
 0x3c7   : > { %v1848_v22 = vpop.xlane.xlu1 %1847  ;;  %2035 = vadd.xlane.f32.xlu1 %v1982_v7  ;;  %v1808_v20 = vpop.xlane.xlu0 %1807 }
 0x3c8   : > { %v5489_v32 = vsel %vm451_vm0, %v1919_v51, 0.0  ;;  %v1888_v8 = vmul.f32 0.010416667, %v1848_v22  ;;  %v1868_v60 = vmul.f32 0.010416667, %v1808_v20 }
 0x3c9   : > { %v1983_v50 = vmul.f32 %v5489_v32, %v5489_v32 }
 0x3ca   : > { %v1920_v5 = vsub.f32 %v5187_v47, %v1888_v8  ;;  %v1900_v62 = vsub.f32 %v5184_v38, %v1868_v60 }
 0x3cb   : > { %v1850_v26 = vpop.xlane.xlu1 %1849  ;;  %2037 = vadd.xlane.f32.xlu0 %v1983_v50  ;;  %v1810_v46 = vpop.xlane.xlu0 %1809 }
 0x3cc   : > { %v5497_v33 = vsel %vm451_vm0, %v1920_v5, 0.0  ;;  %v5501_v14 = vsel %vm451_vm0, %v1900_v62, 0.0  ;;  %v1889_v36 = vmul.f32 0.010416667, %v1850_v26  ;;  %v1869_v63 = vmul.f32 0.010416667, %v1810_v46 }
 0x3cd   : > { %v1984_v24 = vmul.f32 %v5497_v33, %v5497_v33  ;;  %v1964_v47 = vmul.f32 %v5501_v14, %v5501_v14 }
 0x3ce   : > { %v1921_v38 = vsub.f32 %v5202_v25, %v1889_v36  ;;  %v1901_v39 = vsub.f32 %v5199_v59, %v1869_v63 }
 0x3cf   : > { %v1852_v34 = vpop.xlane.xlu1 %1851  ;;  %2039 = vadd.xlane.f32.xlu1 %v1984_v24  ;;  %1999 = vadd.xlane.f32.xlu0 %v1964_v47  ;;  %v1812_v21 = vpop.xlane.xlu0 %1811 }
 0x3d0   : > { %v5511_v10 = vsel %vm451_vm0, %v1921_v38, 0.0  ;;  %v5515_v4 = vsel %vm451_vm0, %v1901_v39, 0.0  ;;  %v1890_v15 = vmul.f32 0.010416667, %v1852_v34  ;;  %v1870_v43 = vmul.f32 0.010416667, %v1812_v21 }
 0x3d1   : > { %v1985_v44 = vmul.f32 %v5511_v10, %v5511_v10  ;;  %v1965_v59 = vmul.f32 %v5515_v4, %v5515_v4 }
 0x3d2   : > { %v1922_v25 = vsub.f32 %v5214_v16, %v1890_v15  ;;  %v1902_v2 = vsub.f32 %v5211_v12, %v1870_v43 }
 0x3d3   : > { %v1854_v58 = vpop.xlane.xlu1 %1853  ;;  %2041 = vadd.xlane.f32.xlu1 %v1985_v44  ;;  %2001 = vadd.xlane.f32.xlu0 %v1965_v59  ;;  %v1814_v11 = vpop.xlane.xlu0 %1813 }
 0x3d4   : > { %v5525_v35 = vsel %vm451_vm0, %v1922_v25, 0.0  ;;  %v5529_v45 = vsel %vm451_vm0, %v1902_v2, 0.0  ;;  %v1891_v53 = vmul.f32 0.010416667, %v1854_v58  ;;  %v1871_v9 = vmul.f32 0.010416667, %v1814_v11 }
 0x3d5   : > { %v1986_v7 = vmul.f32 %v5525_v35, %v5525_v35  ;;  %v1966_v12 = vmul.f32 %v5529_v45, %v5529_v45 }
 0x3d6   : > { %v1923_v16 = vsub.f32 %v5229_v30, %v1891_v53  ;;  %v1903_v51 = vsub.f32 %v5226_v0, %v1871_v9 }
 0x3d7   : > { %v1856_v22 = vpop.xlane.xlu1 %1855  ;;  %2043 = vadd.xlane.f32.xlu1 %v1986_v7  ;;  %2003 = vadd.xlane.f32.xlu0 %v1966_v12  ;;  %v1816_v20 = vpop.xlane.xlu0 %1815 }
 0x3d8   : > { %v5539_v8 = vsel %vm451_vm0, %v1923_v16, 0.0  ;;  %v5543_v60 = vsel %vm451_vm0, %v1903_v51, 0.0  ;;  %v1892_v50 = vmul.f32 0.010416667, %v1856_v22  ;;  %v1872_v5 = vmul.f32 0.010416667, %v1816_v20 }
 0x3d9   : > { %v1987_v62 = vmul.f32 %v5539_v8, %v5539_v8  ;;  %v1967_v0 = vmul.f32 %v5543_v60, %v5543_v60 }
 0x3da   : > { %v1924_v30 = vsub.f32 %v5241_v1, %v1892_v50  ;;  %v1904_v26 = vsub.f32 %v5238_v37, %v1872_v5 }
 0x3db   : > { %v1858_v46 = vpop.xlane.xlu1 %1857  ;;  %2045 = vadd.xlane.f32.xlu1 %v1987_v62  ;;  %2005 = vadd.xlane.f32.xlu0 %v1967_v0 }
 0x3dc   : > { %v5553_v36 = vsel %vm451_vm0, %v1924_v30, 0.0  ;;  %v5557_v63 = vsel %vm451_vm0, %v1904_v26, 0.0  ;;  %v1893_v24 = vmul.f32 0.010416667, %v1858_v46  ;;  %v5600_v30 = vld [vmem:[%s6040_s8] ss:$0 sm:$0xff] }
 0x3dd   : > { %v1988_v47 = vmul.f32 %v5553_v36, %v5553_v36  ;;  %v1968_v1 = vmul.f32 %v5557_v63, %v5557_v63 }
 0x3de   : > { %v1925_v37 = vsub.f32 %v5252_v52, %v1893_v24 }
 0x3df   : > { %v1860_v38 = vpop.xlane.xlu1 %1859  ;;  %2047 = vadd.xlane.f32.xlu1 %v1988_v47  ;;  %2007 = vadd.xlane.f32.xlu0 %v1968_v1 }
 0x3e0   : > { %v5566_v39 = vsel %vm451_vm0, %v1925_v37, 0.0  ;;  %v1894_v34 = vmul.f32 0.010416667, %v1860_v38 }
 0x3e1   : > { %v1989_v21 = vmul.f32 %v5566_v39, %v5566_v39 }
 0x3e2   : > { %v1926_v15 = vsub.f32 %v5262_v61, %v1894_v34 }
 0x3e3   : > { %2049 = vadd.xlane.f32.xlu1 %v1989_v21  ;;  %v1862_v43 = vpop.xlane.xlu1 %1861 }
 0x3e4   : > { %v5573_v44 = vsel %vm451_vm0, %v1926_v15, 0.0  ;;  %v1895_v52 = vmul.f32 0.010416667, %v1862_v43 }
 0x3e5   : > { %v1990_v59 = vmul.f32 %v5573_v44, %v5573_v44 }
 0x3e6   : > { %v1927_v25 = vsub.f32 %v5272_v23, %v1895_v52 }
 0x3e7   : > { %2051 = vadd.xlane.f32.xlu1 %v1990_v59  ;;  %v1864_v2 = vpop.xlane.xlu1 %1863 }
 0x3e8   : > { %v5580_v58 = vsel %vm451_vm0, %v1927_v25, 0.0  ;;  %v1896_v11 = vmul.f32 0.010416667, %v1864_v2 }
 0x3e9   : > { %v1991_v61 = vmul.f32 %v5580_v58, %v5580_v58 }
 0x3ea   : > { %v1928_v53 = vsub.f32 %v5279_v19, %v1896_v11 }
 0x3eb   : > { %2053 = vadd.xlane.f32.xlu1 %v1991_v61 }
 0x3ec   : > { %v5587_v9 = vsel %vm451_vm0, %v1928_v53, 0.0 }
 0x3ed   : > { %v1992_v23 = vmul.f32 %v5587_v9, %v5587_v9 }
 0x3ef   : > { %2055 = vadd.xlane.f32.xlu1 %v1992_v23 }
 0x3fc   : > { %v1994_v7 = vpop.xlane.xlu0 %1993 }
 0x3fd   : > { %v2057_v12 = vmul.f32 0.010416667, %v1994_v7 }
 0x3ff   : > { %v2089_v16 = vadd.f32 1e-05, %v2057_v12 }
 0x400   : > { %v1996_v51 = vpop.xlane.xlu0 %1995 }
 0x401   : > { %3728 = vrsqrt.f32 %v2089_v16  ;;  %v2058_v22 = vmul.f32 0.010416667, %v1996_v51 }
 0x403   : > { %v2090_v20 = vadd.f32 1e-05, %v2058_v22 }
 0x404   : > { %v1998_v50 = vpop.xlane.xlu0 %1997 }
 0x405   : > { %3730 = vrsqrt.f32 %v2090_v20  ;;  %v2059_v5 = vmul.f32 0.010416667, %v1998_v50 }
 0x407   : > { %v2091_v19 = vadd.f32 1e-05, %v2059_v5 }
 0x409   : > { %3732 = vrsqrt.f32 %v2091_v19 }
 0x40e   : > { %v3729_v62 = vpop.eup %3728 }
 0x40f   : > { %v2153_v0 = vmul.f32 %v3729_v62, %v5301_v17 }
 0x411   : > { %v2191_v26 = vmul.f32 %v5594_v41, %v2153_v0 }
 0x412   : > { %v3731_v46 = vpop.eup %3730 }
 0x413   : > { %v2154_v24 = vmul.f32 %v3731_v46, %v5316_v49  ;;  %v5605_v47 = vadd.f32 %v5600_v30, %v2191_v26 }
 0x415   : > { %3447 = vmatprep.mubr.f32.mxu0 %v5605_v47  ;;  %v2192_v1 = vmul.f32 %v5594_v41, %v2154_v24 }
 0x416   : > { %v3733_v37 = vpop.eup %3732 }
 0x417   : > { %v5610_v17 = vadd.f32 %v5600_v30, %v2192_v1  ;;  %v2155_v38 = vmul.f32 %v3733_v37, %v5325_v48 }
 0x419   : > { %3448 = vmatmul.mubr.f32.vlgmr.msra.gmra.mxu0 %v5610_v17  ;;  %v2193_v34 = vmul.f32 %v5594_v41, %v2155_v38 }
 0x41b   : > { %v5616_v21 = vadd.f32 %v5600_v30, %v2193_v34 }
 0x41c   : > { %v2010_v49 = vpop.xlane.xlu0 %2009 }
 0x41d   : > { %6059 = vst [vmem:[#allocation2_spill] sm:$0xff] %v5616_v21  ;;  %3450 = vmatprep.mubr.f32.mxu0 %v5616_v21  ;;  %v2065_v15 = vmul.f32 0.010416667, %v2010_v49 }
 0x41f   : > { %v2097_v43 = vadd.f32 1e-05, %v2065_v15 }
 0x420   : > { %v2012_v52 = vpop.xlane.xlu1 %2011 }
 0x421   : > { %3734 = vrsqrt.f32 %v2097_v43  ;;  %v2066_v59 = vmul.f32 0.010416667, %v2012_v52 }
 0x423   : > { %v2098_v25 = vadd.f32 1e-05, %v2066_v59 }
 0x424   : > { %v2014_v2 = vpop.xlane.xlu0 %2013 }
 0x425   : > { %3736 = vrsqrt.f32 %v2098_v25  ;;  %v2067_v11 = vmul.f32 0.010416667, %v2014_v2 }
 0x427   : > { %v2099_v48 = vadd.f32 1e-05, %v2067_v11 }
 0x428   : > { %v2016_v61 = vpop.xlane.xlu1 %2015 }
 0x429   : > { %3738 = vrsqrt.f32 %v2099_v48  ;;  %v2068_v53 = vmul.f32 0.010416667, %v2016_v61 }
 0x42b   : > { %v2100_v23 = vadd.f32 1e-05, %v2068_v53 }
 0x42c   : > { %v2018_v7 = vpop.xlane.xlu0 %2017 }
 0x42d   : > { %3740 = vrsqrt.f32 %v2100_v23  ;;  %v2069_v12 = vmul.f32 0.010416667, %v2018_v7 }
 0x42e   : > { %v3735_v16 = vpop.eup %3734 }
 0x42f   : > { %v2101_v51 = vadd.f32 1e-05, %v2069_v12  ;;  %v2161_v22 = vmul.f32 %v3735_v16, %v5372_v27 }
 0x430   : > { %v2020_v20 = vpop.xlane.xlu1 %2019 }
 0x431   : > { %3742 = vrsqrt.f32 %v2101_v51  ;;  %v2070_v50 = vmul.f32 0.010416667, %v2020_v20  ;;  %v2199_v5 = vmul.f32 %v5594_v41, %v2161_v22 }
 0x432   : > { %v3737_v19 = vpop.eup %3736 }
 0x433   : > { %v2162_v62 = vmul.f32 %v3737_v19, %v5390_v40  ;;  %v2102_v0 = vadd.f32 1e-05, %v2070_v50  ;;  %v5623_v26 = vadd.f32 %v5600_v30, %v2199_v5 }
 0x434   : > { %v2022_v46 = vpop.xlane.xlu0 %2021 }
 0x435   : > { %3744 = vrsqrt.f32 %v2102_v0  ;;  %v2071_v24 = vmul.f32 0.010416667, %v2022_v46  ;;  %3459 = vmatprep.mubr.f32.mxu1 %v5623_v26  ;;  %v2200_v1 = vmul.f32 %v5594_v41, %v2162_v62 }
 0x436   : > { %v3739_v27 = vpop.eup %3738 }
 0x437   : > { %v2103_v37 = vadd.f32 1e-05, %v2071_v24  ;;  %v5628_v38 = vadd.f32 %v5600_v30, %v2200_v1  ;;  %v2163_v34 = vmul.f32 %v3739_v27, %v5403_v6 }
 0x438   : > { %v2024_v49 = vpop.xlane.xlu1 %2023 }
 0x439   : > { %3746 = vrsqrt.f32 %v2103_v37  ;;  %v2072_v40 = vmul.f32 0.010416667, %v2024_v49  ;;  %3460 = vmatmul.mubr.f32.vlgmr.msra.gmra.mxu1 %v5628_v38  ;;  %v2201_v15 = vmul.f32 %v5594_v41, %v2163_v34 }
 0x43a   : > { %v3741_v43 = vpop.eup %3740 }
 0x43b   : > { %v2104_v52 = vadd.f32 1e-05, %v2072_v40  ;;  %v5634_v59 = vadd.f32 %v5600_v30, %v2201_v15  ;;  %v2164_v25 = vmul.f32 %v3741_v43, %v5412_v29 }
 0x43c   : > { %v2026_v2 = vpop.xlane.xlu0 %2025 }
 0x43d   : > { %3748 = vrsqrt.f32 %v2104_v52  ;;  %v2073_v11 = vmul.f32 0.010416667, %v2026_v2  ;;  %3462 = vmatprep.mubr.f32.mxu1 %v5634_v59  ;;  %v2202_v6 = vmul.f32 %v5594_v41, %v2164_v25 }
 0x43e   : > { %v3743_v48 = vpop.eup %3742 }
 0x43f   : > { %v2105_v61 = vadd.f32 1e-05, %v2073_v11  ;;  %v5640_v53 = vadd.f32 %v5600_v30, %v2202_v6  ;;  %v2165_v23 = vmul.f32 %v3743_v48, %v5419_v31 }
 0x440   : > { %v2028_v7 = vpop.xlane.xlu1 %2027 }
 0x441   : > { %3750 = vrsqrt.f32 %v2105_v61  ;;  %v2074_v12 = vmul.f32 0.010416667, %v2028_v7  ;;  %3463 = vmatmul.mubr.f32.gmra.mxu1 %v5640_v53  ;;  %v2203_v29 = vmul.f32 %v5594_v41, %v2165_v23 }
 0x442   : > { %v3745_v16 = vpop.eup %3744 }
 0x443   : > { %v2106_v51 = vadd.f32 1e-05, %v2074_v12  ;;  %v5646_v22 = vadd.f32 %v5600_v30, %v2203_v29  ;;  %v2166_v20 = vmul.f32 %v3745_v16, %v5426_v28 }
 0x444   : > { %v2030_v50 = vpop.xlane.xlu0 %2029 }
 0x445   : > { %3752 = vrsqrt.f32 %v2106_v51  ;;  %v2075_v5 = vmul.f32 0.010416667, %v2030_v50  ;;  %3465 = vmatprep.mubr.f32.mxu1 %v5646_v22  ;;  %v2204_v31 = vmul.f32 %v5594_v41, %v2166_v20 }
 0x446   : > { %v3747_v19 = vpop.eup %3746 }
 0x447   : > { %v2107_v62 = vadd.f32 1e-05, %v2075_v5  ;;  %v5652_v0 = vadd.f32 %v5600_v30, %v2204_v31  ;;  %v2167_v46 = vmul.f32 %v3747_v19, %v5433_v56  ;;  %v5679_v5 = vpop.f32.mrf.mxu0 }
 0x448   : > { %v2032_v24 = vpop.xlane.xlu1 %2031 }
 0x449   : > { %3754 = vrsqrt.f32 %v2107_v62  ;;  %v2076_v1 = vmul.f32 0.010416667, %v2032_v24  ;;  %3466 = vmatmul.mubr.f32.gmra.mxu1 %v5652_v0  ;;  %v2205_v28 = vmul.f32 %v5594_v41, %v2167_v46 }
 0x44a   : > { %v3749_v27 = vpop.eup %3748 }
 0x44b   : > { %v2108_v37 = vadd.f32 1e-05, %v2076_v1  ;;  %v5658_v34 = vadd.f32 %v5600_v30, %v2205_v28  ;;  %v2168_v49 = vmul.f32 %v3749_v27, %v5440_v42 }
 0x44c   : > { %v2034_v40 = vpop.xlane.xlu0 %2033 }
 0x44d   : > { %3756 = vrsqrt.f32 %v2108_v37  ;;  %v2077_v15 = vmul.f32 0.010416667, %v2034_v40  ;;  %3468 = vmatprep.mubr.f32.mxu1 %v5658_v34  ;;  %v2206_v56 = vmul.f32 %v5594_v41, %v2168_v49 }
 0x44e   : > { %v3751_v43 = vpop.eup %3750 }
 0x44f   : > { %v2109_v52 = vadd.f32 1e-05, %v2077_v15  ;;  %v5664_v25 = vadd.f32 %v5600_v30, %v2206_v56  ;;  %v2169_v2 = vmul.f32 %v3751_v43, %v5447_v13 }
 0x450   : > { %v2036_v11 = vpop.xlane.xlu1 %2035 }
 0x451   : > { %3758 = vrsqrt.f32 %v2109_v52  ;;  %v2078_v6 = vmul.f32 0.010416667, %v2036_v11  ;;  %3469 = vmatmul.mubr.f32.gmra.mxu1 %v5664_v25  ;;  %v2207_v42 = vmul.f32 %v5594_v41, %v2169_v2 }
 0x452   : > { %v3753_v48 = vpop.eup %3752 }
 0x453   : > { %v2110_v61 = vadd.f32 1e-05, %v2078_v6  ;;  %v5670_v23 = vadd.f32 %v5600_v30, %v2207_v42  ;;  %v2170_v7 = vmul.f32 %v3753_v48, %v5454_v55 }
 0x454   : > { %v2038_v12 = vpop.xlane.xlu0 %2037 }
 0x455   : > { %3760 = vrsqrt.f32 %v2110_v61  ;;  %v2079_v29 = vmul.f32 0.010416667, %v2038_v12  ;;  %3471 = vmatprep.mubr.f32.mxu1 %v5670_v23  ;;  %v2208_v13 = vmul.f32 %v5594_v41, %v2170_v7 }
 0x456   : > { %v3755_v16 = vpop.eup %3754 }
 0x457   : > { %v2111_v51 = vadd.f32 1e-05, %v2079_v29  ;;  %v5676_v20 = vadd.f32 %v5600_v30, %v2208_v13  ;;  %v2171_v50 = vmul.f32 %v3755_v16, %v5461_v54  ;;  %v5687_v54 = vpop.f32.mrf.mxu0 }
 0x458   : > { %v2040_v31 = vpop.xlane.xlu1 %2039  ;;  %v2000_v19 = vpop.xlane.xlu0 %1999 }
 0x459   : > { %3762 = vrsqrt.f32 %v2111_v51  ;;  %v2080_v55 = vmul.f32 0.010416667, %v2040_v31  ;;  %v2060_v62 = vmul.f32 0.010416667, %v2000_v19  ;;  %3472 = vmatmul.mubr.f32.gmra.mxu1 %v5676_v20  ;;  %v2209_v46 = vmul.f32 %v5594_v41, %v2171_v50  ;;  %v5695_v42 = vpop.f32.mrf.mxu0 }
 0x45a   : > { %v3757_v24 = vpop.eup %3756 }
 0x45b   : > { %v2112_v1 = vadd.f32 1e-05, %v2080_v55  ;;  %v2092_v28 = vadd.f32 1e-05, %v2060_v62  ;;  %v5684_v27 = vadd.f32 %v5600_v30, %v2209_v46  ;;  %v2172_v37 = vmul.f32 %v3757_v24, %v5468_v18  ;;  %v5703_v31 = vpop.f32.mrf.mxu0 }
 0x45c   : > { %v2042_v49 = vpop.xlane.xlu1 %2041  ;;  %v2002_v40 = vpop.xlane.xlu0 %2001 }
 0x45d   : > { %3764 = vrsqrt.f32 %v2112_v1  ;;  %v2081_v15 = vmul.f32 0.010416667, %v2042_v49  ;;  %v2061_v56 = vmul.f32 0.010416667, %v2002_v40  ;;  %3474 = vmatprep.mubr.f32.mxu1 %v5684_v27  ;;  %v2210_v43 = vmul.f32 %v5594_v41, %v2172_v37  ;;  %v5711_v40 = vpop.f32.mrf.mxu0 }
 0x45e   : > { %v3759_v52 = vpop.eup %3758  ;;  %3766 = vrsqrt.f32 %v2092_v28 }
 0x45f   : > { %v2113_v2 = vadd.f32 1e-05, %v2081_v15  ;;  %v2093_v11 = vadd.f32 1e-05, %v2061_v56  ;;  %v5692_v6 = vadd.f32 %v5600_v30, %v2210_v43  ;;  %v2173_v18 = vmul.f32 %v3759_v52, %v5475_v57 }
 0x460   : > { %v2044_v48 = vpop.xlane.xlu1 %2043  ;;  %v2004_v61 = vpop.xlane.xlu0 %2003 }
 0x461   : > { %3768 = vrsqrt.f32 %v2113_v2  ;;  %v2082_v7 = vmul.f32 0.010416667, %v2044_v48  ;;  %v2062_v12 = vmul.f32 0.010416667, %v2004_v61  ;;  %3475 = vmatmul.mubr.f32.gmra.mxu1 %v5692_v6  ;;  %v2211_v29 = vmul.f32 %v5594_v41, %v2173_v18 }
 0x462   : > { %v3761_v13 = vpop.eup %3760  ;;  %3770 = vrsqrt.f32 %v2093_v11 }
 0x463   : > { %v2114_v16 = vadd.f32 1e-05, %v2082_v7  ;;  %v2094_v51 = vadd.f32 1e-05, %v2062_v12  ;;  %v5700_v50 = vadd.f32 %v5600_v30, %v2211_v29  ;;  %v2174_v57 = vmul.f32 %v3761_v13, %v5482_v3  ;;  %v5720_v13 = vpop.f32.mrf.mxu0 }
 0x464   : > { %v2046_v19 = vpop.xlane.xlu1 %2045  ;;  %v2006_v55 = vpop.xlane.xlu0 %2005 }
 0x465   : > { %3772 = vrsqrt.f32 %v2114_v16  ;;  %v2083_v62 = vmul.f32 0.010416667, %v2046_v19  ;;  %v2063_v46 = vmul.f32 0.010416667, %v2006_v55  ;;  %3477 = vmatprep.mubr.f32.mxu1 %v5700_v50  ;;  %v2212_v24 = vmul.f32 %v5594_v41, %v2174_v57 }
 0x466   : > { %v3763_v1 = vpop.eup %3762  ;;  %3774 = vrsqrt.f32 %v2094_v51 }
 0x467   : > { %v2115_v28 = vadd.f32 1e-05, %v2083_v62  ;;  %v2095_v37 = vadd.f32 1e-05, %v2063_v46  ;;  %v5708_v49 = vadd.f32 %v5600_v30, %v2212_v24  ;;  %v2175_v3 = vmul.f32 %v3763_v1, %v5489_v32 }
 0x468   : > { %v2048_v15 = vpop.xlane.xlu1 %2047  ;;  %v2008_v56 = vpop.xlane.xlu0 %2007 }
 0x469   : > { %3776 = vrsqrt.f32 %v2115_v28  ;;  %v2084_v43 = vmul.f32 0.010416667, %v2048_v15  ;;  %v2064_v52 = vmul.f32 0.010416667, %v2008_v56  ;;  %3478 = vmatmul.mubr.f32.gmra.mxu1 %v5708_v49  ;;  %v2213_v2 = vmul.f32 %v5594_v41, %v2175_v3  ;;  %v5733_v28 = vpop.f32.mrf.mxu0 }
 0x46a   : > { %v3765_v11 = vpop.eup %3764  ;;  %3778 = vrsqrt.f32 %v2095_v37 }
 0x46b   : > { %v3767_v18 = vpop.eup %3766  ;;  %v2116_v48 = vadd.f32 1e-05, %v2084_v43  ;;  %v2096_v61 = vadd.f32 1e-05, %v2064_v52  ;;  %v5716_v7 = vadd.f32 %v5600_v30, %v2213_v2  ;;  %v2176_v32 = vmul.f32 %v3765_v11, %v5497_v33 }
 0x46c   : > { %v2050_v12 = vpop.xlane.xlu1 %2049  ;;  %v2156_v29 = vmul.f32 %v3767_v18, %v5501_v14 }
 0x46d   : > { %6060 = vst [vmem:[#allocation3_spill] sm:$0xff] %v5716_v7  ;;  %3780 = vrsqrt.f32 %v2116_v48  ;;  %v2085_v16 = vmul.f32 0.010416667, %v2050_v12  ;;  %3480 = vmatprep.mubr.f32.mxu1 %v5716_v7  ;;  %v2214_v51 = vmul.f32 %v5594_v41, %v2176_v32  ;;  %v5747_v48 = vpop.f32.mrf.mxu0 }
 0x46e   : > { %v3769_v57 = vpop.eup %3768  ;;  %3782 = vrsqrt.f32 %v2096_v61  ;;  %v2194_v19 = vmul.f32 %v5594_v41, %v2156_v29 }
 0x46f   : > { %v3771_v55 = vpop.eup %3770  ;;  %v2117_v62 = vadd.f32 1e-05, %v2085_v16  ;;  %v5726_v46 = vadd.f32 %v5600_v30, %v2214_v51  ;;  %v2177_v33 = vmul.f32 %v3769_v57, %v5511_v10 }
 0x470   : > { %v2052_v14 = vpop.xlane.xlu1 %2051  ;;  %v5730_v24 = vadd.f32 %v5600_v30, %v2194_v19  ;;  %v2157_v1 = vmul.f32 %v3771_v55, %v5515_v4 }
 0x471   : > { %3784 = vrsqrt.f32 %v2117_v62  ;;  %v2086_v37 = vmul.f32 0.010416667, %v2052_v14  ;;  %3481 = vmatmul.mubr.f32.gmra.mxu1 %v5726_v46  ;;  %v2215_v3 = vmul.f32 %v5594_v41, %v2177_v33  ;;  %v5761_v62 = vpop.f32.mrf.mxu0 }
 0x472   : > { %v3773_v15 = vpop.eup %3772  ;;  %3451 = vmatmul.mubr.f32.gmra.mxu0 %v5730_v24  ;;  %v2195_v56 = vmul.f32 %v5594_v41, %v2157_v1 }
 0x473   : > { %v3775_v10 = vpop.eup %3774  ;;  %v2118_v43 = vadd.f32 1e-05, %v2086_v37  ;;  %v5740_v52 = vadd.f32 %v5600_v30, %v2215_v3  ;;  %v2178_v4 = vmul.f32 %v3773_v15, %v5525_v35 }
 0x474   : > { %v2054_v2 = vpop.xlane.xlu1 %2053  ;;  %v5744_v11 = vadd.f32 %v5600_v30, %v2195_v56  ;;  %v2158_v18 = vmul.f32 %v3775_v10, %v5529_v45 }
 0x475   : > { %6061 = vst [vmem:[#allocation4_spill] sm:$0xff] %v5740_v52  ;;  %3786 = vrsqrt.f32 %v2118_v43  ;;  %v2087_v61 = vmul.f32 0.010416667, %v2054_v2  ;;  %3483 = vmatprep.mubr.f32.mxu1 %v5740_v52  ;;  %v2216_v32 = vmul.f32 %v5594_v41, %v2178_v4  ;;  %v5775_v43 = vpop.f32.mrf.mxu0 }
 0x476   : > { %6062 = vst [vmem:[#allocation5_spill] sm:$0xff] %v5744_v11  ;;  %v3777_v12 = vpop.eup %3776  ;;  %3453 = vmatprep.mubr.f32.mxu0 %v5744_v11  ;;  %v2196_v29 = vmul.f32 %v5594_v41, %v2158_v18 }
 0x477   : > { %v3779_v35 = vpop.eup %3778  ;;  %v2119_v16 = vadd.f32 1e-05, %v2087_v61  ;;  %v5754_v51 = vadd.f32 %v5600_v30, %v2216_v32  ;;  %v2179_v45 = vmul.f32 %v3777_v12, %v5539_v8 }
 0x478   : > { %v2056_v57 = vpop.xlane.xlu1 %2055  ;;  %v5758_v19 = vadd.f32 %v5600_v30, %v2196_v29  ;;  %v2159_v55 = vmul.f32 %v3779_v35, %v5543_v60 }
 0x479   : > { %6063 = vst [vmem:[#allocation6_spill] sm:$0xff] %v5754_v51  ;;  %3788 = vrsqrt.f32 %v2119_v16  ;;  %v2088_v33 = vmul.f32 0.010416667, %v2056_v57  ;;  %3484 = vmatmul.mubr.f32.gmra.mxu1 %v5754_v51  ;;  %v2217_v14 = vmul.f32 %v5594_v41, %v2179_v45 }
 0x47a   : > { %6064 = vst [vmem:[#allocation7_spill] sm:$0xff] %v5758_v19  ;;  %v3781_v1 = vpop.eup %3780  ;;  %3454 = vmatmul.mubr.f32.gmra.mxu0 %v5758_v19  ;;  %v2197_v37 = vmul.f32 %v5594_v41, %v2159_v55 }
 0x47b   : > { %v3783_v8 = vpop.eup %3782  ;;  %v2120_v3 = vadd.f32 1e-05, %v2088_v33  ;;  %v5768_v15 = vadd.f32 %v5600_v30, %v2217_v14  ;;  %v2180_v60 = vmul.f32 %v3781_v1, %v5553_v36 }
 0x47c   : > { %v5772_v56 = vadd.f32 %v5600_v30, %v2197_v37  ;;  %v2160_v10 = vmul.f32 %v3783_v8, %v5557_v63  ;;  %v5788_v63 = vpop.f32.mrf.mxu0 }
 0x47d   : > { %6065 = vst [vmem:[#allocation8_spill] sm:$0xff] %v5768_v15  ;;  %3790 = vrsqrt.f32 %v2120_v3  ;;  %3486 = vmatprep.mubr.f32.mxu1 %v5768_v15  ;;  %v2218_v4 = vmul.f32 %v5594_v41, %v2180_v60 }
 0x47e   : > { %6066 = vst [vmem:[#allocation9_spill] sm:$0xff] %v5772_v56  ;;  %v3785_v2 = vpop.eup %3784  ;;  %3456 = vmatprep.mubr.f32.mxu0 %v5772_v56  ;;  %v2198_v18 = vmul.f32 %v5594_v41, %v2160_v10  ;;  %v5797_v45 = vpop.f32.mrf.mxu0 }
 0x47f   : > { %v5782_v61 = vadd.f32 %v5600_v30, %v2218_v4  ;;  %v2181_v36 = vmul.f32 %v3785_v2, %v5566_v39 }
 0x480   : > { %v5786_v32 = vadd.f32 %v5600_v30, %v2198_v18  ;;  %v5805_v14 = vpop.f32.mrf.mxu0 }
 0x481   : > { %6067 = vst [vmem:[#allocation10_spill] sm:$0xff] %v5782_v61  ;;  %3487 = vmatmul.mubr.f32.gmra.mxu1 %v5782_v61  ;;  %v2219_v12 = vmul.f32 %v5594_v41, %v2181_v36 }
 0x482   : > { %6068 = vst [vmem:[#allocation11_spill] sm:$0xff] %v5786_v32  ;;  %v3787_v29 = vpop.eup %3786  ;;  %3457 = vmatmul.mubr.f32.gmra.mxu0 %v5786_v32  ;;  %v5813_v3 = vpop.f32.mrf.mxu0 }
 0x483   : > { %v5794_v35 = vadd.f32 %v5600_v30, %v2219_v12  ;;  %v2182_v16 = vmul.f32 %v3787_v29, %v5573_v44 }
 0x484   : > { %v5820_v10 = vpop.f32.mrf.mxu0 }
 0x485   : > { %6069 = vst [vmem:[#allocation12_spill] sm:$0xff] %v5794_v35  ;;  %3489 = vmatprep.mubr.f32.mxu1 %v5794_v35  ;;  %v2220_v39 = vmul.f32 %v5594_v41, %v2182_v16 }
 0x486   : > { %v3789_v57 = vpop.eup %3788  ;;  %v5823_v4 = vpop.f32.mrf.mxu0 }
 0x487   : > { %v5802_v55 = vadd.f32 %v5600_v30, %v2220_v39  ;;  %v2183_v33 = vmul.f32 %v3789_v57, %v5580_v58 }
 0x488   : > { %v5825_v2 = vpop.f32.mrf.mxu0 }
 0x489   : > { %6070 = vst [vmem:[#allocation13_spill] sm:$0xff] %v5802_v55  ;;  %3490 = vmatmul.mubr.f32.gmra.mxu1 %v5802_v55  ;;  %v2221_v1 = vmul.f32 %v5594_v41, %v2183_v33 }
 0x48a   : > { %v3791_v37 = vpop.eup %3790  ;;  %v5827_v18 = vpop.f32.mrf.mxu0 }
 0x48b   : > { %v5810_v44 = vadd.f32 %v5600_v30, %v2221_v1  ;;  %v2184_v8 = vmul.f32 %v3791_v37, %v5587_v9 }
 0x48c   : > { %v5829_v9 = vpop.f32.mrf.mxu0 }
 0x48d   : > { %6071 = vst [vmem:[#allocation14_spill] sm:$0xff] %v5810_v44  ;;  %3492 = vmatprep.mubr.f32.mxu1 %v5810_v44  ;;  %v2222_v60 = vmul.f32 %v5594_v41, %v2184_v8 }
 0x48e   : > { %v5831_v36 = vpop.f32.mrf.mxu0 }
 0x48f   : > { %v5818_v58 = vadd.f32 %v5600_v30, %v2222_v60 }
 0x490   : > { %v5833_v12 = vpop.f32.mrf.mxu0 }
 0x491   : > { %6072 = vst [vmem:[#allocation15_spill] sm:$0xff] %v5818_v58  ;;  %3493 = vmatmul.mubr.f32.gmra.mxu1 %v5818_v58  ;;  %v5860_v58 = vld [vmem:[%s6043_s11] ss:$0 sm:$0xff] }
 0x492   : > { %v5835_v41 = vpop.f32.mrf.mxu0 }
 0x494   : > { %v5837_v30 = vpop.f32.mrf.mxu0 }
 0x496   : > { %v5839_v29 = vpop.f32.mrf.mxu0 }
 0x498   : > { %v5841_v16 = vpop.f32.mrf.mxu0 }
 0x49a   : > { %v5843_v39 = vpop.f32.mrf.mxu0 }
 0x49c   : > { %v5845_v57 = vpop.f32.mrf.mxu0 }
 0x49e   : > { %v5847_v33 = vpop.f32.mrf.mxu0 }
 0x4a0   : > { %v5849_v1 = vpop.f32.mrf.mxu0 }
 0x4a2   : > { %v5851_v37 = vpop.f32.mrf.mxu0 }
 0x4a4   : > { %v5853_v8 = vpop.f32.mrf.mxu0 }
 0x4a6   : > { %v5855_v60 = vpop.f32.mrf.mxu0 }
 0x4d9   : > { %v3449_v44 = vpop.f32.mrf.mxu0 }
 0x4da   : > { %v2590_v35 = vadd.f32 %v3449_v44, %v5679_v5 }
 0x4db   : > { %v2584_v55 = vpop.f32.mrf.mxu0 }
 0x4dc   : > { %v2751_v15 = vadd.f32 %v5860_v58, %v2590_v35  ;;  %v2585_v56 = vadd.f32 %v2584_v55, %v5687_v54 }
 0x4de   : > { %v3206_v61 = vmul.f32 -1.442695, %v2751_v15  ;;  %v2750_v32 = vadd.f32 %v5860_v58, %v2585_v56 }
 0x4e0   : > { %3792 = vpow2.f32 %v3206_v61  ;;  %v3205_v52 = vmul.f32 -1.442695, %v2750_v32 }
 0x4e2   : > { %3794 = vpow2.f32 %v3205_v52 }
 0x4ed   : > { %v3793_v11 = vpop.eup %3792 }
 0x4ee   : > { %v2879_v19 = vadd.f32 1.0, %v3793_v11 }
 0x4ef   : > { %v3795_v51 = vpop.eup %3794 }
 0x4f0   : > { %3796 = vrcp.f32 %v2879_v19  ;;  %v2878_v21 = vadd.f32 1.0, %v3795_v51  ;;  %v3952_v51 = vld [vmem:[%s4074_s27 + $0x8] sm:$0xff] }
 0x4f2   : > { %3798 = vrcp.f32 %v2878_v21 }
 0x4f9   : > { %v3461_v5 = vpop.f32.mrf.mxu1 }
 0x4fa   : > { %v2630_v44 = vadd.f32 %v3461_v5, %v5761_v62  ;;  %v3953_v5 = vld [vmem:[%s4074_s27] sm:$0xff] }
 0x4fb   : > { %v2624_v35 = vpop.f32.mrf.mxu1 }
 0x4fc   : > { %v2759_v54 = vadd.f32 %v5860_v58, %v2630_v44  ;;  %v2625_v15 = vadd.f32 %v2624_v35, %v5775_v43 }
 0x4fd   : > { %v3797_v7 = vpop.eup %3796 }
 0x4fe   : > { %v3007_v56 = vsub.f32 1.0, %v3797_v7  ;;  %v3214_v61 = vmul.f32 -1.442695, %v2759_v54  ;;  %v2758_v11 = vadd.f32 %v5860_v58, %v2625_v15  ;;  %v2975_v19 = vmul.f32 %v3797_v7, %v5610_v17 }
 0x4ff   : > { %v3799_v52 = vpop.eup %3798 }
 0x500   : > { %v3039_v32 = vmul.f32 %v3952_v51, %v3007_v56  ;;  %v3006_v21 = vsub.f32 1.0, %v3799_v52  ;;  %3800 = vpow2.f32 %v3214_v61  ;;  %v3213_v62 = vmul.f32 -1.442695, %v2758_v11 }
 0x501   : > { %v2974_v55 = vmul.f32 %v3799_v52, %v5605_v47  ;;  %v3464_v35 = vpop.f32.mrf.mxu1 }
 0x502   : > { %v3071_v43 = vadd.f32 %v3039_v32, %v2975_v19  ;;  %v3038_v44 = vmul.f32 %v3953_v5, %v3006_v21  ;;  %3802 = vpow2.f32 %v3213_v62  ;;  %v2640_v17 = vadd.f32 %v3464_v35, %v5788_v63 }
 0x503   : > { %v2634_v54 = vpop.f32.mrf.mxu1 }
 0x504   : > { %3103 = vst [vmem:[%s5877_s25 + $0x8] sm:$0xff] %v3071_v43  ;;  %v3070_v7 = vadd.f32 %v3038_v44, %v2974_v55  ;;  %v2761_v15 = vadd.f32 %v5860_v58, %v2640_v17  ;;  %v2635_v56 = vadd.f32 %v2634_v54, %v5797_v45 }
 0x506   : > { %3102 = vst [vmem:[%s5877_s25] sm:$0xff] %v3070_v7  ;;  %v3216_v51 = vmul.f32 -1.442695, %v2761_v15  ;;  %v2760_v61 = vadd.f32 %v5860_v58, %v2635_v56 }
 0x508   : > { %3804 = vpow2.f32 %v3216_v51  ;;  %v3215_v11 = vmul.f32 -1.442695, %v2760_v61 }
 0x509   : > { %v3467_v47 = vpop.f32.mrf.mxu1 }
 0x50a   : > { %3806 = vpow2.f32 %v3215_v11  ;;  %v2650_v52 = vadd.f32 %v3467_v47, %v5805_v14 }
 0x50b   : > { %v2644_v19 = vpop.f32.mrf.mxu1 }
 0x50c   : > { %v2763_v63 = vadd.f32 %v5860_v58, %v2650_v52  ;;  %v2645_v32 = vadd.f32 %v2644_v19, %v5813_v3 }
 0x50d   : > { %v3801_v21 = vpop.eup %3800 }
 0x50e   : > { %v2887_v62 = vadd.f32 1.0, %v3801_v21  ;;  %v3218_v43 = vmul.f32 -1.442695, %v2763_v63  ;;  %v2762_v45 = vadd.f32 %v5860_v58, %v2645_v32 }
 0x50f   : > { %v3803_v55 = vpop.eup %3802 }
 0x510   : > { %3808 = vrcp.f32 %v2887_v62  ;;  %v2886_v5 = vadd.f32 1.0, %v3803_v55  ;;  %v3217_v44 = vmul.f32 -1.442695, %v2762_v45 }
 0x511   : > { %3810 = vpow2.f32 %v3218_v43  ;;  %v3470_v35 = vpop.f32.mrf.mxu1 }
 0x512   : > { %3812 = vrcp.f32 %v2886_v5  ;;  %v2660_v17 = vadd.f32 %v3470_v35, %v5820_v10 }
 0x513   : > { %3814 = vpow2.f32 %v3217_v44  ;;  %v2654_v14 = vpop.f32.mrf.mxu1 }
 0x514   : > { %v2765_v7 = vadd.f32 %v5860_v58, %v2660_v17  ;;  %v2655_v3 = vadd.f32 %v2654_v14, %v5823_v4 }
 0x515   : > { %v3805_v54 = vpop.eup %3804 }
 0x516   : > { %v2889_v15 = vadd.f32 1.0, %v3805_v54  ;;  %v3220_v56 = vmul.f32 -1.442695, %v2765_v7  ;;  %v2764_v51 = vadd.f32 %v5860_v58, %v2655_v3 }
 0x517   : > { %v3807_v61 = vpop.eup %3806 }
 0x518   : > { %3816 = vrcp.f32 %v2889_v15  ;;  %v2888_v11 = vadd.f32 1.0, %v3807_v61  ;;  %v3219_v47 = vmul.f32 -1.442695, %v2764_v51 }
 0x519   : > { %3818 = vpow2.f32 %v3220_v56  ;;  %v3473_v52 = vpop.f32.mrf.mxu1  ;;  %v3955_v56 = vld [vmem:[%s4074_s27 + $0x40] sm:$0xff] }
 0x51a   : > { %3820 = vrcp.f32 %v2888_v11  ;;  %v2670_v10 = vadd.f32 %v3473_v52, %v5825_v2  ;;  %v3954_v2 = vld [vmem:[%s4074_s27 + $0x48] sm:$0xff] }
 0x51b   : > { %3822 = vpow2.f32 %v3219_v47  ;;  %v2664_v19 = vpop.f32.mrf.mxu1 }
 0x51c   : > { %v2767_v63 = vadd.f32 %v5860_v58, %v2670_v10  ;;  %v2665_v4 = vadd.f32 %v2664_v19, %v5827_v18 }
 0x51d   : > { %v3809_v32 = vpop.eup %3808 }
 0x51e   : > { %v3811_v21 = vpop.eup %3810  ;;  %v3015_v62 = vsub.f32 1.0, %v3809_v32  ;;  %v3222_v43 = vmul.f32 -1.442695, %v2767_v63  ;;  %v2766_v45 = vadd.f32 %v5860_v58, %v2665_v4  ;;  %v2983_v35 = vmul.f32 %v3809_v32, %v5628_v38 }
 0x51f   : > { %v3813_v55 = vpop.eup %3812  ;;  %v2891_v5 = vadd.f32 1.0, %v3811_v21 }
 0x520   : > { %v3815_v44 = vpop.eup %3814  ;;  %v3047_v17 = vmul.f32 %v3954_v2, %v3015_v62  ;;  %v3014_v14 = vsub.f32 1.0, %v3813_v55  ;;  %3824 = vpow2.f32 %v3222_v43  ;;  %v3221_v18 = vmul.f32 -1.442695, %v2766_v45  ;;  %v3956_v43 = vld [vmem:[%s4074_s27 + $0x58] sm:$0xff] }
 0x521   : > { %3826 = vrcp.f32 %v2891_v5  ;;  %v2890_v7 = vadd.f32 1.0, %v3815_v44  ;;  %v3476_v3 = vpop.f32.mrf.mxu1  ;;  %v2982_v15 = vmul.f32 %v3813_v55, %v5623_v26 }
 0x522   : > { %v3079_v54 = vadd.f32 %v3047_v17, %v2983_v35  ;;  %v3046_v51 = vmul.f32 %v3955_v56, %v3014_v14  ;;  %v2680_v61 = vadd.f32 %v3476_v3, %v5829_v9  ;;  %v3957_v17 = vld [vmem:[%s4074_s27 + $0x50] sm:$0xff] }
 0x523   : > { %3828 = vrcp.f32 %v2890_v7  ;;  %v2674_v11 = vpop.f32.mrf.mxu1 }
 0x524   : > { %3111 = vst [vmem:[%s5877_s25 + $0x48] sm:$0xff] %v3079_v54  ;;  %v3078_v38 = vadd.f32 %v3046_v51, %v2982_v15  ;;  %3830 = vpow2.f32 %v3221_v18  ;;  %v2769_v47 = vadd.f32 %v5860_v58, %v2680_v61  ;;  %v2675_v52 = vadd.f32 %v2674_v11, %v5831_v36 }
 0x525   : > { %v3817_v10 = vpop.eup %3816 }
 0x526   : > { %v3819_v19 = vpop.eup %3818  ;;  %3110 = vst [vmem:[%s5877_s25 + $0x40] sm:$0xff] %v3078_v38  ;;  %v3017_v63 = vsub.f32 1.0, %v3817_v10  ;;  %v3224_v4 = vmul.f32 -1.442695, %v2769_v47  ;;  %v2768_v26 = vadd.f32 %v5860_v58, %v2675_v52  ;;  %v2985_v62 = vmul.f32 %v3817_v10, %v5640_v53  ;;  %v3958_v10 = vld [vmem:[%s4074_s27 + $0x68] sm:$0xff] }
 0x527   : > { %v3821_v32 = vpop.eup %3820  ;;  %v2893_v9 = vadd.f32 1.0, %v3819_v19 }
 0x528   : > { %v3823_v21 = vpop.eup %3822  ;;  %v3049_v45 = vmul.f32 %v3956_v43, %v3017_v63  ;;  %v3016_v55 = vsub.f32 1.0, %v3821_v32  ;;  %3832 = vpow2.f32 %v3224_v4  ;;  %v3223_v5 = vmul.f32 -1.442695, %v2768_v26 }
 0x529   : > { %3834 = vrcp.f32 %v2893_v9  ;;  %v2892_v36 = vadd.f32 1.0, %v3823_v21  ;;  %v3479_v44 = vpop.f32.mrf.mxu1  ;;  %v2984_v2 = vmul.f32 %v3821_v32, %v5634_v59 }
 0x52a   : > { %v3081_v35 = vadd.f32 %v3049_v45, %v2985_v62  ;;  %v3048_v14 = vmul.f32 %v3957_v17, %v3016_v55  ;;  %v2690_v7 = vadd.f32 %v3479_v44, %v5833_v12  ;;  %v3959_v62 = vld [vmem:[%s4074_s27 + $0x60] sm:$0xff] }
 0x52b   : > { %3836 = vrcp.f32 %v2892_v36  ;;  %v2684_v18 = vpop.f32.mrf.mxu1 }
 0x52c   : > { %3113 = vst [vmem:[%s5877_s25 + $0x58] sm:$0xff] %v3081_v35  ;;  %v3080_v53 = vadd.f32 %v3048_v14, %v2984_v2  ;;  %3838 = vpow2.f32 %v3223_v5  ;;  %v2771_v3 = vadd.f32 %v5860_v58, %v2690_v7  ;;  %v2685_v54 = vadd.f32 %v2684_v18, %v5835_v41 }
 0x52d   : > { %v3825_v15 = vpop.eup %3824 }
 0x52e   : > { %v3827_v56 = vpop.eup %3826  ;;  %3112 = vst [vmem:[%s5877_s25 + $0x50] sm:$0xff] %v3080_v53  ;;  %v2895_v51 = vadd.f32 1.0, %v3825_v15  ;;  %v3226_v61 = vmul.f32 -1.442695, %v2771_v3  ;;  %v2770_v59 = vadd.f32 %v5860_v58, %v2685_v54 }
 0x52f   : > { %v3019_v11 = vsub.f32 1.0, %v3827_v56  ;;  %v2987_v52 = vmul.f32 %v3827_v56, %v5652_v0  ;;  %v3960_v56 = vld [vmem:[%s4074_s27 + $0x78] sm:$0xff] }
 0x530   : > { %v3829_v38 = vpop.eup %3828  ;;  %3840 = vrcp.f32 %v2895_v51  ;;  %v3225_v12 = vmul.f32 -1.442695, %v2770_v59 }
 0x531   : > { %v3831_v47 = vpop.eup %3830  ;;  %v3051_v19 = vmul.f32 %v3958_v10, %v3019_v11  ;;  %v3018_v63 = vsub.f32 1.0, %v3829_v38  ;;  %3842 = vpow2.f32 %v3226_v61  ;;  %v3482_v41 = vpop.f32.mrf.mxu1  ;;  %v2986_v21 = vmul.f32 %v3829_v38, %v5646_v22 }
 0x532   : > { %v2894_v4 = vadd.f32 1.0, %v3831_v47  ;;  %3844 = vpow2.f32 %v3225_v12  ;;  %v3452_v26 = vpop.f32.mrf.mxu0  ;;  %v2700_v32 = vadd.f32 %v3482_v41, %v5837_v30 }
 0x533   : > { %v3083_v9 = vadd.f32 %v3051_v19, %v2987_v52  ;;  %v3050_v43 = vmul.f32 %v3959_v62, %v3018_v63  ;;  %v2600_v45 = vadd.f32 %v3452_v26, %v5695_v42  ;;  %v2694_v0 = vpop.f32.mrf.mxu1 }
 0x534   : > { %3846 = vrcp.f32 %v2894_v4  ;;  %v2773_v55 = vadd.f32 %v5860_v58, %v2700_v32  ;;  %v2594_v36 = vpop.f32.mrf.mxu0  ;;  %v2695_v5 = vadd.f32 %v2694_v0, %v5839_v29 }
 0x535   : > { %v3833_v44 = vpop.eup %3832  ;;  %3115 = vst [vmem:[%s5877_s25 + $0x68] sm:$0xff] %v3083_v9  ;;  %v3082_v35 = vadd.f32 %v3050_v43, %v2986_v21  ;;  %v2753_v30 = vadd.f32 %v5860_v58, %v2600_v45  ;;  %v2595_v22 = vadd.f32 %v2594_v36, %v5703_v31 }
 0x536   : > { %v3835_v2 = vpop.eup %3834  ;;  %v2897_v17 = vadd.f32 1.0, %v3833_v44  ;;  %v3228_v14 = vmul.f32 -1.442695, %v2773_v55  ;;  %v2772_v42 = vadd.f32 %v5860_v58, %v2695_v5  ;;  %v3962_v5 = vld [vmem:[%s4074_s27 + $0x88] sm:$0xff] }
 0x537   : > { %3114 = vst [vmem:[%s5877_s25 + $0x60] sm:$0xff] %v3082_v35  ;;  %v3021_v7 = vsub.f32 1.0, %v3835_v2  ;;  %v3208_v18 = vmul.f32 -1.442695, %v2753_v30  ;;  %v2752_v53 = vadd.f32 %v5860_v58, %v2595_v22  ;;  %v2989_v29 = vmul.f32 %v3835_v2, %v5664_v25  ;;  %v3961_v25 = vld [vmem:[%s4074_s27 + $0x70] sm:$0xff] }
 0x538   : > { %v3837_v3 = vpop.eup %3836  ;;  %3848 = vrcp.f32 %v2897_v17  ;;  %v3227_v54 = vmul.f32 -1.442695, %v2772_v42 }
 0x539   : > { %v3839_v15 = vpop.eup %3838  ;;  %v3053_v51 = vmul.f32 %v3960_v56, %v3021_v7  ;;  %v2988_v31 = vmul.f32 %v3837_v3, %v5658_v34  ;;  %v3020_v61 = vsub.f32 1.0, %v3837_v3  ;;  %3850 = vpow2.f32 %v3208_v18  ;;  %v3485_v59 = vpop.f32.mrf.mxu1  ;;  %v3963_v3 = vld [vmem:[%s4074_s27 + $0x80] sm:$0xff] }
 0x53a   : > { %v2896_v11 = vadd.f32 1.0, %v3839_v15  ;;  %3852 = vpow2.f32 %v3228_v14  ;;  %v3207_v38 = vmul.f32 -1.442695, %v2752_v53  ;;  %v3455_v12 = vpop.f32.mrf.mxu0  ;;  %v2710_v47 = vadd.f32 %v3485_v59, %v5841_v16 }
 0x53b   : > { %v3085_v52 = vadd.f32 %v3053_v51, %v2989_v29  ;;  %v3052_v10 = vmul.f32 %v3961_v25, %v3020_v61  ;;  %3854 = vpow2.f32 %v3227_v54  ;;  %v2610_v19 = vadd.f32 %v3455_v12, %v5711_v40  ;;  %v2704_v63 = vpop.f32.mrf.mxu1 }
 0x53c   : > { %3856 = vrcp.f32 %v2896_v11  ;;  %v2775_v34 = vadd.f32 %v5860_v58, %v2710_v47  ;;  %v2604_v41 = vpop.f32.mrf.mxu0  ;;  %v2705_v4 = vadd.f32 %v2704_v63, %v5843_v39 }
 0x53d   : > { %v3841_v26 = vpop.eup %3840  ;;  %3117 = vst [vmem:[%s5877_s25 + $0x78] sm:$0xff] %v3085_v52  ;;  %v3084_v32 = vadd.f32 %v3052_v10, %v2988_v31  ;;  %3858 = vpow2.f32 %v3207_v38  ;;  %v2755_v16 = vadd.f32 %v5860_v58, %v2610_v19  ;;  %v2605_v9 = vadd.f32 %v2604_v41, %v5720_v13  ;;  %v3964_v52 = vld [vmem:[%s4074_s27 + $0x98] sm:$0xff] }
 0x53e   : > { %v3843_v21 = vpop.eup %3842  ;;  %v3023_v62 = vsub.f32 1.0, %v3841_v26  ;;  %v3230_v40 = vmul.f32 -1.442695, %v2775_v34  ;;  %v2774_v43 = vadd.f32 %v5860_v58, %v2705_v4  ;;  %v2991_v36 = vmul.f32 %v3841_v26, %v5676_v20 }
 0x53f   : > { %v3845_v45 = vpop.eup %3844  ;;  %3116 = vst [vmem:[%s5877_s25 + $0x70] sm:$0xff] %v3084_v32  ;;  %v2899_v0 = vadd.f32 1.0, %v3843_v21  ;;  %v3210_v55 = vmul.f32 -1.442695, %v2755_v16  ;;  %v2754_v39 = vadd.f32 %v5860_v58, %v2605_v9 }
 0x540   : > { %v3055_v44 = vmul.f32 %v3962_v5, %v3023_v62  ;;  %v2898_v35 = vadd.f32 1.0, %v3845_v45  ;;  %3860 = vpow2.f32 %v3230_v40  ;;  %v3229_v22 = vmul.f32 -1.442695, %v2774_v43  ;;  %v3965_v40 = vld [vmem:[%s4074_s27 + $0x90] sm:$0xff] }
 0x541   : > { %v3847_v13 = vpop.eup %3846  ;;  %3862 = vrcp.f32 %v2899_v0  ;;  %v3209_v30 = vmul.f32 -1.442695, %v2754_v39  ;;  %v3488_v2 = vpop.f32.mrf.mxu1 }
 0x542   : > { %v3087_v17 = vadd.f32 %v3055_v44, %v2991_v36  ;;  %v3022_v14 = vsub.f32 1.0, %v3847_v13  ;;  %3864 = vrcp.f32 %v2898_v35  ;;  %v3458_v42 = vpop.f32.mrf.mxu0  ;;  %v2720_v20 = vadd.f32 %v3488_v2, %v5845_v57 }
 0x543   : > { %3866 = vpow2.f32 %v3210_v55  ;;  %v2620_v7 = vadd.f32 %v3458_v42, %v5733_v28  ;;  %v2714_v18 = vpop.f32.mrf.mxu1  ;;  %v2990_v53 = vmul.f32 %v3847_v13, %v5670_v23 }
 0x544   : > { %3119 = vst [vmem:[%s5877_s25 + $0x88] sm:$0xff] %v3087_v17  ;;  %v3054_v29 = vmul.f32 %v3963_v3, %v3022_v14  ;;  %3868 = vpow2.f32 %v3209_v30  ;;  %v2614_v54 = vpop.f32.mrf.mxu0  ;;  %v2715_v28 = vadd.f32 %v2714_v18, %v5847_v33  ;;  %v2777_v59 = vadd.f32 %v5860_v58, %v2720_v20  ;;  %v3966_v14 = vld [vmem:[%s4074_s27 + $0xa8] sm:$0xff]  ;;  %v3967_v3 = vld [vmem:[%s4074_s27 + $0xa0] sm:$0xff] }
 0x545   : > { %v3849_v15 = vpop.eup %3848  ;;  %3870 = vpow2.f32 %v3229_v22  ;;  %v2757_v56 = vadd.f32 %v5860_v58, %v2620_v7  ;;  %v2615_v51 = vadd.f32 %v2614_v54, %v5747_v48 }
 0x546   : > { %v3851_v31 = vpop.eup %3850  ;;  %v3086_v57 = vadd.f32 %v3054_v29, %v2990_v53  ;;  %v3025_v61 = vsub.f32 1.0, %v3849_v15  ;;  %v2993_v47 = vmul.f32 %v3849_v15, %v5692_v6  ;;  %v2776_v63 = vadd.f32 %v5860_v58, %v2715_v28 }
 0x547   : > { %v3853_v23 = vpop.eup %3852  ;;  %v2881_v11 = vadd.f32 1.0, %v3851_v31  ;;  %v2756_v38 = vadd.f32 %v5860_v58, %v2615_v51  ;;  %v3212_v19 = vmul.f32 -1.442695, %v2757_v56  ;;  %v3232_v32 = vmul.f32 -1.442695, %v2777_v59 }
 0x548   : > { %v3855_v12 = vpop.eup %3854  ;;  %3118 = vst [vmem:[%s5877_s25 + $0x80] sm:$0xff] %v3086_v57  ;;  %v3057_v25 = vmul.f32 %v3964_v52, %v3025_v61  ;;  %v2901_v10 = vadd.f32 1.0, %v3853_v23  ;;  %v3231_v55 = vmul.f32 -1.442695, %v2776_v63  ;;  %v3968_v52 = vld [vmem:[%s4074_s27 + $0x18] sm:$0xff] }
 0x549   : > { %v3857_v48 = vpop.eup %3856  ;;  %3872 = vrcp.f32 %v2881_v11  ;;  %v2900_v33 = vadd.f32 1.0, %v3855_v12  ;;  %v3491_v34 = vpop.f32.mrf.mxu1  ;;  %v3211_v6 = vmul.f32 -1.442695, %v2756_v38 }
 0x54a   : > { %v3859_v41 = vpop.eup %3858  ;;  %v3089_v4 = vadd.f32 %v3057_v25, %v2993_v47  ;;  %v3024_v26 = vsub.f32 1.0, %v3857_v48  ;;  %3874 = vrcp.f32 %v2901_v10  ;;  %v2730_v9 = vadd.f32 %v3491_v34, %v5849_v1 }
 0x54b   : > { %v2880_v16 = vadd.f32 1.0, %v3859_v41  ;;  %3876 = vrcp.f32 %v2900_v33  ;;  %v2724_v21 = vpop.f32.mrf.mxu1  ;;  %v2992_v62 = vmul.f32 %v3857_v48, %v5684_v27  ;;  %v3969_v33 = vld [vmem:[%s4074_s27 + $0xb8] sm:$0xff] }
 0x54c   : > { %3121 = vst [vmem:[%s5877_s25 + $0x98] sm:$0xff] %v3089_v4  ;;  %v3056_v43 = vmul.f32 %v3965_v40, %v3024_v26  ;;  %3878 = vpow2.f32 %v3212_v19  ;;  %v2725_v45 = vadd.f32 %v2724_v21, %v5851_v37  ;;  %v2779_v39 = vadd.f32 %v5860_v58, %v2730_v9  ;;  %v6073_v26 = vld [vmem:[#allocation3_spill] sm:$0xff] }
 0x54d   : > { %v3861_v0 = vpop.eup %3860  ;;  %3880 = vrcp.f32 %v2880_v16  ;;  %v3970_v16 = vld [vmem:[%s4074_s27 + $0xb0] sm:$0xff] }
 0x54e   : > { %v3863_v36 = vpop.eup %3862  ;;  %v3088_v5 = vadd.f32 %v3056_v43, %v2992_v62  ;;  %v2903_v44 = vadd.f32 1.0, %v3861_v0  ;;  %3882 = vpow2.f32 %v3232_v32  ;;  %v2778_v1 = vadd.f32 %v5860_v58, %v2725_v45  ;;  %v6074_v62 = vld [vmem:[#allocation2_spill] sm:$0xff]  ;;  %v3971_v43 = vld [vmem:[%s4074_s27 + $0x10] sm:$0xff] }
 0x54f   : > { %v3865_v35 = vpop.eup %3864  ;;  %v3027_v27 = vsub.f32 1.0, %v3863_v36  ;;  %3884 = vpow2.f32 %v3211_v6  ;;  %v3234_v13 = vmul.f32 -1.442695, %v2779_v39  ;;  %v2995_v37 = vmul.f32 %v3863_v36, %v5708_v49 }
 0x550   : > { %v3867_v30 = vpop.eup %3866  ;;  %3120 = vst [vmem:[%s5877_s25 + $0x90] sm:$0xff] %v3088_v5  ;;  %v2994_v22 = vmul.f32 %v3865_v35, %v5700_v50  ;;  %v3026_v2 = vsub.f32 1.0, %v3865_v35  ;;  %3886 = vrcp.f32 %v2903_v44  ;;  %v3233_v20 = vmul.f32 -1.442695, %v2778_v1 }
 0x551   : > { %v3869_v17 = vpop.eup %3868  ;;  %v3059_v42 = vmul.f32 %v3966_v14, %v3027_v27  ;;  %v2883_v7 = vadd.f32 1.0, %v3867_v30  ;;  %3888 = vpow2.f32 %v3231_v55  ;;  %v3494_v18 = vpop.f32.mrf.mxu1  ;;  %v6075_v27 = vld [vmem:[#allocation6_spill] sm:$0xff]  ;;  %v3972_v30 = vld [vmem:[%s4074_s27 + $0xc8] sm:$0xff] }
 0x552   : > { %v3871_v53 = vpop.eup %3870  ;;  %v3058_v29 = vmul.f32 %v3967_v3, %v3026_v2  ;;  %v2882_v54 = vadd.f32 1.0, %v3869_v17  ;;  %3890 = vpow2.f32 %v3234_v13  ;;  %v2740_v49 = vadd.f32 %v3494_v18, %v5853_v8  ;;  %v6076_v18 = vld [vmem:[#allocation7_spill] sm:$0xff] }
 0x553   : > { %v3091_v15 = vadd.f32 %v3059_v42, %v2995_v37  ;;  %3892 = vrcp.f32 %v2883_v7  ;;  %v2902_v50 = vadd.f32 1.0, %v3871_v53  ;;  %v2734_v56 = vpop.f32.mrf.mxu1  ;;  %v3973_v3 = vld [vmem:[%s4074_s27 + $0x28] sm:$0xff] }
 0x554   : > { %v3090_v51 = vadd.f32 %v3058_v29, %v2994_v22  ;;  %3894 = vrcp.f32 %v2882_v54  ;;  %v2781_v28 = vadd.f32 %v5860_v58, %v2740_v49  ;;  %v2735_v31 = vadd.f32 %v2734_v56, %v5855_v60  ;;  %v6077_v49 = vld [vmem:[#allocation5_spill] sm:$0xff] }
 0x555   : > { %3123 = vst [vmem:[%s5877_s25 + $0xa8] sm:$0xff] %v3091_v15  ;;  %3896 = vrcp.f32 %v2902_v50  ;;  %v3974_v50 = vld [vmem:[%s4074_s27 + $0x20] sm:$0xff] }
 0x556   : > { %v3873_v57 = vpop.eup %3872  ;;  %3122 = vst [vmem:[%s5877_s25 + $0xa0] sm:$0xff] %v3090_v51  ;;  %3898 = vpow2.f32 %v3233_v20  ;;  %v3236_v61 = vmul.f32 -1.442695, %v2781_v28  ;;  %v2780_v8 = vadd.f32 %v5860_v58, %v2735_v31 }
 0x557   : > { %v3875_v59 = vpop.eup %3874  ;;  %v3009_v23 = vsub.f32 1.0, %v3873_v57  ;;  %v2977_v60 = vmul.f32 %v3873_v57, %v5730_v24  ;;  %v6078_v57 = vld [vmem:[#allocation4_spill] sm:$0xff] }
 0x558   : > { %v3877_v11 = vpop.eup %3876  ;;  %v3029_v38 = vsub.f32 1.0, %v3875_v59  ;;  %3900 = vpow2.f32 %v3236_v61  ;;  %v3235_v12 = vmul.f32 -1.442695, %v2780_v8  ;;  %v2997_v48 = vmul.f32 %v3875_v59, %v5726_v46  ;;  %v3975_v8 = vld [vmem:[%s4074_s27 + $0xc0] sm:$0xff] }
 0x559   : > { %v3879_v47 = vpop.eup %3878  ;;  %v3041_v25 = vmul.f32 %v3968_v52, %v3009_v23  ;;  %v3028_v10 = vsub.f32 1.0, %v3877_v11  ;;  %v2996_v32 = vmul.f32 %v3877_v11, %v6073_v26  ;;  %v6080_v26 = vld [vmem:[#allocation10_spill] sm:$0xff] }
 0x55a   : > { %v3881_v19 = vpop.eup %3880  ;;  %v3061_v63 = vmul.f32 %v3969_v33, %v3029_v38  ;;  %v2885_v58 = vadd.f32 1.0, %v3879_v47  ;;  %3902 = vpow2.f32 %v3235_v12  ;;  %v3976_v33 = vld [vmem:[%s4074_s27 + $0x38] sm:$0xff] }
 0x55b   : > { %v3883_v34 = vpop.eup %3882  ;;  %v3073_v41 = vadd.f32 %v3041_v25, %v2977_v60  ;;  %v3008_v4 = vsub.f32 1.0, %v3881_v19  ;;  %v3060_v24 = vmul.f32 %v3970_v16, %v3028_v10  ;;  %v2976_v40 = vmul.f32 %v3881_v19, %v6074_v62  ;;  %v6079_v19 = vld [vmem:[#allocation11_spill] sm:$0xff]  ;;  %v3977_v16 = vld [vmem:[%s4074_s27 + $0xd8] sm:$0xff] }
 0x55c   : > { %v3885_v6 = vpop.eup %3884  ;;  %v3093_v9 = vadd.f32 %v3061_v63, %v2997_v48  ;;  %3904 = vrcp.f32 %v2885_v58  ;;  %v2905_v21 = vadd.f32 1.0, %v3883_v34 }
 0x55d   : > { %v3887_v46 = vpop.eup %3886  ;;  %3105 = vst [vmem:[%s5877_s25 + $0x18] sm:$0xff] %v3073_v41  ;;  %v3040_v45 = vmul.f32 %v3971_v43, %v3008_v4  ;;  %v3092_v0 = vadd.f32 %v3060_v24, %v2996_v32  ;;  %v2884_v55 = vadd.f32 1.0, %v3885_v6 }
 0x55e   : > { %v3889_v39 = vpop.eup %3888  ;;  %3125 = vst [vmem:[%s5877_s25 + $0xb8] sm:$0xff] %v3093_v9  ;;  %v3031_v36 = vsub.f32 1.0, %v3887_v46  ;;  %3906 = vrcp.f32 %v2905_v21  ;;  %v2999_v13 = vmul.f32 %v3887_v46, %v6075_v27  ;;  %v6081_v9 = vld [vmem:[#allocation9_spill] sm:$0xff]  ;;  %v3978_v46 = vld [vmem:[%s4074_s27 + $0x30] sm:$0xff] }
 0x55f   : > { %v3891_v5 = vpop.eup %3890  ;;  %v3072_v44 = vadd.f32 %v3040_v45, %v2976_v40  ;;  %3124 = vst [vmem:[%s5877_s25 + $0xb0] sm:$0xff] %v3092_v0  ;;  %3908 = vrcp.f32 %v2884_v55  ;;  %v2904_v1 = vadd.f32 1.0, %v3889_v39  ;;  %v6082_v55 = vld [vmem:[#allocation8_spill] sm:$0xff] }
 0x560   : > { %v3893_v35 = vpop.eup %3892  ;;  %v3063_v37 = vmul.f32 %v3972_v30, %v3031_v36  ;;  %v2907_v22 = vadd.f32 1.0, %v3891_v5  ;;  %v3979_v36 = vld [vmem:[%s4074_s27 + $0xd0] sm:$0xff] }
 0x561   : > { %v3895_v2 = vpop.eup %3894  ;;  %3104 = vst [vmem:[%s5877_s25 + $0x10] sm:$0xff] %v3072_v44  ;;  %v3011_v17 = vsub.f32 1.0, %v3893_v35  ;;  %3910 = vrcp.f32 %v2904_v1  ;;  %v2979_v53 = vmul.f32 %v3893_v35, %v6076_v18  ;;  %v6083_v44 = vld [vmem:[#allocation13_spill] sm:$0xff]  ;;  %v3980_v35 = vld [vmem:[%s4074_s27 + $0xe8] sm:$0xff] }
 0x562   : > { %v3897_v14 = vpop.eup %3896  ;;  %v3095_v42 = vadd.f32 %v3063_v37, %v2999_v13  ;;  %v3010_v7 = vsub.f32 1.0, %v3895_v2  ;;  %3912 = vrcp.f32 %v2907_v22  ;;  %v2978_v15 = vmul.f32 %v3895_v2, %v6077_v49 }
 0x563   : > { %v3899_v20 = vpop.eup %3898  ;;  %v3043_v29 = vmul.f32 %v3973_v3, %v3011_v17  ;;  %v3030_v54 = vsub.f32 1.0, %v3897_v14  ;;  %v2998_v61 = vmul.f32 %v3897_v14, %v6078_v57  ;;  %v6084_v17 = vld [vmem:[#allocation12_spill] sm:$0xff]  ;;  %v6085_v3 = vld [vmem:[#allocation15_spill] sm:$0xff] }
 0x564   : > { %3127 = vst [vmem:[%s5877_s25 + $0xc8] sm:$0xff] %v3095_v42  ;;  %v3042_v56 = vmul.f32 %v3974_v50, %v3010_v7  ;;  %v2906_v51 = vadd.f32 1.0, %v3899_v20  ;;  %v3981_v42 = vld [vmem:[%s4074_s27 + $0xe0] sm:$0xff] }
 0x565   : > { %v3901_v28 = vpop.eup %3900  ;;  %v3075_v31 = vadd.f32 %v3043_v29, %v2979_v53  ;;  %v3062_v59 = vmul.f32 %v3975_v8, %v3030_v54  ;;  %v3982_v54 = vld [vmem:[%s4074_s27 + $0xf8] sm:$0xff] }
 0x566   : > { %v3074_v23 = vadd.f32 %v3042_v56, %v2978_v15  ;;  %3914 = vrcp.f32 %v2906_v51  ;;  %v2909_v11 = vadd.f32 1.0, %v3901_v28  ;;  %v6086_v56 = vld [vmem:[#allocation14_spill] sm:$0xff]  ;;  %v3983_v28 = vld [vmem:[%s4074_s27 + $0xf0] sm:$0xff] }
 0x567   : > { %v3903_v38 = vpop.eup %3902  ;;  %3107 = vst [vmem:[%s5877_s25 + $0x28] sm:$0xff] %v3075_v31  ;;  %v3094_v12 = vadd.f32 %v3062_v59, %v2998_v61 }
 0x568   : > { %3106 = vst [vmem:[%s5877_s25 + $0x20] sm:$0xff] %v3074_v23  ;;  %3916 = vrcp.f32 %v2909_v11  ;;  %v2908_v47 = vadd.f32 1.0, %v3903_v38 }
 0x569   : > { %v3905_v60 = vpop.eup %3904  ;;  %3126 = vst [vmem:[%s5877_s25 + $0xc0] sm:$0xff] %v3094_v12 }
 0x56a   : > { %v3013_v52 = vsub.f32 1.0, %v3905_v60  ;;  %3918 = vrcp.f32 %v2908_v47  ;;  %v2981_v48 = vmul.f32 %v3905_v60, %v6079_v19 }
 0x56b   : > { %v3907_v25 = vpop.eup %3906 }
 0x56c   : > { %v3909_v10 = vpop.eup %3908  ;;  %v3045_v63 = vmul.f32 %v3976_v33, %v3013_v52  ;;  %v3033_v58 = vsub.f32 1.0, %v3907_v25  ;;  %v3001_v32 = vmul.f32 %v3907_v25, %v6080_v26 }
 0x56d   : > { %v3012_v34 = vsub.f32 1.0, %v3909_v10  ;;  %v2980_v21 = vmul.f32 %v3909_v10, %v6081_v9 }
 0x56e   : > { %v3911_v41 = vpop.eup %3910  ;;  %v3077_v4 = vadd.f32 %v3045_v63, %v2981_v48  ;;  %v3065_v24 = vmul.f32 %v3977_v16, %v3033_v58 }
 0x56f   : > { %v3913_v6 = vpop.eup %3912  ;;  %v3044_v62 = vmul.f32 %v3978_v46, %v3012_v34  ;;  %v3032_v40 = vsub.f32 1.0, %v3911_v41  ;;  %v3000_v39 = vmul.f32 %v3911_v41, %v6082_v55 }
 0x570   : > { %3109 = vst [vmem:[%s5877_s25 + $0x38] sm:$0xff] %v3077_v4  ;;  %v3097_v43 = vadd.f32 %v3065_v24, %v3001_v32  ;;  %v3035_v45 = vsub.f32 1.0, %v3913_v6  ;;  %v3003_v1 = vmul.f32 %v3913_v6, %v6083_v44 }
 0x571   : > { %v3076_v0 = vadd.f32 %v3044_v62, %v2980_v21  ;;  %v3064_v5 = vmul.f32 %v3979_v36, %v3032_v40 }
 0x572   : > { %3129 = vst [vmem:[%s5877_s25 + $0xd8] sm:$0xff] %v3097_v43  ;;  %v3067_v27 = vmul.f32 %v3980_v35, %v3035_v45 }
 0x573   : > { %v3915_v13 = vpop.eup %3914  ;;  %3108 = vst [vmem:[%s5877_s25 + $0x30] sm:$0xff] %v3076_v0  ;;  %v3096_v30 = vadd.f32 %v3064_v5, %v3000_v39 }
 0x574   : > { %v3099_v37 = vadd.f32 %v3067_v27, %v3003_v1  ;;  %v3034_v22 = vsub.f32 1.0, %v3915_v13  ;;  %v3002_v14 = vmul.f32 %v3915_v13, %v6084_v17 }
 0x575   : > { %v3917_v2 = vpop.eup %3916  ;;  %3128 = vst [vmem:[%s5877_s25 + $0xd0] sm:$0xff] %v3096_v30 }
 0x576   : > { %3131 = vst [vmem:[%s5877_s25 + $0xe8] sm:$0xff] %v3099_v37  ;;  %v3066_v7 = vmul.f32 %v3981_v42, %v3034_v22  ;;  %v3037_v20 = vsub.f32 1.0, %v3917_v2  ;;  %v3005_v29 = vmul.f32 %v3917_v2, %v6085_v3 }
 0x577   : > { %v3919_v18 = vpop.eup %3918 }
 0x578   : > { %v3098_v53 = vadd.f32 %v3066_v7, %v3002_v14  ;;  %v3069_v49 = vmul.f32 %v3982_v54, %v3037_v20  ;;  %v3036_v15 = vsub.f32 1.0, %v3919_v18  ;;  %v3004_v51 = vmul.f32 %v3919_v18, %v6086_v56 }
 0x57a   : > { %3130 = vst [vmem:[%s5877_s25 + $0xe0] sm:$0xff] %v3098_v53  ;;  %v3101_v50 = vadd.f32 %v3069_v49, %v3005_v29  ;;  %v3068_v31 = vmul.f32 %v3983_v28, %v3036_v15 }
 0x57c   : > { %3133 = vst [vmem:[%s5877_s25 + $0xf8] sm:$0xff] %v3101_v50  ;;  %v3100_v57 = vadd.f32 %v3068_v31, %v3004_v51 }
 0x57e   : > { %3132 = vst [vmem:[%s5877_s25 + $0xf0] sm:$0xff] %v3100_v57 }
 0x57f PF: > { %s22_s21 = sadd.s32 1, %s3990_s21  }
 0x580   : > { %p19_p4 = scmp.ge.s32.totalorder %s22_s21, 4  }
 0x582   :  { %21 = sbr.rel (!%p19_p4) target bundleno = 1 (0x1), region = 98 }

// kernel: gated_residual_block.1
= control target key start
LH: loop header
LB: loop body
LE: loop exit
PB: predicated region body
PF: predicated region fallthrough
CT: control target
= control target key end

     0   :  { %s4058_s21 = smov 0   ;;  %s6032_s0 = inlined_call_operand.vmem [shape: f32[512,128], index: 0, kind: input, shape index: {}]   ;;  %s6033_s1 = inlined_call_operand.vmem [shape: f32[1,128], index: 1, kind: input, shape index: {}]   ;;  %s6034_s2 = inlined_call_operand.vmem [shape: f32[1,128], index: 2, kind: input, shape index: {}]   ;;  %s6035_s3 = inlined_call_operand.vmem [shape: f32[128,256], index: 3, kind: input, shape index: {}]   ;;  %s6036_s4 = inlined_call_operand.vmem [shape: f32[1,256], index: 4, kind: input, shape index: {}]   ;;  %s6037_s5 = inlined_call_operand.vmem [shape: f32[256,128], index: 5, kind: input, shape index: {}]   ;;  %s6038_s6 = inlined_call_operand.vmem [shape: f32[1,128], index: 6, kind: input, shape index: {}]   ;;  %s6039_s7 = inlined_call_operand.vmem [shape: f32[1,128], index: 7, kind: input, shape index: {}]   ;;  %s6040_s8 = inlined_call_operand.vmem [shape: f32[1,128], index: 8, kind: input, shape index: {}]   ;;  %s6041_s9 = inlined_call_operand.vmem [shape: f32[128,128], index: 9, kind: input, shape index: {}]   ;;  %s6042_s10 = inlined_call_operand.vmem [shape: f32[128,128], index: 10, kind: input, shape index: {}]   ;;  %s6043_s11 = inlined_call_operand.vmem [shape: f32[1,128], index: 11, kind: input, shape index: {}]   ;;  %s6044_s12 = inlined_call_operand.vmem [shape: f32[512,128], index: 12, kind: output, shape index: {}]  }
   0x1 LB: > { %s3190_s22 = sadd.s32 4294967295, %s3990_s21   ;;  %p3194_p0 = scmp.ge.s32.totalorder %s3990_s21, 1  ;;  %s3990_s21 = sphi %s4058_s21, %s22_s21  }
   0x2   : > { %p363_p1 = scmp.lt.s32.totalorder %s3990_s21, 3 }
   0x4   : > { %p364_p2 = pnand %p3194_p0, %p363_p1 }
   0x6   : > { %367 = sbr.rel (%p364_p2) target bundleno = 1407 (0x57f), region = 68 }
   0xb   : > { %s3195_s23 = sshll.u32 %s3190_s22, 5  ;;  %v945_v32 = vld [vmem:[%s6035_s3 + $0xf8] sm:$0xff]  ;;  %v944_v33 = vld [vmem:[%s6035_s3 + $0xf0] sm:$0xff]  ;;  %v943_v34 = vld [vmem:[%s6035_s3 + $0xe8] sm:$0xff]  ;;  %v449_v40 = vlaneseq }
   0xc   : > { %p406_p3 = scmp.lt.s32.totalorder %s3195_s23, 63  ;;  %958 = vmatprep.subr.mxu0 %v945_v32  ;;  %v942_v35 = vld [vmem:[%s6035_s3 + $0xe0] sm:$0xff]  ;;  %v941_v36 = vld [vmem:[%s6035_s3 + $0xd8] sm:$0xff]  ;;  %v940_v37 = vld [vmem:[%s6035_s3 + $0xd0] sm:$0xff] }
   0xd   : > { %959 = vmatpush1.msra.mxu0 %v944_v33  ;;  %v939_v38 = vld [vmem:[%s6035_s3 + $0xc8] sm:$0xff]  ;;  %v938_v39 = vld [vmem:[%s6035_s3 + $0xc0] sm:$0xff]  ;;  %v4229_v41 = vand.u32 127, %v449_v40 }
   0xe   : > { %s6088_s23 = smov (!%p406_p3, %s3195_s23), 63  ;;  %960 = vmatprep.subr.mxu0 %v943_v34 }
   0xf   : > { %s3196_s24 = sshll.u32 %s6088_s23, 3  ;;  %961 = vmatpush1.msra.mxu0 %v942_v35  ;;  %vm451_vm0 = vcmp.lt.s32.totalorder %v4229_v41, 96  ;;  %v5594_v41 = vld [vmem:[%s6039_s7] ss:$0 sm:$0xff] }
  0x10   : > { %s4074_s27 = scalar_lea.vmem %s6032_s0, %s3196_s24  ;;  %962 = vmatprep.subr.mxu0 %v941_v36  ;;  %s5877_s25 = scalar_lea.vmem %s6044_s12, %s3196_s24 }
  0x11   : > { %v4077_v0 = vld [vmem:[%s4074_s27 + $0x10] sm:$0xff]  ;;  %v4080_v1 = vld [vmem:[%s4074_s27] sm:$0xff]  ;;  %v4085_v2 = vld [vmem:[%s4074_s27 + $0x18] sm:$0xff]  ;;  %963 = vmatpush1.msra.mxu0 %v940_v37 }
  0x12   : > { %458 = vadd.xlane.f32.xlu1 %v4077_v0  ;;  %454 = vadd.xlane.f32.xlu0 %v4080_v1  ;;  %v4088_v3 = vld [vmem:[%s4074_s27 + $0x8] sm:$0xff]  ;;  %v4096_v5 = vld [vmem:[%s4074_s27 + $0x20] sm:$0xff]  ;;  %v4101_v6 = vld [vmem:[%s4074_s27 + $0x38] sm:$0xff] }
  0x13   : > { %v4093_v4 = vld [vmem:[%s4074_s27 + $0x28] sm:$0xff]  ;;  %v4104_v7 = vld [vmem:[%s4074_s27 + $0x30] sm:$0xff]  ;;  %v4112_v9 = vld [vmem:[%s4074_s27 + $0x40] sm:$0xff]  ;;  %964 = vmatprep.subr.mxu0 %v939_v38 }
  0x14   : > { %v4109_v8 = vld [vmem:[%s4074_s27 + $0x48] sm:$0xff]  ;;  %v4117_v10 = vld [vmem:[%s4074_s27 + $0x58] sm:$0xff]  ;;  %v4120_v11 = vld [vmem:[%s4074_s27 + $0x50] sm:$0xff]  ;;  %965 = vmatpush1.msra.mxu0 %v938_v39 }
  0x15   : > { %v4125_v12 = vld [vmem:[%s4074_s27 + $0x68] sm:$0xff]  ;;  %v4128_v13 = vld [vmem:[%s4074_s27 + $0x60] sm:$0xff]  ;;  %v4133_v14 = vld [vmem:[%s4074_s27 + $0x78] sm:$0xff] }
  0x16   : > { %460 = vadd.xlane.f32.xlu1 %v4085_v2  ;;  %456 = vadd.xlane.f32.xlu0 %v4088_v3  ;;  %v4136_v15 = vld [vmem:[%s4074_s27 + $0x70] sm:$0xff]  ;;  %v4141_v16 = vld [vmem:[%s4074_s27 + $0x88] sm:$0xff]  ;;  %v4144_v17 = vld [vmem:[%s4074_s27 + $0x80] sm:$0xff] }
  0x17   : > { %v4149_v18 = vld [vmem:[%s4074_s27 + $0x98] sm:$0xff]  ;;  %v4152_v19 = vld [vmem:[%s4074_s27 + $0x90] sm:$0xff]  ;;  %v4157_v20 = vld [vmem:[%s4074_s27 + $0xa0] sm:$0xff] }
  0x18   : > { %v4161_v21 = vld [vmem:[%s4074_s27 + $0xa8] sm:$0xff]  ;;  %v4165_v22 = vld [vmem:[%s4074_s27 + $0xb0] sm:$0xff]  ;;  %v4169_v23 = vld [vmem:[%s4074_s27 + $0xb8] sm:$0xff] }
  0x19   : > { %v4173_v24 = vld [vmem:[%s4074_s27 + $0xc0] sm:$0xff]  ;;  %v4177_v25 = vld [vmem:[%s4074_s27 + $0xc8] sm:$0xff]  ;;  %v4181_v26 = vld [vmem:[%s4074_s27 + $0xd0] sm:$0xff] }
  0x1a   : > { %464 = vadd.xlane.f32.xlu1 %v4093_v4  ;;  %462 = vadd.xlane.f32.xlu0 %v4096_v5  ;;  %v4185_v27 = vld [vmem:[%s4074_s27 + $0xd8] sm:$0xff]  ;;  %v4189_v28 = vld [vmem:[%s4074_s27 + $0xe0] sm:$0xff]  ;;  %v4193_v29 = vld [vmem:[%s4074_s27 + $0xe8] sm:$0xff] }
  0x1b   : > { %v4197_v30 = vld [vmem:[%s4074_s27 + $0xf0] sm:$0xff]  ;;  %v4201_v31 = vld [vmem:[%s4074_s27 + $0xf8] sm:$0xff]  ;;  %v935_v38 = vld [vmem:[%s6035_s3 + $0xa8] sm:$0xff] }
  0x1c   : > { %v936_v37 = vld [vmem:[%s6035_s3 + $0xb0] sm:$0xff] }
  0x1e   : > { %468 = vadd.xlane.f32.xlu1 %v4101_v6  ;;  %466 = vadd.xlane.f32.xlu0 %v4104_v7 }
  0x22   : > { %472 = vadd.xlane.f32.xlu1 %v4109_v8  ;;  %470 = vadd.xlane.f32.xlu0 %v4112_v9 }
  0x26   : > { %476 = vadd.xlane.f32.xlu1 %v4117_v10  ;;  %474 = vadd.xlane.f32.xlu0 %v4120_v11 }
  0x2a   : > { %480 = vadd.xlane.f32.xlu1 %v4125_v12  ;;  %478 = vadd.xlane.f32.xlu0 %v4128_v13 }
  0x2e   : > { %484 = vadd.xlane.f32.xlu1 %v4133_v14  ;;  %482 = vadd.xlane.f32.xlu0 %v4136_v15 }
  0x32   : > { %488 = vadd.xlane.f32.xlu1 %v4141_v16  ;;  %486 = vadd.xlane.f32.xlu0 %v4144_v17 }
  0x36   : > { %492 = vadd.xlane.f32.xlu1 %v4149_v18  ;;  %490 = vadd.xlane.f32.xlu0 %v4152_v19 }
  0x3a   : > { %494 = vadd.xlane.f32.xlu1 %v4157_v20 }
  0x3e   : > { %496 = vadd.xlane.f32.xlu1 %v4161_v21 }
  0x42   : > { %498 = vadd.xlane.f32.xlu1 %v4165_v22 }
  0x46   : > { %500 = vadd.xlane.f32.xlu1 %v4169_v23 }
  0x4a   : > { %502 = vadd.xlane.f32.xlu1 %v4173_v24 }
  0x4e   : > { %504 = vadd.xlane.f32.xlu1 %v4177_v25 }
  0x52   : > { %506 = vadd.xlane.f32.xlu1 %v4181_v26 }
  0x56   : > { %508 = vadd.xlane.f32.xlu1 %v4185_v27 }
  0x5a   : > { %510 = vadd.xlane.f32.xlu1 %v4189_v28 }
  0x5e   : > { %512 = vadd.xlane.f32.xlu1 %v4193_v29 }
  0x62   : > { %514 = vadd.xlane.f32.xlu1 %v4197_v30 }
  0x66   : > { %516 = vadd.xlane.f32.xlu1 %v4201_v31 }
  0x9b   : > { %v459_v42 = vpop.xlane.xlu1 %458  ;;  %v455_v43 = vpop.xlane.xlu0 %454 }
  0x9c   : > { %v520_v44 = vmul.f32 0.010416667, %v459_v42  ;;  %v518_v45 = vmul.f32 0.010416667, %v455_v43  ;;  %v934_v42 = vld [vmem:[%s6035_s3 + $0xa0] sm:$0xff] }
  0x9e   : > { %v550_v46 = vsub.f32 %v4080_v1, %v518_v45  ;;  %v552_v49 = vsub.f32 %v4077_v0, %v520_v44 }
  0x9f   : > { %v461_v47 = vpop.xlane.xlu1 %460  ;;  %v457_v48 = vpop.xlane.xlu0 %456 }
  0xa0   : > { %v521_v50 = vmul.f32 0.010416667, %v461_v47  ;;  %v519_v51 = vmul.f32 0.010416667, %v457_v48  ;;  %v4236_v52 = vsel %vm451_vm0, %v550_v46, 0.0  ;;  %v4248_v59 = vsel %vm451_vm0, %v552_v49, 0.0 }
  0xa1   : > { %v614_v53 = vmul.f32 %v4236_v52, %v4236_v52  ;;  %v616_v63 = vmul.f32 %v4248_v59, %v4248_v59  ;;  %v933_v47 = vld [vmem:[%s6035_s3 + $0x98] sm:$0xff]  ;;  %v932_v48 = vld [vmem:[%s6035_s3 + $0x90] sm:$0xff] }
  0xa2   : > { %v551_v54 = vsub.f32 %v4088_v3, %v519_v51  ;;  %v553_v57 = vsub.f32 %v4085_v2, %v521_v50  ;;  %v930_v51 = vld [vmem:[%s6035_s3 + $0x80] sm:$0xff] }
  0xa3   : > { %v465_v55 = vpop.xlane.xlu1 %464  ;;  %646 = vadd.xlane.f32.xlu0 %v614_v53  ;;  %v463_v56 = vpop.xlane.xlu0 %462 }
  0xa4   : > { %v4244_v58 = vsel %vm451_vm0, %v551_v54, 0.0  ;;  %v522_v60 = vmul.f32 0.010416667, %v463_v56  ;;  %v523_v0 = vmul.f32 0.010416667, %v465_v55  ;;  %v4257_v2 = vsel %vm451_vm0, %v553_v57, 0.0 }
  0xa5   : > { %v615_v61 = vmul.f32 %v4244_v58, %v4244_v58  ;;  %v617_v33 = vmul.f32 %v4257_v2, %v4257_v2  ;;  %v929_v57 = vld [vmem:[%s6035_s3 + $0x78] sm:$0xff] }
  0xa6   : > { %v554_v1 = vsub.f32 %v4096_v5, %v522_v60  ;;  %v555_v34 = vsub.f32 %v4093_v4, %v523_v0  ;;  %v937_v5 = vld [vmem:[%s6035_s3 + $0xb8] sm:$0xff]  ;;  %v928_v60 = vld [vmem:[%s6035_s3 + $0x70] sm:$0xff] }
  0xa7   : > { %v469_v62 = vpop.xlane.xlu1 %468  ;;  %648 = vadd.xlane.f32.xlu0 %v615_v61  ;;  %v467_v3 = vpop.xlane.xlu0 %466  ;;  %966 = vmatprep.subr.mxu0 %v937_v5  ;;  %v925_v5 = vld [vmem:[%s6035_s3 + $0x58] sm:$0xff] }
  0xa8   : > { %v4264_v35 = vsel %vm451_vm0, %v554_v1, 0.0  ;;  %v524_v36 = vmul.f32 0.010416667, %v467_v3  ;;  %967 = vmatpush1.msra.mxu0 %v936_v37  ;;  %v525_v43 = vmul.f32 0.010416667, %v469_v62  ;;  %v4285_v45 = vsel %vm451_vm0, %v555_v34, 0.0 }
  0xa9   : > { %v618_v4 = vmul.f32 %v4264_v35, %v4264_v35  ;;  %968 = vmatprep.subr.mxu0 %v935_v38  ;;  %v619_v50 = vmul.f32 %v4285_v45, %v4285_v45  ;;  %v926_v3 = vld [vmem:[%s6035_s3 + $0x60] sm:$0xff]  ;;  %v924_v37 = vld [vmem:[%s6035_s3 + $0x50] sm:$0xff] }
  0xaa   : > { %v556_v44 = vsub.f32 %v4104_v7, %v524_v36  ;;  %969 = vmatpush1.msra.mxu0 %v934_v42  ;;  %v931_v7 = vld [vmem:[%s6035_s3 + $0x88] sm:$0xff]  ;;  %v557_v53 = vsub.f32 %v4101_v6, %v525_v43 }
  0xab   : > { %v473_v32 = vpop.xlane.xlu1 %472  ;;  %650 = vadd.xlane.f32.xlu0 %v616_v63  ;;  %v471_v46 = vpop.xlane.xlu0 %470  ;;  %970 = vmatprep.subr.mxu0 %v933_v47  ;;  %v927_v6 = vld [vmem:[%s6035_s3 + $0x68] sm:$0xff] }
  0xac   : > { %971 = vmatpush1.msra.mxu0 %v932_v48  ;;  %v4304_v55 = vsel %vm451_vm0, %v556_v44, 0.0  ;;  %v526_v56 = vmul.f32 0.010416667, %v471_v46  ;;  %v527_v62 = vmul.f32 0.010416667, %v473_v32  ;;  %v4328_v32 = vsel %vm451_vm0, %v557_v53, 0.0 }
  0xad   : > { %972 = vmatprep.subr.mxu0 %v931_v7  ;;  %v620_v0 = vmul.f32 %v4304_v55, %v4304_v55  ;;  %v621_v43 = vmul.f32 %v4328_v32, %v4328_v32  ;;  %v922_v46 = vld [vmem:[%s6035_s3 + $0x40] sm:$0xff] }
  0xae   : > { %973 = vmatpush1.msra.mxu0 %v930_v51  ;;  %v558_v34 = vsub.f32 %v4112_v9, %v526_v56  ;;  %v923_v9 = vld [vmem:[%s6035_s3 + $0x48] sm:$0xff]  ;;  %v920_v51 = vld [vmem:[%s6035_s3 + $0x30] sm:$0xff] }
  0xaf   : > { %v4275_v39 = vpop.xlane.xlu1 %476  ;;  %652 = vadd.xlane.f32.xlu0 %v617_v33  ;;  %974 = vmatprep.subr.mxu0 %v929_v57  ;;  %v475_v1 = vpop.xlane.xlu0 %474  ;;  %v919_v57 = vld [vmem:[%s6035_s3 + $0x28] sm:$0xff] }
  0xb0   : > { %975 = vmatpush1.msra.mxu0 %v928_v60  ;;  %v4354_v48 = vsel %vm451_vm0, %v558_v34, 0.0  ;;  %v529_v53 = vmul.f32 0.010416667, %v4275_v39 }
  0xb1   : > { %976 = vmatprep.subr.mxu0 %v927_v6  ;;  %v622_v56 = vmul.f32 %v4354_v48, %v4354_v48 }
  0xb2   : > { %977 = vmatpush1.msra.mxu0 %v926_v3  ;;  %v561_v34 = vsub.f32 %v4117_v10, %v529_v53  ;;  %v915_v10 = vld [vmem:[%s6035_s3 + $0x8] sm:$0xff] }
  0xb3   : > { %v481_v49 = vpop.xlane.xlu1 %480  ;;  %654 = vadd.xlane.f32.xlu0 %v618_v4  ;;  %978 = vmatprep.subr.mxu0 %v925_v5  ;;  %v559_v4 = vsub.f32 %v4109_v8, %v527_v62  ;;  %v479_v44 = vpop.xlane.xlu0 %478  ;;  %v528_v8 = vmul.f32 0.010416667, %v475_v1 }
  0xb4   : > { %v531_v54 = vmul.f32 0.010416667, %v481_v49  ;;  %979 = vmatpush1.msra.mxu0 %v924_v37  ;;  %v921_v49 = vld [vmem:[%s6035_s3 + $0x38] sm:$0xff]  ;;  %v530_v5 = vmul.f32 0.010416667, %v479_v44  ;;  %v3992_v37 = vmov 0.0  }
  0xb5   : > { %980 = vmatprep.subr.mxu0 %v923_v9  ;;  %v4378_v39 = vsel %vm451_vm0, %v559_v4, 0.0  ;;  %1022 = vmatprep.mubr.f32.mxu0 %v3992_v37  ;;  %v914_v9 = vld [vmem:[%s6035_s3] sm:$0xff] }
  0xb6   : > { %v563_v61 = vsub.f32 %v4125_v12, %v531_v54  ;;  %981 = vmatpush1.msra.mxu0 %v922_v46  ;;  %v623_v3 = vmul.f32 %v4378_v39, %v4378_v39  ;;  %1574 = vmatprep.subr.mxu1 %v3992_v37  ;;  %v562_v46 = vsub.f32 %v4128_v13, %v530_v5 }
  0xb7   : > { %v485_v63 = vpop.xlane.xlu1 %484  ;;  %656 = vadd.xlane.f32.xlu0 %v619_v50  ;;  %982 = vmatprep.subr.mxu0 %v921_v49  ;;  %v483_v62 = vpop.xlane.xlu0 %482 }
  0xb8   : > { %v533_v33 = vmul.f32 0.010416667, %v485_v63  ;;  %v4323_v12 = vsel %vm451_vm0, %v563_v61, 0.0  ;;  %v560_v61 = vsub.f32 %v4120_v11, %v528_v8  ;;  %983 = vmatpush1.msra.mxu0 %v920_v51  ;;  %v918_v63 = vld [vmem:[%s6035_s3 + $0x20] sm:$0xff]  ;;  %v917_v11 = vld [vmem:[%s6035_s3 + $0x18] sm:$0xff]  ;;  %v4430_v53 = vsel %vm451_vm0, %v562_v46, 0.0 }
  0xb9   : > { %v627_v36 = vmul.f32 %v4323_v12, %v4323_v12  ;;  %984 = vmatprep.subr.mxu0 %v919_v57  ;;  %v532_v8 = vmul.f32 0.010416667, %v483_v62 }
  0xba   : > { %v565_v38 = vsub.f32 %v4133_v14, %v533_v33  ;;  %v916_v33 = vld [vmem:[%s6035_s3 + $0x10] sm:$0xff]  ;;  %985 = vmatpush1.msra.mxu0 %v918_v63 }
  0xbb   : > { %672 = vadd.xlane.f32.xlu1 %v627_v36  ;;  %v489_v42 = vpop.xlane.xlu1 %488  ;;  %658 = vadd.xlane.f32.xlu0 %v620_v0  ;;  %v4401_v36 = vsel %vm451_vm0, %v560_v61, 0.0  ;;  %v564_v13 = vsub.f32 %v4136_v15, %v532_v8 }
  0xbc   : > { %v535_v47 = vmul.f32 0.010416667, %v489_v42  ;;  %v4350_v14 = vsel %vm451_vm0, %v565_v38, 0.0  ;;  %986 = vmatprep.subr.mxu0 %v917_v11  ;;  %v624_v42 = vmul.f32 %v4401_v36, %v4401_v36 }
  0xbd   : > { %v629_v7 = vmul.f32 %v4350_v14, %v4350_v14  ;;  %987 = vmatpush1.msra.mxu0 %v916_v33  ;;  %v4439_v15 = vsel %vm451_vm0, %v564_v13, 0.0 }
  0xbe   : > { %v567_v50 = vsub.f32 %v4141_v16, %v535_v47  ;;  %v4418_v47 = vsel %vm451_vm0, %v561_v34, 0.0  ;;  %988 = vmatprep.subr.mxu0 %v915_v10  ;;  %v628_v11 = vmul.f32 %v4439_v15, %v4439_v15 }
  0xbf   : > { %676 = vadd.xlane.f32.xlu1 %v629_v7  ;;  %v493_v54 = vpop.xlane.xlu1 %492  ;;  %660 = vadd.xlane.f32.xlu0 %v621_v43  ;;  %v487_v43 = vpop.xlane.xlu0 %486 }
  0xc0   : > { %v537_v60 = vmul.f32 0.010416667, %v493_v54  ;;  %v4373_v16 = vsel %vm451_vm0, %v567_v50, 0.0  ;;  %989 = vmatpush1.msra.mxu0 %v914_v9  ;;  %v625_v50 = vmul.f32 %v4418_v47, %v4418_v47  ;;  %v534_v54 = vmul.f32 0.010416667, %v487_v43 }
  0xc1   : > { %v631_v6 = vmul.f32 %v4373_v16, %v4373_v16 }
  0xc2   : > { %v569_v0 = vsub.f32 %v4149_v18, %v537_v60  ;;  %v626_v60 = vmul.f32 %v4430_v53, %v4430_v53 }
  0xc3   : > { %680 = vadd.xlane.f32.xlu1 %v631_v6  ;;  %v495_v1 = vpop.xlane.xlu1 %494  ;;  %662 = vadd.xlane.f32.xlu0 %v622_v56  ;;  %v566_v6 = vsub.f32 %v4144_v17, %v534_v54 }
  0xc4   : > { %v4397_v18 = vsel %vm451_vm0, %v569_v0, 0.0 }
  0xc5   : > { %v633_v38 = vmul.f32 %v4397_v18, %v4397_v18  ;;  %v4451_v17 = vsel %vm451_vm0, %v566_v6, 0.0 }
  0xc7   : > { %684 = vadd.xlane.f32.xlu1 %v633_v38  ;;  %v497_v4 = vpop.xlane.xlu1 %496  ;;  %664 = vadd.xlane.f32.xlu0 %v623_v3  ;;  %v538_v3 = vmul.f32 0.010416667, %v495_v1  ;;  %v630_v38 = vmul.f32 %v4451_v17, %v4451_v17 }
  0xc8   : > { %v539_v44 = vmul.f32 0.010416667, %v497_v4 }
  0xc9   : > { %v570_v1 = vsub.f32 %v4157_v20, %v538_v3 }
  0xca   : > { %v571_v7 = vsub.f32 %v4161_v21, %v539_v44  ;;  %v491_v21 = vpop.xlane.xlu0 %490 }
  0xcb   : > { %v499_v49 = vpop.xlane.xlu1 %498  ;;  %666 = vadd.xlane.f32.xlu0 %v624_v42  ;;  %v536_v62 = vmul.f32 0.010416667, %v491_v21  ;;  %v4472_v20 = vsel %vm451_vm0, %v570_v1, 0.0 }
  0xcc   : > { %v4425_v51 = vsel %vm451_vm0, %v571_v7, 0.0  ;;  %v540_v10 = vmul.f32 0.010416667, %v499_v49  ;;  %v634_v49 = vmul.f32 %v4472_v20, %v4472_v20 }
  0xcd   : > { %v635_v56 = vmul.f32 %v4425_v51, %v4425_v51  ;;  %v568_v34 = vsub.f32 %v4152_v19, %v536_v62 }
  0xce   : > { %v572_v44 = vsub.f32 %v4165_v22, %v540_v10 }
  0xcf   : > { %688 = vadd.xlane.f32.xlu1 %v635_v56  ;;  %v501_v57 = vpop.xlane.xlu1 %500  ;;  %668 = vadd.xlane.f32.xlu0 %v625_v50  ;;  %v4460_v19 = vsel %vm451_vm0, %v568_v34, 0.0 }
  0xd0   : > { %v541_v61 = vmul.f32 0.010416667, %v501_v57  ;;  %v632_v43 = vmul.f32 %v4460_v19, %v4460_v19  ;;  %v4481_v54 = vsel %vm451_vm0, %v572_v44, 0.0 }
  0xd1   : > { %v636_v57 = vmul.f32 %v4481_v54, %v4481_v54 }
  0xd2   : > { %v573_v63 = vsub.f32 %v4169_v23, %v541_v61 }
  0xd3   : > { %v503_v0 = vpop.xlane.xlu1 %502  ;;  %670 = vadd.xlane.f32.xlu0 %v626_v60 }
  0xd4   : > { %v4446_v33 = vsel %vm451_vm0, %v573_v63, 0.0  ;;  %v542_v46 = vmul.f32 0.010416667, %v503_v0 }
  0xd5   : > { %v637_v5 = vmul.f32 %v4446_v33, %v4446_v33 }
  0xd6   : > { %v574_v22 = vsub.f32 %v4173_v24, %v542_v46 }
  0xd7   : > { %692 = vadd.xlane.f32.xlu1 %v637_v5  ;;  %v505_v23 = vpop.xlane.xlu1 %504  ;;  %674 = vadd.xlane.f32.xlu0 %v628_v11 }
  0xd8   : > { %v543_v9 = vmul.f32 0.010416667, %v505_v23  ;;  %v4493_v24 = vsel %vm451_vm0, %v574_v22, 0.0 }
  0xd9   : > { %v638_v63 = vmul.f32 %v4493_v24, %v4493_v24 }
  0xda   : > { %v575_v4 = vsub.f32 %v4177_v25, %v543_v9 }
  0xdb   : > { %v507_v42 = vpop.xlane.xlu1 %506  ;;  %678 = vadd.xlane.f32.xlu0 %v630_v38 }
  0xdc   : > { %v4468_v8 = vsel %vm451_vm0, %v575_v4, 0.0  ;;  %v544_v50 = vmul.f32 0.010416667, %v507_v42 }
  0xdd   : > { %v639_v7 = vmul.f32 %v4468_v8, %v4468_v8 }
  0xde   : > { %v576_v60 = vsub.f32 %v4181_v26, %v544_v50 }
  0xdf   : > { %696 = vadd.xlane.f32.xlu1 %v639_v7  ;;  %v509_v25 = vpop.xlane.xlu1 %508  ;;  %682 = vadd.xlane.f32.xlu0 %v632_v43 }
  0xe0   : > { %v545_v13 = vmul.f32 0.010416667, %v509_v25  ;;  %v4502_v11 = vsel %vm451_vm0, %v576_v60, 0.0 }
  0xe1   : > { %v640_v5 = vmul.f32 %v4502_v11, %v4502_v11 }
  0xe2   : > { %v577_v56 = vsub.f32 %v4185_v27, %v545_v13 }
  0xe3   : > { %v511_v21 = vpop.xlane.xlu1 %510  ;;  %686 = vadd.xlane.f32.xlu0 %v634_v49 }
  0xe4   : > { %v546_v61 = vmul.f32 0.010416667, %v511_v21  ;;  %v4489_v6 = vsel %vm451_vm0, %v577_v56, 0.0 }
  0xe5   : > { %v641_v62 = vmul.f32 %v4489_v6, %v4489_v6 }
  0xe6   : > { %v578_v26 = vsub.f32 %v4189_v28, %v546_v61 }
  0xe7   : > { %700 = vadd.xlane.f32.xlu1 %v641_v62  ;;  %v513_v27 = vpop.xlane.xlu1 %512  ;;  %690 = vadd.xlane.f32.xlu0 %v636_v57 }
  0xe8   : > { %v547_v0 = vmul.f32 0.010416667, %v513_v27  ;;  %v4513_v28 = vsel %vm451_vm0, %v578_v26, 0.0  ;;  %v4536_v26 = vld [vmem:[%s6033_s1] ss:$0 sm:$0xff] }
  0xe9   : > { %v642_v9 = vmul.f32 %v4513_v28, %v4513_v28 }
  0xea   : > { %v579_v3 = vsub.f32 %v4193_v29, %v547_v0 }
  0xeb   : > { %v515_v34 = vpop.xlane.xlu1 %514  ;;  %694 = vadd.xlane.f32.xlu0 %v638_v63 }
  0xec   : > { %v548_v23 = vmul.f32 0.010416667, %v515_v34  ;;  %v4509_v38 = vsel %vm451_vm0, %v579_v3, 0.0 }
  0xed   : > { %v643_v1 = vmul.f32 %v4509_v38, %v4509_v38 }
  0xee   : > { %v580_v10 = vsub.f32 %v4197_v30, %v548_v23 }
  0xef   : > { %704 = vadd.xlane.f32.xlu1 %v643_v1  ;;  %v517_v29 = vpop.xlane.xlu1 %516  ;;  %698 = vadd.xlane.f32.xlu0 %v640_v5  ;;  %v4542_v5 = vld [vmem:[%s6034_s2] ss:$0 sm:$0xff] }
  0xf0   : > { %v549_v4 = vmul.f32 0.010416667, %v517_v29  ;;  %v4522_v42 = vsel %vm451_vm0, %v580_v10, 0.0  ;;  %v1550_v29 = vld [vmem:[%s6037_s5 + $0x78] sm:$0xff] }
  0xf1   : > { %v644_v44 = vmul.f32 %v4522_v42, %v4522_v42  ;;  %1575 = vmatpush1.msra.mxu1 %v1550_v29 }
  0xf2   : > { %v581_v43 = vsub.f32 %v4201_v31, %v549_v4  ;;  %1576 = vmatprep.subr.mxu1 %v3992_v37 }
  0xf3   : > { %702 = vadd.xlane.f32.xlu0 %v642_v9  ;;  %v1549_v9 = vld [vmem:[%s6037_s5 + $0x70] sm:$0xff] }
  0xf4   : > { %v4529_v30 = vsel %vm451_vm0, %v581_v43, 0.0  ;;  %1577 = vmatpush1.msra.mxu1 %v1549_v9 }
  0xf5   : > { %v645_v46 = vmul.f32 %v4529_v30, %v4529_v30  ;;  %1578 = vmatprep.subr.mxu1 %v3992_v37 }
  0xf7   : > { %708 = vadd.xlane.f32.xlu1 %v645_v46  ;;  %706 = vadd.xlane.f32.xlu0 %v644_v44  ;;  %v1548_v46 = vld [vmem:[%s6037_s5 + $0x68] sm:$0xff] }
  0xf8   : > { %1579 = vmatpush1.msra.mxu1 %v1548_v46 }
  0xf9   : > { %1580 = vmatprep.subr.mxu1 %v3992_v37 }
 0x12c   : > { %v647_v7 = vpop.xlane.xlu0 %646 }
 0x12d   : > { %v710_v25 = vmul.f32 0.010416667, %v647_v7 }
 0x12f   : > { %v742_v49 = vadd.f32 1e-05, %v710_v25 }
 0x130   : > { %v649_v22 = vpop.xlane.xlu0 %648 }
 0x131   : > { %3536 = vrsqrt.f32 %v742_v49  ;;  %v711_v50 = vmul.f32 0.010416667, %v649_v22 }
 0x133   : > { %v743_v31 = vadd.f32 1e-05, %v711_v50 }
 0x134   : > { %v651_v13 = vpop.xlane.xlu0 %650 }
 0x135   : > { %3538 = vrsqrt.f32 %v743_v31  ;;  %v712_v56 = vmul.f32 0.010416667, %v651_v13 }
 0x137   : > { %v744_v21 = vadd.f32 1e-05, %v712_v56  ;;  %v1546_v56 = vld [vmem:[%s6037_s5 + $0x58] sm:$0xff] }
 0x138   : > { %v653_v57 = vpop.xlane.xlu0 %652 }
 0x139   : > { %3540 = vrsqrt.f32 %v744_v21  ;;  %v713_v60 = vmul.f32 0.010416667, %v653_v57 }
 0x13b   : > { %v745_v61 = vadd.f32 1e-05, %v713_v60 }
 0x13c   : > { %v655_v62 = vpop.xlane.xlu0 %654 }
 0x13d   : > { %3542 = vrsqrt.f32 %v745_v61  ;;  %v714_v27 = vmul.f32 0.010416667, %v655_v62 }
 0x13e   : > { %v3537_v63 = vpop.eup %3536 }
 0x13f   : > { %v746_v0 = vadd.f32 1e-05, %v714_v27  ;;  %v806_v3 = vmul.f32 %v3537_v63, %v4236_v52 }
 0x140   : > { %v657_v34 = vpop.xlane.xlu0 %656 }
 0x141   : > { %3544 = vrsqrt.f32 %v746_v0  ;;  %v715_v23 = vmul.f32 0.010416667, %v657_v34  ;;  %v844_v1 = vmul.f32 %v4536_v26, %v806_v3  ;;  %v1544_v0 = vld [vmem:[%s6037_s5 + $0x48] sm:$0xff] }
 0x142   : > { %v3539_v10 = vpop.eup %3538 }
 0x143   : > { %v747_v52 = vadd.f32 1e-05, %v715_v23  ;;  %v882_v4 = vadd.f32 %v4542_v5, %v844_v1  ;;  %v807_v43 = vmul.f32 %v3539_v10, %v4244_v58  ;;  %v1547_v58 = vld [vmem:[%s6037_s5 + $0x60] sm:$0xff] }
 0x144   : > { %v659_v44 = vpop.xlane.xlu0 %658  ;;  %1581 = vmatpush1.msra.mxu1 %v1547_v58  ;;  %v1540_v58 = vld [vmem:[%s6037_s5 + $0x28] sm:$0xff] }
 0x145   : > { %3546 = vrsqrt.f32 %v747_v52  ;;  %v716_v7 = vmul.f32 0.010416667, %v659_v44  ;;  %1023 = vmatmul.mubr.f32.vlgmr.msra.gmra.mxu0 %v882_v4  ;;  %v845_v25 = vmul.f32 %v4536_v26, %v807_v43  ;;  %1582 = vmatprep.subr.mxu1 %v3992_v37  ;;  %v1542_v52 = vld [vmem:[%s6037_s5 + $0x38] sm:$0xff] }
 0x146   : > { %v3541_v49 = vpop.eup %3540  ;;  %1028 = vmatprep.mubr.f32.mxu0 %v3992_v37  ;;  %1583 = vmatpush1.msra.mxu1 %v1546_v56 }
 0x147   : > { %v748_v22 = vadd.f32 1e-05, %v716_v7  ;;  %v883_v50 = vadd.f32 %v4542_v5, %v845_v25  ;;  %v808_v31 = vmul.f32 %v3541_v49, %v4248_v59  ;;  %v1545_v59 = vld [vmem:[%s6037_s5 + $0x50] sm:$0xff]  ;;  %1584 = vmatprep.subr.mxu1 %v3992_v37 }
 0x148   : > { %v661_v13 = vpop.xlane.xlu0 %660  ;;  %1585 = vmatpush1.msra.mxu1 %v1545_v59 }
 0x149   : > { %v717_v21 = vmul.f32 0.010416667, %v661_v13  ;;  %1029 = vmatmul.mubr.f32.gmra.mxu0 %v883_v50  ;;  %v846_v57 = vmul.f32 %v4536_v26, %v808_v31  ;;  %3548 = vrsqrt.f32 %v748_v22  ;;  %1586 = vmatprep.subr.mxu1 %v3992_v37  ;;  %v673_v22 = vpop.xlane.xlu1 %672 }
 0x14a   : > { %v3543_v60 = vpop.eup %3542  ;;  %1034 = vmatprep.mubr.f32.mxu0 %v3992_v37  ;;  %1587 = vmatpush1.msra.mxu1 %v1544_v0 }
 0x14b   : > { %v749_v61 = vadd.f32 1e-05, %v717_v21  ;;  %v884_v62 = vadd.f32 %v4542_v5, %v846_v57  ;;  %v809_v27 = vmul.f32 %v3543_v60, %v4257_v2  ;;  %v1543_v2 = vld [vmem:[%s6037_s5 + $0x40] sm:$0xff]  ;;  %1588 = vmatprep.subr.mxu1 %v3992_v37  ;;  %v723_v57 = vmul.f32 0.010416667, %v673_v22 }
 0x14c   : > { %v663_v63 = vpop.xlane.xlu0 %662  ;;  %1589 = vmatpush1.msra.mxu1 %v1543_v2 }
 0x14d   : > { %v718_v3 = vmul.f32 0.010416667, %v663_v63  ;;  %1035 = vmatmul.mubr.f32.gmra.mxu0 %v884_v62  ;;  %v847_v34 = vmul.f32 %v4536_v26, %v809_v27  ;;  %3550 = vrsqrt.f32 %v749_v61  ;;  %1590 = vmatprep.subr.mxu1 %v3992_v37  ;;  %v1538_v61 = vld [vmem:[%s6037_s5 + $0x18] sm:$0xff] }
 0x14e   : > { %v3545_v23 = vpop.eup %3544  ;;  %1040 = vmatprep.mubr.f32.mxu0 %v3992_v37  ;;  %1591 = vmatpush1.msra.mxu1 %v1542_v52  ;;  %v1535_v52 = vld [vmem:[%s6037_s5] sm:$0xff] }
 0x14f   : > { %v750_v1 = vadd.f32 1e-05, %v718_v3  ;;  %v885_v10 = vadd.f32 %v4542_v5, %v847_v34  ;;  %v810_v29 = vmul.f32 %v3545_v23, %v4264_v35  ;;  %v1541_v35 = vld [vmem:[%s6037_s5 + $0x30] sm:$0xff]  ;;  %1592 = vmatprep.subr.mxu1 %v3992_v37  ;;  %v755_v3 = vadd.f32 1e-05, %v723_v57  ;;  %v677_v34 = vpop.xlane.xlu1 %676 }
 0x150   : > { %v665_v9 = vpop.xlane.xlu0 %664  ;;  %1593 = vmatpush1.msra.mxu1 %v1541_v35 }
 0x151   : > { %v719_v4 = vmul.f32 0.010416667, %v665_v9  ;;  %1041 = vmatmul.mubr.f32.gmra.mxu0 %v885_v10  ;;  %v848_v43 = vmul.f32 %v4536_v26, %v810_v29  ;;  %3552 = vrsqrt.f32 %v750_v1  ;;  %1594 = vmatprep.subr.mxu1 %v3992_v37  ;;  %v1536_v10 = vld [vmem:[%s6037_s5 + $0x8] sm:$0xff] }
 0x152   : > { %v3547_v44 = vpop.eup %3546  ;;  %1046 = vmatprep.mubr.f32.mxu0 %v3992_v37  ;;  %1595 = vmatpush1.msra.mxu1 %v1540_v58  ;;  %v1565_v58 = vld [vmem:[%s6037_s5 + $0xf0] sm:$0xff] }
 0x153   : > { %v751_v46 = vadd.f32 1e-05, %v719_v4  ;;  %v886_v7 = vadd.f32 %v4542_v5, %v848_v43  ;;  %v811_v25 = vmul.f32 %v3547_v44, %v4285_v45  ;;  %v1539_v45 = vld [vmem:[%s6037_s5 + $0x20] sm:$0xff]  ;;  %1596 = vmatprep.subr.mxu1 %v3992_v37 }
 0x154   : > { %v667_v49 = vpop.xlane.xlu0 %666  ;;  %1597 = vmatpush1.msra.mxu1 %v1539_v45 }
 0x155   : > { %v720_v50 = vmul.f32 0.010416667, %v667_v49  ;;  %1047 = vmatmul.mubr.f32.gmra.mxu0 %v886_v7  ;;  %v849_v31 = vmul.f32 %v4536_v26, %v811_v25  ;;  %3554 = vrsqrt.f32 %v751_v46  ;;  %1598 = vmatprep.subr.mxu1 %v3992_v37  ;;  %v1566_v7 = vld [vmem:[%s6037_s5 + $0xf8] sm:$0xff] }
 0x156   : > { %1052 = vmatprep.mubr.f32.mxu0 %v3992_v37  ;;  %v3549_v13 = vpop.eup %3548  ;;  %1599 = vmatpush1.msra.mxu1 %v1538_v61 }
 0x157   : > { %v752_v56 = vadd.f32 1e-05, %v720_v50  ;;  %v887_v21 = vadd.f32 %v4542_v5, %v849_v31  ;;  %v812_v59 = vmul.f32 %v3549_v13, %v4304_v55  ;;  %v1537_v55 = vld [vmem:[%s6037_s5 + $0x10] sm:$0xff]  ;;  %1600 = vmatprep.subr.mxu1 %v3992_v37  ;;  %v681_v31 = vpop.xlane.xlu1 %680 }
 0x158   : > { %v669_v60 = vpop.xlane.xlu0 %668  ;;  %1601 = vmatpush1.msra.mxu1 %v1537_v55  ;;  %v727_v61 = vmul.f32 0.010416667, %v681_v31 }
 0x159   : > { %3556 = vrsqrt.f32 %v752_v56  ;;  %v721_v62 = vmul.f32 0.010416667, %v669_v60  ;;  %1053 = vmatmul.mubr.f32.gmra.mxu0 %v887_v21  ;;  %v850_v27 = vmul.f32 %v4536_v26, %v812_v59  ;;  %1602 = vmatprep.subr.mxu1 %v3992_v37  ;;  %v1564_v21 = vld [vmem:[%s6037_s5 + $0xe8] sm:$0xff] }
 0x15a   : > { %1058 = vmatprep.mubr.f32.mxu0 %v3992_v37  ;;  %v3551_v63 = vpop.eup %3550  ;;  %1603 = vmatpush1.msra.mxu1 %v1536_v10 }
 0x15b   : > { %v753_v0 = vadd.f32 1e-05, %v721_v62  ;;  %v888_v2 = vadd.f32 %v4542_v5, %v850_v27  ;;  %v813_v1 = vmul.f32 %v3551_v63, %v4328_v32  ;;  %v725_v32 = vmul.f32 0.010416667, %v677_v34  ;;  %1604 = vmatprep.subr.mxu1 %v3992_v37 }
 0x15c   : > { %v671_v23 = vpop.xlane.xlu0 %670  ;;  %1605 = vmatpush1.msra.mxu1 %v1535_v52 }
 0x15d   : > { %v722_v29 = vmul.f32 0.010416667, %v671_v23  ;;  %3558 = vrsqrt.f32 %v753_v0  ;;  %1059 = vmatmul.mubr.f32.gmra.mxu0 %v888_v2  ;;  %v851_v9 = vmul.f32 %v4536_v26, %v813_v1  ;;  %1606 = vmatprep.subr.mxu1 %v3992_v37  ;;  %v685_v23 = vpop.xlane.xlu1 %684 }
 0x15e   : > { %v3553_v4 = vpop.eup %3552  ;;  %1064 = vmatprep.mubr.f32.mxu0 %v3992_v37  ;;  %3560 = vrsqrt.f32 %v755_v3  ;;  %1607 = vmatpush2.msra.mxu1 %v1566_v7  ;;  %v759_v3 = vadd.f32 1e-05, %v727_v61 }
 0x15f   : > { %v754_v43 = vadd.f32 1e-05, %v722_v29  ;;  %v889_v35 = vadd.f32 %v4542_v5, %v851_v9  ;;  %v814_v46 = vmul.f32 %v3553_v4, %v4354_v48  ;;  %v757_v48 = vadd.f32 1e-05, %v725_v32  ;;  %1608 = vmatprep.subr.mxu1 %v3992_v37 }
 0x160   : > { %v675_v44 = vpop.xlane.xlu0 %674  ;;  %1609 = vmatpush2.msra.mxu1 %v1565_v58  ;;  %v729_v9 = vmul.f32 0.010416667, %v685_v23 }
 0x161   : > { %3562 = vrsqrt.f32 %v754_v43  ;;  %v724_v25 = vmul.f32 0.010416667, %v675_v44  ;;  %1065 = vmatmul.mubr.f32.gmra.mxu0 %v889_v35  ;;  %v852_v49 = vmul.f32 %v4536_v26, %v814_v46  ;;  %1610 = vmatprep.subr.mxu1 %v3992_v37 }
 0x162   : > { %v3555_v22 = vpop.eup %3554  ;;  %1070 = vmatprep.mubr.f32.mxu0 %v3992_v37  ;;  %1611 = vmatpush2.msra.mxu1 %v1564_v21  ;;  %v761_v46 = vadd.f32 1e-05, %v729_v9 }
 0x163   : > { %v756_v50 = vadd.f32 1e-05, %v724_v25  ;;  %v890_v13 = vadd.f32 %v4542_v5, %v852_v49  ;;  %v815_v56 = vmul.f32 %v3555_v22, %v4378_v39  ;;  %1612 = vmatprep.subr.mxu1 %v3992_v37  ;;  %v689_v49 = vpop.xlane.xlu1 %688 }
 0x164   : > { %v679_v45 = vpop.xlane.xlu0 %678 }
 0x165   : > { %v726_v57 = vmul.f32 0.010416667, %v679_v45  ;;  %3564 = vrsqrt.f32 %v756_v50  ;;  %1071 = vmatmul.mubr.f32.gmra.mxu0 %v890_v13  ;;  %v853_v59 = vmul.f32 %v4536_v26, %v815_v56 }
 0x166   : > { %v3557_v60 = vpop.eup %3556  ;;  %3566 = vrsqrt.f32 %v757_v48  ;;  %1076 = vmatprep.mubr.f32.mxu0 %v3992_v37 }
 0x167   : > { %v816_v39 = vmul.f32 %v3557_v60, %v4401_v36  ;;  %v758_v62 = vadd.f32 1e-05, %v726_v57  ;;  %v891_v27 = vadd.f32 %v4542_v5, %v853_v59  ;;  %v693_v60 = vpop.xlane.xlu1 %692 }
 0x168   : > { %v683_v55 = vpop.xlane.xlu0 %682 }
 0x169   : > { %v854_v63 = vmul.f32 %v4536_v26, %v816_v39  ;;  %1077 = vmatmul.mubr.f32.gmra.mxu0 %v891_v27  ;;  %3568 = vrsqrt.f32 %v758_v62  ;;  %v728_v2 = vmul.f32 0.010416667, %v683_v55  ;;  %v733_v39 = vmul.f32 0.010416667, %v693_v60 }
 0x16a   : > { %v3559_v0 = vpop.eup %3558  ;;  %1082 = vmatprep.mubr.f32.mxu0 %v3992_v37  ;;  %3570 = vrsqrt.f32 %v759_v3 }
 0x16b   : > { %v892_v34 = vadd.f32 %v4542_v5, %v854_v63  ;;  %v817_v36 = vmul.f32 %v3559_v0, %v4418_v47  ;;  %v3561_v1 = vpop.eup %3560  ;;  %v760_v4 = vadd.f32 1e-05, %v728_v2  ;;  %v697_v2 = vpop.xlane.xlu1 %696 }
 0x16c   : > { %v819_v43 = vmul.f32 %v3561_v1, %v4323_v12  ;;  %v687_v44 = vpop.xlane.xlu0 %686  ;;  %v731_v12 = vmul.f32 0.010416667, %v689_v49 }
 0x16d   : > { %1083 = vmatmul.mubr.f32.gmra.mxu0 %v892_v34  ;;  %v855_v29 = vmul.f32 %v4536_v26, %v817_v36  ;;  %3572 = vrsqrt.f32 %v760_v4  ;;  %v730_v58 = vmul.f32 0.010416667, %v687_v44  ;;  %v765_v34 = vadd.f32 1e-05, %v733_v39  ;;  %v1556_v39 = vld [vmem:[%s6037_s5 + $0xa8] sm:$0xff] }
 0x16e   : > { %v3563_v10 = vpop.eup %3562  ;;  %1088 = vmatprep.mubr.f32.mxu0 %v3992_v37  ;;  %3574 = vrsqrt.f32 %v761_v46  ;;  %v763_v21 = vadd.f32 1e-05, %v731_v12 }
 0x16f   : > { %v818_v52 = vmul.f32 %v3563_v10, %v4430_v53  ;;  %v893_v32 = vadd.f32 %v4542_v5, %v855_v29  ;;  %v857_v53 = vmul.f32 %v4536_v26, %v819_v43  ;;  %v762_v50 = vadd.f32 1e-05, %v730_v58  ;;  %v1563_v10 = vld [vmem:[%s6037_s5 + $0xe0] sm:$0xff] }
 0x170   : > { %v691_v56 = vpop.xlane.xlu0 %690  ;;  %v735_v29 = vmul.f32 0.010416667, %v697_v2  ;;  %1613 = vmatpush2.msra.mxu1 %v1563_v10 }
 0x171   : > { %v856_v35 = vmul.f32 %v4536_v26, %v818_v52  ;;  %1089 = vmatmul.mubr.f32.gmra.mxu0 %v893_v32  ;;  %v895_v31 = vadd.f32 %v4542_v5, %v857_v53  ;;  %3576 = vrsqrt.f32 %v762_v50  ;;  %v732_v59 = vmul.f32 0.010416667, %v691_v56  ;;  %1614 = vmatprep.subr.mxu1 %v3992_v37  ;;  %v1560_v53 = vld [vmem:[%s6037_s5 + $0xc8] sm:$0xff] }
 0x172   : > { %v3565_v47 = vpop.eup %3564  ;;  %1094 = vmatprep.mubr.f32.mxu0 %v3992_v37  ;;  %3578 = vrsqrt.f32 %v763_v21 }
 0x173   : > { %v894_v7 = vadd.f32 %v4542_v5, %v856_v35  ;;  %v3567_v25 = vpop.eup %3566  ;;  %v820_v22 = vmul.f32 %v3565_v47, %v4439_v15  ;;  %v764_v27 = vadd.f32 1e-05, %v732_v59  ;;  %v767_v35 = vadd.f32 1e-05, %v735_v29  ;;  %v1552_v29 = vld [vmem:[%s6037_s5 + $0x88] sm:$0xff] }
 0x174   : > { %v821_v48 = vmul.f32 %v3567_v25, %v4350_v14  ;;  %v695_v3 = vpop.xlane.xlu0 %694 }
 0x175   : > { %1095 = vmatmul.mubr.f32.gmra.mxu0 %v894_v7  ;;  %v858_v45 = vmul.f32 %v4536_v26, %v820_v22  ;;  %3580 = vrsqrt.f32 %v764_v27  ;;  %v734_v36 = vmul.f32 0.010416667, %v695_v3  ;;  %v701_v7 = vpop.xlane.xlu1 %700  ;;  %v1559_v22 = vld [vmem:[%s6037_s5 + $0xc0] sm:$0xff]  ;;  %v1554_v3 = vld [vmem:[%s6037_s5 + $0x98] sm:$0xff] }
 0x176   : > { %1100 = vmatprep.mubr.f32.mxu0 %v3992_v37  ;;  %v3569_v13 = vpop.eup %3568  ;;  %v859_v15 = vmul.f32 %v4536_v26, %v821_v48  ;;  %3582 = vrsqrt.f32 %v765_v34  ;;  %v737_v12 = vmul.f32 0.010416667, %v701_v7 }
 0x177   : > { %v3571_v57 = vpop.eup %3570  ;;  %v896_v61 = vadd.f32 %v4542_v5, %v858_v45  ;;  %v822_v14 = vmul.f32 %v3569_v13, %v4451_v17  ;;  %v766_v52 = vadd.f32 1e-05, %v734_v36  ;;  %v1558_v45 = vld [vmem:[%s6037_s5 + $0xb8] sm:$0xff] }
 0x178   : > { %v823_v62 = vmul.f32 %v3571_v57, %v4373_v16  ;;  %v897_v55 = vadd.f32 %v4542_v5, %v859_v15  ;;  %v699_v44 = vpop.xlane.xlu0 %698  ;;  %v769_v21 = vadd.f32 1e-05, %v737_v12 }
 0x179   : > { %1101 = vmatmul.mubr.f32.gmra.mxu0 %v895_v31  ;;  %v860_v63 = vmul.f32 %v4536_v26, %v822_v14  ;;  %3584 = vrsqrt.f32 %v766_v52  ;;  %v736_v25 = vmul.f32 0.010416667, %v699_v44  ;;  %v705_v60 = vpop.xlane.xlu1 %704  ;;  %v1551_v52 = vld [vmem:[%s6037_s5 + $0x80] sm:$0xff] }
 0x17a   : > { %1106 = vmatprep.mubr.f32.mxu0 %v3992_v37  ;;  %v3573_v0 = vpop.eup %3572  ;;  %v861_v17 = vmul.f32 %v4536_v26, %v823_v62  ;;  %3586 = vrsqrt.f32 %v767_v35  ;;  %v1555_v62 = vld [vmem:[%s6037_s5 + $0xa0] sm:$0xff]  ;;  %v739_v27 = vmul.f32 0.010416667, %v705_v60  ;;  %v949_v60 = vshrl.u32 %v449_v40, 7 }
 0x17b   : > { %v3575_v23 = vpop.eup %3574  ;;  %v898_v1 = vadd.f32 %v4542_v5, %v860_v63  ;;  %v824_v16 = vmul.f32 %v3573_v0, %v4460_v19  ;;  %v1562_v19 = vld [vmem:[%s6037_s5 + $0xd8] sm:$0xff]  ;;  %v768_v48 = vadd.f32 1e-05, %v736_v25 }
 0x17c   : > { %v825_v9 = vmul.f32 %v3575_v23, %v4397_v18  ;;  %v899_v4 = vadd.f32 %v4542_v5, %v861_v17  ;;  %1615 = vmatpush2.msra.mxu1 %v1562_v19  ;;  %v1561_v18 = vld [vmem:[%s6037_s5 + $0xd0] sm:$0xff]  ;;  %v703_v56 = vpop.xlane.xlu0 %702  ;;  %v771_v23 = vadd.f32 1e-05, %v739_v27 }
 0x17d   : > { %1107 = vmatmul.mubr.f32.gmra.mxu0 %v896_v61  ;;  %v862_v32 = vmul.f32 %v4536_v26, %v824_v16  ;;  %1616 = vmatprep.subr.mxu1 %v3992_v37  ;;  %3588 = vrsqrt.f32 %v768_v48  ;;  %v738_v59 = vmul.f32 0.010416667, %v703_v56 }
 0x17e   : > { %1112 = vmatprep.mubr.f32.mxu0 %v3992_v37  ;;  %v3577_v43 = vpop.eup %3576  ;;  %v863_v47 = vmul.f32 %v4536_v26, %v825_v9  ;;  %1617 = vmatpush2.msra.mxu1 %v1561_v18  ;;  %3590 = vrsqrt.f32 %v769_v21 }
 0x17f   : > { %v3579_v46 = vpop.eup %3578  ;;  %v900_v49 = vadd.f32 %v4542_v5, %v862_v32  ;;  %v826_v58 = vmul.f32 %v3577_v43, %v4472_v20  ;;  %1618 = vmatprep.subr.mxu1 %v3992_v37 }
 0x180   : > { %1619 = vmatpush2.msra.mxu1 %v1560_v53  ;;  %v827_v20 = vmul.f32 %v3579_v46, %v4425_v51  ;;  %v901_v50 = vadd.f32 %v4542_v5, %v863_v47  ;;  %v1557_v51 = vld [vmem:[%s6037_s5 + $0xb0] sm:$0xff]  ;;  %v707_v17 = vpop.xlane.xlu0 %706  ;;  %v709_v9 = vpop.xlane.xlu1 %708 }
 0x181   : > { %1113 = vmatmul.mubr.f32.gmra.mxu0 %v897_v55  ;;  %1620 = vmatprep.subr.mxu1 %v3992_v37  ;;  %v864_v31 = vmul.f32 %v4536_v26, %v826_v58  ;;  %v741_v32 = vmul.f32 0.010416667, %v709_v9 }
 0x182   : > { %1118 = vmatprep.mubr.f32.mxu0 %v3992_v37  ;;  %1621 = vmatpush2.msra.mxu1 %v1559_v22  ;;  %v3581_v13 = vpop.eup %3580  ;;  %v865_v15 = vmul.f32 %v4536_v26, %v827_v20 }
 0x183   : > { %1622 = vmatprep.subr.mxu1 %v3992_v37  ;;  %v3583_v57 = vpop.eup %3582  ;;  %v902_v61 = vadd.f32 %v4542_v5, %v864_v31  ;;  %v828_v14 = vmul.f32 %v3581_v13, %v4481_v54  ;;  %v770_v54 = vadd.f32 1e-05, %v738_v59  ;;  %v773_v35 = vadd.f32 1e-05, %v741_v32 }
 0x184   : > { %1623 = vmatpush2.msra.mxu1 %v1558_v45  ;;  %v829_v55 = vmul.f32 %v3583_v57, %v4446_v33  ;;  %v903_v63 = vadd.f32 %v4542_v5, %v865_v15  ;;  %v1553_v33 = vld [vmem:[%s6037_s5 + $0x90] sm:$0xff]  ;;  %v3920_v57 = vld [vmem:[%s4074_s27] sm:$0xff]  ;;  %v950_v59 = vsub.s32 0, %v949_v60 }
 0x185   : > { %1119 = vmatmul.mubr.f32.gmra.mxu0 %v898_v1  ;;  %1624 = vmatprep.subr.mxu1 %v3992_v37  ;;  %v866_v0 = vmul.f32 %v4536_v26, %v828_v14  ;;  %3592 = vrsqrt.f32 %v770_v54  ;;  %v740_v1 = vmul.f32 0.010416667, %v707_v17 }
 0x186   : > { %1124 = vmatprep.mubr.f32.mxu0 %v3992_v37  ;;  %1625 = vmatpush2.msra.mxu1 %v1557_v51  ;;  %v3585_v34 = vpop.eup %3584  ;;  %v867_v2 = vmul.f32 %v4536_v26, %v829_v55  ;;  %3594 = vrsqrt.f32 %v771_v23 }
 0x187   : > { %1626 = vmatprep.subr.mxu1 %v3992_v37  ;;  %v3587_v36 = vpop.eup %3586  ;;  %v904_v16 = vadd.f32 %v4542_v5, %v866_v0  ;;  %v830_v10 = vmul.f32 %v3585_v34, %v4493_v24  ;;  %v772_v19 = vadd.f32 1e-05, %v740_v1 }
 0x188   : > { %1627 = vmatpush2.msra.mxu1 %v1556_v39  ;;  %v831_v24 = vmul.f32 %v3587_v36, %v4468_v8 }
 0x189   : > { %1125 = vmatmul.mubr.f32.gmra.mxu0 %v899_v4  ;;  %1628 = vmatprep.subr.mxu1 %v3992_v37  ;;  %v905_v4 = vadd.f32 %v4542_v5, %v867_v2  ;;  %v868_v43 = vmul.f32 %v4536_v26, %v830_v10  ;;  %3596 = vrsqrt.f32 %v772_v19 }
 0x18a   : > { %1130 = vmatprep.mubr.f32.mxu0 %v3992_v37  ;;  %1629 = vmatpush2.msra.mxu1 %v1555_v62  ;;  %v3589_v44 = vpop.eup %3588  ;;  %v869_v18 = vmul.f32 %v4536_v26, %v831_v24  ;;  %3598 = vrsqrt.f32 %v773_v35 }
 0x18b   : > { %1630 = vmatprep.subr.mxu1 %v3992_v37  ;;  %v906_v47 = vadd.f32 %v4542_v5, %v868_v43  ;;  %v832_v46 = vmul.f32 %v3589_v44, %v4502_v11  ;;  %v3591_v7 = vpop.eup %3590 }
 0x18c   : > { %1631 = vmatpush2.msra.mxu1 %v1554_v3  ;;  %v907_v8 = vadd.f32 %v4542_v5, %v869_v18 }
 0x18d   : > { %1131 = vmatmul.mubr.f32.gmra.mxu0 %v900_v49  ;;  %1632 = vmatprep.subr.mxu1 %v3992_v37  ;;  %v870_v25 = vmul.f32 %v4536_v26, %v832_v46  ;;  %v833_v49 = vmul.f32 %v3591_v7, %v4489_v6 }
 0x18e   : > { %1136 = vmatprep.mubr.f32.mxu0 %v3992_v37  ;;  %1633 = vmatpush2.msra.mxu1 %v1553_v33 }
 0x18f   : > { %1634 = vmatprep.subr.mxu1 %v3992_v37  ;;  %v908_v53 = vadd.f32 %v4542_v5, %v870_v25  ;;  %v871_v22 = vmul.f32 %v4536_v26, %v833_v49 }
 0x190   : > { %1635 = vmatpush2.msra.mxu1 %v1552_v29 }
 0x191   : > { %1137 = vmatmul.mubr.f32.gmra.mxu0 %v901_v50  ;;  %1636 = vmatprep.subr.mxu1 %v3992_v37  ;;  %v909_v20 = vadd.f32 %v4542_v5, %v871_v22 }
 0x192   : > { %1142 = vmatprep.mubr.f32.mxu0 %v3992_v37  ;;  %1637 = vmatpush2.msra.mxu1 %v1551_v52  ;;  %v3593_v58 = vpop.eup %3592 }
 0x193   : > { %v834_v11 = vmul.f32 %v3593_v58, %v4513_v28  ;;  %v3595_v12 = vpop.eup %3594 }
 0x194   : > { %v835_v6 = vmul.f32 %v3595_v12, %v4509_v38 }
 0x195   : > { %1143 = vmatmul.mubr.f32.gmra.mxu0 %v902_v61  ;;  %v872_v48 = vmul.f32 %v4536_v26, %v834_v11  ;;  %v954_v61 = vsub.s32 1, %v949_v60 }
 0x196   : > { %1148 = vmatprep.mubr.f32.mxu0 %v3992_v37  ;;  %v3597_v50 = vpop.eup %3596  ;;  %v873_v45 = vmul.f32 %v4536_v26, %v835_v6 }
 0x197   : > { %v910_v31 = vadd.f32 %v4542_v5, %v872_v48  ;;  %v836_v28 = vmul.f32 %v3597_v50, %v4522_v42  ;;  %v3599_v13 = vpop.eup %3598 }
 0x198   : > { %v911_v56 = vadd.f32 %v4542_v5, %v873_v45  ;;  %v837_v38 = vmul.f32 %v3599_v13, %v4529_v30  ;;  %v946_v30 = vld [vmem:[%s6036_s4] sm:$0x3] }
 0x199   : > { %1149 = vmatmul.mubr.f32.gmra.mxu0 %v903_v63  ;;  %v874_v51 = vmul.f32 %v4536_v26, %v836_v28  ;;  %v4802_v14 = vrot.slane %v946_v30, %v950_v59  ;;  %v4804_v39 = vrot.slane %v946_v30, %v954_v61 }
 0x19a   : > { %1154 = vmatprep.mubr.f32.mxu0 %v3992_v37  ;;  %v875_v15 = vmul.f32 %v4536_v26, %v837_v38 }
 0x19b   : > { %v912_v21 = vadd.f32 %v4542_v5, %v874_v51 }
 0x19c   : > { %v913_v42 = vadd.f32 %v4542_v5, %v875_v15 }
 0x19d   : > { %1155 = vmatmul.mubr.f32.gmra.mxu0 %v904_v16 }
 0x19e   : > { %1160 = vmatprep.mubr.f32.mxu0 %v3992_v37 }
 0x1a1   : > { %1161 = vmatmul.mubr.f32.gmra.mxu0 %v905_v4 }
 0x1a2   : > { %1166 = vmatprep.mubr.f32.mxu0 %v3992_v37 }
 0x1a5   : > { %1167 = vmatmul.mubr.f32.gmra.mxu0 %v906_v47 }
 0x1a6   : > { %1172 = vmatprep.mubr.f32.mxu0 %v3992_v37 }
 0x1a9   : > { %1173 = vmatmul.mubr.f32.gmra.mxu0 %v907_v8 }
 0x1aa   : > { %1178 = vmatprep.mubr.f32.mxu0 %v3992_v37 }
 0x1ad   : > { %1179 = vmatmul.mubr.f32.gmra.mxu0 %v908_v53 }
 0x1ae   : > { %1184 = vmatprep.mubr.f32.mxu0 %v3992_v37 }
 0x1b1   : > { %1185 = vmatmul.mubr.f32.gmra.mxu0 %v909_v20 }
 0x1b2   : > { %1190 = vmatprep.mubr.f32.mxu0 %v3992_v37 }
 0x1b5   : > { %1191 = vmatmul.mubr.f32.gmra.mxu0 %v910_v31 }
 0x1b6   : > { %1196 = vmatprep.mubr.f32.mxu0 %v3992_v37 }
 0x1b9   : > { %1197 = vmatmul.mubr.f32.gmra.mxu0 %v911_v56 }
 0x1ba   : > { %1202 = vmatprep.mubr.f32.mxu0 %v3992_v37 }
 0x1bd   : > { %1203 = vmatmul.mubr.f32.gmra.mxu0 %v912_v21 }
 0x1be   : > { %1208 = vmatprep.mubr.f32.mxu0 %v3992_v37 }
 0x1c1   : > { %1209 = vmatmul.mubr.f32.gmra.mxu0 %v913_v42 }
 0x1c2   : > { %3367 = vmatprep.mubr.f32.mxu0 %v3920_v57 }
 0x205   : > { %v1024_v26 = vpop.f32.mrf.mxu0 }
 0x206   : > { %v1025_v37 = vadd.f32 %v1024_v26, %v4802_v14 }
 0x207   : > { %v1026_v62 = vpop.f32.mrf.mxu0 }
 0x208   : > { %v1279_v5 = vmul.f32 0.70710677, %v1025_v37  ;;  %v1027_v27 = vadd.f32 %v1026_v62, %v4804_v39  ;;  %v1215_v49 = vmul.f32 0.5, %v1025_v37 }
 0x209   : > { %v1030_v55 = vpop.f32.mrf.mxu0 }
 0x20a   : > { %3600 = verf.f32 %v1279_v5  ;;  %v1280_v40 = vmul.f32 0.70710677, %v1027_v27  ;;  %v1031_v54 = vadd.f32 %v1030_v55, %v4802_v14  ;;  %v1216_v53 = vmul.f32 0.5, %v1027_v27 }
 0x20b   : > { %v1032_v63 = vpop.f32.mrf.mxu0 }
 0x20c   : > { %3602 = verf.f32 %v1280_v40  ;;  %v1281_v0 = vmul.f32 0.70710677, %v1031_v54  ;;  %v1033_v3 = vadd.f32 %v1032_v63, %v4804_v39  ;;  %v1217_v38 = vmul.f32 0.5, %v1031_v54 }
 0x20d   : > { %v1036_v34 = vpop.f32.mrf.mxu0 }
 0x20e   : > { %3604 = verf.f32 %v1281_v0  ;;  %v1282_v17 = vmul.f32 0.70710677, %v1033_v3  ;;  %v4811_v33 = vadd.f32 %v1036_v34, %v4802_v14  ;;  %v1218_v48 = vmul.f32 0.5, %v1033_v3 }
 0x20f   : > { %v1038_v23 = vpop.f32.mrf.mxu0 }
 0x210   : > { %3606 = verf.f32 %v1282_v17  ;;  %v1283_v2 = vmul.f32 0.70710677, %v4811_v33  ;;  %v1039_v36 = vadd.f32 %v1038_v23, %v4804_v39  ;;  %v1219_v55 = vmul.f32 0.5, %v4811_v33 }
 0x211   : > { %v1042_v1 = vpop.f32.mrf.mxu0 }
 0x212   : > { %3608 = verf.f32 %v1283_v2  ;;  %v1284_v16 = vmul.f32 0.70710677, %v1039_v36  ;;  %v4816_v10 = vadd.f32 %v1042_v1, %v4802_v14  ;;  %v1220_v59 = vmul.f32 0.5, %v1039_v36 }
 0x213   : > { %v1044_v29 = vpop.f32.mrf.mxu0 }
 0x214   : > { %3610 = verf.f32 %v1284_v16  ;;  %v1285_v9 = vmul.f32 0.70710677, %v4816_v10  ;;  %v1045_v52 = vadd.f32 %v1044_v29, %v4804_v39  ;;  %v1221_v29 = vmul.f32 0.5, %v4816_v10 }
 0x215   : > { %v1048_v4 = vpop.f32.mrf.mxu0 }
 0x216   : > { %3612 = verf.f32 %v1285_v9  ;;  %v1286_v24 = vmul.f32 0.70710677, %v1045_v52  ;;  %v4821_v32 = vadd.f32 %v1048_v4, %v4802_v14  ;;  %v1222_v34 = vmul.f32 0.5, %v1045_v52 }
 0x217   : > { %v3601_v19 = vpop.eup %3600  ;;  %v1050_v43 = vpop.f32.mrf.mxu0 }
 0x218   : > { %3614 = verf.f32 %v1286_v24  ;;  %v1287_v44 = vmul.f32 0.70710677, %v4821_v32  ;;  %v4825_v18 = vadd.f32 %v1050_v43, %v4804_v39  ;;  %v1407_v46 = vadd.f32 1.0, %v3601_v19 }
 0x219   : > { %v3603_v35 = vpop.eup %3602  ;;  %v1054_v47 = vpop.f32.mrf.mxu0 }
 0x21a   : > { %3616 = verf.f32 %v1287_v44  ;;  %v1288_v7 = vmul.f32 0.70710677, %v4825_v18  ;;  %v4829_v8 = vadd.f32 %v1054_v47, %v4802_v14  ;;  %v1408_v22 = vadd.f32 1.0, %v3603_v35 }
 0x21b   : > { %v3605_v25 = vpop.eup %3604  ;;  %v1056_v58 = vpop.f32.mrf.mxu0  ;;  %v1471_v50 = vmul.f32 %v1407_v46, %v1215_v49  ;;  %v1224_v43 = vmul.f32 0.5, %v4825_v18  ;;  %v1223_v49 = vmul.f32 0.5, %v4821_v32 }
 0x21c   : > { %3618 = verf.f32 %v1288_v7  ;;  %v1289_v11 = vmul.f32 0.70710677, %v4829_v8  ;;  %v4833_v12 = vadd.f32 %v1056_v58, %v4804_v39  ;;  %v1472_v6 = vmul.f32 %v1408_v22, %v1216_v53 }
 0x21d   : > { %v3607_v20 = vpop.eup %3606  ;;  %v1060_v45 = vpop.f32.mrf.mxu0  ;;  %v1409_v13 = vadd.f32 1.0, %v3605_v25 }
 0x21e   : > { %3620 = verf.f32 %v1289_v11  ;;  %v1290_v31 = vmul.f32 0.70710677, %v4833_v12  ;;  %v1410_v28 = vadd.f32 1.0, %v3607_v20  ;;  %v4837_v51 = vadd.f32 %v1060_v45, %v4802_v14  ;;  %1638 = vmatprep.mubr.f32.mxu1 %v1472_v6 }
 0x21f   : > { %v3609_v56 = vpop.eup %3608  ;;  %v1062_v21 = vpop.f32.mrf.mxu0  ;;  %1639 = vmatmul.mubr.f32.vlgmr.msra.gmra.mxu1 %v1471_v50  ;;  %v1473_v61 = vmul.f32 %v1409_v13, %v1217_v38  ;;  %v1226_v20 = vmul.f32 0.5, %v4833_v12  ;;  %v1225_v13 = vmul.f32 0.5, %v4829_v8 }
 0x220   : > { %3622 = verf.f32 %v1290_v31  ;;  %v1474_v15 = vmul.f32 %v1410_v28, %v1218_v48  ;;  %v1291_v57 = vmul.f32 0.70710677, %v4837_v51  ;;  %v4841_v60 = vadd.f32 %v1062_v21, %v4804_v39 }
 0x221   : > { %v3611_v42 = vpop.eup %3610  ;;  %v1066_v30 = vpop.f32.mrf.mxu0  ;;  %v1411_v37 = vadd.f32 1.0, %v3609_v56 }
 0x222   : > { %1643 = vmatprep.mubr.f32.mxu1 %v1474_v15  ;;  %v1412_v26 = vadd.f32 1.0, %v3611_v42  ;;  %3624 = verf.f32 %v1291_v57  ;;  %v1292_v5 = vmul.f32 0.70710677, %v4841_v60  ;;  %v4845_v27 = vadd.f32 %v1066_v30, %v4802_v14 }
 0x223   : > { %v3613_v62 = vpop.eup %3612  ;;  %v1068_v40 = vpop.f32.mrf.mxu0  ;;  %1644 = vmatmul.mubr.f32.gmra.mxu1 %v1473_v61  ;;  %v1475_v23 = vmul.f32 %v1411_v37, %v1219_v55  ;;  %v1228_v37 = vmul.f32 0.5, %v4841_v60 }
 0x224   : > { %v1476_v54 = vmul.f32 %v1412_v26, %v1220_v59  ;;  %3626 = verf.f32 %v1292_v5  ;;  %v1293_v0 = vmul.f32 0.70710677, %v4845_v27  ;;  %v4850_v3 = vadd.f32 %v1068_v40, %v4804_v39 }
 0x225   : > { %v3615_v63 = vpop.eup %3614  ;;  %v1072_v17 = vpop.f32.mrf.mxu0  ;;  %v1413_v36 = vadd.f32 1.0, %v3613_v62  ;;  %v1227_v26 = vmul.f32 0.5, %v4837_v51 }
 0x226   : > { %1648 = vmatprep.mubr.f32.mxu1 %v1476_v54  ;;  %v1414_v2 = vadd.f32 1.0, %v3615_v63  ;;  %3628 = verf.f32 %v1293_v0  ;;  %v1294_v33 = vmul.f32 0.70710677, %v4850_v3  ;;  %v4854_v16 = vadd.f32 %v1072_v17, %v4802_v14 }
 0x227   : > { %v3617_v1 = vpop.eup %3616  ;;  %v1074_v9 = vpop.f32.mrf.mxu0  ;;  %1649 = vmatmul.mubr.f32.gmra.mxu1 %v1475_v23  ;;  %v1477_v35 = vmul.f32 %v1413_v36, %v1221_v29 }
 0x228   : > { %v1478_v4 = vmul.f32 %v1414_v2, %v1222_v34  ;;  %3630 = verf.f32 %v1294_v33  ;;  %v1295_v52 = vmul.f32 0.70710677, %v4854_v16  ;;  %v4859_v19 = vadd.f32 %v1074_v9, %v4804_v39 }
 0x229   : > { %v3619_v24 = vpop.eup %3618  ;;  %v1078_v44 = vpop.f32.mrf.mxu0  ;;  %v1415_v46 = vadd.f32 1.0, %v3617_v1  ;;  %v1230_v2 = vmul.f32 0.5, %v4850_v3  ;;  %v1229_v33 = vmul.f32 0.5, %v4845_v27  ;;  %v1231_v27 = vmul.f32 0.5, %v4854_v16 }
 0x22a   : > { %1653 = vmatprep.mubr.f32.mxu1 %v1478_v4  ;;  %v1416_v47 = vadd.f32 1.0, %v3619_v24  ;;  %3632 = verf.f32 %v1295_v52  ;;  %v1296_v10 = vmul.f32 0.70710677, %v4859_v19  ;;  %v4864_v25 = vadd.f32 %v1078_v44, %v4802_v14 }
 0x22b   : > { %v3621_v7 = vpop.eup %3620  ;;  %v1080_v58 = vpop.f32.mrf.mxu0  ;;  %1654 = vmatmul.mubr.f32.gmra.mxu1 %v1477_v35  ;;  %v1479_v6 = vmul.f32 %v1415_v46, %v1223_v49  ;;  %v1232_v46 = vmul.f32 0.5, %v4859_v19 }
 0x22c   : > { %v1480_v53 = vmul.f32 %v1416_v47, %v1224_v43  ;;  %3634 = verf.f32 %v1296_v10  ;;  %v1297_v18 = vmul.f32 0.70710677, %v4864_v25  ;;  %v4869_v11 = vadd.f32 %v1080_v58, %v4804_v39 }
 0x22d   : > { %v3623_v22 = vpop.eup %3622  ;;  %v1084_v48 = vpop.f32.mrf.mxu0  ;;  %v1417_v31 = vadd.f32 1.0, %v3621_v7 }
 0x22e   : > { %1658 = vmatprep.mubr.f32.mxu1 %v1480_v53  ;;  %v1418_v50 = vadd.f32 1.0, %v3623_v22  ;;  %3636 = verf.f32 %v1297_v18  ;;  %v1298_v32 = vmul.f32 0.70710677, %v4869_v11  ;;  %v4874_v45 = vadd.f32 %v1084_v48, %v4802_v14 }
 0x22f   : > { %v3625_v28 = vpop.eup %3624  ;;  %v1086_v56 = vpop.f32.mrf.mxu0  ;;  %1659 = vmatmul.mubr.f32.gmra.mxu1 %v1479_v6  ;;  %v1481_v57 = vmul.f32 %v1417_v31, %v1225_v13 }
 0x230   : > { %v1482_v38 = vmul.f32 %v1418_v50, %v1226_v20  ;;  %3638 = verf.f32 %v1298_v32  ;;  %v1299_v12 = vmul.f32 0.70710677, %v4874_v45  ;;  %v4879_v21 = vadd.f32 %v1086_v56, %v4804_v39 }
 0x231   : > { %v3627_v15 = vpop.eup %3626  ;;  %v1090_v42 = vpop.f32.mrf.mxu0  ;;  %v1419_v59 = vadd.f32 1.0, %v3625_v28  ;;  %v1234_v50 = vmul.f32 0.5, %v4869_v11  ;;  %v1233_v28 = vmul.f32 0.5, %v4864_v25  ;;  %v1235_v25 = vmul.f32 0.5, %v4874_v45 }
 0x232   : > { %1663 = vmatprep.mubr.f32.mxu1 %v1482_v38  ;;  %3640 = verf.f32 %v1299_v12  ;;  %v1300_v30 = vmul.f32 0.70710677, %v4879_v21  ;;  %v4883_v61 = vadd.f32 %v1090_v42, %v4802_v14  ;;  %v1420_v5 = vadd.f32 1.0, %v3627_v15 }
 0x233   : > { %v3629_v8 = vpop.eup %3628  ;;  %v1092_v62 = vpop.f32.mrf.mxu0  ;;  %1664 = vmatmul.mubr.f32.gmra.mxu1 %v1481_v57  ;;  %v1483_v34 = vmul.f32 %v1419_v59, %v1227_v26 }
 0x234   : > { %3642 = verf.f32 %v1300_v30  ;;  %v1301_v55 = vmul.f32 0.70710677, %v4883_v61  ;;  %v4889_v40 = vadd.f32 %v1092_v62, %v4804_v39  ;;  %v1484_v0 = vmul.f32 %v1420_v5, %v1228_v37 }
 0x235   : > { %v3631_v54 = vpop.eup %3630  ;;  %v1096_v63 = vpop.f32.mrf.mxu0  ;;  %v1421_v60 = vadd.f32 1.0, %v3629_v8  ;;  %v1236_v8 = vmul.f32 0.5, %v4879_v21 }
 0x236   : > { %3644 = verf.f32 %v1301_v55  ;;  %v1302_v17 = vmul.f32 0.70710677, %v4889_v40  ;;  %v4893_v51 = vadd.f32 %v1096_v63, %v4802_v14  ;;  %1668 = vmatprep.mubr.f32.mxu1 %v1484_v0  ;;  %v1422_v1 = vadd.f32 1.0, %v3631_v54 }
 0x237   : > { %v3633_v23 = vpop.eup %3632  ;;  %v1098_v36 = vpop.f32.mrf.mxu0  ;;  %1669 = vmatmul.mubr.f32.gmra.mxu1 %v1483_v34  ;;  %v1485_v35 = vmul.f32 %v1421_v60, %v1229_v33  ;;  %v1238_v60 = vmul.f32 0.5, %v4889_v40 }
 0x238   : > { %3646 = verf.f32 %v1302_v17  ;;  %v1303_v29 = vmul.f32 0.70710677, %v4893_v51  ;;  %v4899_v9 = vadd.f32 %v1098_v36, %v4804_v39  ;;  %v1486_v52 = vmul.f32 %v1422_v1, %v1230_v2 }
 0x239   : > { %v3635_v4 = vpop.eup %3634  ;;  %v1102_v24 = vpop.f32.mrf.mxu0  ;;  %v1423_v43 = vadd.f32 1.0, %v3633_v23  ;;  %v1237_v36 = vmul.f32 0.5, %v4883_v61  ;;  %v1239_v61 = vmul.f32 0.5, %v4893_v51 }
 0x23a   : > { %3648 = verf.f32 %v1303_v29  ;;  %v1304_v44 = vmul.f32 0.70710677, %v4899_v9  ;;  %v4903_v3 = vadd.f32 %v1102_v24, %v4802_v14  ;;  %1673 = vmatprep.mubr.f32.mxu1 %v1486_v52  ;;  %v1424_v10 = vadd.f32 1.0, %v3635_v4 }
 0x23b   : > { %v3637_v47 = vpop.eup %3636  ;;  %v1104_v7 = vpop.f32.mrf.mxu0  ;;  %1674 = vmatmul.mubr.f32.gmra.mxu1 %v1485_v35  ;;  %v1487_v20 = vmul.f32 %v1423_v43, %v1231_v27 }
 0x23c   : > { %3650 = verf.f32 %v1304_v44  ;;  %v1305_v49 = vmul.f32 0.70710677, %v4903_v3  ;;  %v4909_v58 = vadd.f32 %v1104_v7, %v4804_v39  ;;  %v1488_v18 = vmul.f32 %v1424_v10, %v1232_v46 }
 0x23d   : > { %v3639_v53 = vpop.eup %3638  ;;  %v1108_v22 = vpop.f32.mrf.mxu0  ;;  %v1425_v19 = vadd.f32 1.0, %v3637_v47  ;;  %v1240_v47 = vmul.f32 0.5, %v4899_v9 }
 0x23e   : > { %3652 = verf.f32 %v1305_v49  ;;  %v1306_v48 = vmul.f32 0.70710677, %v4909_v58  ;;  %v4913_v16 = vadd.f32 %v1108_v22, %v4802_v14  ;;  %1678 = vmatprep.mubr.f32.mxu1 %v1488_v18  ;;  %v1426_v32 = vadd.f32 1.0, %v3639_v53 }
 0x23f   : > { %v3641_v6 = vpop.eup %3640  ;;  %v1110_v31 = vpop.f32.mrf.mxu0  ;;  %1679 = vmatmul.mubr.f32.gmra.mxu1 %v1487_v20  ;;  %v1489_v59 = vmul.f32 %v1425_v19, %v1233_v28  ;;  %v1242_v19 = vmul.f32 0.5, %v4909_v58 }
 0x240   : > { %3654 = verf.f32 %v1306_v48  ;;  %v1307_v13 = vmul.f32 0.70710677, %v4913_v16  ;;  %v4919_v56 = vadd.f32 %v1110_v31, %v4804_v39  ;;  %v1490_v15 = vmul.f32 %v1426_v32, %v1234_v50 }
 0x241   : > { %v3643_v38 = vpop.eup %3642  ;;  %v1114_v12 = vpop.f32.mrf.mxu0  ;;  %v1427_v42 = vadd.f32 1.0, %v3641_v6  ;;  %v1241_v31 = vmul.f32 0.5, %v4903_v3  ;;  %v1243_v3 = vmul.f32 0.5, %v4913_v16 }
 0x242   : > { %3656 = verf.f32 %v1307_v13  ;;  %v1308_v57 = vmul.f32 0.70710677, %v4919_v56  ;;  %v4923_v11 = vadd.f32 %v1114_v12, %v4802_v14  ;;  %1683 = vmatprep.mubr.f32.mxu1 %v1490_v15  ;;  %v1428_v37 = vadd.f32 1.0, %v3643_v38 }
 0x243   : > { %v3645_v30 = vpop.eup %3644  ;;  %v1116_v26 = vpop.f32.mrf.mxu0  ;;  %1684 = vmatmul.mubr.f32.gmra.mxu1 %v1489_v59  ;;  %v1491_v0 = vmul.f32 %v1427_v42, %v1235_v25 }
 0x244   : > { %3658 = verf.f32 %v1308_v57  ;;  %v1309_v62 = vmul.f32 0.70710677, %v4923_v11  ;;  %v4929_v5 = vadd.f32 %v1116_v26, %v4804_v39  ;;  %v1492_v63 = vmul.f32 %v1428_v37, %v1236_v8 }
 0x245   : > { %v3647_v55 = vpop.eup %3646  ;;  %v1120_v54 = vpop.f32.mrf.mxu0  ;;  %v1429_v21 = vadd.f32 1.0, %v3645_v30  ;;  %v1244_v30 = vmul.f32 0.5, %v4919_v56 }
 0x246   : > { %3660 = verf.f32 %v1309_v62  ;;  %v1310_v34 = vmul.f32 0.70710677, %v4929_v5  ;;  %v4933_v45 = vadd.f32 %v1120_v54, %v4802_v14  ;;  %1688 = vmatprep.mubr.f32.mxu1 %v1492_v63  ;;  %v1430_v2 = vadd.f32 1.0, %v3647_v55 }
 0x247   : > { %v3649_v17 = vpop.eup %3648  ;;  %v1122_v23 = vpop.f32.mrf.mxu0  ;;  %1689 = vmatmul.mubr.f32.gmra.mxu1 %v1491_v0  ;;  %v1493_v44 = vmul.f32 %v1429_v21, %v1237_v36  ;;  %v1246_v21 = vmul.f32 0.5, %v4929_v5 }
 0x248   : > { %3662 = verf.f32 %v1310_v34  ;;  %v1311_v1 = vmul.f32 0.70710677, %v4933_v45  ;;  %v4939_v33 = vadd.f32 %v1122_v23, %v4804_v39  ;;  %v1494_v24 = vmul.f32 %v1430_v2, %v1238_v60 }
 0x249   : > { %v3651_v29 = vpop.eup %3650  ;;  %v1126_v4 = vpop.f32.mrf.mxu0  ;;  %v1431_v52 = vadd.f32 1.0, %v3649_v17  ;;  %v1245_v23 = vmul.f32 0.5, %v4923_v11  ;;  %v1247_v11 = vmul.f32 0.5, %v4933_v45 }
 0x24a   : > { %3664 = verf.f32 %v1311_v1  ;;  %v1312_v43 = vmul.f32 0.70710677, %v4939_v33  ;;  %v4943_v40 = vadd.f32 %v1126_v4, %v4802_v14  ;;  %1693 = vmatprep.mubr.f32.mxu1 %v1494_v24  ;;  %v1432_v46 = vadd.f32 1.0, %v3651_v29 }
 0x24b   : > { %v3653_v35 = vpop.eup %3652  ;;  %v1128_v27 = vpop.f32.mrf.mxu0  ;;  %1694 = vmatmul.mubr.f32.gmra.mxu1 %v1493_v44  ;;  %v1495_v18 = vmul.f32 %v1431_v52, %v1239_v61 }
 0x24c   : > { %3666 = verf.f32 %v1312_v43  ;;  %v1313_v7 = vmul.f32 0.70710677, %v4943_v40  ;;  %v4949_v10 = vadd.f32 %v1128_v27, %v4804_v39  ;;  %v1496_v22 = vmul.f32 %v1432_v46, %v1240_v47 }
 0x24d   : > { %v3655_v49 = vpop.eup %3654  ;;  %v1132_v53 = vpop.f32.mrf.mxu0  ;;  %v1433_v9 = vadd.f32 1.0, %v3653_v35  ;;  %v1248_v35 = vmul.f32 0.5, %v4939_v33 }
 0x24e   : > { %3668 = verf.f32 %v1313_v7  ;;  %v1314_v20 = vmul.f32 0.70710677, %v4949_v10  ;;  %v4953_v51 = vadd.f32 %v1132_v53, %v4802_v14  ;;  %1698 = vmatprep.mubr.f32.mxu1 %v1496_v22  ;;  %v1434_v50 = vadd.f32 1.0, %v3655_v49 }
 0x24f   : > { %v3657_v48 = vpop.eup %3656  ;;  %v1134_v6 = vpop.f32.mrf.mxu0  ;;  %1699 = vmatmul.mubr.f32.gmra.mxu1 %v1495_v18  ;;  %v1497_v57 = vmul.f32 %v1433_v9, %v1241_v31  ;;  %v1250_v9 = vmul.f32 0.5, %v4949_v10 }
 0x250   : > { %3670 = verf.f32 %v1314_v20  ;;  %v1315_v32 = vmul.f32 0.70710677, %v4953_v51  ;;  %v4959_v28 = vadd.f32 %v1134_v6, %v4804_v39  ;;  %v1498_v12 = vmul.f32 %v1434_v50, %v1242_v19 }
 0x251   : > { %v3659_v13 = vpop.eup %3658  ;;  %v1138_v38 = vpop.f32.mrf.mxu0  ;;  %v1435_v15 = vadd.f32 1.0, %v3657_v48  ;;  %v1249_v6 = vmul.f32 0.5, %v4943_v40  ;;  %v1251_v40 = vmul.f32 0.5, %v4953_v51 }
 0x252   : > { %3672 = verf.f32 %v1315_v32  ;;  %v1316_v42 = vmul.f32 0.70710677, %v4959_v28  ;;  %v4963_v58 = vadd.f32 %v1138_v38, %v4802_v14  ;;  %1703 = vmatprep.mubr.f32.mxu1 %v1498_v12  ;;  %v1436_v8 = vadd.f32 1.0, %v3659_v13 }
 0x253   : > { %v3661_v59 = vpop.eup %3660  ;;  %v1140_v25 = vpop.f32.mrf.mxu0  ;;  %1704 = vmatmul.mubr.f32.gmra.mxu1 %v1497_v57  ;;  %v1499_v63 = vmul.f32 %v1435_v15, %v1243_v3 }
 0x254   : > { %3674 = verf.f32 %v1316_v42  ;;  %v1317_v26 = vmul.f32 0.70710677, %v4963_v58  ;;  %v4969_v37 = vadd.f32 %v1140_v25, %v4804_v39  ;;  %v1500_v54 = vmul.f32 %v1436_v8, %v1244_v30 }
 0x255   : > { %v3663_v62 = vpop.eup %3662  ;;  %v1144_v55 = vpop.f32.mrf.mxu0  ;;  %v1437_v56 = vadd.f32 1.0, %v3661_v59  ;;  %v1252_v59 = vmul.f32 0.5, %v4959_v28 }
 0x256   : > { %3676 = verf.f32 %v1317_v26  ;;  %v1318_v0 = vmul.f32 0.70710677, %v4969_v37  ;;  %v4973_v16 = vadd.f32 %v1144_v55, %v4802_v14  ;;  %1708 = vmatprep.mubr.f32.mxu1 %v1500_v54  ;;  %v1438_v60 = vadd.f32 1.0, %v3663_v62 }
 0x257   : > { %v3665_v34 = vpop.eup %3664  ;;  %v1146_v17 = vpop.f32.mrf.mxu0  ;;  %1709 = vmatmul.mubr.f32.gmra.mxu1 %v1499_v63  ;;  %v1501_v43 = vmul.f32 %v1437_v56, %v1245_v23  ;;  %v1254_v56 = vmul.f32 0.5, %v4969_v37 }
 0x258   : > { %3678 = verf.f32 %v1318_v0  ;;  %v1319_v2 = vmul.f32 0.70710677, %v4973_v16  ;;  %v4979_v36 = vadd.f32 %v1146_v17, %v4804_v39  ;;  %v1502_v4 = vmul.f32 %v1438_v60, %v1246_v21 }
 0x259   : > { %v3667_v1 = vpop.eup %3666  ;;  %v1150_v29 = vpop.f32.mrf.mxu0  ;;  %v1439_v24 = vadd.f32 1.0, %v3665_v34  ;;  %v1253_v17 = vmul.f32 0.5, %v4963_v58  ;;  %v1255_v58 = vmul.f32 0.5, %v4973_v16 }
 0x25a   : > { %3680 = verf.f32 %v1319_v2  ;;  %v1320_v52 = vmul.f32 0.70710677, %v4979_v36  ;;  %v4983_v5 = vadd.f32 %v1150_v29, %v4802_v14  ;;  %1713 = vmatprep.mubr.f32.mxu1 %v1502_v4  ;;  %v1440_v47 = vadd.f32 1.0, %v3667_v1 }
 0x25b   : > { %v3669_v44 = vpop.eup %3668  ;;  %v1152_v61 = vpop.f32.mrf.mxu0  ;;  %1714 = vmatmul.mubr.f32.gmra.mxu1 %v1501_v43  ;;  %v1503_v22 = vmul.f32 %v1439_v24, %v1247_v11 }
 0x25c   : > { %3682 = verf.f32 %v1320_v52  ;;  %v1321_v27 = vmul.f32 0.70710677, %v4983_v5  ;;  %v4989_v46 = vadd.f32 %v1152_v61, %v4804_v39  ;;  %v1504_v53 = vmul.f32 %v1440_v47, %v1248_v35 }
 0x25d   : > { %v3671_v7 = vpop.eup %3670  ;;  %v1156_v49 = vpop.f32.mrf.mxu0  ;;  %v1441_v33 = vadd.f32 1.0, %v3669_v44  ;;  %v1256_v44 = vmul.f32 0.5, %v4979_v36 }
 0x25e   : > { %3684 = verf.f32 %v1321_v27  ;;  %v1322_v18 = vmul.f32 0.70710677, %v4989_v46  ;;  %v4993_v45 = vadd.f32 %v1156_v49, %v4802_v14  ;;  %1718 = vmatprep.mubr.f32.mxu1 %v1504_v53  ;;  %v1442_v19 = vadd.f32 1.0, %v3671_v7 }
 0x25f   : > { %v3673_v20 = vpop.eup %3672  ;;  %v1158_v48 = vpop.f32.mrf.mxu0  ;;  %1719 = vmatmul.mubr.f32.gmra.mxu1 %v1503_v22  ;;  %v1505_v42 = vmul.f32 %v1441_v33, %v1249_v6  ;;  %v1258_v33 = vmul.f32 0.5, %v4989_v46 }
 0x260   : > { %3686 = verf.f32 %v1322_v18  ;;  %v1323_v50 = vmul.f32 0.70710677, %v4993_v45  ;;  %v4999_v31 = vadd.f32 %v1158_v48, %v4804_v39  ;;  %v1506_v38 = vmul.f32 %v1442_v19, %v1250_v9 }
 0x261   : > { %v3675_v32 = vpop.eup %3674  ;;  %v1162_v13 = vpop.f32.mrf.mxu0  ;;  %v1443_v12 = vadd.f32 1.0, %v3673_v20  ;;  %v1257_v48 = vmul.f32 0.5, %v4983_v5  ;;  %v1259_v5 = vmul.f32 0.5, %v4993_v45 }
 0x262   : > { %3688 = verf.f32 %v1323_v50  ;;  %v1324_v15 = vmul.f32 0.70710677, %v4999_v31  ;;  %v5003_v10 = vadd.f32 %v1162_v13, %v4802_v14  ;;  %1723 = vmatprep.mubr.f32.mxu1 %v1506_v38  ;;  %v1444_v30 = vadd.f32 1.0, %v3675_v32 }
 0x263   : > { %v3677_v57 = vpop.eup %3676  ;;  %v1164_v3 = vpop.f32.mrf.mxu0  ;;  %1724 = vmatmul.mubr.f32.gmra.mxu1 %v1505_v42  ;;  %v1507_v54 = vmul.f32 %v1443_v12, %v1251_v40 }
 0x264   : > { %3690 = verf.f32 %v1324_v15  ;;  %v1325_v25 = vmul.f32 0.70710677, %v5003_v10  ;;  %v5009_v8 = vadd.f32 %v1164_v3, %v4804_v39  ;;  %v1508_v55 = vmul.f32 %v1444_v30, %v1252_v59 }
 0x265   : > { %v3679_v26 = vpop.eup %3678  ;;  %v1168_v62 = vpop.f32.mrf.mxu0  ;;  %v1445_v28 = vadd.f32 1.0, %v3677_v57  ;;  %v1260_v57 = vmul.f32 0.5, %v4999_v31 }
 0x266   : > { %3692 = verf.f32 %v1325_v25  ;;  %v1326_v63 = vmul.f32 0.70710677, %v5009_v8  ;;  %v5013_v51 = vadd.f32 %v1168_v62, %v4802_v14  ;;  %1728 = vmatprep.mubr.f32.mxu1 %v1508_v55  ;;  %v1446_v21 = vadd.f32 1.0, %v3679_v26 }
 0x267   : > { %v3681_v0 = vpop.eup %3680  ;;  %v1170_v34 = vpop.f32.mrf.mxu0  ;;  %1729 = vmatmul.mubr.f32.gmra.mxu1 %v1507_v54  ;;  %v1509_v52 = vmul.f32 %v1445_v28, %v1253_v17  ;;  %v1262_v28 = vmul.f32 0.5, %v5009_v8 }
 0x268   : > { %3694 = verf.f32 %v1326_v63  ;;  %v1327_v60 = vmul.f32 0.70710677, %v5013_v51  ;;  %v5019_v23 = vadd.f32 %v1170_v34, %v4804_v39  ;;  %v1510_v29 = vmul.f32 %v1446_v21, %v1254_v56 }
 0x269   : > { %v3683_v2 = vpop.eup %3682  ;;  %v1174_v1 = vpop.f32.mrf.mxu0  ;;  %v1447_v4 = vadd.f32 1.0, %v3681_v0  ;;  %v1261_v34 = vmul.f32 0.5, %v5003_v10  ;;  %v1263_v10 = vmul.f32 0.5, %v5013_v51 }
 0x26a   : > { %3696 = verf.f32 %v1327_v60  ;;  %v1328_v24 = vmul.f32 0.70710677, %v5019_v23  ;;  %v5023_v37 = vadd.f32 %v1174_v1, %v4802_v14  ;;  %1733 = vmatprep.mubr.f32.mxu1 %v1510_v29  ;;  %v1448_v35 = vadd.f32 1.0, %v3683_v2 }
 0x26b   : > { %v3685_v43 = vpop.eup %3684  ;;  %v1176_v11 = vpop.f32.mrf.mxu0  ;;  %1734 = vmatmul.mubr.f32.gmra.mxu1 %v1509_v52  ;;  %v1511_v53 = vmul.f32 %v1447_v4, %v1255_v58 }
 0x26c   : > { %3698 = verf.f32 %v1328_v24  ;;  %v1329_v61 = vmul.f32 0.70710677, %v5023_v37  ;;  %v5029_v47 = vadd.f32 %v1176_v11, %v4804_v39  ;;  %v1512_v49 = vmul.f32 %v1448_v35, %v1256_v44 }
 0x26d   : > { %v3687_v27 = vpop.eup %3686  ;;  %v1180_v7 = vpop.f32.mrf.mxu0  ;;  %v1449_v36 = vadd.f32 1.0, %v3685_v43  ;;  %v1264_v43 = vmul.f32 0.5, %v5019_v23 }
 0x26e   : > { %3700 = verf.f32 %v1329_v61  ;;  %v1330_v22 = vmul.f32 0.70710677, %v5029_v47  ;;  %v5033_v16 = vadd.f32 %v1180_v7, %v4802_v14  ;;  %1738 = vmatprep.mubr.f32.mxu1 %v1512_v49  ;;  %v1450_v9 = vadd.f32 1.0, %v3687_v27 }
 0x26f   : > { %v3689_v18 = vpop.eup %3688  ;;  %v1182_v20 = vpop.f32.mrf.mxu0  ;;  %1739 = vmatmul.mubr.f32.gmra.mxu1 %v1511_v53  ;;  %v1513_v15 = vmul.f32 %v1449_v36, %v1257_v48  ;;  %v1266_v36 = vmul.f32 0.5, %v5029_v47 }
 0x270   : > { %3702 = verf.f32 %v1330_v22  ;;  %v1331_v19 = vmul.f32 0.70710677, %v5033_v16  ;;  %v5039_v6 = vadd.f32 %v1182_v20, %v4804_v39  ;;  %v1514_v13 = vmul.f32 %v1450_v9, %v1258_v33 }
 0x271   : > { %v3691_v50 = vpop.eup %3690  ;;  %v1186_v32 = vpop.f32.mrf.mxu0  ;;  %v1451_v38 = vadd.f32 1.0, %v3689_v18  ;;  %v1265_v20 = vmul.f32 0.5, %v5023_v37 }
 0x272   : > { %3704 = verf.f32 %v1331_v19  ;;  %v1332_v12 = vmul.f32 0.70710677, %v5039_v6  ;;  %v5043_v46 = vadd.f32 %v1186_v32, %v4802_v14  ;;  %1743 = vmatprep.mubr.f32.mxu1 %v1514_v13  ;;  %v1452_v59 = vadd.f32 1.0, %v3691_v50 }
 0x273   : > { %v3693_v42 = vpop.eup %3692  ;;  %v1188_v40 = vpop.f32.mrf.mxu0  ;;  %1744 = vmatmul.mubr.f32.gmra.mxu1 %v1513_v15  ;;  %v1515_v55 = vmul.f32 %v1451_v38, %v1259_v5  ;;  %v1268_v37 = vmul.f32 0.5, %v5039_v6 }
 0x274   : > { %3706 = verf.f32 %v1332_v12  ;;  %v1333_v3 = vmul.f32 0.70710677, %v5043_v46  ;;  %v5049_v30 = vadd.f32 %v1188_v40, %v4804_v39  ;;  %v1516_v62 = vmul.f32 %v1452_v59, %v1260_v57 }
 0x275   : > { %v3695_v25 = vpop.eup %3694  ;;  %v1192_v26 = vpop.f32.mrf.mxu0  ;;  %v1453_v31 = vadd.f32 1.0, %v3693_v42  ;;  %v1267_v42 = vmul.f32 0.5, %v5033_v16  ;;  %v1269_v6 = vmul.f32 0.5, %v5043_v46 }
 0x276   : > { %3708 = verf.f32 %v1333_v3  ;;  %v1334_v54 = vmul.f32 0.70710677, %v5049_v30  ;;  %v5053_v45 = vadd.f32 %v1192_v26, %v4802_v14  ;;  %1748 = vmatprep.mubr.f32.mxu1 %v1516_v62  ;;  %v1454_v56 = vadd.f32 1.0, %v3695_v25 }
 0x277   : > { %v3697_v63 = vpop.eup %3696  ;;  %v1194_v0 = vpop.f32.mrf.mxu0  ;;  %1749 = vmatmul.mubr.f32.gmra.mxu1 %v1515_v55  ;;  %v1517_v24 = vmul.f32 %v1453_v31, %v1261_v34  ;;  %v1270_v25 = vmul.f32 0.5, %v5049_v30 }
 0x278   : > { %3710 = verf.f32 %v1334_v54  ;;  %v1335_v21 = vmul.f32 0.70710677, %v5053_v45  ;;  %v5059_v17 = vadd.f32 %v1194_v0, %v4804_v39  ;;  %v1518_v1 = vmul.f32 %v1454_v56, %v1262_v28 }
 0x279   : > { %v3699_v60 = vpop.eup %3698  ;;  %v1198_v2 = vpop.f32.mrf.mxu0  ;;  %v1455_v29 = vadd.f32 1.0, %v3697_v63  ;;  %v1271_v34 = vmul.f32 0.5, %v5053_v45 }
 0x27a   : > { %3712 = verf.f32 %v1335_v21  ;;  %v1336_v4 = vmul.f32 0.70710677, %v5059_v17  ;;  %v5063_v8 = vadd.f32 %v1198_v2, %v4802_v14  ;;  %1753 = vmatprep.mubr.f32.mxu1 %v1518_v1  ;;  %v1456_v44 = vadd.f32 1.0, %v3699_v60 }
 0x27b   : > { %v3701_v52 = vpop.eup %3700  ;;  %v1200_v58 = vpop.f32.mrf.mxu0  ;;  %1754 = vmatmul.mubr.f32.gmra.mxu1 %v1517_v24  ;;  %v1519_v49 = vmul.f32 %v1455_v29, %v1263_v10 }
 0x27c   : > { %3714 = verf.f32 %v1336_v4  ;;  %v1337_v11 = vmul.f32 0.70710677, %v5063_v8  ;;  %v1201_v35 = vadd.f32 %v1200_v58, %v4804_v39  ;;  %v1520_v7 = vmul.f32 %v1456_v44, %v1264_v43 }
 0x27d   : > { %v3703_v61 = vpop.eup %3702  ;;  %v1204_v27 = vpop.f32.mrf.mxu0  ;;  %v1457_v51 = vadd.f32 1.0, %v3701_v52  ;;  %v1273_v24 = vmul.f32 0.5, %v5063_v8 }
 0x27e   : > { %3716 = verf.f32 %v1337_v11  ;;  %v1338_v53 = vmul.f32 0.70710677, %v1201_v35  ;;  %v5070_v22 = vadd.f32 %v1204_v27, %v4802_v14  ;;  %1758 = vmatprep.mubr.f32.mxu1 %v1520_v7  ;;  %v1458_v33 = vadd.f32 1.0, %v3703_v61 }
 0x27f   : > { %v3705_v23 = vpop.eup %3704  ;;  %v1206_v18 = vpop.f32.mrf.mxu0  ;;  %1759 = vmatmul.mubr.f32.gmra.mxu1 %v1519_v49  ;;  %v1521_v47 = vmul.f32 %v1457_v51, %v1265_v20  ;;  %v1274_v2 = vmul.f32 0.5, %v1201_v35 }
 0x280   : > { %3718 = verf.f32 %v1338_v53  ;;  %v1339_v9 = vmul.f32 0.70710677, %v5070_v22  ;;  %v1207_v48 = vadd.f32 %v1206_v18, %v4804_v39  ;;  %v1522_v32 = vmul.f32 %v1458_v33, %v1266_v36  ;;  %v5089_v36 = vld [vmem:[%s6038_s6] ss:$0 sm:$0xff] }
 0x281   : > { %v3707_v19 = vpop.eup %3706  ;;  %v1210_v50 = vpop.f32.mrf.mxu0  ;;  %v1459_v13 = vadd.f32 1.0, %v3705_v23  ;;  %v1275_v11 = vmul.f32 0.5, %v5070_v22 }
 0x282   : > { %3720 = verf.f32 %v1339_v9  ;;  %v1340_v38 = vmul.f32 0.70710677, %v1207_v48  ;;  %v1211_v12 = vadd.f32 %v1210_v50, %v4802_v14  ;;  %1763 = vmatprep.mubr.f32.mxu1 %v1522_v32  ;;  %v1460_v57 = vadd.f32 1.0, %v3707_v19 }
 0x283   : > { %v3709_v15 = vpop.eup %3708  ;;  %v1212_v5 = vpop.f32.mrf.mxu0  ;;  %1764 = vmatmul.mubr.f32.gmra.mxu1 %v1521_v47  ;;  %v1523_v62 = vmul.f32 %v1459_v13, %v1267_v42  ;;  %v1276_v10 = vmul.f32 0.5, %v1207_v48 }
 0x284   : > { %3722 = verf.f32 %v1340_v38  ;;  %v1341_v40 = vmul.f32 0.70710677, %v1211_v12  ;;  %v1213_v59 = vadd.f32 %v1212_v5, %v4804_v39  ;;  %v1524_v26 = vmul.f32 %v1460_v57, %v1268_v37 }
 0x285   : > { %v3711_v3 = vpop.eup %3710  ;;  %v1461_v54 = vadd.f32 1.0, %v3709_v15  ;;  %v1272_v39 = vmul.f32 0.5, %v5059_v17  ;;  %v1277_v8 = vmul.f32 0.5, %v1211_v12 }
 0x286   : > { %3724 = verf.f32 %v1341_v40  ;;  %v1342_v14 = vmul.f32 0.70710677, %v1213_v59  ;;  %v1462_v55 = vadd.f32 1.0, %v3711_v3  ;;  %1768 = vmatprep.mubr.f32.mxu1 %v1524_v26  ;;  %v1278_v27 = vmul.f32 0.5, %v1213_v59 }
 0x287   : > { %v3713_v16 = vpop.eup %3712  ;;  %1769 = vmatmul.mubr.f32.gmra.mxu1 %v1523_v62  ;;  %v1525_v28 = vmul.f32 %v1461_v54, %v1269_v6 }
 0x288   : > { %3726 = verf.f32 %v1342_v14  ;;  %v1526_v31 = vmul.f32 %v1462_v55, %v1270_v25  ;;  %v1463_v30 = vadd.f32 1.0, %v3713_v16 }
 0x289   : > { %v3715_v63 = vpop.eup %3714 }
 0x28a   : > { %1773 = vmatprep.mubr.f32.mxu1 %v1526_v31  ;;  %v1464_v0 = vadd.f32 1.0, %v3715_v63  ;;  %v1527_v1 = vmul.f32 %v1463_v30, %v1271_v34 }
 0x28b   : > { %v3717_v56 = vpop.eup %3716  ;;  %1774 = vmatmul.mubr.f32.gmra.mxu1 %v1525_v28 }
 0x28c   : > { %v1528_v21 = vmul.f32 %v1464_v0, %v1272_v39  ;;  %v1465_v29 = vadd.f32 1.0, %v3717_v56 }
 0x28d   : > { %v3719_v60 = vpop.eup %3718 }
 0x28e   : > { %1778 = vmatprep.mubr.f32.mxu1 %v1528_v21  ;;  %v1466_v46 = vadd.f32 1.0, %v3719_v60  ;;  %v1529_v43 = vmul.f32 %v1465_v29, %v1273_v24 }
 0x28f   : > { %v3721_v4 = vpop.eup %3720  ;;  %1779 = vmatmul.mubr.f32.gmra.mxu1 %v1527_v1 }
 0x290   : > { %v1530_v17 = vmul.f32 %v1466_v46, %v1274_v2  ;;  %v1467_v44 = vadd.f32 1.0, %v3721_v4 }
 0x291   : > { %v3723_v52 = vpop.eup %3722 }
 0x292   : > { %1783 = vmatprep.mubr.f32.mxu1 %v1530_v17  ;;  %v1468_v58 = vadd.f32 1.0, %v3723_v52  ;;  %v1531_v7 = vmul.f32 %v1467_v44, %v1275_v11 }
 0x293   : > { %v3725_v45 = vpop.eup %3724  ;;  %1784 = vmatmul.mubr.f32.gmra.mxu1 %v1529_v43 }
 0x294   : > { %v1532_v35 = vmul.f32 %v1468_v58, %v1276_v10  ;;  %v1469_v53 = vadd.f32 1.0, %v3725_v45 }
 0x295   : > { %v3727_v61 = vpop.eup %3726 }
 0x296   : > { %1788 = vmatprep.mubr.f32.mxu1 %v1532_v35  ;;  %v1470_v49 = vadd.f32 1.0, %v3727_v61  ;;  %v1533_v23 = vmul.f32 %v1469_v53, %v1277_v8 }
 0x297   : > { %1789 = vmatmul.mubr.f32.gmra.mxu1 %v1531_v7 }
 0x298   : > { %v1534_v51 = vmul.f32 %v1470_v49, %v1278_v27 }
 0x29a   : > { %1793 = vmatprep.mubr.f32.mxu1 %v1534_v51 }
 0x29b   : > { %1794 = vmatmul.mubr.f32.gmra.mxu1 %v1533_v23 }
 0x2df   : > { %v1640_v22 = vpop.f32.mrf.mxu1 }
 0x2e0   : > { %v5092_v18 = vadd.f32 %v5089_v36, %v1640_v22  ;;  %v2292_v22 = vld [vmem:[%s6042_s10 + $0x78] sm:$0xff] }
 0x2e1   : > { %v1642_v33 = vpop.f32.mrf.mxu1  ;;  %3335 = vmatprep.subr.mxu0 %v2292_v22 }
 0x2e2   : > { %1801 = vadd.xlane.f32.xlu0 %v5092_v18  ;;  %3336 = vmatpush3.msra.mxu0 %v2292_v22  ;;  %v2277_v22 = vld [vmem:[%s6042_s10] sm:$0xff] }
 0x2e3   : > { %v1645_v20 = vpop.f32.mrf.mxu1 }
 0x2e4   : > { %v5096_v9 = vadd.f32 %v5089_v36, %v1645_v20 }
 0x2e5   : > { %v1647_v48 = vpop.f32.mrf.mxu1 }
 0x2e6   : > { %1803 = vadd.xlane.f32.xlu0 %v5096_v9  ;;  %v2291_v48 = vld [vmem:[%s6042_s10 + $0x70] sm:$0xff] }
 0x2e7   : > { %v1650_v19 = vpop.f32.mrf.mxu1  ;;  %3337 = vmatprep.subr.mxu0 %v2291_v48 }
 0x2e8   : > { %v5100_v50 = vadd.f32 %v5089_v36, %v1650_v19  ;;  %3338 = vmatpush3.msra.mxu0 %v2291_v48 }
 0x2e9   : > { %v1652_v32 = vpop.f32.mrf.mxu1 }
 0x2ea   : > { %1805 = vadd.xlane.f32.xlu0 %v5100_v50  ;;  %v2290_v32 = vld [vmem:[%s6042_s10 + $0x68] sm:$0xff] }
 0x2eb   : > { %v5103_v13 = vpop.f32.mrf.mxu1  ;;  %3339 = vmatprep.subr.mxu0 %v2290_v32 }
 0x2ec   : > { %3340 = vmatpush3.msra.mxu0 %v2290_v32 }
 0x2ed   : > { %v1657_v38 = vpop.f32.mrf.mxu1 }
 0x2ee   : > { %v5184_v38 = vadd.f32 %v5089_v36, %v5103_v13  ;;  %v2288_v13 = vld [vmem:[%s6042_s10 + $0x58] sm:$0xff] }
 0x2ef   : > { %v5105_v12 = vpop.f32.mrf.mxu1 }
 0x2f1   : > { %v1662_v47 = vpop.f32.mrf.mxu1 }
 0x2f3   : > { %v5107_v15 = vpop.f32.mrf.mxu1 }
 0x2f5   : > { %v1667_v42 = vpop.f32.mrf.mxu1 }
 0x2f7   : > { %v5109_v37 = vpop.f32.mrf.mxu1 }
 0x2f9   : > { %v1672_v5 = vpop.f32.mrf.mxu1 }
 0x2fa   : > { %v2289_v5 = vld [vmem:[%s6042_s10 + $0x60] sm:$0xff] }
 0x2fb   : > { %v5111_v57 = vpop.f32.mrf.mxu1  ;;  %3341 = vmatprep.subr.mxu0 %v2289_v5 }
 0x2fc   : > { %3342 = vmatpush3.msra.mxu0 %v2289_v5  ;;  %v3922_v5 = vld [vmem:[%s4074_s27 + $0x10] sm:$0xff] }
 0x2fd   : > { %v1677_v40 = vpop.f32.mrf.mxu1  ;;  %3343 = vmatprep.subr.mxu0 %v2288_v13 }
 0x2fe   : > { %3344 = vmatpush3.msra.mxu0 %v2288_v13  ;;  %v3924_v13 = vld [vmem:[%s4074_s27 + $0x20] sm:$0xff] }
 0x2ff   : > { %v1680_v59 = vpop.f32.mrf.mxu1 }
 0x300   : > { %v5114_v3 = vadd.f32 %v5089_v36, %v1680_v59  ;;  %v5199_v59 = vadd.f32 %v5089_v36, %v5105_v12  ;;  %v5211_v12 = vadd.f32 %v5089_v36, %v5107_v15 }
 0x301   : > { %v1682_v25 = vpop.f32.mrf.mxu1 }
 0x302   : > { %1817 = vadd.xlane.f32.xlu0 %v5114_v3 }
 0x303   : > { %v1685_v26 = vpop.f32.mrf.mxu1 }
 0x304   : > { %v5118_v62 = vadd.f32 %v5089_v36, %v1685_v26 }
 0x305   : > { %v1687_v14 = vpop.f32.mrf.mxu1 }
 0x306   : > { %1819 = vadd.xlane.f32.xlu1 %v5118_v62  ;;  %v2287_v14 = vld [vmem:[%s6042_s10 + $0x50] sm:$0xff] }
 0x307   : > { %v1690_v55 = vpop.f32.mrf.mxu1  ;;  %3345 = vmatprep.subr.mxu0 %v2287_v14 }
 0x308   : > { %v5122_v54 = vadd.f32 %v5089_v36, %v1690_v55  ;;  %3346 = vmatpush3.msra.mxu0 %v2287_v14  ;;  %v3926_v14 = vld [vmem:[%s4074_s27 + $0x30] sm:$0xff] }
 0x309   : > { %v1692_v16 = vpop.f32.mrf.mxu1 }
 0x30a   : > { %1821 = vadd.xlane.f32.xlu0 %v5122_v54 }
 0x30b   : > { %v1695_v6 = vpop.f32.mrf.mxu1 }
 0x30c   : > { %v5126_v31 = vadd.f32 %v5089_v36, %v1695_v6  ;;  %v2286_v6 = vld [vmem:[%s6042_s10 + $0x48] sm:$0xff] }
 0x30d   : > { %v1697_v63 = vpop.f32.mrf.mxu1  ;;  %3347 = vmatprep.subr.mxu0 %v2286_v6 }
 0x30e   : > { %1823 = vadd.xlane.f32.xlu1 %v5126_v31  ;;  %3348 = vmatpush3.msra.mxu0 %v2286_v6 }
 0x30f   : > { %v1700_v39 = vpop.f32.mrf.mxu1 }
 0x310   : > { %v5130_v28 = vadd.f32 %v5089_v36, %v1700_v39  ;;  %v2285_v39 = vld [vmem:[%s6042_s10 + $0x40] sm:$0xff] }
 0x311   : > { %v1702_v0 = vpop.f32.mrf.mxu1  ;;  %3349 = vmatprep.subr.mxu0 %v2285_v39 }
 0x312   : > { %1825 = vadd.xlane.f32.xlu0 %v5130_v28  ;;  %v5226_v0 = vadd.f32 %v5089_v36, %v5109_v37  ;;  %3350 = vmatpush3.msra.mxu0 %v2285_v39  ;;  %v5238_v37 = vadd.f32 %v5089_v36, %v5111_v57 }
 0x313   : > { %v1705_v30 = vpop.f32.mrf.mxu1 }
 0x314   : > { %v5134_v56 = vadd.f32 %v5089_v36, %v1705_v30 }
 0x315   : > { %v1707_v34 = vpop.f32.mrf.mxu1 }
 0x316   : > { %1827 = vadd.xlane.f32.xlu1 %v5134_v56 }
 0x317   : > { %v1710_v21 = vpop.f32.mrf.mxu1 }
 0x318   : > { %v5138_v60 = vadd.f32 %v5089_v36, %v1710_v21  ;;  %v2284_v21 = vld [vmem:[%s6042_s10 + $0x38] sm:$0xff] }
 0x319   : > { %v1712_v2 = vpop.f32.mrf.mxu1  ;;  %3351 = vmatprep.subr.mxu0 %v2284_v21 }
 0x31a   : > { %1829 = vadd.xlane.f32.xlu0 %v5138_v60  ;;  %3352 = vmatpush3.msra.mxu0 %v2284_v21  ;;  %v3929_v21 = vld [vmem:[%s4074_s27 + $0x48] sm:$0xff] }
 0x31b   : > { %v1715_v1 = vpop.f32.mrf.mxu1 }
 0x31c   : > { %v5142_v46 = vadd.f32 %v5089_v36, %v1715_v1 }
 0x31d   : > { %v1717_v29 = vpop.f32.mrf.mxu1 }
 0x31e   : > { %1831 = vadd.xlane.f32.xlu1 %v5142_v46  ;;  %v2283_v29 = vld [vmem:[%s6042_s10 + $0x30] sm:$0xff] }
 0x31f   : > { %v1720_v4 = vpop.f32.mrf.mxu1  ;;  %3353 = vmatprep.subr.mxu0 %v2283_v29 }
 0x320   : > { %v5146_v24 = vadd.f32 %v5089_v36, %v1720_v4  ;;  %3354 = vmatpush3.msra.mxu0 %v2283_v29  ;;  %v3930_v29 = vld [vmem:[%s4074_s27 + $0x50] sm:$0xff] }
 0x321   : > { %v1722_v17 = vpop.f32.mrf.mxu1 }
 0x322   : > { %1833 = vadd.xlane.f32.xlu0 %v5146_v24  ;;  %v2282_v17 = vld [vmem:[%s6042_s10 + $0x28] sm:$0xff] }
 0x323   : > { %v1725_v52 = vpop.f32.mrf.mxu1  ;;  %3355 = vmatprep.subr.mxu0 %v2282_v17 }
 0x324   : > { %v5150_v10 = vadd.f32 %v5089_v36, %v1725_v52  ;;  %3356 = vmatpush3.msra.mxu0 %v2282_v17 }
 0x325   : > { %v1727_v43 = vpop.f32.mrf.mxu1 }
 0x326   : > { %1835 = vadd.xlane.f32.xlu1 %v5150_v10  ;;  %v2281_v43 = vld [vmem:[%s6042_s10 + $0x20] sm:$0xff] }
 0x327   : > { %v1730_v58 = vpop.f32.mrf.mxu1  ;;  %3357 = vmatprep.subr.mxu0 %v2281_v43 }
 0x328   : > { %v5154_v44 = vadd.f32 %v5089_v36, %v1730_v58  ;;  %3358 = vmatpush3.msra.mxu0 %v2281_v43 }
 0x329   : > { %v1732_v45 = vpop.f32.mrf.mxu1 }
 0x32a   : > { %1837 = vadd.xlane.f32.xlu0 %v5154_v44  ;;  %v2280_v45 = vld [vmem:[%s6042_s10 + $0x18] sm:$0xff] }
 0x32b   : > { %v1735_v11 = vpop.f32.mrf.mxu1  ;;  %3359 = vmatprep.subr.mxu0 %v2280_v45 }
 0x32c   : > { %v5158_v35 = vadd.f32 %v5089_v36, %v1735_v11  ;;  %3360 = vmatpush3.msra.mxu0 %v2280_v45 }
 0x32d   : > { %v1737_v61 = vpop.f32.mrf.mxu1 }
 0x32e   : > { %1839 = vadd.xlane.f32.xlu1 %v5158_v35 }
 0x32f   : > { %v1740_v27 = vpop.f32.mrf.mxu1 }
 0x330   : > { %v5162_v7 = vadd.f32 %v5089_v36, %v1740_v27  ;;  %v2279_v27 = vld [vmem:[%s6042_s10 + $0x10] sm:$0xff] }
 0x331   : > { %v1742_v49 = vpop.f32.mrf.mxu1  ;;  %3361 = vmatprep.subr.mxu0 %v2279_v27 }
 0x332   : > { %1841 = vadd.xlane.f32.xlu0 %v5162_v7  ;;  %3362 = vmatpush3.msra.mxu0 %v2279_v27  ;;  %v2273_v27 = vld [vmem:[%s6041_s9 + $0x60] sm:$0xff] }
 0x333   : > { %v1745_v53 = vpop.f32.mrf.mxu1 }
 0x334   : > { %v5166_v8 = vadd.f32 %v5089_v36, %v1745_v53  ;;  %v2278_v53 = vld [vmem:[%s6042_s10 + $0x8] sm:$0xff] }
 0x335   : > { %v1747_v51 = vpop.f32.mrf.mxu1  ;;  %3363 = vmatprep.subr.mxu0 %v2278_v53 }
 0x336   : > { %1843 = vadd.xlane.f32.xlu1 %v5166_v8  ;;  %3364 = vmatpush3.msra.mxu0 %v2278_v53 }
 0x337   : > { %v1750_v23 = vpop.f32.mrf.mxu1  ;;  %3365 = vmatprep.subr.mxu0 %v2277_v22 }
 0x338   : > { %v5173_v33 = vadd.f32 %v5089_v36, %v1750_v23  ;;  %3366 = vmatpush3.msra.mxu0 %v2277_v22  ;;  %v3933_v22 = vld [vmem:[%s4074_s27 + $0x68] sm:$0xff] }
 0x339   : > { %v1752_v20 = vpop.f32.mrf.mxu1 }
 0x33a   : > { %1845 = vadd.xlane.f32.xlu0 %v5173_v33 }
 0x33b   : > { %v1755_v19 = vpop.f32.mrf.mxu1 }
 0x33c   : > { %v5187_v47 = vadd.f32 %v5089_v36, %v1755_v19 }
 0x33d   : > { %v1757_v42 = vpop.f32.mrf.mxu1 }
 0x33e   : > { %1847 = vadd.xlane.f32.xlu1 %v5187_v47  ;;  %1807 = vadd.xlane.f32.xlu0 %v5184_v38  ;;  %v3921_v42 = vld [vmem:[%s4074_s27 + $0x8] sm:$0xff] }
 0x33f   : > { %v1760_v40 = vpop.f32.mrf.mxu1  ;;  %3368 = vmatmul.mubr.f32.vlgmr.msra.gmra.mxu0 %v3921_v42  ;;  %v3935_v42 = vld [vmem:[%s4074_s27 + $0x78] sm:$0xff] }
 0x340   : > { %v5202_v25 = vadd.f32 %v5089_v36, %v1760_v40  ;;  %3370 = vmatprep.mubr.f32.mxu0 %v3922_v5  ;;  %v3923_v40 = vld [vmem:[%s4074_s27 + $0x18] sm:$0xff]  ;;  %v3937_v5 = vld [vmem:[%s4074_s27 + $0x88] sm:$0xff] }
 0x341   : > { %v1762_v26 = vpop.f32.mrf.mxu1 }
 0x342   : > { %1809 = vadd.xlane.f32.xlu0 %v5199_v59  ;;  %1849 = vadd.xlane.f32.xlu1 %v5202_v25  ;;  %v3925_v26 = vld [vmem:[%s4074_s27 + $0x28] sm:$0xff] }
 0x343   : > { %v1765_v55 = vpop.f32.mrf.mxu1  ;;  %3371 = vmatmul.mubr.f32.gmra.mxu0 %v3923_v40  ;;  %v3938_v40 = vld [vmem:[%s4074_s27 + $0x90] sm:$0xff] }
 0x344   : > { %v5214_v16 = vadd.f32 %v5089_v36, %v1765_v55  ;;  %3373 = vmatprep.mubr.f32.mxu0 %v3924_v13  ;;  %v3927_v55 = vld [vmem:[%s4074_s27 + $0x38] sm:$0xff] }
 0x345   : > { %v1767_v63 = vpop.f32.mrf.mxu1  ;;  %v2272_v13 = vld [vmem:[%s6041_s9 + $0x58] sm:$0xff] }
 0x346   : > { %1811 = vadd.xlane.f32.xlu0 %v5211_v12  ;;  %1851 = vadd.xlane.f32.xlu1 %v5214_v16  ;;  %v3928_v63 = vld [vmem:[%s4074_s27 + $0x40] sm:$0xff] }
 0x347   : > { %v1770_v15 = vpop.f32.mrf.mxu1  ;;  %3374 = vmatmul.mubr.f32.gmra.mxu0 %v3925_v26  ;;  %v3939_v26 = vld [vmem:[%s4074_s27 + $0x98] sm:$0xff] }
 0x348   : > { %v5229_v30 = vadd.f32 %v5089_v36, %v1770_v15  ;;  %3376 = vmatprep.mubr.f32.mxu0 %v3926_v14  ;;  %v2275_v15 = vld [vmem:[%s6041_s9 + $0x70] sm:$0xff]  ;;  %v3940_v14 = vld [vmem:[%s4074_s27 + $0xa0] sm:$0xff] }
 0x349   : > { %v1772_v34 = vpop.f32.mrf.mxu1 }
 0x34a   : > { %1813 = vadd.xlane.f32.xlu0 %v5226_v0  ;;  %1853 = vadd.xlane.f32.xlu1 %v5229_v30 }
 0x34b   : > { %v1775_v2 = vpop.f32.mrf.mxu1  ;;  %3377 = vmatmul.mubr.f32.gmra.mxu0 %v3927_v55  ;;  %v2270_v55 = vld [vmem:[%s6041_s9 + $0x48] sm:$0xff] }
 0x34c   : > { %v5241_v1 = vadd.f32 %v5089_v36, %v1775_v2  ;;  %3379 = vmatprep.mubr.f32.mxu0 %v3928_v63  ;;  %v3942_v63 = vld [vmem:[%s4074_s27 + $0xb0] sm:$0xff] }
 0x34d   : > { %v1777_v4 = vpop.f32.mrf.mxu1 }
 0x34e   : > { %1815 = vadd.xlane.f32.xlu0 %v5238_v37  ;;  %1855 = vadd.xlane.f32.xlu1 %v5241_v1 }
 0x34f   : > { %v1780_v57 = vpop.f32.mrf.mxu1  ;;  %3380 = vmatmul.mubr.f32.gmra.mxu0 %v3929_v21  ;;  %v3944_v21 = vld [vmem:[%s4074_s27 + $0xc0] sm:$0xff] }
 0x350   : > { %v5252_v52 = vadd.f32 %v5089_v36, %v1780_v57  ;;  %3382 = vmatprep.mubr.f32.mxu0 %v3930_v29  ;;  %v2274_v57 = vld [vmem:[%s6041_s9 + $0x68] sm:$0xff] }
 0x351   : > { %v1782_v58 = vpop.f32.mrf.mxu1 }
 0x352   : > { %1857 = vadd.xlane.f32.xlu1 %v5252_v52  ;;  %v3931_v58 = vld [vmem:[%s4074_s27 + $0x58] sm:$0xff] }
 0x353   : > { %v1785_v11 = vpop.f32.mrf.mxu1  ;;  %3383 = vmatmul.mubr.f32.gmra.mxu0 %v3931_v58  ;;  %v3946_v58 = vld [vmem:[%s4074_s27 + $0xd0] sm:$0xff] }
 0x354   : > { %v5262_v61 = vadd.f32 %v5089_v36, %v1785_v11  ;;  %v3932_v11 = vld [vmem:[%s4074_s27 + $0x60] sm:$0xff] }
 0x355   : > { %v1787_v49 = vpop.f32.mrf.mxu1  ;;  %3385 = vmatprep.mubr.f32.mxu0 %v3932_v11 }
 0x356   : > { %1859 = vadd.xlane.f32.xlu1 %v5262_v61 }
 0x357   : > { %v1790_v51 = vpop.f32.mrf.mxu1  ;;  %3386 = vmatmul.mubr.f32.gmra.mxu0 %v3933_v22 }
 0x358   : > { %v5272_v23 = vadd.f32 %v5089_v36, %v1790_v51 }
 0x359   : > { %v1792_v20 = vpop.f32.mrf.mxu1 }
 0x35a   : > { %1861 = vadd.xlane.f32.xlu1 %v5272_v23  ;;  %v3934_v20 = vld [vmem:[%s4074_s27 + $0x70] sm:$0xff] }
 0x35b   : > { %v1795_v48 = vpop.f32.mrf.mxu1  ;;  %3388 = vmatprep.mubr.f32.mxu0 %v3934_v20  ;;  %v3948_v20 = vld [vmem:[%s4074_s27 + $0xe0] sm:$0xff] }
 0x35c   : > { %v5279_v19 = vadd.f32 %v5089_v36, %v1795_v48  ;;  %v2276_v36 = vld [vmem:[%s6041_s9 + $0x78] sm:$0xff]  ;;  %3389 = vmatmul.mubr.f32.gmra.mxu0 %v3935_v42  ;;  %v2262_v42 = vld [vmem:[%s6041_s9 + $0x8] sm:$0xff] }
 0x35d   : > { %v1797_v32 = vpop.f32.mrf.mxu1  ;;  %3495 = vmatprep.subr.mxu1 %v2276_v36  ;;  %3415 = vmatprep.subr.mxu0 %v2276_v36 }
 0x35e   : > { %1863 = vadd.xlane.f32.xlu1 %v5279_v19  ;;  %3511 = vmatpush3.msra.mxu1 %v2276_v36 }
 0x35f   : > { %3416 = vmatpush3.msra.mxu0 %v2276_v36  ;;  %3496 = vmatprep.subr.mxu1 %v2275_v15  ;;  %v2271_v36 = vld [vmem:[%s6041_s9 + $0x50] sm:$0xff] }
 0x360   : > { %3512 = vmatpush3.msra.mxu1 %v2275_v15  ;;  %3417 = vmatprep.subr.mxu0 %v2275_v15 }
 0x361   : > { %3497 = vmatprep.subr.mxu1 %v2274_v57  ;;  %3418 = vmatpush3.msra.mxu0 %v2275_v15  ;;  %v5352_v15 = vld [vmem:[%s6041_s9 + $0x38] sm:$0xff] }
 0x362   : > { %3513 = vmatpush3.msra.mxu1 %v2274_v57  ;;  %3419 = vmatprep.subr.mxu0 %v2274_v57 }
 0x363   : > { %3498 = vmatprep.subr.mxu1 %v2273_v27  ;;  %3420 = vmatpush3.msra.mxu0 %v2274_v57  ;;  %v2266_v57 = vld [vmem:[%s6041_s9 + $0x28] sm:$0xff] }
 0x364   : > { %3514 = vmatpush3.msra.mxu1 %v2273_v27  ;;  %3421 = vmatprep.subr.mxu0 %v2273_v27 }
 0x365   : > { %3422 = vmatpush3.msra.mxu0 %v2273_v27  ;;  %3499 = vmatprep.subr.mxu1 %v2272_v13 }
 0x366   : > { %3423 = vmatprep.subr.mxu0 %v2272_v13  ;;  %3515 = vmatpush3.msra.mxu1 %v2272_v13 }
 0x367   : > { %3424 = vmatpush3.msra.mxu0 %v2272_v13  ;;  %3500 = vmatprep.subr.mxu1 %v2271_v36 }
 0x368   : > { %3425 = vmatprep.subr.mxu0 %v2271_v36  ;;  %3516 = vmatpush3.msra.mxu1 %v2271_v36 }
 0x369   : > { %3426 = vmatpush3.msra.mxu0 %v2271_v36  ;;  %3501 = vmatprep.subr.mxu1 %v2270_v55  ;;  %v3950_v36 = vld [vmem:[%s4074_s27 + $0xf0] sm:$0xff] }
 0x36a   : > { %3427 = vmatprep.subr.mxu0 %v2270_v55  ;;  %3517 = vmatpush3.msra.mxu1 %v2270_v55 }
 0x36b   : > { %v1802_v6 = vpop.xlane.xlu0 %1801  ;;  %3428 = vmatpush3.msra.mxu0 %v2270_v55 }
 0x36c   : > { %v1865_v39 = vmul.f32 0.010416667, %v1802_v6  ;;  %v3941_v6 = vld [vmem:[%s4074_s27 + $0xa8] sm:$0xff] }
 0x36e   : > { %v1897_v34 = vsub.f32 %v5092_v18, %v1865_v39  ;;  %v2269_v39 = vld [vmem:[%s6041_s9 + $0x40] sm:$0xff] }
 0x36f   : > { %v1804_v2 = vpop.xlane.xlu0 %1803  ;;  %3429 = vmatprep.subr.mxu0 %v2269_v39  ;;  %3502 = vmatprep.subr.mxu1 %v2269_v39 }
 0x370   : > { %v1866_v4 = vmul.f32 0.010416667, %v1804_v2  ;;  %v5301_v17 = vsel %vm451_vm0, %v1897_v34, 0.0  ;;  %3430 = vmatpush3.msra.mxu0 %v2269_v39  ;;  %v3943_v34 = vld [vmem:[%s4074_s27 + $0xb8] sm:$0xff]  ;;  %v2267_v2 = vld [vmem:[%s6041_s9 + $0x30] sm:$0xff]  ;;  %3518 = vmatpush3.msra.mxu1 %v2269_v39 }
 0x371   : > { %v1961_v18 = vmul.f32 %v5301_v17, %v5301_v17  ;;  %3431 = vmatprep.subr.mxu0 %v5352_v15  ;;  %3503 = vmatprep.subr.mxu1 %v5352_v15 }
 0x372   : > { %v1898_v43 = vsub.f32 %v5096_v9, %v1866_v4  ;;  %3432 = vmatpush3.msra.mxu0 %v5352_v15  ;;  %3519 = vmatpush3.msra.mxu1 %v5352_v15 }
 0x373   : > { %1993 = vadd.xlane.f32.xlu0 %v1961_v18  ;;  %v1806_v45 = vpop.xlane.xlu0 %1805  ;;  %3433 = vmatprep.subr.mxu0 %v2267_v2  ;;  %v3945_v18 = vld [vmem:[%s4074_s27 + $0xc8] sm:$0xff] }
 0x374   : > { %v5316_v49 = vsel %vm451_vm0, %v1898_v43, 0.0  ;;  %v1867_v53 = vmul.f32 0.010416667, %v1806_v45  ;;  %3434 = vmatpush3.msra.mxu0 %v2267_v2  ;;  %v2265_v45 = vld [vmem:[%s6041_s9 + $0x20] sm:$0xff]  ;;  %3504 = vmatprep.subr.mxu1 %v2267_v2 }
 0x375   : > { %v1962_v9 = vmul.f32 %v5316_v49, %v5316_v49  ;;  %3435 = vmatprep.subr.mxu0 %v2266_v57  ;;  %3520 = vmatpush3.msra.mxu1 %v2267_v2 }
 0x376   : > { %v1899_v51 = vsub.f32 %v5100_v50, %v1867_v53  ;;  %v3936_v50 = vld [vmem:[%s4074_s27 + $0x80] sm:$0xff]  ;;  %3436 = vmatpush3.msra.mxu0 %v2266_v57  ;;  %3505 = vmatprep.subr.mxu1 %v2266_v57 }
 0x377   : > { %1995 = vadd.xlane.f32.xlu0 %v1962_v9  ;;  %3391 = vmatprep.mubr.f32.mxu0 %v3936_v50 }
 0x378   : > { %v5325_v48 = vsel %vm451_vm0, %v1899_v51, 0.0  ;;  %3392 = vmatmul.mubr.f32.gmra.mxu0 %v3937_v5  ;;  %3437 = vmatprep.subr.mxu0 %v2265_v45  ;;  %v3947_v51 = vld [vmem:[%s4074_s27 + $0xd8] sm:$0xff] }
 0x379   : > { %v1963_v32 = vmul.f32 %v5325_v48, %v5325_v48  ;;  %3394 = vmatprep.mubr.f32.mxu0 %v3938_v40  ;;  %3438 = vmatpush3.msra.mxu0 %v2265_v45 }
 0x37a   : > { %3521 = vmatpush3.msra.mxu1 %v2266_v57 }
 0x37b   : > { %1997 = vadd.xlane.f32.xlu0 %v1963_v32  ;;  %v2263_v32 = vld [vmem:[%s6041_s9 + $0x10] sm:$0xff]  ;;  %3506 = vmatprep.subr.mxu1 %v2265_v45 }
 0x37c   : > { %3395 = vmatmul.mubr.f32.gmra.mxu0 %v3939_v26  ;;  %v3949_v26 = vld [vmem:[%s4074_s27 + $0xe8] sm:$0xff]  ;;  %3522 = vmatpush3.msra.mxu1 %v2265_v45 }
 0x37d   : > { %3397 = vmatprep.mubr.f32.mxu0 %v3940_v14 }
 0x380   : > { %3398 = vmatmul.mubr.f32.gmra.mxu0 %v3941_v6 }
 0x381   : > { %3400 = vmatprep.mubr.f32.mxu0 %v3942_v63 }
 0x384   : > { %3401 = vmatmul.mubr.f32.gmra.mxu0 %v3943_v34  ;;  %v3951_v34 = vld [vmem:[%s4074_s27 + $0xf8] sm:$0xff] }
 0x385   : > { %3403 = vmatprep.mubr.f32.mxu0 %v3944_v21 }
 0x388   : > { %3404 = vmatmul.mubr.f32.gmra.mxu0 %v3945_v18 }
 0x389   : > { %3406 = vmatprep.mubr.f32.mxu0 %v3946_v58 }
 0x38b   : > { %v1818_v29 = vpop.xlane.xlu0 %1817 }
 0x38c   : > { %v1873_v4 = vmul.f32 0.010416667, %v1818_v29  ;;  %3407 = vmatmul.mubr.f32.gmra.mxu0 %v3947_v51 }
 0x38d   : > { %3409 = vmatprep.mubr.f32.mxu0 %v3948_v20 }
 0x38e   : > { %v1905_v43 = vsub.f32 %v5114_v3, %v1873_v4  ;;  %v2264_v3 = vld [vmem:[%s6041_s9 + $0x18] sm:$0xff] }
 0x38f   : > { %v1820_v11 = vpop.xlane.xlu1 %1819  ;;  %3439 = vmatprep.subr.mxu0 %v2264_v3  ;;  %3507 = vmatprep.subr.mxu1 %v2264_v3 }
 0x390   : > { %v5372_v27 = vsel %vm451_vm0, %v1905_v43, 0.0  ;;  %v1874_v53 = vmul.f32 0.010416667, %v1820_v11  ;;  %3440 = vmatpush3.msra.mxu0 %v2264_v3  ;;  %3523 = vmatpush3.msra.mxu1 %v2264_v3 }
 0x391   : > { %v1969_v9 = vmul.f32 %v5372_v27, %v5372_v27  ;;  %3441 = vmatprep.subr.mxu0 %v2263_v32  ;;  %3410 = vmatmul.mubr.f32.gmra.mxu0 %v3949_v26 }
 0x392   : > { %v1906_v22 = vsub.f32 %v5118_v62, %v1874_v53  ;;  %3442 = vmatpush3.msra.mxu0 %v2263_v32  ;;  %v2261_v62 = vld [vmem:[%s6041_s9] sm:$0xff]  ;;  %3412 = vmatprep.mubr.f32.mxu0 %v3950_v36 }
 0x393   : > { %2009 = vadd.xlane.f32.xlu0 %v1969_v9  ;;  %v1822_v50 = vpop.xlane.xlu0 %1821  ;;  %3443 = vmatprep.subr.mxu0 %v2262_v42 }
 0x394   : > { %v1875_v5 = vmul.f32 0.010416667, %v1822_v50  ;;  %v5390_v40 = vsel %vm451_vm0, %v1906_v22, 0.0  ;;  %3444 = vmatpush3.msra.mxu0 %v2262_v42  ;;  %3508 = vmatprep.subr.mxu1 %v2263_v32 }
 0x395   : > { %v1970_v13 = vmul.f32 %v5390_v40, %v5390_v40  ;;  %3445 = vmatprep.subr.mxu0 %v2261_v62  ;;  %3413 = vmatmul.mubr.f32.gmra.mxu0 %v3951_v34 }
 0x396   : > { %v1907_v14 = vsub.f32 %v5122_v54, %v1875_v5  ;;  %3446 = vmatpush3.msra.mxu0 %v2261_v62  ;;  %3524 = vmatpush3.msra.mxu1 %v2263_v32 }
 0x397   : > { %v1824_v55 = vpop.xlane.xlu1 %1823  ;;  %2011 = vadd.xlane.f32.xlu1 %v1970_v13  ;;  %3509 = vmatprep.subr.mxu1 %v2262_v42 }
 0x398   : > { %v5403_v6 = vsel %vm451_vm0, %v1907_v14, 0.0  ;;  %v1876_v63 = vmul.f32 0.010416667, %v1824_v55  ;;  %3525 = vmatpush3.msra.mxu1 %v2262_v42 }
 0x399   : > { %v1971_v39 = vmul.f32 %v5403_v6, %v5403_v6  ;;  %3510 = vmatprep.subr.mxu1 %v2261_v62 }
 0x39a   : > { %v1908_v54 = vsub.f32 %v5126_v31, %v1876_v63  ;;  %3526 = vmatpush3.msra.mxu1 %v2261_v62 }
 0x39b   : > { %2013 = vadd.xlane.f32.xlu0 %v1971_v39  ;;  %v1826_v21 = vpop.xlane.xlu0 %1825 }
 0x39c   : > { %v5412_v29 = vsel %vm451_vm0, %v1908_v54, 0.0  ;;  %v1877_v4 = vmul.f32 0.010416667, %v1826_v21 }
 0x39d   : > { %v1972_v15 = vmul.f32 %v5412_v29, %v5412_v29 }
 0x39e   : > { %v1909_v18 = vsub.f32 %v5130_v28, %v1877_v4 }
 0x39f   : > { %v1828_v43 = vpop.xlane.xlu1 %1827  ;;  %2015 = vadd.xlane.f32.xlu1 %v1972_v15 }
 0x3a0   : > { %v5419_v31 = vsel %vm451_vm0, %v1909_v18, 0.0  ;;  %v1878_v2 = vmul.f32 0.010416667, %v1828_v43 }
 0x3a1   : > { %v1973_v58 = vmul.f32 %v5419_v31, %v5419_v31 }
 0x3a2   : > { %v1910_v57 = vsub.f32 %v5134_v56, %v1878_v2 }
 0x3a3   : > { %2017 = vadd.xlane.f32.xlu0 %v1973_v58  ;;  %v1830_v11 = vpop.xlane.xlu0 %1829 }
 0x3a4   : > { %v5426_v28 = vsel %vm451_vm0, %v1910_v57, 0.0  ;;  %v1879_v45 = vmul.f32 0.010416667, %v1830_v11 }
 0x3a5   : > { %v1974_v53 = vmul.f32 %v5426_v28, %v5426_v28 }
 0x3a6   : > { %v1911_v3 = vsub.f32 %v5138_v60, %v1879_v45 }
 0x3a7   : > { %v1832_v9 = vpop.xlane.xlu1 %1831  ;;  %2019 = vadd.xlane.f32.xlu1 %v1974_v53 }
 0x3a8   : > { %v5433_v56 = vsel %vm451_vm0, %v1911_v3, 0.0  ;;  %v1880_v51 = vmul.f32 0.010416667, %v1832_v9 }
 0x3a9   : > { %v1975_v22 = vmul.f32 %v5433_v56, %v5433_v56 }
 0x3aa   : > { %v1912_v20 = vsub.f32 %v5142_v46, %v1880_v51 }
 0x3ab   : > { %2021 = vadd.xlane.f32.xlu0 %v1975_v22  ;;  %v1834_v32 = vpop.xlane.xlu0 %1833 }
 0x3ac   : > { %v5440_v42 = vsel %vm451_vm0, %v1912_v20, 0.0  ;;  %v1881_v60 = vmul.f32 0.010416667, %v1834_v32 }
 0x3ad   : > { %v1976_v50 = vmul.f32 %v5440_v42, %v5440_v42 }
 0x3ae   : > { %v1913_v5 = vsub.f32 %v5146_v24, %v1881_v60 }
 0x3af   : > { %v1836_v62 = vpop.xlane.xlu1 %1835  ;;  %2023 = vadd.xlane.f32.xlu1 %v1976_v50 }
 0x3b0   : > { %v5447_v13 = vsel %vm451_vm0, %v1913_v5, 0.0  ;;  %v1882_v26 = vmul.f32 0.010416667, %v1836_v62 }
 0x3b1   : > { %v1977_v46 = vmul.f32 %v5447_v13, %v5447_v13 }
 0x3b2   : > { %v1914_v14 = vsub.f32 %v5150_v10, %v1882_v26 }
 0x3b3   : > { %2025 = vadd.xlane.f32.xlu0 %v1977_v46  ;;  %v1838_v36 = vpop.xlane.xlu0 %1837 }
 0x3b4   : > { %v5454_v55 = vsel %vm451_vm0, %v1914_v14, 0.0  ;;  %v1883_v63 = vmul.f32 0.010416667, %v1838_v36 }
 0x3b5   : > { %v1978_v24 = vmul.f32 %v5454_v55, %v5454_v55 }
 0x3b6   : > { %v1915_v39 = vsub.f32 %v5154_v44, %v1883_v63 }
 0x3b7   : > { %v1840_v34 = vpop.xlane.xlu1 %1839  ;;  %2027 = vadd.xlane.f32.xlu1 %v1978_v24 }
 0x3b8   : > { %v5461_v54 = vsel %vm451_vm0, %v1915_v39, 0.0  ;;  %v1884_v21 = vmul.f32 0.010416667, %v1840_v34 }
 0x3b9   : > { %v1979_v10 = vmul.f32 %v5461_v54, %v5461_v54 }
 0x3ba   : > { %v1916_v4 = vsub.f32 %v5158_v35, %v1884_v21 }
 0x3bb   : > { %2029 = vadd.xlane.f32.xlu0 %v1979_v10  ;;  %v1842_v15 = vpop.xlane.xlu0 %1841 }
 0x3bc   : > { %v5468_v18 = vsel %vm451_vm0, %v1916_v4, 0.0  ;;  %v1885_v43 = vmul.f32 0.010416667, %v1842_v15 }
 0x3bd   : > { %v1980_v44 = vmul.f32 %v5468_v18, %v5468_v18 }
 0x3be   : > { %v1917_v2 = vsub.f32 %v5162_v7, %v1885_v43 }
 0x3bf   : > { %v1844_v58 = vpop.xlane.xlu1 %1843  ;;  %2031 = vadd.xlane.f32.xlu1 %v1980_v44 }
 0x3c0   : > { %v5475_v57 = vsel %vm451_vm0, %v1917_v2, 0.0  ;;  %v1886_v11 = vmul.f32 0.010416667, %v1844_v58 }
 0x3c1   : > { %v1981_v35 = vmul.f32 %v5475_v57, %v5475_v57 }
 0x3c2   : > { %v1918_v45 = vsub.f32 %v5166_v8, %v1886_v11 }
 0x3c3   : > { %2033 = vadd.xlane.f32.xlu0 %v1981_v35  ;;  %v1846_v53 = vpop.xlane.xlu0 %1845 }
 0x3c4   : > { %v5482_v3 = vsel %vm451_vm0, %v1918_v45, 0.0  ;;  %v1887_v9 = vmul.f32 0.010416667, %v1846_v53 }
 0x3c5   : > { %v1982_v7 = vmul.f32 %v5482_v3, %v5482_v3 }
 0x3c6   : > { %v1919_v51 = vsub.f32 %v5173_v33, %v1887_v9 }
 0x3c7   : > { %v1848_v22 = vpop.xlane.xlu1 %1847  ;;  %2035 = vadd.xlane.f32.xlu1 %v1982_v7  ;;  %v1808_v20 = vpop.xlane.xlu0 %1807 }
 0x3c8   : > { %v5489_v32 = vsel %vm451_vm0, %v1919_v51, 0.0  ;;  %v1888_v8 = vmul.f32 0.010416667, %v1848_v22  ;;  %v1868_v60 = vmul.f32 0.010416667, %v1808_v20 }
 0x3c9   : > { %v1983_v50 = vmul.f32 %v5489_v32, %v5489_v32 }
 0x3ca   : > { %v1920_v5 = vsub.f32 %v5187_v47, %v1888_v8  ;;  %v1900_v62 = vsub.f32 %v5184_v38, %v1868_v60 }
 0x3cb   : > { %v1850_v26 = vpop.xlane.xlu1 %1849  ;;  %2037 = vadd.xlane.f32.xlu0 %v1983_v50  ;;  %v1810_v46 = vpop.xlane.xlu0 %1809 }
 0x3cc   : > { %v5497_v33 = vsel %vm451_vm0, %v1920_v5, 0.0  ;;  %v5501_v14 = vsel %vm451_vm0, %v1900_v62, 0.0  ;;  %v1889_v36 = vmul.f32 0.010416667, %v1850_v26  ;;  %v1869_v63 = vmul.f32 0.010416667, %v1810_v46 }
 0x3cd   : > { %v1984_v24 = vmul.f32 %v5497_v33, %v5497_v33  ;;  %v1964_v47 = vmul.f32 %v5501_v14, %v5501_v14 }
 0x3ce   : > { %v1921_v38 = vsub.f32 %v5202_v25, %v1889_v36  ;;  %v1901_v39 = vsub.f32 %v5199_v59, %v1869_v63 }
 0x3cf   : > { %v1852_v34 = vpop.xlane.xlu1 %1851  ;;  %2039 = vadd.xlane.f32.xlu1 %v1984_v24  ;;  %1999 = vadd.xlane.f32.xlu0 %v1964_v47  ;;  %v1812_v21 = vpop.xlane.xlu0 %1811 }
 0x3d0   : > { %v5511_v10 = vsel %vm451_vm0, %v1921_v38, 0.0  ;;  %v5515_v4 = vsel %vm451_vm0, %v1901_v39, 0.0  ;;  %v1890_v15 = vmul.f32 0.010416667, %v1852_v34  ;;  %v1870_v43 = vmul.f32 0.010416667, %v1812_v21 }
 0x3d1   : > { %v1985_v44 = vmul.f32 %v5511_v10, %v5511_v10  ;;  %v1965_v59 = vmul.f32 %v5515_v4, %v5515_v4 }
 0x3d2   : > { %v1922_v25 = vsub.f32 %v5214_v16, %v1890_v15  ;;  %v1902_v2 = vsub.f32 %v5211_v12, %v1870_v43 }
 0x3d3   : > { %v1854_v58 = vpop.xlane.xlu1 %1853  ;;  %2041 = vadd.xlane.f32.xlu1 %v1985_v44  ;;  %2001 = vadd.xlane.f32.xlu0 %v1965_v59  ;;  %v1814_v11 = vpop.xlane.xlu0 %1813 }
 0x3d4   : > { %v5525_v35 = vsel %vm451_vm0, %v1922_v25, 0.0  ;;  %v5529_v45 = vsel %vm451_vm0, %v1902_v2, 0.0  ;;  %v1891_v53 = vmul.f32 0.010416667, %v1854_v58  ;;  %v1871_v9 = vmul.f32 0.010416667, %v1814_v11 }
 0x3d5   : > { %v1986_v7 = vmul.f32 %v5525_v35, %v5525_v35  ;;  %v1966_v12 = vmul.f32 %v5529_v45, %v5529_v45 }
 0x3d6   : > { %v1923_v16 = vsub.f32 %v5229_v30, %v1891_v53  ;;  %v1903_v51 = vsub.f32 %v5226_v0, %v1871_v9 }
 0x3d7   : > { %v1856_v22 = vpop.xlane.xlu1 %1855  ;;  %2043 = vadd.xlane.f32.xlu1 %v1986_v7  ;;  %2003 = vadd.xlane.f32.xlu0 %v1966_v12  ;;  %v1816_v20 = vpop.xlane.xlu0 %1815 }
 0x3d8   : > { %v5539_v8 = vsel %vm451_vm0, %v1923_v16, 0.0  ;;  %v5543_v60 = vsel %vm451_vm0, %v1903_v51, 0.0  ;;  %v1892_v50 = vmul.f32 0.010416667, %v1856_v22  ;;  %v1872_v5 = vmul.f32 0.010416667, %v1816_v20 }
 0x3d9   : > { %v1987_v62 = vmul.f32 %v5539_v8, %v5539_v8  ;;  %v1967_v0 = vmul.f32 %v5543_v60, %v5543_v60 }
 0x3da   : > { %v1924_v30 = vsub.f32 %v5241_v1, %v1892_v50  ;;  %v1904_v26 = vsub.f32 %v5238_v37, %v1872_v5 }
 0x3db   : > { %v1858_v46 = vpop.xlane.xlu1 %1857  ;;  %2045 = vadd.xlane.f32.xlu1 %v1987_v62  ;;  %2005 = vadd.xlane.f32.xlu0 %v1967_v0 }
 0x3dc   : > { %v5553_v36 = vsel %vm451_vm0, %v1924_v30, 0.0  ;;  %v5557_v63 = vsel %vm451_vm0, %v1904_v26, 0.0  ;;  %v1893_v24 = vmul.f32 0.010416667, %v1858_v46  ;;  %v5600_v30 = vld [vmem:[%s6040_s8] ss:$0 sm:$0xff] }
 0x3dd   : > { %v1988_v47 = vmul.f32 %v5553_v36, %v5553_v36  ;;  %v1968_v1 = vmul.f32 %v5557_v63, %v5557_v63 }
 0x3de   : > { %v1925_v37 = vsub.f32 %v5252_v52, %v1893_v24 }
 0x3df   : > { %v1860_v38 = vpop.xlane.xlu1 %1859  ;;  %2047 = vadd.xlane.f32.xlu1 %v1988_v47  ;;  %2007 = vadd.xlane.f32.xlu0 %v1968_v1 }
 0x3e0   : > { %v5566_v39 = vsel %vm451_vm0, %v1925_v37, 0.0  ;;  %v1894_v34 = vmul.f32 0.010416667, %v1860_v38 }
 0x3e1   : > { %v1989_v21 = vmul.f32 %v5566_v39, %v5566_v39 }
 0x3e2   : > { %v1926_v15 = vsub.f32 %v5262_v61, %v1894_v34 }
 0x3e3   : > { %2049 = vadd.xlane.f32.xlu1 %v1989_v21  ;;  %v1862_v43 = vpop.xlane.xlu1 %1861 }
 0x3e4   : > { %v5573_v44 = vsel %vm451_vm0, %v1926_v15, 0.0  ;;  %v1895_v52 = vmul.f32 0.010416667, %v1862_v43 }
 0x3e5   : > { %v1990_v59 = vmul.f32 %v5573_v44, %v5573_v44 }
 0x3e6   : > { %v1927_v25 = vsub.f32 %v5272_v23, %v1895_v52 }
 0x3e7   : > { %2051 = vadd.xlane.f32.xlu1 %v1990_v59  ;;  %v1864_v2 = vpop.xlane.xlu1 %1863 }
 0x3e8   : > { %v5580_v58 = vsel %vm451_vm0, %v1927_v25, 0.0  ;;  %v1896_v11 = vmul.f32 0.010416667, %v1864_v2 }
 0x3e9   : > { %v1991_v61 = vmul.f32 %v5580_v58, %v5580_v58 }
 0x3ea   : > { %v1928_v53 = vsub.f32 %v5279_v19, %v1896_v11 }
 0x3eb   : > { %2053 = vadd.xlane.f32.xlu1 %v1991_v61 }
 0x3ec   : > { %v5587_v9 = vsel %vm451_vm0, %v1928_v53, 0.0 }
 0x3ed   : > { %v1992_v23 = vmul.f32 %v5587_v9, %v5587_v9 }
 0x3ef   : > { %2055 = vadd.xlane.f32.xlu1 %v1992_v23 }
 0x3fc   : > { %v1994_v7 = vpop.xlane.xlu0 %1993 }
 0x3fd   : > { %v2057_v12 = vmul.f32 0.010416667, %v1994_v7 }
 0x3ff   : > { %v2089_v16 = vadd.f32 1e-05, %v2057_v12 }
 0x400   : > { %v1996_v51 = vpop.xlane.xlu0 %1995 }
 0x401   : > { %3728 = vrsqrt.f32 %v2089_v16  ;;  %v2058_v22 = vmul.f32 0.010416667, %v1996_v51 }
 0x403   : > { %v2090_v20 = vadd.f32 1e-05, %v2058_v22 }
 0x404   : > { %v1998_v50 = vpop.xlane.xlu0 %1997 }
 0x405   : > { %3730 = vrsqrt.f32 %v2090_v20  ;;  %v2059_v5 = vmul.f32 0.010416667, %v1998_v50 }
 0x407   : > { %v2091_v19 = vadd.f32 1e-05, %v2059_v5 }
 0x409   : > { %3732 = vrsqrt.f32 %v2091_v19 }
 0x40e   : > { %v3729_v62 = vpop.eup %3728 }
 0x40f   : > { %v2153_v0 = vmul.f32 %v3729_v62, %v5301_v17 }
 0x411   : > { %v2191_v26 = vmul.f32 %v5594_v41, %v2153_v0 }
 0x412   : > { %v3731_v46 = vpop.eup %3730 }
 0x413   : > { %v2154_v24 = vmul.f32 %v3731_v46, %v5316_v49  ;;  %v5605_v47 = vadd.f32 %v5600_v30, %v2191_v26 }
 0x415   : > { %3447 = vmatprep.mubr.f32.mxu0 %v5605_v47  ;;  %v2192_v1 = vmul.f32 %v5594_v41, %v2154_v24 }
 0x416   : > { %v3733_v37 = vpop.eup %3732 }
 0x417   : > { %v5610_v17 = vadd.f32 %v5600_v30, %v2192_v1  ;;  %v2155_v38 = vmul.f32 %v3733_v37, %v5325_v48 }
 0x419   : > { %3448 = vmatmul.mubr.f32.vlgmr.msra.gmra.mxu0 %v5610_v17  ;;  %v2193_v34 = vmul.f32 %v5594_v41, %v2155_v38 }
 0x41b   : > { %v5616_v21 = vadd.f32 %v5600_v30, %v2193_v34 }
 0x41c   : > { %v2010_v49 = vpop.xlane.xlu0 %2009 }
 0x41d   : > { %6059 = vst [vmem:[#allocation2_spill] sm:$0xff] %v5616_v21  ;;  %3450 = vmatprep.mubr.f32.mxu0 %v5616_v21  ;;  %v2065_v15 = vmul.f32 0.010416667, %v2010_v49 }
 0x41f   : > { %v2097_v43 = vadd.f32 1e-05, %v2065_v15 }
 0x420   : > { %v2012_v52 = vpop.xlane.xlu1 %2011 }
 0x421   : > { %3734 = vrsqrt.f32 %v2097_v43  ;;  %v2066_v59 = vmul.f32 0.010416667, %v2012_v52 }
 0x423   : > { %v2098_v25 = vadd.f32 1e-05, %v2066_v59 }
 0x424   : > { %v2014_v2 = vpop.xlane.xlu0 %2013 }
 0x425   : > { %3736 = vrsqrt.f32 %v2098_v25  ;;  %v2067_v11 = vmul.f32 0.010416667, %v2014_v2 }
 0x427   : > { %v2099_v48 = vadd.f32 1e-05, %v2067_v11 }
 0x428   : > { %v2016_v61 = vpop.xlane.xlu1 %2015 }
 0x429   : > { %3738 = vrsqrt.f32 %v2099_v48  ;;  %v2068_v53 = vmul.f32 0.010416667, %v2016_v61 }
 0x42b   : > { %v2100_v23 = vadd.f32 1e-05, %v2068_v53 }
 0x42c   : > { %v2018_v7 = vpop.xlane.xlu0 %2017 }
 0x42d   : > { %3740 = vrsqrt.f32 %v2100_v23  ;;  %v2069_v12 = vmul.f32 0.010416667, %v2018_v7 }
 0x42e   : > { %v3735_v16 = vpop.eup %3734 }
 0x42f   : > { %v2101_v51 = vadd.f32 1e-05, %v2069_v12  ;;  %v2161_v22 = vmul.f32 %v3735_v16, %v5372_v27 }
 0x430   : > { %v2020_v20 = vpop.xlane.xlu1 %2019 }
 0x431   : > { %3742 = vrsqrt.f32 %v2101_v51  ;;  %v2070_v50 = vmul.f32 0.010416667, %v2020_v20  ;;  %v2199_v5 = vmul.f32 %v5594_v41, %v2161_v22 }
 0x432   : > { %v3737_v19 = vpop.eup %3736 }
 0x433   : > { %v2162_v62 = vmul.f32 %v3737_v19, %v5390_v40  ;;  %v2102_v0 = vadd.f32 1e-05, %v2070_v50  ;;  %v5623_v26 = vadd.f32 %v5600_v30, %v2199_v5 }
 0x434   : > { %v2022_v46 = vpop.xlane.xlu0 %2021 }
 0x435   : > { %3744 = vrsqrt.f32 %v2102_v0  ;;  %v2071_v24 = vmul.f32 0.010416667, %v2022_v46  ;;  %3459 = vmatprep.mubr.f32.mxu1 %v5623_v26  ;;  %v2200_v1 = vmul.f32 %v5594_v41, %v2162_v62 }
 0x436   : > { %v3739_v27 = vpop.eup %3738 }
 0x437   : > { %v2103_v37 = vadd.f32 1e-05, %v2071_v24  ;;  %v5628_v38 = vadd.f32 %v5600_v30, %v2200_v1  ;;  %v2163_v34 = vmul.f32 %v3739_v27, %v5403_v6 }
 0x438   : > { %v2024_v49 = vpop.xlane.xlu1 %2023 }
 0x439   : > { %3746 = vrsqrt.f32 %v2103_v37  ;;  %v2072_v40 = vmul.f32 0.010416667, %v2024_v49  ;;  %3460 = vmatmul.mubr.f32.vlgmr.msra.gmra.mxu1 %v5628_v38  ;;  %v2201_v15 = vmul.f32 %v5594_v41, %v2163_v34 }
 0x43a   : > { %v3741_v43 = vpop.eup %3740 }
 0x43b   : > { %v2104_v52 = vadd.f32 1e-05, %v2072_v40  ;;  %v5634_v59 = vadd.f32 %v5600_v30, %v2201_v15  ;;  %v2164_v25 = vmul.f32 %v3741_v43, %v5412_v29 }
 0x43c   : > { %v2026_v2 = vpop.xlane.xlu0 %2025 }
 0x43d   : > { %3748 = vrsqrt.f32 %v2104_v52  ;;  %v2073_v11 = vmul.f32 0.010416667, %v2026_v2  ;;  %3462 = vmatprep.mubr.f32.mxu1 %v5634_v59  ;;  %v2202_v6 = vmul.f32 %v5594_v41, %v2164_v25 }
 0x43e   : > { %v3743_v48 = vpop.eup %3742 }
 0x43f   : > { %v2105_v61 = vadd.f32 1e-05, %v2073_v11  ;;  %v5640_v53 = vadd.f32 %v5600_v30, %v2202_v6  ;;  %v2165_v23 = vmul.f32 %v3743_v48, %v5419_v31 }
 0x440   : > { %v2028_v7 = vpop.xlane.xlu1 %2027 }
 0x441   : > { %3750 = vrsqrt.f32 %v2105_v61  ;;  %v2074_v12 = vmul.f32 0.010416667, %v2028_v7  ;;  %3463 = vmatmul.mubr.f32.gmra.mxu1 %v5640_v53  ;;  %v2203_v29 = vmul.f32 %v5594_v41, %v2165_v23 }
 0x442   : > { %v3745_v16 = vpop.eup %3744 }
 0x443   : > { %v2106_v51 = vadd.f32 1e-05, %v2074_v12  ;;  %v5646_v22 = vadd.f32 %v5600_v30, %v2203_v29  ;;  %v2166_v20 = vmul.f32 %v3745_v16, %v5426_v28 }
 0x444   : > { %v2030_v50 = vpop.xlane.xlu0 %2029 }
 0x445   : > { %3752 = vrsqrt.f32 %v2106_v51  ;;  %v2075_v5 = vmul.f32 0.010416667, %v2030_v50  ;;  %3465 = vmatprep.mubr.f32.mxu1 %v5646_v22  ;;  %v2204_v31 = vmul.f32 %v5594_v41, %v2166_v20 }
 0x446   : > { %v3747_v19 = vpop.eup %3746 }
 0x447   : > { %v2107_v62 = vadd.f32 1e-05, %v2075_v5  ;;  %v5652_v0 = vadd.f32 %v5600_v30, %v2204_v31  ;;  %v2167_v46 = vmul.f32 %v3747_v19, %v5433_v56  ;;  %v5679_v5 = vpop.f32.mrf.mxu0 }
 0x448   : > { %v2032_v24 = vpop.xlane.xlu1 %2031 }
 0x449   : > { %3754 = vrsqrt.f32 %v2107_v62  ;;  %v2076_v1 = vmul.f32 0.010416667, %v2032_v24  ;;  %3466 = vmatmul.mubr.f32.gmra.mxu1 %v5652_v0  ;;  %v2205_v28 = vmul.f32 %v5594_v41, %v2167_v46 }
 0x44a   : > { %v3749_v27 = vpop.eup %3748 }
 0x44b   : > { %v2108_v37 = vadd.f32 1e-05, %v2076_v1  ;;  %v5658_v34 = vadd.f32 %v5600_v30, %v2205_v28  ;;  %v2168_v49 = vmul.f32 %v3749_v27, %v5440_v42 }
 0x44c   : > { %v2034_v40 = vpop.xlane.xlu0 %2033 }
 0x44d   : > { %3756 = vrsqrt.f32 %v2108_v37  ;;  %v2077_v15 = vmul.f32 0.010416667, %v2034_v40  ;;  %3468 = vmatprep.mubr.f32.mxu1 %v5658_v34  ;;  %v2206_v56 = vmul.f32 %v5594_v41, %v2168_v49 }
 0x44e   : > { %v3751_v43 = vpop.eup %3750 }
 0x44f   : > { %v2109_v52 = vadd.f32 1e-05, %v2077_v15  ;;  %v5664_v25 = vadd.f32 %v5600_v30, %v2206_v56  ;;  %v2169_v2 = vmul.f32 %v3751_v43, %v5447_v13 }
 0x450   : > { %v2036_v11 = vpop.xlane.xlu1 %2035 }
 0x451   : > { %3758 = vrsqrt.f32 %v2109_v52  ;;  %v2078_v6 = vmul.f32 0.010416667, %v2036_v11  ;;  %3469 = vmatmul.mubr.f32.gmra.mxu1 %v5664_v25  ;;  %v2207_v42 = vmul.f32 %v5594_v41, %v2169_v2 }
 0x452   : > { %v3753_v48 = vpop.eup %3752 }
 0x453   : > { %v2110_v61 = vadd.f32 1e-05, %v2078_v6  ;;  %v5670_v23 = vadd.f32 %v5600_v30, %v2207_v42  ;;  %v2170_v7 = vmul.f32 %v3753_v48, %v5454_v55 }
 0x454   : > { %v2038_v12 = vpop.xlane.xlu0 %2037 }
 0x455   : > { %3760 = vrsqrt.f32 %v2110_v61  ;;  %v2079_v29 = vmul.f32 0.010416667, %v2038_v12  ;;  %3471 = vmatprep.mubr.f32.mxu1 %v5670_v23  ;;  %v2208_v13 = vmul.f32 %v5594_v41, %v2170_v7 }
 0x456   : > { %v3755_v16 = vpop.eup %3754 }
 0x457   : > { %v2111_v51 = vadd.f32 1e-05, %v2079_v29  ;;  %v5676_v20 = vadd.f32 %v5600_v30, %v2208_v13  ;;  %v2171_v50 = vmul.f32 %v3755_v16, %v5461_v54  ;;  %v5687_v54 = vpop.f32.mrf.mxu0 }
 0x458   : > { %v2040_v31 = vpop.xlane.xlu1 %2039  ;;  %v2000_v19 = vpop.xlane.xlu0 %1999 }
 0x459   : > { %3762 = vrsqrt.f32 %v2111_v51  ;;  %v2080_v55 = vmul.f32 0.010416667, %v2040_v31  ;;  %v2060_v62 = vmul.f32 0.010416667, %v2000_v19  ;;  %3472 = vmatmul.mubr.f32.gmra.mxu1 %v5676_v20  ;;  %v2209_v46 = vmul.f32 %v5594_v41, %v2171_v50  ;;  %v5695_v42 = vpop.f32.mrf.mxu0 }
 0x45a   : > { %v3757_v24 = vpop.eup %3756 }
 0x45b   : > { %v2112_v1 = vadd.f32 1e-05, %v2080_v55  ;;  %v2092_v28 = vadd.f32 1e-05, %v2060_v62  ;;  %v5684_v27 = vadd.f32 %v5600_v30, %v2209_v46  ;;  %v2172_v37 = vmul.f32 %v3757_v24, %v5468_v18  ;;  %v5703_v31 = vpop.f32.mrf.mxu0 }
 0x45c   : > { %v2042_v49 = vpop.xlane.xlu1 %2041  ;;  %v2002_v40 = vpop.xlane.xlu0 %2001 }
 0x45d   : > { %3764 = vrsqrt.f32 %v2112_v1  ;;  %v2081_v15 = vmul.f32 0.010416667, %v2042_v49  ;;  %v2061_v56 = vmul.f32 0.010416667, %v2002_v40  ;;  %3474 = vmatprep.mubr.f32.mxu1 %v5684_v27  ;;  %v2210_v43 = vmul.f32 %v5594_v41, %v2172_v37  ;;  %v5711_v40 = vpop.f32.mrf.mxu0 }
 0x45e   : > { %v3759_v52 = vpop.eup %3758  ;;  %3766 = vrsqrt.f32 %v2092_v28 }
 0x45f   : > { %v2113_v2 = vadd.f32 1e-05, %v2081_v15  ;;  %v2093_v11 = vadd.f32 1e-05, %v2061_v56  ;;  %v5692_v6 = vadd.f32 %v5600_v30, %v2210_v43  ;;  %v2173_v18 = vmul.f32 %v3759_v52, %v5475_v57 }
 0x460   : > { %v2044_v48 = vpop.xlane.xlu1 %2043  ;;  %v2004_v61 = vpop.xlane.xlu0 %2003 }
 0x461   : > { %3768 = vrsqrt.f32 %v2113_v2  ;;  %v2082_v7 = vmul.f32 0.010416667, %v2044_v48  ;;  %v2062_v12 = vmul.f32 0.010416667, %v2004_v61  ;;  %3475 = vmatmul.mubr.f32.gmra.mxu1 %v5692_v6  ;;  %v2211_v29 = vmul.f32 %v5594_v41, %v2173_v18 }
 0x462   : > { %v3761_v13 = vpop.eup %3760  ;;  %3770 = vrsqrt.f32 %v2093_v11 }
 0x463   : > { %v2114_v16 = vadd.f32 1e-05, %v2082_v7  ;;  %v2094_v51 = vadd.f32 1e-05, %v2062_v12  ;;  %v5700_v50 = vadd.f32 %v5600_v30, %v2211_v29  ;;  %v2174_v57 = vmul.f32 %v3761_v13, %v5482_v3  ;;  %v5720_v13 = vpop.f32.mrf.mxu0 }
 0x464   : > { %v2046_v19 = vpop.xlane.xlu1 %2045  ;;  %v2006_v55 = vpop.xlane.xlu0 %2005 }
 0x465   : > { %3772 = vrsqrt.f32 %v2114_v16  ;;  %v2083_v62 = vmul.f32 0.010416667, %v2046_v19  ;;  %v2063_v46 = vmul.f32 0.010416667, %v2006_v55  ;;  %3477 = vmatprep.mubr.f32.mxu1 %v5700_v50  ;;  %v2212_v24 = vmul.f32 %v5594_v41, %v2174_v57 }
 0x466   : > { %v3763_v1 = vpop.eup %3762  ;;  %3774 = vrsqrt.f32 %v2094_v51 }
 0x467   : > { %v2115_v28 = vadd.f32 1e-05, %v2083_v62  ;;  %v2095_v37 = vadd.f32 1e-05, %v2063_v46  ;;  %v5708_v49 = vadd.f32 %v5600_v30, %v2212_v24  ;;  %v2175_v3 = vmul.f32 %v3763_v1, %v5489_v32 }
 0x468   : > { %v2048_v15 = vpop.xlane.xlu1 %2047  ;;  %v2008_v56 = vpop.xlane.xlu0 %2007 }
 0x469   : > { %3776 = vrsqrt.f32 %v2115_v28  ;;  %v2084_v43 = vmul.f32 0.010416667, %v2048_v15  ;;  %v2064_v52 = vmul.f32 0.010416667, %v2008_v56  ;;  %3478 = vmatmul.mubr.f32.gmra.mxu1 %v5708_v49  ;;  %v2213_v2 = vmul.f32 %v5594_v41, %v2175_v3  ;;  %v5733_v28 = vpop.f32.mrf.mxu0 }
 0x46a   : > { %v3765_v11 = vpop.eup %3764  ;;  %3778 = vrsqrt.f32 %v2095_v37 }
 0x46b   : > { %v3767_v18 = vpop.eup %3766  ;;  %v2116_v48 = vadd.f32 1e-05, %v2084_v43  ;;  %v2096_v61 = vadd.f32 1e-05, %v2064_v52  ;;  %v5716_v7 = vadd.f32 %v5600_v30, %v2213_v2  ;;  %v2176_v32 = vmul.f32 %v3765_v11, %v5497_v33 }
 0x46c   : > { %v2050_v12 = vpop.xlane.xlu1 %2049  ;;  %v2156_v29 = vmul.f32 %v3767_v18, %v5501_v14 }
 0x46d   : > { %6060 = vst [vmem:[#allocation3_spill] sm:$0xff] %v5716_v7  ;;  %3780 = vrsqrt.f32 %v2116_v48  ;;  %v2085_v16 = vmul.f32 0.010416667, %v2050_v12  ;;  %3480 = vmatprep.mubr.f32.mxu1 %v5716_v7  ;;  %v2214_v51 = vmul.f32 %v5594_v41, %v2176_v32  ;;  %v5747_v48 = vpop.f32.mrf.mxu0 }
 0x46e   : > { %v3769_v57 = vpop.eup %3768  ;;  %3782 = vrsqrt.f32 %v2096_v61  ;;  %v2194_v19 = vmul.f32 %v5594_v41, %v2156_v29 }
 0x46f   : > { %v3771_v55 = vpop.eup %3770  ;;  %v2117_v62 = vadd.f32 1e-05, %v2085_v16  ;;  %v5726_v46 = vadd.f32 %v5600_v30, %v2214_v51  ;;  %v2177_v33 = vmul.f32 %v3769_v57, %v5511_v10 }
 0x470   : > { %v2052_v14 = vpop.xlane.xlu1 %2051  ;;  %v5730_v24 = vadd.f32 %v5600_v30, %v2194_v19  ;;  %v2157_v1 = vmul.f32 %v3771_v55, %v5515_v4 }
 0x471   : > { %3784 = vrsqrt.f32 %v2117_v62  ;;  %v2086_v37 = vmul.f32 0.010416667, %v2052_v14  ;;  %3481 = vmatmul.mubr.f32.gmra.mxu1 %v5726_v46  ;;  %v2215_v3 = vmul.f32 %v5594_v41, %v2177_v33  ;;  %v5761_v62 = vpop.f32.mrf.mxu0 }
 0x472   : > { %v3773_v15 = vpop.eup %3772  ;;  %3451 = vmatmul.mubr.f32.gmra.mxu0 %v5730_v24  ;;  %v2195_v56 = vmul.f32 %v5594_v41, %v2157_v1 }
 0x473   : > { %v3775_v10 = vpop.eup %3774  ;;  %v2118_v43 = vadd.f32 1e-05, %v2086_v37  ;;  %v5740_v52 = vadd.f32 %v5600_v30, %v2215_v3  ;;  %v2178_v4 = vmul.f32 %v3773_v15, %v5525_v35 }
 0x474   : > { %v2054_v2 = vpop.xlane.xlu1 %2053  ;;  %v5744_v11 = vadd.f32 %v5600_v30, %v2195_v56  ;;  %v2158_v18 = vmul.f32 %v3775_v10, %v5529_v45 }
 0x475   : > { %6061 = vst [vmem:[#allocation4_spill] sm:$0xff] %v5740_v52  ;;  %3786 = vrsqrt.f32 %v2118_v43  ;;  %v2087_v61 = vmul.f32 0.010416667, %v2054_v2  ;;  %3483 = vmatprep.mubr.f32.mxu1 %v5740_v52  ;;  %v2216_v32 = vmul.f32 %v5594_v41, %v2178_v4  ;;  %v5775_v43 = vpop.f32.mrf.mxu0 }
 0x476   : > { %6062 = vst [vmem:[#allocation5_spill] sm:$0xff] %v5744_v11  ;;  %v3777_v12 = vpop.eup %3776  ;;  %3453 = vmatprep.mubr.f32.mxu0 %v5744_v11  ;;  %v2196_v29 = vmul.f32 %v5594_v41, %v2158_v18 }
 0x477   : > { %v3779_v35 = vpop.eup %3778  ;;  %v2119_v16 = vadd.f32 1e-05, %v2087_v61  ;;  %v5754_v51 = vadd.f32 %v5600_v30, %v2216_v32  ;;  %v2179_v45 = vmul.f32 %v3777_v12, %v5539_v8 }
 0x478   : > { %v2056_v57 = vpop.xlane.xlu1 %2055  ;;  %v5758_v19 = vadd.f32 %v5600_v30, %v2196_v29  ;;  %v2159_v55 = vmul.f32 %v3779_v35, %v5543_v60 }
 0x479   : > { %6063 = vst [vmem:[#allocation6_spill] sm:$0xff] %v5754_v51  ;;  %3788 = vrsqrt.f32 %v2119_v16  ;;  %v2088_v33 = vmul.f32 0.010416667, %v2056_v57  ;;  %3484 = vmatmul.mubr.f32.gmra.mxu1 %v5754_v51  ;;  %v2217_v14 = vmul.f32 %v5594_v41, %v2179_v45 }
 0x47a   : > { %6064 = vst [vmem:[#allocation7_spill] sm:$0xff] %v5758_v19  ;;  %v3781_v1 = vpop.eup %3780  ;;  %3454 = vmatmul.mubr.f32.gmra.mxu0 %v5758_v19  ;;  %v2197_v37 = vmul.f32 %v5594_v41, %v2159_v55 }
 0x47b   : > { %v3783_v8 = vpop.eup %3782  ;;  %v2120_v3 = vadd.f32 1e-05, %v2088_v33  ;;  %v5768_v15 = vadd.f32 %v5600_v30, %v2217_v14  ;;  %v2180_v60 = vmul.f32 %v3781_v1, %v5553_v36 }
 0x47c   : > { %v5772_v56 = vadd.f32 %v5600_v30, %v2197_v37  ;;  %v2160_v10 = vmul.f32 %v3783_v8, %v5557_v63  ;;  %v5788_v63 = vpop.f32.mrf.mxu0 }
 0x47d   : > { %6065 = vst [vmem:[#allocation8_spill] sm:$0xff] %v5768_v15  ;;  %3790 = vrsqrt.f32 %v2120_v3  ;;  %3486 = vmatprep.mubr.f32.mxu1 %v5768_v15  ;;  %v2218_v4 = vmul.f32 %v5594_v41, %v2180_v60 }
 0x47e   : > { %6066 = vst [vmem:[#allocation9_spill] sm:$0xff] %v5772_v56  ;;  %v3785_v2 = vpop.eup %3784  ;;  %3456 = vmatprep.mubr.f32.mxu0 %v5772_v56  ;;  %v2198_v18 = vmul.f32 %v5594_v41, %v2160_v10  ;;  %v5797_v45 = vpop.f32.mrf.mxu0 }
 0x47f   : > { %v5782_v61 = vadd.f32 %v5600_v30, %v2218_v4  ;;  %v2181_v36 = vmul.f32 %v3785_v2, %v5566_v39 }
 0x480   : > { %v5786_v32 = vadd.f32 %v5600_v30, %v2198_v18  ;;  %v5805_v14 = vpop.f32.mrf.mxu0 }
 0x481   : > { %6067 = vst [vmem:[#allocation10_spill] sm:$0xff] %v5782_v61  ;;  %3487 = vmatmul.mubr.f32.gmra.mxu1 %v5782_v61  ;;  %v2219_v12 = vmul.f32 %v5594_v41, %v2181_v36 }
 0x482   : > { %6068 = vst [vmem:[#allocation11_spill] sm:$0xff] %v5786_v32  ;;  %v3787_v29 = vpop.eup %3786  ;;  %3457 = vmatmul.mubr.f32.gmra.mxu0 %v5786_v32  ;;  %v5813_v3 = vpop.f32.mrf.mxu0 }
 0x483   : > { %v5794_v35 = vadd.f32 %v5600_v30, %v2219_v12  ;;  %v2182_v16 = vmul.f32 %v3787_v29, %v5573_v44 }
 0x484   : > { %v5820_v10 = vpop.f32.mrf.mxu0 }
 0x485   : > { %6069 = vst [vmem:[#allocation12_spill] sm:$0xff] %v5794_v35  ;;  %3489 = vmatprep.mubr.f32.mxu1 %v5794_v35  ;;  %v2220_v39 = vmul.f32 %v5594_v41, %v2182_v16 }
 0x486   : > { %v3789_v57 = vpop.eup %3788  ;;  %v5823_v4 = vpop.f32.mrf.mxu0 }
 0x487   : > { %v5802_v55 = vadd.f32 %v5600_v30, %v2220_v39  ;;  %v2183_v33 = vmul.f32 %v3789_v57, %v5580_v58 }
 0x488   : > { %v5825_v2 = vpop.f32.mrf.mxu0 }
 0x489   : > { %6070 = vst [vmem:[#allocation13_spill] sm:$0xff] %v5802_v55  ;;  %3490 = vmatmul.mubr.f32.gmra.mxu1 %v5802_v55  ;;  %v2221_v1 = vmul.f32 %v5594_v41, %v2183_v33 }
 0x48a   : > { %v3791_v37 = vpop.eup %3790  ;;  %v5827_v18 = vpop.f32.mrf.mxu0 }
 0x48b   : > { %v5810_v44 = vadd.f32 %v5600_v30, %v2221_v1  ;;  %v2184_v8 = vmul.f32 %v3791_v37, %v5587_v9 }
 0x48c   : > { %v5829_v9 = vpop.f32.mrf.mxu0 }
 0x48d   : > { %6071 = vst [vmem:[#allocation14_spill] sm:$0xff] %v5810_v44  ;;  %3492 = vmatprep.mubr.f32.mxu1 %v5810_v44  ;;  %v2222_v60 = vmul.f32 %v5594_v41, %v2184_v8 }
 0x48e   : > { %v5831_v36 = vpop.f32.mrf.mxu0 }
 0x48f   : > { %v5818_v58 = vadd.f32 %v5600_v30, %v2222_v60 }
 0x490   : > { %v5833_v12 = vpop.f32.mrf.mxu0 }
 0x491   : > { %6072 = vst [vmem:[#allocation15_spill] sm:$0xff] %v5818_v58  ;;  %3493 = vmatmul.mubr.f32.gmra.mxu1 %v5818_v58  ;;  %v5860_v58 = vld [vmem:[%s6043_s11] ss:$0 sm:$0xff] }
 0x492   : > { %v5835_v41 = vpop.f32.mrf.mxu0 }
 0x494   : > { %v5837_v30 = vpop.f32.mrf.mxu0 }
 0x496   : > { %v5839_v29 = vpop.f32.mrf.mxu0 }
 0x498   : > { %v5841_v16 = vpop.f32.mrf.mxu0 }
 0x49a   : > { %v5843_v39 = vpop.f32.mrf.mxu0 }
 0x49c   : > { %v5845_v57 = vpop.f32.mrf.mxu0 }
 0x49e   : > { %v5847_v33 = vpop.f32.mrf.mxu0 }
 0x4a0   : > { %v5849_v1 = vpop.f32.mrf.mxu0 }
 0x4a2   : > { %v5851_v37 = vpop.f32.mrf.mxu0 }
 0x4a4   : > { %v5853_v8 = vpop.f32.mrf.mxu0 }
 0x4a6   : > { %v5855_v60 = vpop.f32.mrf.mxu0 }
 0x4d9   : > { %v3449_v44 = vpop.f32.mrf.mxu0 }
 0x4da   : > { %v2590_v35 = vadd.f32 %v3449_v44, %v5679_v5 }
 0x4db   : > { %v2584_v55 = vpop.f32.mrf.mxu0 }
 0x4dc   : > { %v2751_v15 = vadd.f32 %v5860_v58, %v2590_v35  ;;  %v2585_v56 = vadd.f32 %v2584_v55, %v5687_v54 }
 0x4de   : > { %v3206_v61 = vmul.f32 -1.442695, %v2751_v15  ;;  %v2750_v32 = vadd.f32 %v5860_v58, %v2585_v56 }
 0x4e0   : > { %3792 = vpow2.f32 %v3206_v61  ;;  %v3205_v52 = vmul.f32 -1.442695, %v2750_v32 }
 0x4e2   : > { %3794 = vpow2.f32 %v3205_v52 }
 0x4ed   : > { %v3793_v11 = vpop.eup %3792 }
 0x4ee   : > { %v2879_v19 = vadd.f32 1.0, %v3793_v11 }
 0x4ef   : > { %v3795_v51 = vpop.eup %3794 }
 0x4f0   : > { %3796 = vrcp.f32 %v2879_v19  ;;  %v2878_v21 = vadd.f32 1.0, %v3795_v51  ;;  %v3952_v51 = vld [vmem:[%s4074_s27 + $0x8] sm:$0xff] }
 0x4f2   : > { %3798 = vrcp.f32 %v2878_v21 }
 0x4f9   : > { %v3461_v5 = vpop.f32.mrf.mxu1 }
 0x4fa   : > { %v2630_v44 = vadd.f32 %v3461_v5, %v5761_v62  ;;  %v3953_v5 = vld [vmem:[%s4074_s27] sm:$0xff] }
 0x4fb   : > { %v2624_v35 = vpop.f32.mrf.mxu1 }
 0x4fc   : > { %v2759_v54 = vadd.f32 %v5860_v58, %v2630_v44  ;;  %v2625_v15 = vadd.f32 %v2624_v35, %v5775_v43 }
 0x4fd   : > { %v3797_v7 = vpop.eup %3796 }
 0x4fe   : > { %v3007_v56 = vsub.f32 1.0, %v3797_v7  ;;  %v3214_v61 = vmul.f32 -1.442695, %v2759_v54  ;;  %v2758_v11 = vadd.f32 %v5860_v58, %v2625_v15  ;;  %v2975_v19 = vmul.f32 %v3797_v7, %v5610_v17 }
 0x4ff   : > { %v3799_v52 = vpop.eup %3798 }
 0x500   : > { %v3039_v32 = vmul.f32 %v3952_v51, %v3007_v56  ;;  %v3006_v21 = vsub.f32 1.0, %v3799_v52  ;;  %3800 = vpow2.f32 %v3214_v61  ;;  %v3213_v62 = vmul.f32 -1.442695, %v2758_v11 }
 0x501   : > { %v2974_v55 = vmul.f32 %v3799_v52, %v5605_v47  ;;  %v3464_v35 = vpop.f32.mrf.mxu1 }
 0x502   : > { %v3071_v43 = vadd.f32 %v3039_v32, %v2975_v19  ;;  %v3038_v44 = vmul.f32 %v3953_v5, %v3006_v21  ;;  %3802 = vpow2.f32 %v3213_v62  ;;  %v2640_v17 = vadd.f32 %v3464_v35, %v5788_v63 }
 0x503   : > { %v2634_v54 = vpop.f32.mrf.mxu1 }
 0x504   : > { %3103 = vst [vmem:[%s5877_s25 + $0x8] sm:$0xff] %v3071_v43  ;;  %v3070_v7 = vadd.f32 %v3038_v44, %v2974_v55  ;;  %v2761_v15 = vadd.f32 %v5860_v58, %v2640_v17  ;;  %v2635_v56 = vadd.f32 %v2634_v54, %v5797_v45 }
 0x506   : > { %3102 = vst [vmem:[%s5877_s25] sm:$0xff] %v3070_v7  ;;  %v3216_v51 = vmul.f32 -1.442695, %v2761_v15  ;;  %v2760_v61 = vadd.f32 %v5860_v58, %v2635_v56 }
 0x508   : > { %3804 = vpow2.f32 %v3216_v51  ;;  %v3215_v11 = vmul.f32 -1.442695, %v2760_v61 }
 0x509   : > { %v3467_v47 = vpop.f32.mrf.mxu1 }
 0x50a   : > { %3806 = vpow2.f32 %v3215_v11  ;;  %v2650_v52 = vadd.f32 %v3467_v47, %v5805_v14 }
 0x50b   : > { %v2644_v19 = vpop.f32.mrf.mxu1 }
 0x50c   : > { %v2763_v63 = vadd.f32 %v5860_v58, %v2650_v52  ;;  %v2645_v32 = vadd.f32 %v2644_v19, %v5813_v3 }
 0x50d   : > { %v3801_v21 = vpop.eup %3800 }
 0x50e   : > { %v2887_v62 = vadd.f32 1.0, %v3801_v21  ;;  %v3218_v43 = vmul.f32 -1.442695, %v2763_v63  ;;  %v2762_v45 = vadd.f32 %v5860_v58, %v2645_v32 }
 0x50f   : > { %v3803_v55 = vpop.eup %3802 }
 0x510   : > { %3808 = vrcp.f32 %v2887_v62  ;;  %v2886_v5 = vadd.f32 1.0, %v3803_v55  ;;  %v3217_v44 = vmul.f32 -1.442695, %v2762_v45 }
 0x511   : > { %3810 = vpow2.f32 %v3218_v43  ;;  %v3470_v35 = vpop.f32.mrf.mxu1 }
 0x512   : > { %3812 = vrcp.f32 %v2886_v5  ;;  %v2660_v17 = vadd.f32 %v3470_v35, %v5820_v10 }
 0x513   : > { %3814 = vpow2.f32 %v3217_v44  ;;  %v2654_v14 = vpop.f32.mrf.mxu1 }
 0x514   : > { %v2765_v7 = vadd.f32 %v5860_v58, %v2660_v17  ;;  %v2655_v3 = vadd.f32 %v2654_v14, %v5823_v4 }
 0x515   : > { %v3805_v54 = vpop.eup %3804 }
 0x516   : > { %v2889_v15 = vadd.f32 1.0, %v3805_v54  ;;  %v3220_v56 = vmul.f32 -1.442695, %v2765_v7  ;;  %v2764_v51 = vadd.f32 %v5860_v58, %v2655_v3 }
 0x517   : > { %v3807_v61 = vpop.eup %3806 }
 0x518   : > { %3816 = vrcp.f32 %v2889_v15  ;;  %v2888_v11 = vadd.f32 1.0, %v3807_v61  ;;  %v3219_v47 = vmul.f32 -1.442695, %v2764_v51 }
 0x519   : > { %3818 = vpow2.f32 %v3220_v56  ;;  %v3473_v52 = vpop.f32.mrf.mxu1  ;;  %v3955_v56 = vld [vmem:[%s4074_s27 + $0x40] sm:$0xff] }
 0x51a   : > { %3820 = vrcp.f32 %v2888_v11  ;;  %v2670_v10 = vadd.f32 %v3473_v52, %v5825_v2  ;;  %v3954_v2 = vld [vmem:[%s4074_s27 + $0x48] sm:$0xff] }
 0x51b   : > { %3822 = vpow2.f32 %v3219_v47  ;;  %v2664_v19 = vpop.f32.mrf.mxu1 }
 0x51c   : > { %v2767_v63 = vadd.f32 %v5860_v58, %v2670_v10  ;;  %v2665_v4 = vadd.f32 %v2664_v19, %v5827_v18 }
 0x51d   : > { %v3809_v32 = vpop.eup %3808 }
 0x51e   : > { %v3811_v21 = vpop.eup %3810  ;;  %v3015_v62 = vsub.f32 1.0, %v3809_v32  ;;  %v3222_v43 = vmul.f32 -1.442695, %v2767_v63  ;;  %v2766_v45 = vadd.f32 %v5860_v58, %v2665_v4  ;;  %v2983_v35 = vmul.f32 %v3809_v32, %v5628_v38 }
 0x51f   : > { %v3813_v55 = vpop.eup %3812  ;;  %v2891_v5 = vadd.f32 1.0, %v3811_v21 }
 0x520   : > { %v3815_v44 = vpop.eup %3814  ;;  %v3047_v17 = vmul.f32 %v3954_v2, %v3015_v62  ;;  %v3014_v14 = vsub.f32 1.0, %v3813_v55  ;;  %3824 = vpow2.f32 %v3222_v43  ;;  %v3221_v18 = vmul.f32 -1.442695, %v2766_v45  ;;  %v3956_v43 = vld [vmem:[%s4074_s27 + $0x58] sm:$0xff] }
 0x521   : > { %3826 = vrcp.f32 %v2891_v5  ;;  %v2890_v7 = vadd.f32 1.0, %v3815_v44  ;;  %v3476_v3 = vpop.f32.mrf.mxu1  ;;  %v2982_v15 = vmul.f32 %v3813_v55, %v5623_v26 }
 0x522   : > { %v3079_v54 = vadd.f32 %v3047_v17, %v2983_v35  ;;  %v3046_v51 = vmul.f32 %v3955_v56, %v3014_v14  ;;  %v2680_v61 = vadd.f32 %v3476_v3, %v5829_v9  ;;  %v3957_v17 = vld [vmem:[%s4074_s27 + $0x50] sm:$0xff] }
 0x523   : > { %3828 = vrcp.f32 %v2890_v7  ;;  %v2674_v11 = vpop.f32.mrf.mxu1 }
 0x524   : > { %3111 = vst [vmem:[%s5877_s25 + $0x48] sm:$0xff] %v3079_v54  ;;  %v3078_v38 = vadd.f32 %v3046_v51, %v2982_v15  ;;  %3830 = vpow2.f32 %v3221_v18  ;;  %v2769_v47 = vadd.f32 %v5860_v58, %v2680_v61  ;;  %v2675_v52 = vadd.f32 %v2674_v11, %v5831_v36 }
 0x525   : > { %v3817_v10 = vpop.eup %3816 }
 0x526   : > { %v3819_v19 = vpop.eup %3818  ;;  %3110 = vst [vmem:[%s5877_s25 + $0x40] sm:$0xff] %v3078_v38  ;;  %v3017_v63 = vsub.f32 1.0, %v3817_v10  ;;  %v3224_v4 = vmul.f32 -1.442695, %v2769_v47  ;;  %v2768_v26 = vadd.f32 %v5860_v58, %v2675_v52  ;;  %v2985_v62 = vmul.f32 %v3817_v10, %v5640_v53  ;;  %v3958_v10 = vld [vmem:[%s4074_s27 + $0x68] sm:$0xff] }
 0x527   : > { %v3821_v32 = vpop.eup %3820  ;;  %v2893_v9 = vadd.f32 1.0, %v3819_v19 }
 0x528   : > { %v3823_v21 = vpop.eup %3822  ;;  %v3049_v45 = vmul.f32 %v3956_v43, %v3017_v63  ;;  %v3016_v55 = vsub.f32 1.0, %v3821_v32  ;;  %3832 = vpow2.f32 %v3224_v4  ;;  %v3223_v5 = vmul.f32 -1.442695, %v2768_v26 }
 0x529   : > { %3834 = vrcp.f32 %v2893_v9  ;;  %v2892_v36 = vadd.f32 1.0, %v3823_v21  ;;  %v3479_v44 = vpop.f32.mrf.mxu1  ;;  %v2984_v2 = vmul.f32 %v3821_v32, %v5634_v59 }
 0x52a   : > { %v3081_v35 = vadd.f32 %v3049_v45, %v2985_v62  ;;  %v3048_v14 = vmul.f32 %v3957_v17, %v3016_v55  ;;  %v2690_v7 = vadd.f32 %v3479_v44, %v5833_v12  ;;  %v3959_v62 = vld [vmem:[%s4074_s27 + $0x60] sm:$0xff] }
 0x52b   : > { %3836 = vrcp.f32 %v2892_v36  ;;  %v2684_v18 = vpop.f32.mrf.mxu1 }
 0x52c   : > { %3113 = vst [vmem:[%s5877_s25 + $0x58] sm:$0xff] %v3081_v35  ;;  %v3080_v53 = vadd.f32 %v3048_v14, %v2984_v2  ;;  %3838 = vpow2.f32 %v3223_v5  ;;  %v2771_v3 = vadd.f32 %v5860_v58, %v2690_v7  ;;  %v2685_v54 = vadd.f32 %v2684_v18, %v5835_v41 }
 0x52d   : > { %v3825_v15 = vpop.eup %3824 }
 0x52e   : > { %v3827_v56 = vpop.eup %3826  ;;  %3112 = vst [vmem:[%s5877_s25 + $0x50] sm:$0xff] %v3080_v53  ;;  %v2895_v51 = vadd.f32 1.0, %v3825_v15  ;;  %v3226_v61 = vmul.f32 -1.442695, %v2771_v3  ;;  %v2770_v59 = vadd.f32 %v5860_v58, %v2685_v54 }
 0x52f   : > { %v3019_v11 = vsub.f32 1.0, %v3827_v56  ;;  %v2987_v52 = vmul.f32 %v3827_v56, %v5652_v0  ;;  %v3960_v56 = vld [vmem:[%s4074_s27 + $0x78] sm:$0xff] }
 0x530   : > { %v3829_v38 = vpop.eup %3828  ;;  %3840 = vrcp.f32 %v2895_v51  ;;  %v3225_v12 = vmul.f32 -1.442695, %v2770_v59 }
 0x531   : > { %v3831_v47 = vpop.eup %3830  ;;  %v3051_v19 = vmul.f32 %v3958_v10, %v3019_v11  ;;  %v3018_v63 = vsub.f32 1.0, %v3829_v38  ;;  %3842 = vpow2.f32 %v3226_v61  ;;  %v3482_v41 = vpop.f32.mrf.mxu1  ;;  %v2986_v21 = vmul.f32 %v3829_v38, %v5646_v22 }
 0x532   : > { %v2894_v4 = vadd.f32 1.0, %v3831_v47  ;;  %3844 = vpow2.f32 %v3225_v12  ;;  %v3452_v26 = vpop.f32.mrf.mxu0  ;;  %v2700_v32 = vadd.f32 %v3482_v41, %v5837_v30 }
 0x533   : > { %v3083_v9 = vadd.f32 %v3051_v19, %v2987_v52  ;;  %v3050_v43 = vmul.f32 %v3959_v62, %v3018_v63  ;;  %v2600_v45 = vadd.f32 %v3452_v26, %v5695_v42  ;;  %v2694_v0 = vpop.f32.mrf.mxu1 }
 0x534   : > { %3846 = vrcp.f32 %v2894_v4  ;;  %v2773_v55 = vadd.f32 %v5860_v58, %v2700_v32  ;;  %v2594_v36 = vpop.f32.mrf.mxu0  ;;  %v2695_v5 = vadd.f32 %v2694_v0, %v5839_v29 }
 0x535   : > { %v3833_v44 = vpop.eup %3832  ;;  %3115 = vst [vmem:[%s5877_s25 + $0x68] sm:$0xff] %v3083_v9  ;;  %v3082_v35 = vadd.f32 %v3050_v43, %v2986_v21  ;;  %v2753_v30 = vadd.f32 %v5860_v58, %v2600_v45  ;;  %v2595_v22 = vadd.f32 %v2594_v36, %v5703_v31 }
 0x536   : > { %v3835_v2 = vpop.eup %3834  ;;  %v2897_v17 = vadd.f32 1.0, %v3833_v44  ;;  %v3228_v14 = vmul.f32 -1.442695, %v2773_v55  ;;  %v2772_v42 = vadd.f32 %v5860_v58, %v2695_v5  ;;  %v3962_v5 = vld [vmem:[%s4074_s27 + $0x88] sm:$0xff] }
 0x537   : > { %3114 = vst [vmem:[%s5877_s25 + $0x60] sm:$0xff] %v3082_v35  ;;  %v3021_v7 = vsub.f32 1.0, %v3835_v2  ;;  %v3208_v18 = vmul.f32 -1.442695, %v2753_v30  ;;  %v2752_v53 = vadd.f32 %v5860_v58, %v2595_v22  ;;  %v2989_v29 = vmul.f32 %v3835_v2, %v5664_v25  ;;  %v3961_v25 = vld [vmem:[%s4074_s27 + $0x70] sm:$0xff] }
 0x538   : > { %v3837_v3 = vpop.eup %3836  ;;  %3848 = vrcp.f32 %v2897_v17  ;;  %v3227_v54 = vmul.f32 -1.442695, %v2772_v42 }
 0x539   : > { %v3839_v15 = vpop.eup %3838  ;;  %v3053_v51 = vmul.f32 %v3960_v56, %v3021_v7  ;;  %v2988_v31 = vmul.f32 %v3837_v3, %v5658_v34  ;;  %v3020_v61 = vsub.f32 1.0, %v3837_v3  ;;  %3850 = vpow2.f32 %v3208_v18  ;;  %v3485_v59 = vpop.f32.mrf.mxu1  ;;  %v3963_v3 = vld [vmem:[%s4074_s27 + $0x80] sm:$0xff] }
 0x53a   : > { %v2896_v11 = vadd.f32 1.0, %v3839_v15  ;;  %3852 = vpow2.f32 %v3228_v14  ;;  %v3207_v38 = vmul.f32 -1.442695, %v2752_v53  ;;  %v3455_v12 = vpop.f32.mrf.mxu0  ;;  %v2710_v47 = vadd.f32 %v3485_v59, %v5841_v16 }
 0x53b   : > { %v3085_v52 = vadd.f32 %v3053_v51, %v2989_v29  ;;  %v3052_v10 = vmul.f32 %v3961_v25, %v3020_v61  ;;  %3854 = vpow2.f32 %v3227_v54  ;;  %v2610_v19 = vadd.f32 %v3455_v12, %v5711_v40  ;;  %v2704_v63 = vpop.f32.mrf.mxu1 }
 0x53c   : > { %3856 = vrcp.f32 %v2896_v11  ;;  %v2775_v34 = vadd.f32 %v5860_v58, %v2710_v47  ;;  %v2604_v41 = vpop.f32.mrf.mxu0  ;;  %v2705_v4 = vadd.f32 %v2704_v63, %v5843_v39 }
 0x53d   : > { %v3841_v26 = vpop.eup %3840  ;;  %3117 = vst [vmem:[%s5877_s25 + $0x78] sm:$0xff] %v3085_v52  ;;  %v3084_v32 = vadd.f32 %v3052_v10, %v2988_v31  ;;  %3858 = vpow2.f32 %v3207_v38  ;;  %v2755_v16 = vadd.f32 %v5860_v58, %v2610_v19  ;;  %v2605_v9 = vadd.f32 %v2604_v41, %v5720_v13  ;;  %v3964_v52 = vld [vmem:[%s4074_s27 + $0x98] sm:$0xff] }
 0x53e   : > { %v3843_v21 = vpop.eup %3842  ;;  %v3023_v62 = vsub.f32 1.0, %v3841_v26  ;;  %v3230_v40 = vmul.f32 -1.442695, %v2775_v34  ;;  %v2774_v43 = vadd.f32 %v5860_v58, %v2705_v4  ;;  %v2991_v36 = vmul.f32 %v3841_v26, %v5676_v20 }
 0x53f   : > { %v3845_v45 = vpop.eup %3844  ;;  %3116 = vst [vmem:[%s5877_s25 + $0x70] sm:$0xff] %v3084_v32  ;;  %v2899_v0 = vadd.f32 1.0, %v3843_v21  ;;  %v3210_v55 = vmul.f32 -1.442695, %v2755_v16  ;;  %v2754_v39 = vadd.f32 %v5860_v58, %v2605_v9 }
 0x540   : > { %v3055_v44 = vmul.f32 %v3962_v5, %v3023_v62  ;;  %v2898_v35 = vadd.f32 1.0, %v3845_v45  ;;  %3860 = vpow2.f32 %v3230_v40  ;;  %v3229_v22 = vmul.f32 -1.442695, %v2774_v43  ;;  %v3965_v40 = vld [vmem:[%s4074_s27 + $0x90] sm:$0xff] }
 0x541   : > { %v3847_v13 = vpop.eup %3846  ;;  %3862 = vrcp.f32 %v2899_v0  ;;  %v3209_v30 = vmul.f32 -1.442695, %v2754_v39  ;;  %v3488_v2 = vpop.f32.mrf.mxu1 }
 0x542   : > { %v3087_v17 = vadd.f32 %v3055_v44, %v2991_v36  ;;  %v3022_v14 = vsub.f32 1.0, %v3847_v13  ;;  %3864 = vrcp.f32 %v2898_v35  ;;  %v3458_v42 = vpop.f32.mrf.mxu0  ;;  %v2720_v20 = vadd.f32 %v3488_v2, %v5845_v57 }
 0x543   : > { %3866 = vpow2.f32 %v3210_v55  ;;  %v2620_v7 = vadd.f32 %v3458_v42, %v5733_v28  ;;  %v2714_v18 = vpop.f32.mrf.mxu1  ;;  %v2990_v53 = vmul.f32 %v3847_v13, %v5670_v23 }
 0x544   : > { %3119 = vst [vmem:[%s5877_s25 + $0x88] sm:$0xff] %v3087_v17  ;;  %v3054_v29 = vmul.f32 %v3963_v3, %v3022_v14  ;;  %3868 = vpow2.f32 %v3209_v30  ;;  %v2614_v54 = vpop.f32.mrf.mxu0  ;;  %v2715_v28 = vadd.f32 %v2714_v18, %v5847_v33  ;;  %v2777_v59 = vadd.f32 %v5860_v58, %v2720_v20  ;;  %v3966_v14 = vld [vmem:[%s4074_s27 + $0xa8] sm:$0xff]  ;;  %v3967_v3 = vld [vmem:[%s4074_s27 + $0xa0] sm:$0xff] }
 0x545   : > { %v3849_v15 = vpop.eup %3848  ;;  %3870 = vpow2.f32 %v3229_v22  ;;  %v2757_v56 = vadd.f32 %v5860_v58, %v2620_v7  ;;  %v2615_v51 = vadd.f32 %v2614_v54, %v5747_v48 }
 0x546   : > { %v3851_v31 = vpop.eup %3850  ;;  %v3086_v57 = vadd.f32 %v3054_v29, %v2990_v53  ;;  %v3025_v61 = vsub.f32 1.0, %v3849_v15  ;;  %v2993_v47 = vmul.f32 %v3849_v15, %v5692_v6  ;;  %v2776_v63 = vadd.f32 %v5860_v58, %v2715_v28 }
 0x547   : > { %v3853_v23 = vpop.eup %3852  ;;  %v2881_v11 = vadd.f32 1.0, %v3851_v31  ;;  %v2756_v38 = vadd.f32 %v5860_v58, %v2615_v51  ;;  %v3212_v19 = vmul.f32 -1.442695, %v2757_v56  ;;  %v3232_v32 = vmul.f32 -1.442695, %v2777_v59 }
 0x548   : > { %v3855_v12 = vpop.eup %3854  ;;  %3118 = vst [vmem:[%s5877_s25 + $0x80] sm:$0xff] %v3086_v57  ;;  %v3057_v25 = vmul.f32 %v3964_v52, %v3025_v61  ;;  %v2901_v10 = vadd.f32 1.0, %v3853_v23  ;;  %v3231_v55 = vmul.f32 -1.442695, %v2776_v63  ;;  %v3968_v52 = vld [vmem:[%s4074_s27 + $0x18] sm:$0xff] }
 0x549   : > { %v3857_v48 = vpop.eup %3856  ;;  %3872 = vrcp.f32 %v2881_v11  ;;  %v2900_v33 = vadd.f32 1.0, %v3855_v12  ;;  %v3491_v34 = vpop.f32.mrf.mxu1  ;;  %v3211_v6 = vmul.f32 -1.442695, %v2756_v38 }
 0x54a   : > { %v3859_v41 = vpop.eup %3858  ;;  %v3089_v4 = vadd.f32 %v3057_v25, %v2993_v47  ;;  %v3024_v26 = vsub.f32 1.0, %v3857_v48  ;;  %3874 = vrcp.f32 %v2901_v10  ;;  %v2730_v9 = vadd.f32 %v3491_v34, %v5849_v1 }
 0x54b   : > { %v2880_v16 = vadd.f32 1.0, %v3859_v41  ;;  %3876 = vrcp.f32 %v2900_v33  ;;  %v2724_v21 = vpop.f32.mrf.mxu1  ;;  %v2992_v62 = vmul.f32 %v3857_v48, %v5684_v27  ;;  %v3969_v33 = vld [vmem:[%s4074_s27 + $0xb8] sm:$0xff] }
 0x54c   : > { %3121 = vst [vmem:[%s5877_s25 + $0x98] sm:$0xff] %v3089_v4  ;;  %v3056_v43 = vmul.f32 %v3965_v40, %v3024_v26  ;;  %3878 = vpow2.f32 %v3212_v19  ;;  %v2725_v45 = vadd.f32 %v2724_v21, %v5851_v37  ;;  %v2779_v39 = vadd.f32 %v5860_v58, %v2730_v9  ;;  %v6073_v26 = vld [vmem:[#allocation3_spill] sm:$0xff] }
 0x54d   : > { %v3861_v0 = vpop.eup %3860  ;;  %3880 = vrcp.f32 %v2880_v16  ;;  %v3970_v16 = vld [vmem:[%s4074_s27 + $0xb0] sm:$0xff] }
 0x54e   : > { %v3863_v36 = vpop.eup %3862  ;;  %v3088_v5 = vadd.f32 %v3056_v43, %v2992_v62  ;;  %v2903_v44 = vadd.f32 1.0, %v3861_v0  ;;  %3882 = vpow2.f32 %v3232_v32  ;;  %v2778_v1 = vadd.f32 %v5860_v58, %v2725_v45  ;;  %v6074_v62 = vld [vmem:[#allocation2_spill] sm:$0xff]  ;;  %v3971_v43 = vld [vmem:[%s4074_s27 + $0x10] sm:$0xff] }
 0x54f   : > { %v3865_v35 = vpop.eup %3864  ;;  %v3027_v27 = vsub.f32 1.0, %v3863_v36  ;;  %3884 = vpow2.f32 %v3211_v6  ;;  %v3234_v13 = vmul.f32 -1.442695, %v2779_v39  ;;  %v2995_v37 = vmul.f32 %v3863_v36, %v5708_v49 }
 0x550   : > { %v3867_v30 = vpop.eup %3866  ;;  %3120 = vst [vmem:[%s5877_s25 + $0x90] sm:$0xff] %v3088_v5  ;;  %v2994_v22 = vmul.f32 %v3865_v35, %v5700_v50  ;;  %v3026_v2 = vsub.f32 1.0, %v3865_v35  ;;  %3886 = vrcp.f32 %v2903_v44  ;;  %v3233_v20 = vmul.f32 -1.442695, %v2778_v1 }
 0x551   : > { %v3869_v17 = vpop.eup %3868  ;;  %v3059_v42 = vmul.f32 %v3966_v14, %v3027_v27  ;;  %v2883_v7 = vadd.f32 1.0, %v3867_v30  ;;  %3888 = vpow2.f32 %v3231_v55  ;;  %v3494_v18 = vpop.f32.mrf.mxu1  ;;  %v6075_v27 = vld [vmem:[#allocation6_spill] sm:$0xff]  ;;  %v3972_v30 = vld [vmem:[%s4074_s27 + $0xc8] sm:$0xff] }
 0x552   : > { %v3871_v53 = vpop.eup %3870  ;;  %v3058_v29 = vmul.f32 %v3967_v3, %v3026_v2  ;;  %v2882_v54 = vadd.f32 1.0, %v3869_v17  ;;  %3890 = vpow2.f32 %v3234_v13  ;;  %v2740_v49 = vadd.f32 %v3494_v18, %v5853_v8  ;;  %v6076_v18 = vld [vmem:[#allocation7_spill] sm:$0xff] }
 0x553   : > { %v3091_v15 = vadd.f32 %v3059_v42, %v2995_v37  ;;  %3892 = vrcp.f32 %v2883_v7  ;;  %v2902_v50 = vadd.f32 1.0, %v3871_v53  ;;  %v2734_v56 = vpop.f32.mrf.mxu1  ;;  %v3973_v3 = vld [vmem:[%s4074_s27 + $0x28] sm:$0xff] }
 0x554   : > { %v3090_v51 = vadd.f32 %v3058_v29, %v2994_v22  ;;  %3894 = vrcp.f32 %v2882_v54  ;;  %v2781_v28 = vadd.f32 %v5860_v58, %v2740_v49  ;;  %v2735_v31 = vadd.f32 %v2734_v56, %v5855_v60  ;;  %v6077_v49 = vld [vmem:[#allocation5_spill] sm:$0xff] }
 0x555   : > { %3123 = vst [vmem:[%s5877_s25 + $0xa8] sm:$0xff] %v3091_v15  ;;  %3896 = vrcp.f32 %v2902_v50  ;;  %v3974_v50 = vld [vmem:[%s4074_s27 + $0x20] sm:$0xff] }
 0x556   : > { %v3873_v57 = vpop.eup %3872  ;;  %3122 = vst [vmem:[%s5877_s25 + $0xa0] sm:$0xff] %v3090_v51  ;;  %3898 = vpow2.f32 %v3233_v20  ;;  %v3236_v61 = vmul.f32 -1.442695, %v2781_v28  ;;  %v2780_v8 = vadd.f32 %v5860_v58, %v2735_v31 }
 0x557   : > { %v3875_v59 = vpop.eup %3874  ;;  %v3009_v23 = vsub.f32 1.0, %v3873_v57  ;;  %v2977_v60 = vmul.f32 %v3873_v57, %v5730_v24  ;;  %v6078_v57 = vld [vmem:[#allocation4_spill] sm:$0xff] }
 0x558   : > { %v3877_v11 = vpop.eup %3876  ;;  %v3029_v38 = vsub.f32 1.0, %v3875_v59  ;;  %3900 = vpow2.f32 %v3236_v61  ;;  %v3235_v12 = vmul.f32 -1.442695, %v2780_v8  ;;  %v2997_v48 = vmul.f32 %v3875_v59, %v5726_v46  ;;  %v3975_v8 = vld [vmem:[%s4074_s27 + $0xc0] sm:$0xff] }
 0x559   : > { %v3879_v47 = vpop.eup %3878  ;;  %v3041_v25 = vmul.f32 %v3968_v52, %v3009_v23  ;;  %v3028_v10 = vsub.f32 1.0, %v3877_v11  ;;  %v2996_v32 = vmul.f32 %v3877_v11, %v6073_v26  ;;  %v6080_v26 = vld [vmem:[#allocation10_spill] sm:$0xff] }
 0x55a   : > { %v3881_v19 = vpop.eup %3880  ;;  %v3061_v63 = vmul.f32 %v3969_v33, %v3029_v38  ;;  %v2885_v58 = vadd.f32 1.0, %v3879_v47  ;;  %3902 = vpow2.f32 %v3235_v12  ;;  %v3976_v33 = vld [vmem:[%s4074_s27 + $0x38] sm:$0xff] }
 0x55b   : > { %v3883_v34 = vpop.eup %3882  ;;  %v3073_v41 = vadd.f32 %v3041_v25, %v2977_v60  ;;  %v3008_v4 = vsub.f32 1.0, %v3881_v19  ;;  %v3060_v24 = vmul.f32 %v3970_v16, %v3028_v10  ;;  %v2976_v40 = vmul.f32 %v3881_v19, %v6074_v62  ;;  %v6079_v19 = vld [vmem:[#allocation11_spill] sm:$0xff]  ;;  %v3977_v16 = vld [vmem:[%s4074_s27 + $0xd8] sm:$0xff] }
 0x55c   : > { %v3885_v6 = vpop.eup %3884  ;;  %v3093_v9 = vadd.f32 %v3061_v63, %v2997_v48  ;;  %3904 = vrcp.f32 %v2885_v58  ;;  %v2905_v21 = vadd.f32 1.0, %v3883_v34 }
 0x55d   : > { %v3887_v46 = vpop.eup %3886  ;;  %3105 = vst [vmem:[%s5877_s25 + $0x18] sm:$0xff] %v3073_v41  ;;  %v3040_v45 = vmul.f32 %v3971_v43, %v3008_v4  ;;  %v3092_v0 = vadd.f32 %v3060_v24, %v2996_v32  ;;  %v2884_v55 = vadd.f32 1.0, %v3885_v6 }
 0x55e   : > { %v3889_v39 = vpop.eup %3888  ;;  %3125 = vst [vmem:[%s5877_s25 + $0xb8] sm:$0xff] %v3093_v9  ;;  %v3031_v36 = vsub.f32 1.0, %v3887_v46  ;;  %3906 = vrcp.f32 %v2905_v21  ;;  %v2999_v13 = vmul.f32 %v3887_v46, %v6075_v27  ;;  %v6081_v9 = vld [vmem:[#allocation9_spill] sm:$0xff]  ;;  %v3978_v46 = vld [vmem:[%s4074_s27 + $0x30] sm:$0xff] }
 0x55f   : > { %v3891_v5 = vpop.eup %3890  ;;  %v3072_v44 = vadd.f32 %v3040_v45, %v2976_v40  ;;  %3124 = vst [vmem:[%s5877_s25 + $0xb0] sm:$0xff] %v3092_v0  ;;  %3908 = vrcp.f32 %v2884_v55  ;;  %v2904_v1 = vadd.f32 1.0, %v3889_v39  ;;  %v6082_v55 = vld [vmem:[#allocation8_spill] sm:$0xff] }
 0x560   : > { %v3893_v35 = vpop.eup %3892  ;;  %v3063_v37 = vmul.f32 %v3972_v30, %v3031_v36  ;;  %v2907_v22 = vadd.f32 1.0, %v3891_v5  ;;  %v3979_v36 = vld [vmem:[%s4074_s27 + $0xd0] sm:$0xff] }
 0x561   : > { %v3895_v2 = vpop.eup %3894  ;;  %3104 = vst [vmem:[%s5877_s25 + $0x10] sm:$0xff] %v3072_v44  ;;  %v3011_v17 = vsub.f32 1.0, %v3893_v35  ;;  %3910 = vrcp.f32 %v2904_v1  ;;  %v2979_v53 = vmul.f32 %v3893_v35, %v6076_v18  ;;  %v6083_v44 = vld [vmem:[#allocation13_spill] sm:$0xff]  ;;  %v3980_v35 = vld [vmem:[%s4074_s27 + $0xe8] sm:$0xff] }
 0x562   : > { %v3897_v14 = vpop.eup %3896  ;;  %v3095_v42 = vadd.f32 %v3063_v37, %v2999_v13  ;;  %v3010_v7 = vsub.f32 1.0, %v3895_v2  ;;  %3912 = vrcp.f32 %v2907_v22  ;;  %v2978_v15 = vmul.f32 %v3895_v2, %v6077_v49 }
 0x563   : > { %v3899_v20 = vpop.eup %3898  ;;  %v3043_v29 = vmul.f32 %v3973_v3, %v3011_v17  ;;  %v3030_v54 = vsub.f32 1.0, %v3897_v14  ;;  %v2998_v61 = vmul.f32 %v3897_v14, %v6078_v57  ;;  %v6084_v17 = vld [vmem:[#allocation12_spill] sm:$0xff]  ;;  %v6085_v3 = vld [vmem:[#allocation15_spill] sm:$0xff] }
 0x564   : > { %3127 = vst [vmem:[%s5877_s25 + $0xc8] sm:$0xff] %v3095_v42  ;;  %v3042_v56 = vmul.f32 %v3974_v50, %v3010_v7  ;;  %v2906_v51 = vadd.f32 1.0, %v3899_v20  ;;  %v3981_v42 = vld [vmem:[%s4074_s27 + $0xe0] sm:$0xff] }
 0x565   : > { %v3901_v28 = vpop.eup %3900  ;;  %v3075_v31 = vadd.f32 %v3043_v29, %v2979_v53  ;;  %v3062_v59 = vmul.f32 %v3975_v8, %v3030_v54  ;;  %v3982_v54 = vld [vmem:[%s4074_s27 + $0xf8] sm:$0xff] }
 0x566   : > { %v3074_v23 = vadd.f32 %v3042_v56, %v2978_v15  ;;  %3914 = vrcp.f32 %v2906_v51  ;;  %v2909_v11 = vadd.f32 1.0, %v3901_v28  ;;  %v6086_v56 = vld [vmem:[#allocation14_spill] sm:$0xff]  ;;  %v3983_v28 = vld [vmem:[%s4074_s27 + $0xf0] sm:$0xff] }
 0x567   : > { %v3903_v38 = vpop.eup %3902  ;;  %3107 = vst [vmem:[%s5877_s25 + $0x28] sm:$0xff] %v3075_v31  ;;  %v3094_v12 = vadd.f32 %v3062_v59, %v2998_v61 }
 0x568   : > { %3106 = vst [vmem:[%s5877_s25 + $0x20] sm:$0xff] %v3074_v23  ;;  %3916 = vrcp.f32 %v2909_v11  ;;  %v2908_v47 = vadd.f32 1.0, %v3903_v38 }
 0x569   : > { %v3905_v60 = vpop.eup %3904  ;;  %3126 = vst [vmem:[%s5877_s25 + $0xc0] sm:$0xff] %v3094_v12 }
 0x56a   : > { %v3013_v52 = vsub.f32 1.0, %v3905_v60  ;;  %3918 = vrcp.f32 %v2908_v47  ;;  %v2981_v48 = vmul.f32 %v3905_v60, %v6079_v19 }
 0x56b   : > { %v3907_v25 = vpop.eup %3906 }
 0x56c   : > { %v3909_v10 = vpop.eup %3908  ;;  %v3045_v63 = vmul.f32 %v3976_v33, %v3013_v52  ;;  %v3033_v58 = vsub.f32 1.0, %v3907_v25  ;;  %v3001_v32 = vmul.f32 %v3907_v25, %v6080_v26 }
 0x56d   : > { %v3012_v34 = vsub.f32 1.0, %v3909_v10  ;;  %v2980_v21 = vmul.f32 %v3909_v10, %v6081_v9 }
 0x56e   : > { %v3911_v41 = vpop.eup %3910  ;;  %v3077_v4 = vadd.f32 %v3045_v63, %v2981_v48  ;;  %v3065_v24 = vmul.f32 %v3977_v16, %v3033_v58 }
 0x56f   : > { %v3913_v6 = vpop.eup %3912  ;;  %v3044_v62 = vmul.f32 %v3978_v46, %v3012_v34  ;;  %v3032_v40 = vsub.f32 1.0, %v3911_v41  ;;  %v3000_v39 = vmul.f32 %v3911_v41, %v6082_v55 }
 0x570   : > { %3109 = vst [vmem:[%s5877_s25 + $0x38] sm:$0xff] %v3077_v4  ;;  %v3097_v43 = vadd.f32 %v3065_v24, %v3001_v32  ;;  %v3035_v45 = vsub.f32 1.0, %v3913_v6  ;;  %v3003_v1 = vmul.f32 %v3913_v6, %v6083_v44 }
 0x571   : > { %v3076_v0 = vadd.f32 %v3044_v62, %v2980_v21  ;;  %v3064_v5 = vmul.f32 %v3979_v36, %v3032_v40 }
 0x572   : > { %3129 = vst [vmem:[%s5877_s25 + $0xd8] sm:$0xff] %v3097_v43  ;;  %v3067_v27 = vmul.f32 %v3980_v35, %v3035_v45 }
 0x573   : > { %v3915_v13 = vpop.eup %3914  ;;  %3108 = vst [vmem:[%s5877_s25 + $0x30] sm:$0xff] %v3076_v0  ;;  %v3096_v30 = vadd.f32 %v3064_v5, %v3000_v39 }
 0x574   : > { %v3099_v37 = vadd.f32 %v3067_v27, %v3003_v1  ;;  %v3034_v22 = vsub.f32 1.0, %v3915_v13  ;;  %v3002_v14 = vmul.f32 %v3915_v13, %v6084_v17 }
 0x575   : > { %v3917_v2 = vpop.eup %3916  ;;  %3128 = vst [vmem:[%s5877_s25 + $0xd0] sm:$0xff] %v3096_v30 }
 0x576   : > { %3131 = vst [vmem:[%s5877_s25 + $0xe8] sm:$0xff] %v3099_v37  ;;  %v3066_v7 = vmul.f32 %v3981_v42, %v3034_v22  ;;  %v3037_v20 = vsub.f32 1.0, %v3917_v2  ;;  %v3005_v29 = vmul.f32 %v3917_v2, %v6085_v3 }
 0x577   : > { %v3919_v18 = vpop.eup %3918 }
 0x578   : > { %v3098_v53 = vadd.f32 %v3066_v7, %v3002_v14  ;;  %v3069_v49 = vmul.f32 %v3982_v54, %v3037_v20  ;;  %v3036_v15 = vsub.f32 1.0, %v3919_v18  ;;  %v3004_v51 = vmul.f32 %v3919_v18, %v6086_v56 }
 0x57a   : > { %3130 = vst [vmem:[%s5877_s25 + $0xe0] sm:$0xff] %v3098_v53  ;;  %v3101_v50 = vadd.f32 %v3069_v49, %v3005_v29  ;;  %v3068_v31 = vmul.f32 %v3983_v28, %v3036_v15 }
 0x57c   : > { %3133 = vst [vmem:[%s5877_s25 + $0xf8] sm:$0xff] %v3101_v50  ;;  %v3100_v57 = vadd.f32 %v3068_v31, %v3004_v51 }
 0x57e   : > { %3132 = vst [vmem:[%s5877_s25 + $0xf0] sm:$0xff] %v3100_v57 }
 0x57f PF: > { %s22_s21 = sadd.s32 1, %s3990_s21  }
 0x580   : > { %p19_p4 = scmp.ge.s32.totalorder %s22_s21, 4  }
 0x582   :  { %21 = sbr.rel (!%p19_p4) target bundleno = 1 (0x1), region = 98 }

</bundles_post_ra>
